<compile_context>
chip_gen: v5e
topology: v5e:2x2
jax: 0.10.0
libtpu: 0.0.40
codegen_flags: <defaults>
</compile_context>

<pallas_src>
import jax
import jax.numpy as jnp
import numpy as np
from jax.experimental import pallas as pl
from jax.experimental.pallas import tpu as pltpu

D_IN = 512        # Linear(512, 1024) input
D_H = 1024        # hidden width
D_MID = 512       # Linear(1024, 512)
D_OUT = 4         # Linear(512, 4)
D_OUT_PAD = 128   # lane-aligned padded width of the final projection
N_CAPS = 3        # len(sigma) = len([2**8, 2**4, 2**0])


def _loc_decoder_kernel(loc_ref,
                        w0_ref, b0_ref,
                        w1_ref, b1_ref,
                        w2_ref, b2_ref,
                        w3_ref, b3_ref,
                        w4_ref, b4_ref,
                        out_ref):
    """One grid step == one LocationDecoderCapsule; writes its own output block."""
    x = loc_ref[...].astype(jnp.bfloat16)                                    # (B, 512)

    # tail: Linear(512, 1024)  -- bf16 MXU operands, f32 accumulation + bias.
    h = jnp.dot(x, w0_ref[0], preferred_element_type=jnp.float32) + b0_ref[0]
    # capsule: ReLU, Linear(1024,1024), ReLU, Linear(1024,1024), ReLU,
    #          Linear(1024,512), Linear(512, 4->128 padded)
    h = jnp.maximum(h, 0.0)
    h = jnp.dot(h.astype(jnp.bfloat16), w1_ref[0],
                preferred_element_type=jnp.float32) + b1_ref[0]
    h = jnp.maximum(h, 0.0)
    h = jnp.dot(h.astype(jnp.bfloat16), w2_ref[0],
                preferred_element_type=jnp.float32) + b2_ref[0]
    h = jnp.maximum(h, 0.0)
    h = jnp.dot(h.astype(jnp.bfloat16), w3_ref[0],
                preferred_element_type=jnp.float32) + b3_ref[0]
    c = jnp.dot(h.astype(jnp.bfloat16), w4_ref[0],
                preferred_element_type=jnp.float32) + b4_ref[0]               # (B, 128)

    out_ref[0] = c                                                            # lane-dense store


def location_decoder_coords(location, params):
    """Pallas hot path: per-capsule MLP outputs, summed + unpadded in glue -> (B, 4)."""
    B = location.shape[0]
    loc = location.astype(jnp.float32)
    (w0, b0, w1, b1, w2, b2, w3, b3, w4, b4) = params

    def wspec(shape2d):
        # one capsule's (in, out) weight / (1, out) bias slab per grid step
        return pl.BlockSpec((1,) + shape2d, lambda i: (i, 0, 0))

    per_caps = pl.pallas_call(
        _loc_decoder_kernel,
        out_shape=jax.ShapeDtypeStruct((N_CAPS, B, D_OUT_PAD), jnp.float32),
        grid_spec=pltpu.PrefetchScalarGridSpec(
            num_scalar_prefetch=0,
            grid=(N_CAPS,),
            in_specs=[
                pl.BlockSpec((B, D_IN), lambda i: (0, 0)),     # location, resident
                wspec((D_IN, D_H)),   wspec((1, D_H)),         # tail Linear(512,1024)
                wspec((D_H, D_H)),    wspec((1, D_H)),         # Linear(1024,1024)
                wspec((D_H, D_H)),    wspec((1, D_H)),         # Linear(1024,1024)
                wspec((D_H, D_MID)),  wspec((1, D_MID)),       # Linear(1024,512)
                wspec((D_MID, D_OUT_PAD)), wspec((1, D_OUT_PAD)),  # Linear(512,4) padded
            ],
            out_specs=pl.BlockSpec((1, B, D_OUT_PAD), lambda i: (i, 0, 0)),
        ),
        compiler_params=pltpu.CompilerParams(
            dimension_semantics=("parallel",),     # independent capsules -> 2 TCs on v7x
            vmem_limit_bytes=32 * 1024 * 1024,     # ~12.3 MiB double-buffered bf16 weights
        ),
    )(loc, w0, b0, w1, b1, w2, b2, w3, b3, w4, b4)

    # Glue: sum over the 3 capsules, drop the lane-padding columns.
    return jnp.sum(per_caps, axis=0)[:, :D_OUT]


def location_decoder_forward(location, params):
    """Full LocationDecoder.forward: coords (Pallas) -> lat/lon in degrees (glue)."""
    coords = location_decoder_coords(location, params)
    lat = jnp.degrees(jnp.arctan(coords[:, 0] / coords[:, 1]))
    lon = jnp.degrees(jnp.arctan(coords[:, 2] / coords[:, 3]))
    return jnp.stack((lat, lon), axis=1)


def init_params(key):
    """PyTorch-Linear-style init, stacked over 3 capsules; weights bf16, biases f32."""
    layer_dims = [(D_IN, D_H), (D_H, D_H), (D_H, D_H), (D_H, D_MID), (D_MID, D_OUT)]
    params = []
    for fan_in, fan_out in layer_dims:
        key, kw, kb = jax.random.split(key, 3)
        bound = 1.0 / np.sqrt(fan_in)
        w = jax.random.uniform(kw, (N_CAPS, fan_in, fan_out), jnp.float32,
                               minval=-bound, maxval=bound)
        b = jax.random.uniform(kb, (N_CAPS, 1, fan_out), jnp.float32,
                               minval=-bound, maxval=bound)
        if fan_out == D_OUT:
            # Pad the final projection to a lane-aligned width with zero columns.
            w = jnp.pad(w, ((0, 0), (0, 0), (0, D_OUT_PAD - D_OUT)))
            b = jnp.pad(b, ((0, 0), (0, 0), (0, D_OUT_PAD - D_OUT)))
        params += [w.astype(jnp.bfloat16), b.astype(jnp.float32)]
    return tuple(params)


def reference_coords(location, params):
    """Pure-JAX reference on the SAME bf16-quantized weights (f32 compute)."""
    loc = location.astype(jnp.float32)
    w0, b0, w1, b1, w2, b2, w3, b3, w4, b4 = params
    hp = jax.lax.Precision.HIGHEST
    coords = jnp.zeros((loc.shape[0], D_OUT), jnp.float32)
    for i in range(N_CAPS):
        h = jnp.dot(loc, w0[i].astype(jnp.float32), precision=hp) + b0[i, 0]
        h = jax.nn.relu(h)
        h = jnp.dot(h, w1[i].astype(jnp.float32), precision=hp) + b1[i, 0]
        h = jax.nn.relu(h)
        h = jnp.dot(h, w2[i].astype(jnp.float32), precision=hp) + b2[i, 0]
        h = jax.nn.relu(h)
        h = jnp.dot(h, w3[i].astype(jnp.float32), precision=hp) + b3[i, 0]
        c = jnp.dot(h, w4[i].astype(jnp.float32), precision=hp) + b4[i, 0]
        coords = coords + c[:, :D_OUT]
    return coords


if __name__ == "__main__":
    key = jax.random.PRNGKey(0)
    key, k_in = jax.random.split(key)

    B = 8
    location = jax.random.normal(k_in, (B, D_IN), dtype=jnp.float32)
    params = init_params(key)

    # Kernel hot-path output (summed capsule coords) + full forward.
    coords = jax.block_until_ready(location_decoder_coords(location, params))
    out = jax.block_until_ready(location_decoder_forward(location, params))
    assert out.shape == (B, 2) and out.dtype == jnp.float32

    # Correctness check of the kernel against a pure-JAX reference on the same
    # bf16 weights (kernel additionally casts activations to bf16 at MXU inputs).
    coords_ref = jax.block_until_ready(reference_coords(location, params))
    np.testing.assert_allclose(np.asarray(coords), np.asarray(coords_ref),
                               rtol=5e-2, atol=2e-2)

    print("KERNEL_OK")
</pallas_src>

<mosaic_0001>
module attributes {stable_mosaic.version = 11 : i64} {
  func.func @_loc_decoder_kernel(%arg0: i32, %arg1: memref<8x512xf32, #tpu.memory_space<vmem>>, %arg2: memref<1x512x1024xbf16, #tpu.memory_space<vmem>>, %arg3: memref<1x1x1024xf32, #tpu.memory_space<vmem>>, %arg4: memref<1x1024x1024xbf16, #tpu.memory_space<vmem>>, %arg5: memref<1x1x1024xf32, #tpu.memory_space<vmem>>, %arg6: memref<1x1024x1024xbf16, #tpu.memory_space<vmem>>, %arg7: memref<1x1x1024xf32, #tpu.memory_space<vmem>>, %arg8: memref<1x1024x512xbf16, #tpu.memory_space<vmem>>, %arg9: memref<1x1x512xf32, #tpu.memory_space<vmem>>, %arg10: memref<1x512x128xbf16, #tpu.memory_space<vmem>>, %arg11: memref<1x1x128xf32, #tpu.memory_space<vmem>>, %arg12: memref<1x8x128xf32, #tpu.memory_space<vmem>>) attributes {dimension_semantics = [#tpu.dimension_semantics<parallel>], iteration_bounds = array<i64: 3>, scalar_prefetch = 0 : i64, scratch_operands = 0 : i64, tpu.core_type = #tpu.core_type<tc>, window_params = [{pipeline_mode = #tpu.pipeline_mode<synchronous>, transform_indices = @transform_0, window_bounds = array<i64: 8, 512>}, {transform_indices = @transform_1, window_bounds = array<i64: 1, 512, 1024>}, {transform_indices = @transform_2, window_bounds = array<i64: 1, 1, 1024>}, {transform_indices = @transform_3, window_bounds = array<i64: 1, 1024, 1024>}, {transform_indices = @transform_4, window_bounds = array<i64: 1, 1, 1024>}, {transform_indices = @transform_5, window_bounds = array<i64: 1, 1024, 1024>}, {transform_indices = @transform_6, window_bounds = array<i64: 1, 1, 1024>}, {transform_indices = @transform_7, window_bounds = array<i64: 1, 1024, 512>}, {transform_indices = @transform_8, window_bounds = array<i64: 1, 1, 512>}, {transform_indices = @transform_9, window_bounds = array<i64: 1, 512, 128>}, {transform_indices = @transform_10, window_bounds = array<i64: 1, 1, 128>}, {transform_indices = @transform_11, window_bounds = array<i64: 1, 8, 128>}]} {
    %c0 = arith.constant 0 : index
    %c0_0 = arith.constant 0 : index
    %0 = vector.load %arg1[%c0, %c0_0] : memref<8x512xf32, #tpu.memory_space<vmem>>, vector<8x512xf32>
    %1 = arith.truncf %0 : vector<8x512xf32> to vector<8x512xbf16>
    %c0_1 = arith.constant 0 : index
    %c0_2 = arith.constant 0 : index
    %c0_3 = arith.constant 0 : index
    %2 = vector.load %arg2[%c0_1, %c0_2, %c0_3] : memref<1x512x1024xbf16, #tpu.memory_space<vmem>>, vector<1x512x1024xbf16>
    %3 = vector.shape_cast %2 : vector<1x512x1024xbf16> to vector<512x1024xbf16>
    %cst = arith.constant dense<0.000000e+00> : vector<8x1024xf32>
    %4 = tpu.matmul %1, %3, %cst {dimension_numbers = #tpu.dot_dimension_numbers<[1], [0], [0], [1], [0, 0, 1, 1], [], []>} : vector<8x512xbf16>, vector<512x1024xbf16>, vector<8x1024xf32> -> vector<8x1024xf32>
    %c0_4 = arith.constant 0 : index
    %c0_5 = arith.constant 0 : index
    %c0_6 = arith.constant 0 : index
    %5 = vector.load %arg3[%c0_4, %c0_5, %c0_6] : memref<1x1x1024xf32, #tpu.memory_space<vmem>>, vector<1x1x1024xf32>
    %6 = vector.shape_cast %5 : vector<1x1x1024xf32> to vector<1x1024xf32>
    %7 = vector.broadcast %6 : vector<1x1024xf32> to vector<8x1024xf32>
    %8 = arith.addf %4, %7 : vector<8x1024xf32>
    %cst_7 = arith.constant 0.000000e+00 : f32
    %9 = vector.broadcast %cst_7 : f32 to vector<8x1024xf32>
    %10 = arith.maximumf %8, %9 : vector<8x1024xf32>
    %11 = arith.truncf %10 : vector<8x1024xf32> to vector<8x1024xbf16>
    %c0_8 = arith.constant 0 : index
    %c0_9 = arith.constant 0 : index
    %c0_10 = arith.constant 0 : index
    %12 = vector.load %arg4[%c0_8, %c0_9, %c0_10] : memref<1x1024x1024xbf16, #tpu.memory_space<vmem>>, vector<1x1024x1024xbf16>
    %13 = vector.shape_cast %12 : vector<1x1024x1024xbf16> to vector<1024x1024xbf16>
    %cst_11 = arith.constant dense<0.000000e+00> : vector<8x1024xf32>
    %14 = tpu.matmul %11, %13, %cst_11 {dimension_numbers = #tpu.dot_dimension_numbers<[1], [0], [0], [1], [0, 0, 1, 1], [], []>} : vector<8x1024xbf16>, vector<1024x1024xbf16>, vector<8x1024xf32> -> vector<8x1024xf32>
    %c0_12 = arith.constant 0 : index
    %c0_13 = arith.constant 0 : index
    %c0_14 = arith.constant 0 : index
    %15 = vector.load %arg5[%c0_12, %c0_13, %c0_14] : memref<1x1x1024xf32, #tpu.memory_space<vmem>>, vector<1x1x1024xf32>
    %16 = vector.shape_cast %15 : vector<1x1x1024xf32> to vector<1x1024xf32>
    %17 = vector.broadcast %16 : vector<1x1024xf32> to vector<8x1024xf32>
    %18 = arith.addf %14, %17 : vector<8x1024xf32>
    %cst_15 = arith.constant 0.000000e+00 : f32
    %19 = vector.broadcast %cst_15 : f32 to vector<8x1024xf32>
    %20 = arith.maximumf %18, %19 : vector<8x1024xf32>
    %21 = arith.truncf %20 : vector<8x1024xf32> to vector<8x1024xbf16>
    %c0_16 = arith.constant 0 : index
    %c0_17 = arith.constant 0 : index
    %c0_18 = arith.constant 0 : index
    %22 = vector.load %arg6[%c0_16, %c0_17, %c0_18] : memref<1x1024x1024xbf16, #tpu.memory_space<vmem>>, vector<1x1024x1024xbf16>
    %23 = vector.shape_cast %22 : vector<1x1024x1024xbf16> to vector<1024x1024xbf16>
    %cst_19 = arith.constant dense<0.000000e+00> : vector<8x1024xf32>
    %24 = tpu.matmul %21, %23, %cst_19 {dimension_numbers = #tpu.dot_dimension_numbers<[1], [0], [0], [1], [0, 0, 1, 1], [], []>} : vector<8x1024xbf16>, vector<1024x1024xbf16>, vector<8x1024xf32> -> vector<8x1024xf32>
    %c0_20 = arith.constant 0 : index
    %c0_21 = arith.constant 0 : index
    %c0_22 = arith.constant 0 : index
    %25 = vector.load %arg7[%c0_20, %c0_21, %c0_22] : memref<1x1x1024xf32, #tpu.memory_space<vmem>>, vector<1x1x1024xf32>
    %26 = vector.shape_cast %25 : vector<1x1x1024xf32> to vector<1x1024xf32>
    %27 = vector.broadcast %26 : vector<1x1024xf32> to vector<8x1024xf32>
    %28 = arith.addf %24, %27 : vector<8x1024xf32>
    %cst_23 = arith.constant 0.000000e+00 : f32
    %29 = vector.broadcast %cst_23 : f32 to vector<8x1024xf32>
    %30 = arith.maximumf %28, %29 : vector<8x1024xf32>
    %31 = arith.truncf %30 : vector<8x1024xf32> to vector<8x1024xbf16>
    %c0_24 = arith.constant 0 : index
    %c0_25 = arith.constant 0 : index
    %c0_26 = arith.constant 0 : index
    %32 = vector.load %arg8[%c0_24, %c0_25, %c0_26] : memref<1x1024x512xbf16, #tpu.memory_space<vmem>>, vector<1x1024x512xbf16>
    %33 = vector.shape_cast %32 : vector<1x1024x512xbf16> to vector<1024x512xbf16>
    %cst_27 = arith.constant dense<0.000000e+00> : vector<8x512xf32>
    %34 = tpu.matmul %31, %33, %cst_27 {dimension_numbers = #tpu.dot_dimension_numbers<[1], [0], [0], [1], [0, 0, 1, 1], [], []>} : vector<8x1024xbf16>, vector<1024x512xbf16>, vector<8x512xf32> -> vector<8x512xf32>
    %c0_28 = arith.constant 0 : index
    %c0_29 = arith.constant 0 : index
    %c0_30 = arith.constant 0 : index
    %35 = vector.load %arg9[%c0_28, %c0_29, %c0_30] : memref<1x1x512xf32, #tpu.memory_space<vmem>>, vector<1x1x512xf32>
    %36 = vector.shape_cast %35 : vector<1x1x512xf32> to vector<1x512xf32>
    %37 = vector.broadcast %36 : vector<1x512xf32> to vector<8x512xf32>
    %38 = arith.addf %34, %37 : vector<8x512xf32>
    %39 = arith.truncf %38 : vector<8x512xf32> to vector<8x512xbf16>
    %c0_31 = arith.constant 0 : index
    %c0_32 = arith.constant 0 : index
    %c0_33 = arith.constant 0 : index
    %40 = vector.load %arg10[%c0_31, %c0_32, %c0_33] : memref<1x512x128xbf16, #tpu.memory_space<vmem>>, vector<1x512x128xbf16>
    %41 = vector.shape_cast %40 : vector<1x512x128xbf16> to vector<512x128xbf16>
    %cst_34 = arith.constant dense<0.000000e+00> : vector<8x128xf32>
    %42 = tpu.matmul %39, %41, %cst_34 {dimension_numbers = #tpu.dot_dimension_numbers<[1], [0], [0], [1], [0, 0, 1, 1], [], []>} : vector<8x512xbf16>, vector<512x128xbf16>, vector<8x128xf32> -> vector<8x128xf32>
    %c0_35 = arith.constant 0 : index
    %c0_36 = arith.constant 0 : index
    %c0_37 = arith.constant 0 : index
    %43 = vector.load %arg11[%c0_35, %c0_36, %c0_37] : memref<1x1x128xf32, #tpu.memory_space<vmem>>, vector<1x1x128xf32>
    %44 = vector.shape_cast %43 : vector<1x1x128xf32> to vector<1x128xf32>
    %45 = vector.broadcast %44 : vector<1x128xf32> to vector<8x128xf32>
    %46 = arith.addf %42, %45 : vector<8x128xf32>
    %c0_38 = arith.constant 0 : index
    %c0_39 = arith.constant 0 : index
    %c0_40 = arith.constant 0 : index
    %47 = vector.load %arg12[%c0_38, %c0_39, %c0_40] : memref<1x8x128xf32, #tpu.memory_space<vmem>>, vector<1x8x128xf32>
    %48 = vector.shape_cast %47 : vector<1x8x128xf32> to vector<8x128xf32>
    %49 = vector.shape_cast %46 : vector<8x128xf32> to vector<1x8x128xf32>
    tpu.vector_store %arg12[%c0_38, %c0_39, %c0_40], %49 {strides = array<i32>} : memref<1x8x128xf32, #tpu.memory_space<vmem>>, vector<1x8x128xf32>,
    return
  }
  func.func @transform_0(%arg0: i32) -> (i32, i32) {
    %c0_i32 = arith.constant 0 : i32
    %c0_i32_0 = arith.constant 0 : i32
    %c0_i32_1 = arith.constant 0 : i32
    return %c0_i32, %c0_i32_0 : i32, i32
  }
  func.func @transform_1(%arg0: i32) -> (i32, i32, i32) {
    %c0_i32 = arith.constant 0 : i32
    %c0_i32_0 = arith.constant 0 : i32
    %c0_i32_1 = arith.constant 0 : i32
    return %arg0, %c0_i32, %c0_i32_0 : i32, i32, i32
  }
  func.func @transform_2(%arg0: i32) -> (i32, i32, i32) {
    %c0_i32 = arith.constant 0 : i32
    %c0_i32_0 = arith.constant 0 : i32
    %c0_i32_1 = arith.constant 0 : i32
    return %arg0, %c0_i32, %c0_i32_0 : i32, i32, i32
  }
  func.func @transform_3(%arg0: i32) -> (i32, i32, i32) {
    %c0_i32 = arith.constant 0 : i32
    %c0_i32_0 = arith.constant 0 : i32
    %c0_i32_1 = arith.constant 0 : i32
    return %arg0, %c0_i32, %c0_i32_0 : i32, i32, i32
  }
  func.func @transform_4(%arg0: i32) -> (i32, i32, i32) {
    %c0_i32 = arith.constant 0 : i32
    %c0_i32_0 = arith.constant 0 : i32
    %c0_i32_1 = arith.constant 0 : i32
    return %arg0, %c0_i32, %c0_i32_0 : i32, i32, i32
  }
  func.func @transform_5(%arg0: i32) -> (i32, i32, i32) {
    %c0_i32 = arith.constant 0 : i32
    %c0_i32_0 = arith.constant 0 : i32
    %c0_i32_1 = arith.constant 0 : i32
    return %arg0, %c0_i32, %c0_i32_0 : i32, i32, i32
  }
  func.func @transform_6(%arg0: i32) -> (i32, i32, i32) {
    %c0_i32 = arith.constant 0 : i32
    %c0_i32_0 = arith.constant 0 : i32
    %c0_i32_1 = arith.constant 0 : i32
    return %arg0, %c0_i32, %c0_i32_0 : i32, i32, i32
  }
  func.func @transform_7(%arg0: i32) -> (i32, i32, i32) {
    %c0_i32 = arith.constant 0 : i32
    %c0_i32_0 = arith.constant 0 : i32
    %c0_i32_1 = arith.constant 0 : i32
    return %arg0, %c0_i32, %c0_i32_0 : i32, i32, i32
  }
  func.func @transform_8(%arg0: i32) -> (i32, i32, i32) {
    %c0_i32 = arith.constant 0 : i32
    %c0_i32_0 = arith.constant 0 : i32
    %c0_i32_1 = arith.constant 0 : i32
    return %arg0, %c0_i32, %c0_i32_0 : i32, i32, i32
  }
  func.func @transform_9(%arg0: i32) -> (i32, i32, i32) {
    %c0_i32 = arith.constant 0 : i32
    %c0_i32_0 = arith.constant 0 : i32
    %c0_i32_1 = arith.constant 0 : i32
    return %arg0, %c0_i32, %c0_i32_0 : i32, i32, i32
  }
  func.func @transform_10(%arg0: i32) -> (i32, i32, i32) {
    %c0_i32 = arith.constant 0 : i32
    %c0_i32_0 = arith.constant 0 : i32
    %c0_i32_1 = arith.constant 0 : i32
    return %arg0, %c0_i32, %c0_i32_0 : i32, i32, i32
  }
  func.func @transform_11(%arg0: i32) -> (i32, i32, i32) {
    %c0_i32 = arith.constant 0 : i32
    %c0_i32_0 = arith.constant 0 : i32
    %c0_i32_1 = arith.constant 0 : i32
    return %arg0, %c0_i32, %c0_i32_0 : i32, i32, i32
  }
}

</mosaic_0001>

<bundles_post_ra>
// kernel: tpu_custom_call.1
= control target key start
LH: loop header
LB: loop body
LE: loop exit
PB: predicated region body
PF: predicated region fallthrough
CT: control target
= control target key end

     0   :  { %s25867_s0 = inlined_call_operand.hbm [shape: f32[8,512], index: 0, kind: input, shape index: {}]   ;;  %s25868_s1 = inlined_call_operand.hbm [shape: bf16[3,512,1024], index: 1, kind: input, shape index: {}]   ;;  %s25869_s2 = inlined_call_operand.hbm [shape: f32[3,1,1024], index: 2, kind: input, shape index: {}]   ;;  %s25870_s3 = inlined_call_operand.hbm [shape: bf16[3,1024,1024], index: 3, kind: input, shape index: {}]   ;;  %s25871_s4 = inlined_call_operand.hbm [shape: f32[3,1,1024], index: 4, kind: input, shape index: {}]   ;;  %s25872_s5 = inlined_call_operand.hbm [shape: bf16[3,1024,1024], index: 5, kind: input, shape index: {}]   ;;  %s25873_s6 = inlined_call_operand.hbm [shape: f32[3,1,1024], index: 6, kind: input, shape index: {}]   ;;  %s25874_s7 = inlined_call_operand.hbm [shape: bf16[3,1024,512], index: 7, kind: input, shape index: {}]   ;;  %s25875_s8 = inlined_call_operand.hbm [shape: f32[3,1,512], index: 8, kind: input, shape index: {}]   ;;  %s25876_s9 = inlined_call_operand.hbm [shape: bf16[3,512,128], index: 9, kind: input, shape index: {}]   ;;  %s25877_s10 = inlined_call_operand.hbm [shape: f32[3,1,128], index: 10, kind: input, shape index: {}]   ;;  %s25878_s11 = inlined_call_operand.hbm [shape: f32[3,8,128], index: 11, kind: output, shape index: {}]  }
   0x1   :  { %25892 = sst [smem:[#allocation30_spill]] %s25867_s0 }
   0x2   :  { %25893 = sst [smem:[#allocation31_spill]] %s25868_s1 }
   0x3   :  { %25894 = sst [smem:[#allocation32_spill]] %s25869_s2 }
   0x4   :  { %25895 = sst [smem:[#allocation33_spill]] %s25870_s3 }
   0x5   :  { %25896 = sst [smem:[#allocation34_spill]] %s25872_s5 }
   0x6   :  { %25897 = sst [smem:[#allocation35_spill]] %s25873_s6 }
   0x7   :  { %25898 = sst [smem:[#allocation36_spill]] %s25874_s7 }
   0x8   :  { %25899 = sst [smem:[#allocation37_spill]] %s25875_s8 }
   0x9   :  { %25900 = sst [smem:[#allocation38_spill]] %s25876_s9 }
   0xa   :  { %25901 = sst [smem:[#allocation39_spill]] %s25877_s10 }
   0xb   :  { %25902 = sst [smem:[#allocation40_spill]] %s25878_s11 }
   0xc   :  { %16 = vsyncpa [#allocation3], 0 }
   0xd   :  { %17 = vsyncpa [#allocation6], 0 }
   0xe   :  { %19 = vsyncpa [#allocation6 + $0x1], 0 }
   0xf   :  { %20 = vsyncpa [#allocation9], 0 }
  0x10   :  { %22 = vsyncpa [#allocation9 + $0x1], 0 }
  0x11   :  { %23 = vsyncpa [#allocation12], 0 }
  0x12   :  { %25 = vsyncpa [#allocation12 + $0x1], 0 }
  0x13   :  { %26 = vsyncpa [#allocation15], 0 }
  0x14   :  { %28 = vsyncpa [#allocation15 + $0x1], 0 }
  0x15   :  { %29 = vsyncpa [#allocation18], 0 }
  0x16   :  { %31 = vsyncpa [#allocation18 + $0x1], 0 }
  0x17   :  { %32 = vsyncpa [#allocation4], 0 }
  0x18   :  { %34 = vsyncpa [#allocation4 + $0x1], 0  ;;  %s21691_s17 = smov 0   ;;  %s21693_s18 = smov 0  }
  0x19   :  { %s21695_s19 = smov 0   ;;  %s21697_s20 = smov 0  }
  0x1a LB: > { %s21712_s21 = sadd.s32 1, %s21622_s20   ;;  %s68_s22 = sadd.s32 1, %s21618_s19  ;;  %s21622_s20 = sphi %s21697_s20, %s25934_s20   ;;  %s21618_s19 = sphi %s21695_s19, %s25938_s19   ;;  %s21614_s18 = sphi %s21693_s18, %s25937_s18   ;;  %s21610_s17 = sphi %s21691_s17, %s25936_s17  }
  0x1b   : > { %25903 = sst [smem:[#allocation28_spill]] %s21712_s21  ;;  %s65_s23 = ssub.s32 %s21622_s20, %s21712_s21 }
  0x1c   : > { %p75_p0 = scmp.ne.s32.totalorder %s21618_s19, %s21614_s18  ;;  %p66_p1 = scmp.eq.s32.totalorder %s65_s23, 0 }
  0x1d   : > { %p76_p2 = scmp.eq.s32.totalorder %s21622_s20, 0  ;;  %p21155_p3 = scmp.lt.s32.totalorder %s21622_s20, 3 }
  0x1e   : > { %s21722_s24 = scalar_select %p66_p1, %s21618_s19, %s68_s22  }
  0x1f   : > { %p77_p4 = por %p76_p2, %p75_p0  ;;  %s21728_s25 = sand.u32 1, %s21622_s20  }
  0x20   : > { %25904 = sst [smem:[#allocation29_spill]] %s21722_s24  ;;  %s21731_s26 = sand.u32 1, %s21618_s19  }
  0x21   : > { %s25881_s27 = sshll.u32 %s21731_s26, 11  ;;  %s25882_s28 = sshll.u32 %s21622_s20, 11 }
  0x22   : > { %s25905_s1 = sld [smem:[#allocation31_spill]]  ;;  %s381_s14 = scalar_lea.vmem [#allocation5], %s25881_s27 }
  0x23   : > { %s389_s15 = sshll.u32 %s381_s14, 4  ;;  %p21744_p5 = pnand %p21155_p3, %p77_p4  ;;  %s390_s15 = int_to_ptr.vmem [resolvable:$true] %s389_s15 }
  0x25   : > { %p21752_p7 = pneg %p21744_p5 }
  0x28   : > { %s386_s12 = scalar_lea.hbm %s25905_s1, %s25882_s28  ;;  %s21213_s14 = scalar_lea.hbm %s25905_s1, 6144 }
  0x29   : > { %s387_s13 = sshll.u32 %s386_s12, 4  ;;  %s388_s13 = int_to_ptr.hbm [resolvable:$true] %s387_s13 }
  0x2a   : > { %s21206_s24 = sshra.s32 %s388_s13, 4  ;;  %s21207_s24 = int_to_ptr.hbm [resolvable:$true] %s21206_s24 }
  0x2b   : > { %s21208_s21 = scalar_lea.hbm %s21207_s24, 2048  ;;  %p21214_p10 = scmp.lt.s32.totalorder %s21207_s24, %s25905_s1 }
  0x2c   : > { %p21209_p6 = scmp.ne.s32.totalorder %s21207_s24, %s21208_s21  ;;  %p21215_p11 = scmp.lt.s32.totalorder %s21213_s14, %s21208_s21 }
  0x2e   : > { %p21211_p8 = pnand %p21752_p7, %p21209_p6  ;;  %p21216_p12 = por %p21215_p11, %p21214_p10 }
  0x30   : > { %p21212_p9 = pneg %p21211_p8 }
  0x32   : > { %p21217_p13 = pnand %p21216_p12, %p21212_p9 }
  0x34   : > { %21220 = shalt.err (!%p21217_p13)
}
  0x35   : > { %s21624_s22 = smov 512   ;;  %s21625_s23 = smov 32  }
  0x36   : > { %s25908_s30 = scalar_lea.sflag [#allocation6], %s21728_s25  ;;  %s19517_s27 = sshll.u32 %s21622_s20, 12 }
  0x37   : > { %21122 = dma.hbm_to_vmem [thread:$0]  (!%p21744_p5), %s388_s13, 32768, %s390_s15, %s25908_s30, %s21624_s22, %s21624_s22, %s21625_s23  }
  0x38   : > { %s25909_s3 = sld [smem:[#allocation33_spill]]  ;;  %s25910_s12 = sshll.u32 %s21731_s26, 12 }
  0x39   : > { %s422_s14 = scalar_lea.vmem [#allocation8], %s25910_s12  ;;  %s25890_s10 = scalar_lea.sflag [#allocation9], %s21728_s25 }
  0x3a   : > { %s430_s1 = sshll.u32 %s422_s14, 4  ;;  %s431_s1 = int_to_ptr.vmem [resolvable:$true] %s430_s1 }
  0x3e   : > { %s427_s28 = scalar_lea.hbm %s25909_s3, %s19517_s27  ;;  %s21243_s30 = scalar_lea.hbm %s25909_s3, 12288 }
  0x3f   : > { %s428_s11 = sshll.u32 %s427_s28, 4  ;;  %s429_s11 = int_to_ptr.hbm [resolvable:$true] %s428_s11 }
  0x40   : > { %s21236_s8 = sshra.s32 %s429_s11, 4  ;;  %s21237_s8 = int_to_ptr.hbm [resolvable:$true] %s21236_s8 }
  0x41   : > { %s21238_s6 = scalar_lea.hbm %s21237_s8, 4096  ;;  %p21244_p4 = scmp.lt.s32.totalorder %s21237_s8, %s25909_s3 }
  0x42   : > { %p21239_p1 = scmp.ne.s32.totalorder %s21237_s8, %s21238_s6  ;;  %p21245_p6 = scmp.lt.s32.totalorder %s21243_s30, %s21238_s6 }
  0x44   : > { %p21241_p2 = pnand %p21239_p1, %p21752_p7  ;;  %p21246_p8 = por %p21245_p6, %p21244_p4 }
  0x46   : > { %p21242_p3 = pneg %p21241_p2 }
  0x48   : > { %p21247_p9 = pnand %p21246_p8, %p21242_p3 }
  0x4a   : > { %21250 = shalt.err (!%p21247_p9)
}
  0x4b   : > { %21128 = dma.hbm_to_vmem [thread:$0]  (!%p21744_p5), %s429_s11, 65536, %s431_s1, %s25890_s10, %s21624_s22, %s21624_s22, %s21625_s23  }
  0x4c   : > { %s25911_s5 = sld [smem:[#allocation34_spill]]  ;;  %s25912_s6 = sshll.u32 %s21731_s26, 12 }
  0x4d   : > { %s463_s13 = scalar_lea.vmem [#allocation11], %s25912_s6  ;;  %s25887_s30 = scalar_lea.sflag [#allocation12], %s21728_s25 }
  0x4e   : > { %s471_s15 = sshll.u32 %s463_s13, 4  ;;  %s472_s15 = int_to_ptr.vmem [resolvable:$true] %s471_s15 }
  0x52   : > { %s468_s14 = scalar_lea.hbm %s25911_s5, %s19517_s27  ;;  %s21273_s11 = scalar_lea.hbm %s25911_s5, 12288 }
  0x53   : > { %s469_s8 = sshll.u32 %s468_s14, 4  ;;  %s470_s8 = int_to_ptr.hbm [resolvable:$true] %s469_s8 }
  0x54   : > { %s21266_s24 = sshra.s32 %s470_s8, 4  ;;  %s21267_s24 = int_to_ptr.hbm [resolvable:$true] %s21266_s24 }
  0x55   : > { %s21268_s21 = scalar_lea.hbm %s21267_s24, 4096  ;;  %p21274_p13 = scmp.lt.s32.totalorder %s21267_s24, %s25911_s5 }
  0x56   : > { %p21269_p10 = scmp.ne.s32.totalorder %s21267_s24, %s21268_s21  ;;  %p21275_p1 = scmp.lt.s32.totalorder %s21273_s11, %s21268_s21 }
  0x58   : > { %p21271_p11 = pnand %p21269_p10, %p21752_p7  ;;  %p21276_p2 = por %p21275_p1, %p21274_p13 }
  0x5a   : > { %p21272_p12 = pneg %p21271_p11 }
  0x5c   : > { %p21277_p3 = pnand %p21276_p2, %p21272_p12 }
  0x5e   : > { %21280 = shalt.err (!%p21277_p3)
}
  0x5f   : > { %21134 = dma.hbm_to_vmem [thread:$0]  (!%p21744_p5), %s470_s8, 65536, %s472_s15, %s25887_s30, %s21624_s22, %s21624_s22, %s21625_s23  }
  0x60   : > { %s25913_s3 = sshll.u32 %s21622_s20, 11  ;;  %s25914_s7 = sld [smem:[#allocation36_spill]] }
  0x61   : > { %s25915_s13 = sshll.u32 %s21731_s26, 11  ;;  %s25889_s11 = scalar_lea.sflag [#allocation15], %s21728_s25 }
  0x62   : > { %s504_s24 = scalar_lea.vmem [#allocation14], %s25915_s13 }
  0x63   : > { %s512_s21 = sshll.u32 %s504_s24, 4  ;;  %s513_s21 = int_to_ptr.vmem [resolvable:$true] %s512_s21 }
  0x66   : > { %s509_s6 = scalar_lea.hbm %s25914_s7, %s25913_s3  ;;  %s21303_s8 = scalar_lea.hbm %s25914_s7, 6144 }
  0x67   : > { %s510_s1 = sshll.u32 %s509_s6, 4  ;;  %s511_s1 = int_to_ptr.hbm [resolvable:$true] %s510_s1 }
  0x68   : > { %s21296_s28 = sshra.s32 %s511_s1, 4  ;;  %s21297_s28 = int_to_ptr.hbm [resolvable:$true] %s21296_s28 }
  0x69   : > { %s21298_s27 = scalar_lea.hbm %s21297_s28, 2048  ;;  %p21304_p9 = scmp.lt.s32.totalorder %s21297_s28, %s25914_s7 }
  0x6a   : > { %p21299_p4 = scmp.ne.s32.totalorder %s21297_s28, %s21298_s27  ;;  %p21305_p10 = scmp.lt.s32.totalorder %s21303_s8, %s21298_s27 }
  0x6c   : > { %p21301_p6 = pnand %p21299_p4, %p21752_p7  ;;  %p21306_p11 = por %p21305_p10, %p21304_p9 }
  0x6e   : > { %p21302_p8 = pneg %p21301_p6 }
  0x70   : > { %p21307_p12 = pnand %p21306_p11, %p21302_p8 }
  0x72   : > { %21310 = shalt.err (!%p21307_p12)
}
  0x73   : > { %s21626_s12 = smov 256   ;;  %s21627_s14 = smov 16  }
  0x74   : > { %21140 = dma.hbm_to_vmem [thread:$0]  (!%p21744_p5), %s511_s1, 32768, %s513_s21, %s25889_s11, %s21626_s12, %s21626_s12, %s21627_s14  }
  0x75   : > { %s13225_s6 = sshll.u32 %s21731_s26, 8  ;;  %s19520_s13 = sshll.u32 %s21622_s20, 8 }
  0x76   : > { %s25916_s9 = sld [smem:[#allocation38_spill]]  ;;  %s545_s23 = scalar_lea.vmem [#allocation17], %s13225_s6 }
  0x77   : > { %s553_s8 = sshll.u32 %s545_s23, 4  ;;  %s25888_s15 = scalar_lea.sflag [#allocation18], %s21728_s25  ;;  %s554_s8 = int_to_ptr.vmem [resolvable:$true] %s553_s8 }
  0x7c   : > { %s550_s28 = scalar_lea.hbm %s25916_s9, %s19520_s13  ;;  %s21333_s12 = scalar_lea.hbm %s25916_s9, 768 }
  0x7d   : > { %s551_s27 = sshll.u32 %s550_s28, 4  ;;  %s552_s27 = int_to_ptr.hbm [resolvable:$true] %s551_s27 }
  0x7e   : > { %s21326_s3 = sshra.s32 %s552_s27, 4  ;;  %s21327_s3 = int_to_ptr.hbm [resolvable:$true] %s21326_s3 }
  0x7f   : > { %s21328_s30 = scalar_lea.hbm %s21327_s3, 256  ;;  %p21334_p3 = scmp.lt.s32.totalorder %s21327_s3, %s25916_s9 }
  0x80   : > { %p21329_p13 = scmp.ne.s32.totalorder %s21327_s3, %s21328_s30  ;;  %p21335_p4 = scmp.lt.s32.totalorder %s21333_s12, %s21328_s30 }
  0x82   : > { %p21331_p1 = pnand %p21329_p13, %p21752_p7  ;;  %p21336_p6 = por %p21335_p4, %p21334_p3 }
  0x84   : > { %p21332_p2 = pneg %p21331_p1 }
  0x86   : > { %p21337_p8 = pnand %p21336_p6, %p21332_p2 }
  0x88   : > { %21340 = shalt.err (!%p21337_p8)
}
  0x89   : > { %s21628_s6 = smov 64   ;;  %s21629_s13 = smov 4  }
  0x8a   : > { %21146 = dma.hbm_to_vmem [thread:$0]  (!%p21744_p5), %s552_s27, 4096, %s554_s8, %s25888_s15, %s21628_s6, %s21628_s6, %s21629_s13  }
  0x8b   : > { %s21853_s22 = sadd.s32 4294967295, %s21622_s20   ;;  %s13201_s30 = sadd.s32 4294967294, %s21622_s20  }
  0x8c   : > { %p81_p9 = scmp.ne.s32.totalorder %s21614_s18, %s21610_s17  ;;  %p25891_p10 = scmp.eq.s32.totalorder %s21853_s22, 0 }
  0x8d   : > { %p339_p11 = scmp.eq.s32.totalorder %s21853_s22, 2  ;;  %p345_p12 = scmp.eq.s32.totalorder %s13201_s30, 2 }
  0x8e   : > { %p21862_p13 = por %p25891_p10, %p81_p9  ;;  %p13202_p1 = scmp.ge.s32.totalorder %s21622_s20, 1 }
  0x8f   : > { %p21870_p2 = por %p339_p11, %p75_p0  ;;  %p21874_p3 = por %p345_p12, %p81_p9 }
  0x90   : > { %p352_p4 = scmp.lt.s32.totalorder %s21622_s20, 4  ;;  %s25920_s0 = sld [smem:[#allocation30_spill]] }
  0x91   : > { %s21630_s12 = smov [#allocation2]   ;;  %s21887_s24 = sshll.u32 %s21731_s26, 3 }
  0x92   : > { %p21882_p6 = pnand %p13202_p1, %p352_p4  ;;  %s366_s14 = sshll.u32 %s21630_s12, 4  ;;  %s367_s14 = int_to_ptr.vmem [resolvable:$true] %s366_s14 }
  0x93   : > { %s21892_s6 = sshll.u32 %s21622_s20, 3  ;;  %s25922_s2 = sld [smem:[#allocation32_spill]] }
  0x94   : > { %p21115_p0 = pneg %p21882_p6  ;;  %s403_s15 = scalar_lea.vmem [#allocation7], %s21887_s24 }
  0x95   : > { %s411_s11 = sshll.u32 %s403_s15, 4  ;;  %s412_s11 = int_to_ptr.vmem [resolvable:$true] %s411_s11 }
  0x96   : > { %s364_s21 = sshll.u32 %s25920_s0, 4  ;;  %p21116_p8 = pnand %p21115_p0, %p25891_p10  ;;  %s365_s21 = int_to_ptr.hbm [resolvable:$true] %s364_s21 }
  0x98   : > { %21118 = dma.hbm_to_vmem [thread:$0]  (!%p21116_p8), %s365_s21, 512, %s367_s14, [#allocation3]  }
  0x99   : > { %s407_s8 = scalar_lea.hbm %s25922_s2, %s21892_s6  ;;  %s21393_s7 = scalar_lea.hbm %s25922_s2, 24 }
  0x9a   : > { %s409_s3 = sshll.u32 %s407_s8, 4  ;;  %s410_s3 = int_to_ptr.hbm [resolvable:$true] %s409_s3 }
  0x9b   : > { %s21386_s12 = sshra.s32 %s410_s3, 4  ;;  %s21387_s12 = int_to_ptr.hbm [resolvable:$true] %s21386_s12 }
  0x9c   : > { %s21388_s10 = scalar_lea.hbm %s21387_s12, 8  ;;  %p21394_p1 = scmp.lt.s32.totalorder %s21387_s12, %s25922_s2 }
  0x9d   : > { %p21389_p9 = scmp.ne.s32.totalorder %s21387_s12, %s21388_s10  ;;  %p21395_p4 = scmp.lt.s32.totalorder %s21393_s7, %s21388_s10 }
  0x9f   : > { %p21391_p11 = pnand %p21389_p9, %p21752_p7  ;;  %p21396_p0 = por %p21395_p4, %p21394_p1 }
  0xa1   : > { %p21392_p12 = pneg %p21391_p11 }
  0xa3   : > { %p21397_p10 = pnand %p21396_p0, %p21392_p12 }
  0xa5   : > { %21400 = shalt.err (!%p21397_p10)
}
  0xa6   : > { %s25923_s15 = scalar_lea.sflag [#allocation6], %s21728_s25  ;;  %s448_s0 = scalar_lea.hbm %s25871_s4, %s21892_s6 }
  0xa7   : > { %21125 = dma.hbm_to_vmem [thread:$0]  (!%p21744_p5), %s410_s3, 128, %s412_s11, %s25923_s15  }
  0xa8   : > { %s444_s5 = scalar_lea.vmem [#allocation10], %s21887_s24  ;;  %s450_s9 = sshll.u32 %s448_s0, 4  ;;  %s451_s9 = int_to_ptr.hbm [resolvable:$true] %s450_s9 }
  0xa9   : > { %s452_s30 = sshll.u32 %s444_s5, 4  ;;  %s21416_s7 = sshra.s32 %s451_s9, 4  ;;  %s453_s30 = int_to_ptr.vmem [resolvable:$true] %s452_s30  ;;  %s21417_s7 = int_to_ptr.hbm [resolvable:$true] %s21416_s7 }
  0xaa   : > { %s21418_s10 = scalar_lea.hbm %s21417_s7, 8  ;;  %s21423_s11 = scalar_lea.hbm %s25871_s4, 24 }
  0xab   : > { %p21419_p10 = scmp.ne.s32.totalorder %s21417_s7, %s21418_s10  ;;  %p21424_p11 = scmp.lt.s32.totalorder %s21417_s7, %s25871_s4 }
  0xac   : > { %p21425_p12 = scmp.lt.s32.totalorder %s21423_s11, %s21418_s10 }
  0xad   : > { %p21421_p8 = pnand %p21419_p10, %p21752_p7 }
  0xae   : > { %p21426_p1 = por %p21425_p12, %p21424_p11 }
  0xaf   : > { %p21422_p9 = pneg %p21421_p8 }
  0xb1   : > { %p21427_p4 = pnand %p21426_p1, %p21422_p9 }
  0xb3   : > { %21430 = shalt.err (!%p21427_p4)
}
  0xb4   : > { %s25924_s15 = scalar_lea.sflag [#allocation9], %s21728_s25  ;;  %s25925_s0 = sld [smem:[#allocation35_spill]] }
  0xb5   : > { %21131 = dma.hbm_to_vmem [thread:$0]  (!%p21744_p5), %s451_s9, 128, %s453_s30, %s25924_s15  }
  0xb6   : > { %s485_s8 = scalar_lea.vmem [#allocation13], %s21887_s24  ;;  %s13223_s10 = sshll.u32 %s21731_s26, 2 }
  0xb7   : > { %s493_s12 = sshll.u32 %s485_s8, 4  ;;  %s494_s12 = int_to_ptr.vmem [resolvable:$true] %s493_s12 }
  0xba   : > { %s489_s5 = scalar_lea.hbm %s25925_s0, %s21892_s6  ;;  %s21453_s30 = scalar_lea.hbm %s25925_s0, 24 }
  0xbb   : > { %s491_s7 = sshll.u32 %s489_s5, 4  ;;  %s492_s7 = int_to_ptr.hbm [resolvable:$true] %s491_s7 }
  0xbc   : > { %s21446_s11 = sshra.s32 %s492_s7, 4  ;;  %s21447_s11 = int_to_ptr.hbm [resolvable:$true] %s21446_s11 }
  0xbd   : > { %s21448_s3 = scalar_lea.hbm %s21447_s11, 8  ;;  %p21454_p9 = scmp.lt.s32.totalorder %s21447_s11, %s25925_s0 }
  0xbe   : > { %p21449_p0 = scmp.ne.s32.totalorder %s21447_s11, %s21448_s3  ;;  %p21455_p11 = scmp.lt.s32.totalorder %s21453_s30, %s21448_s3 }
  0xc0   : > { %p21451_p10 = pnand %p21449_p0, %p21752_p7  ;;  %p21456_p12 = por %p21455_p11, %p21454_p9 }
  0xc2   : > { %p21452_p8 = pneg %p21451_p10 }
  0xc4   : > { %p21457_p1 = pnand %p21456_p12, %p21452_p8 }
  0xc6   : > { %21460 = shalt.err (!%p21457_p1)
}
  0xc7   : > { %s25926_s24 = scalar_lea.sflag [#allocation12], %s21728_s25  ;;  %s13224_s6 = sshll.u32 %s21622_s20, 2 }
  0xc8   : > { %21137 = dma.hbm_to_vmem [thread:$0]  (!%p21744_p5), %s492_s7, 128, %s494_s12, %s25926_s24  }
  0xc9   : > { %s25927_s2 = sld [smem:[#allocation37_spill]]  ;;  %s526_s8 = scalar_lea.vmem [#allocation16], %s13223_s10 }
  0xca   : > { %s534_s13 = sshll.u32 %s526_s8, 4  ;;  %s535_s13 = int_to_ptr.vmem [resolvable:$true] %s534_s13 }
  0xcf   : > { %s530_s5 = scalar_lea.hbm %s25927_s2, %s13224_s6  ;;  %s21483_s12 = scalar_lea.hbm %s25927_s2, 12 }
  0xd0   : > { %s532_s9 = sshll.u32 %s530_s5, 4  ;;  %s533_s9 = int_to_ptr.hbm [resolvable:$true] %s532_s9 }
  0xd1   : > { %s21476_s11 = sshra.s32 %s533_s9, 4  ;;  %s21477_s11 = int_to_ptr.hbm [resolvable:$true] %s21476_s11 }
  0xd2   : > { %s21478_s3 = scalar_lea.hbm %s21477_s11, 4  ;;  %p21484_p8 = scmp.lt.s32.totalorder %s21477_s11, %s25927_s2 }
  0xd3   : > { %p21479_p4 = scmp.ne.s32.totalorder %s21477_s11, %s21478_s3  ;;  %p21485_p9 = scmp.lt.s32.totalorder %s21483_s12, %s21478_s3 }
  0xd5   : > { %p21481_p0 = pnand %p21479_p4, %p21752_p7  ;;  %p21486_p11 = por %p21485_p9, %p21484_p8 }
  0xd7   : > { %p21482_p10 = pneg %p21481_p0 }
  0xd9   : > { %p21487_p12 = pnand %p21486_p11, %p21482_p10 }
  0xdb   : > { %21490 = shalt.err (!%p21487_p12)
}
  0xdc   : > { %s25928_s10 = scalar_lea.sflag [#allocation15], %s21728_s25  ;;  %s25929_s14 = sld [smem:[#allocation39_spill]] }
  0xdd   : > { %21143 = dma.hbm_to_vmem [thread:$0]  (!%p21744_p5), %s533_s9, 64, %s535_s13, %s25928_s10  }
  0xde   : > { %s566_s8 = scalar_lea.vmem [#allocation19], %s21731_s26 }
  0xdf   : > { %s573_s30 = sshll.u32 %s566_s8, 4  ;;  %s574_s30 = int_to_ptr.vmem [resolvable:$true] %s573_s30 }
  0xe2   : > { %s569_s5 = scalar_lea.hbm %s25929_s14, %s21622_s20  ;;  %s21513_s13 = scalar_lea.hbm %s25929_s14, 3 }
  0xe3   : > { %s571_s15 = sshll.u32 %s569_s5, 4  ;;  %s572_s15 = int_to_ptr.hbm [resolvable:$true] %s571_s15 }
  0xe4   : > { %s21506_s11 = sshra.s32 %s572_s15, 4  ;;  %s21507_s11 = int_to_ptr.hbm [resolvable:$true] %s21506_s11 }
  0xe5   : > { %s21508_s3 = scalar_lea.hbm %s21507_s11, 1  ;;  %p21514_p10 = scmp.lt.s32.totalorder %s21507_s11, %s25929_s14 }
  0xe6   : > { %p21509_p1 = scmp.ne.s32.totalorder %s21507_s11, %s21508_s3  ;;  %p21515_p8 = scmp.lt.s32.totalorder %s21513_s13, %s21508_s3 }
  0xe8   : > { %p21511_p4 = pnand %p21509_p1, %p21752_p7  ;;  %p21516_p9 = por %p21515_p8, %p21514_p10 }
  0xea   : > { %p21512_p0 = pneg %p21511_p4 }
  0xec   : > { %p21517_p11 = pnand %p21516_p9, %p21512_p0 }
  0xee   : > { %21520 = shalt.err (!%p21517_p11)
}
  0xef   : > { %s25930_s26 = scalar_lea.sflag [#allocation18], %s21728_s25  ;;  %582 = sbr.rel (%p21882_p6) target bundleno = 2298 (0x8fa), region = 64 }
  0xf0   : > { %21149 = dma.hbm_to_vmem [thread:$0]  (!%p21744_p5), %s572_s15, 16, %s574_s30, %s25930_s26  }
  0xf1   : > { %p25931_p7 = scmp.eq.s32.totalorder (!%p21882_p6), %s21853_s22, 0 }
  0xf4   : > { %21581 = dma.done.wait (%p25931_p7), [#allocation3], 512   ;;  %p25932_p12 = pmov %p25931_p7 }
  0xf5   : > { %s21988_s29 = sand.u32 1, %s21853_s22   ;;  %s21991_s10 = sand.u32 1, %s21614_s18  }
  0xf6   : > { %21583 = vsyncadd (%p25932_p12), [#allocation3], 4294966784  ;;  %s13230_s25 = sshll.u32 %s21991_s10, 11  ;;  %s590_s16 = scalar_lea.sflag [#allocation6], %s21988_s29 }
  0xf7   : > { %s21995_s6 = scalar_lea.vmem [#allocation5], %s13230_s25 }
  0xf8   : > { %21585 = dma.done.wait (%p21862_p13), %s590_s16, 32896  }
  0xf9   : > { %21587 = vsyncadd (%p21862_p13), %s590_s16, 4294934400  ;;  %s22002_s1 = sshll.u32 %s21991_s10, 3  ;;  %s13232_s21 = sshll.u32 %s21991_s10, 12 }
  0xfa   : > { %s603_s5 = scalar_lea.vmem [#allocation7], %s22002_s1  ;;  %s610_s8 = scalar_lea.sflag [#allocation9], %s21988_s29 }
  0xfb   : > { %s22007_s30 = scalar_lea.vmem [#allocation8], %s13232_s21 }
  0xfc   : > { %21589 = dma.done.wait (%p21862_p13), %s610_s8, 65664  }
  0xfd   : > { %21591 = vsyncadd (%p21862_p13), %s610_s8, 4294901632  ;;  %s22014_s15 = scalar_lea.vmem [#allocation10], %s22002_s1  ;;  %s630_s11 = scalar_lea.sflag [#allocation12], %s21988_s29 }
  0xfe   : > { %s22017_s3 = scalar_lea.vmem [#allocation11], %s13232_s21 }
  0xff   : > { %21593 = dma.done.wait (%p21862_p13), %s630_s11, 65664  }
 0x100   : > { %21595 = vsyncadd (%p21862_p13), %s630_s11, 4294901632  ;;  %s22024_s12 = scalar_lea.vmem [#allocation13], %s22002_s1  ;;  %s650_s7 = scalar_lea.sflag [#allocation15], %s21988_s29 }
 0x101   : > { %s22027_s13 = scalar_lea.vmem [#allocation14], %s13230_s25 }
 0x102   : > { %21597 = dma.done.wait (%p21862_p13), %s650_s7, 32832  }
 0x103   : > { %21599 = vsyncadd (%p21862_p13), %s650_s7, 4294934464  ;;  %s13237_s9 = sshll.u32 %s21991_s10, 2  ;;  %s13238_s24 = sshll.u32 %s21991_s10, 8 }
 0x104   : > { %s22035_s26 = scalar_lea.vmem [#allocation16], %s13237_s9  ;;  %s670_s16 = scalar_lea.sflag [#allocation18], %s21988_s29 }
 0x105   : > { %s22038_s21 = scalar_lea.vmem [#allocation17], %s13238_s24 }
 0x106   : > { %21601 = dma.done.wait (%p21862_p13), %s670_s16, 4112  }
 0x107   : > { %21603 = vsyncadd (%p21862_p13), %s670_s16, 4294963184  ;;  %v13466_v0 = vld [vmem:[%s21995_s6 + $0x1c0] sm:$0xf]  ;;  %s682_s28 = scalar_lea.vmem [#allocation19], %s21991_s10  ;;  %s19513_s29 = sshll.u32 %s21853_s22, 3 }
 0x108   : > { %v19581_v1 = vld [vmem:[%s21995_s6 + $0x1dc] sm:$0xf0] }
 0x109   : > { %v13722_v2 = vld [vmem:[%s21995_s6 + $0x3c0] sm:$0xf]  ;;  %v13467_v3 = vor.u32 %v19581_v1, %v13466_v0 }
 0x10a   : > { %v19645_v4 = vld [vmem:[%s21995_s6 + $0x3dc] sm:$0xf0] }
 0x10b   : > { %v13978_v5 = vld [vmem:[%s21995_s6 + $0x5c0] sm:$0xf]  ;;  %v13723_v7 = vor.u32 %v19645_v4, %v13722_v2  ;;  %2328 = vmatpush.bf16.msra.mxu0 %v13467_v3 }
 0x10c   : > { %v19709_v6 = vld [vmem:[%s21995_s6 + $0x5dc] sm:$0xf0] }
 0x10d   : > { %v13979_v8 = vor.u32 %v19709_v6, %v13978_v5  ;;  %v14234_v9 = vld [vmem:[%s21995_s6 + $0x7c0] sm:$0xf]  ;;  %2341 = vmatpush.bf16.msra.mxu1 %v13723_v7 }
 0x10e   : > { %v19773_v10 = vld [vmem:[%s21995_s6 + $0x7dc] sm:$0xf0] }
 0x10f   : > { %v13434_v11 = vld [vmem:[%s21995_s6 + $0x180] sm:$0xf]  ;;  %v14235_v12 = vor.u32 %v19773_v10, %v14234_v9  ;;  %2354 = vmatpush.bf16.msra.mxu2 %v13979_v8 }
 0x110   : > { %v19573_v13 = vld [vmem:[%s21995_s6 + $0x19c] sm:$0xf0] }
 0x111   : > { %v13690_v14 = vld [vmem:[%s21995_s6 + $0x380] sm:$0xf]  ;;  %v13435_v16 = vor.u32 %v19573_v13, %v13434_v11  ;;  %2367 = vmatpush.bf16.msra.mxu3 %v14235_v12 }
 0x112   : > { %v19637_v15 = vld [vmem:[%s21995_s6 + $0x39c] sm:$0xf0] }
 0x113   : > { %v13691_v17 = vor.u32 %v19637_v15, %v13690_v14  ;;  %v13946_v18 = vld [vmem:[%s21995_s6 + $0x580] sm:$0xf]  ;;  %2329 = vmatpush.bf16.msra.mxu0 %v13435_v16 }
 0x114   : > { %v19701_v19 = vld [vmem:[%s21995_s6 + $0x59c] sm:$0xf0] }
 0x115   : > { %v14202_v20 = vld [vmem:[%s21995_s6 + $0x780] sm:$0xf]  ;;  %v13947_v21 = vor.u32 %v19701_v19, %v13946_v18  ;;  %2342 = vmatpush.bf16.msra.mxu1 %v13691_v17 }
 0x116   : > { %v19765_v22 = vld [vmem:[%s21995_s6 + $0x79c] sm:$0xf0] }
 0x117   : > { %v13402_v23 = vld [vmem:[%s21995_s6 + $0x140] sm:$0xf]  ;;  %v14203_v25 = vor.u32 %v19765_v22, %v14202_v20  ;;  %2355 = vmatpush.bf16.msra.mxu2 %v13947_v21 }
 0x118   : > { %v19565_v24 = vld [vmem:[%s21995_s6 + $0x15c] sm:$0xf0] }
 0x119   : > { %v13658_v26 = vld [vmem:[%s21995_s6 + $0x340] sm:$0xf]  ;;  %v13403_v29 = vor.u32 %v19565_v24, %v13402_v23  ;;  %2368 = vmatpush.bf16.msra.mxu3 %v14203_v25 }
 0x11a   : > { %v19629_v27 = vld [vmem:[%s21995_s6 + $0x35c] sm:$0xf0] }
 0x11b   : > { %v13914_v28 = vld [vmem:[%s21995_s6 + $0x540] sm:$0xf]  ;;  %v13659_v33 = vor.u32 %v19629_v27, %v13658_v26  ;;  %2330 = vmatpush.bf16.msra.mxu0 %v13403_v29  ;;  %v13468_v29 = vld [vmem:[%s21995_s6 + $0x1e0] sm:$0xf0] }
 0x11c   : > { %v19693_v30 = vld [vmem:[%s21995_s6 + $0x55c] sm:$0xf0] }
 0x11d   : > { %v14170_v31 = vld [vmem:[%s21995_s6 + $0x740] sm:$0xf]  ;;  %v13915_v34 = vor.u32 %v19693_v30, %v13914_v28  ;;  %2343 = vmatpush.bf16.msra.mxu1 %v13659_v33  ;;  %v19577_v28 = vld [vmem:[%s21995_s6 + $0x1c4] sm:$0xf] }
 0x11e   : > { %v19757_v32 = vld [vmem:[%s21995_s6 + $0x75c] sm:$0xf0]  ;;  %v19641_v30 = vld [vmem:[%s21995_s6 + $0x3c4] sm:$0xf] }
 0x11f   : > { %v13370_v35 = vld [vmem:[%s21995_s6 + $0x100] sm:$0xf]  ;;  %v14171_v38 = vor.u32 %v19757_v32, %v14170_v31  ;;  %2356 = vmatpush.bf16.msra.mxu2 %v13915_v34  ;;  %v13724_v32 = vld [vmem:[%s21995_s6 + $0x3e0] sm:$0xf0] }
 0x120   : > { %v19557_v36 = vld [vmem:[%s21995_s6 + $0x11c] sm:$0xf0]  ;;  %v19705_v33 = vld [vmem:[%s21995_s6 + $0x5c4] sm:$0xf] }
 0x121   : > { %v13626_v37 = vld [vmem:[%s21995_s6 + $0x300] sm:$0xf]  ;;  %v13371_v44 = vor.u32 %v19557_v36, %v13370_v35  ;;  %2369 = vmatpush.bf16.msra.mxu3 %v14171_v38  ;;  %v13980_v34 = vld [vmem:[%s21995_s6 + $0x5e0] sm:$0xf0] }
 0x122   : > { %v19621_v39 = vld [vmem:[%s21995_s6 + $0x31c] sm:$0xf0]  ;;  %v14236_v38 = vld [vmem:[%s21995_s6 + $0x7e0] sm:$0xf0] }
 0x123   : > { %v13882_v40 = vld [vmem:[%s21995_s6 + $0x500] sm:$0xf]  ;;  %v13627_v45 = vor.u32 %v19621_v39, %v13626_v37  ;;  %2331 = vmatpush.bf16.msra.mxu0 %v13371_v44  ;;  %v19769_v37 = vld [vmem:[%s21995_s6 + $0x7c4] sm:$0xf] }
 0x124   : > { %v19685_v41 = vld [vmem:[%s21995_s6 + $0x51c] sm:$0xf0]  ;;  %v13436_v44 = vld [vmem:[%s21995_s6 + $0x1a0] sm:$0xf0] }
 0x125   : > { %v14138_v42 = vld [vmem:[%s21995_s6 + $0x700] sm:$0xf]  ;;  %v13883_v46 = vor.u32 %v19685_v41, %v13882_v40  ;;  %2344 = vmatpush.bf16.msra.mxu1 %v13627_v45  ;;  %v13471_v40 = vor.u32 %v19577_v28, %v13468_v29  ;;  %v13727_v41 = vor.u32 %v19641_v30, %v13724_v32  ;;  %v19633_v45 = vld [vmem:[%s21995_s6 + $0x384] sm:$0xf] }
 0x126   : > { %v19749_v43 = vld [vmem:[%s21995_s6 + $0x71c] sm:$0xf0]  ;;  %v19673_v28 = vld [vmem:[%s21995_s6 + $0x4c4] sm:$0xf] }
 0x127   : > { %v13338_v47 = vld [vmem:[%s21995_s6 + $0xc0] sm:$0xf]  ;;  %v14139_v50 = vor.u32 %v19749_v43, %v14138_v42  ;;  %2357 = vmatpush.bf16.msra.mxu2 %v13883_v46  ;;  %v13983_v42 = vor.u32 %v19705_v33, %v13980_v34  ;;  %v19569_v43 = vld [vmem:[%s21995_s6 + $0x184] sm:$0xf]  ;;  %v14239_v46 = vor.u32 %v19769_v37, %v14236_v38 }
 0x128   : > { %v19549_v48 = vld [vmem:[%s21995_s6 + $0xdc] sm:$0xf0]  ;;  %v13852_v29 = vld [vmem:[%s21995_s6 + $0x4e0] sm:$0xf0] }
 0x129   : > { %v13594_v49 = vld [vmem:[%s21995_s6 + $0x2c0] sm:$0xf]  ;;  %v13339_v56 = vor.u32 %v19549_v48, %v13338_v47  ;;  %2370 = vmatpush.bf16.msra.mxu3 %v14139_v50  ;;  %v13692_v47 = vld [vmem:[%s21995_s6 + $0x3a0] sm:$0xf0]  ;;  %v13855_v34 = vor.u32 %v19673_v28, %v13852_v29  ;;  %v13954_v28 = vld [vmem:[%s21995_s6 + $0x588] sm:$0xf] }
 0x12a   : > { %v19613_v51 = vld [vmem:[%s21995_s6 + $0x2dc] sm:$0xf0]  ;;  %v19697_v48 = vld [vmem:[%s21995_s6 + $0x584] sm:$0xf]  ;;  %v19702_v29 = vld [vmem:[%s21995_s6 + $0x5a4] sm:$0xf0] }
 0x12b   : > { %v13850_v52 = vld [vmem:[%s21995_s6 + $0x4c0] sm:$0xf]  ;;  %v13595_v57 = vor.u32 %v19613_v51, %v13594_v49  ;;  %2332 = vmatpush.bf16.msra.mxu0 %v13339_v56  ;;  %v13948_v49 = vld [vmem:[%s21995_s6 + $0x5a0] sm:$0xf0] }
 0x12c   : > { %v19677_v53 = vld [vmem:[%s21995_s6 + $0x4dc] sm:$0xf0]  ;;  %v19761_v50 = vld [vmem:[%s21995_s6 + $0x784] sm:$0xf] }
 0x12d   : > { %v14106_v54 = vld [vmem:[%s21995_s6 + $0x6c0] sm:$0xf]  ;;  %v13851_v58 = vor.u32 %v19677_v53, %v13850_v52  ;;  %2345 = vmatpush.bf16.msra.mxu1 %v13595_v57  ;;  %v14204_v51 = vld [vmem:[%s21995_s6 + $0x7a0] sm:$0xf0]  ;;  %v13439_v52 = vor.u32 %v19569_v43, %v13436_v44 }
 0x12e   : > { %v19741_v55 = vld [vmem:[%s21995_s6 + $0x6dc] sm:$0xf0]  ;;  %v19561_v53 = vld [vmem:[%s21995_s6 + $0x144] sm:$0xf] }
 0x12f   : > { %v13306_v59 = vld [vmem:[%s21995_s6 + $0x80] sm:$0xf]  ;;  %v14107_v62 = vor.u32 %v19741_v55, %v14106_v54  ;;  %2358 = vmatpush.bf16.msra.mxu2 %v13851_v58  ;;  %v13695_v54 = vor.u32 %v19633_v45, %v13692_v47  ;;  %v13951_v55 = vor.u32 %v19697_v48, %v13948_v49  ;;  %v13404_v56 = vld [vmem:[%s21995_s6 + $0x160] sm:$0xf0] }
 0x130   : > { %v19541_v60 = vld [vmem:[%s21995_s6 + $0x9c] sm:$0xf0]  ;;  %v19625_v57 = vld [vmem:[%s21995_s6 + $0x344] sm:$0xf] }
 0x131   : > { %v13562_v61 = vld [vmem:[%s21995_s6 + $0x280] sm:$0xf]  ;;  %v13307_v4 = vor.u32 %v19541_v60, %v13306_v59  ;;  %2371 = vmatpush.bf16.msra.mxu3 %v14107_v62  ;;  %v13660_v58 = vld [vmem:[%s21995_s6 + $0x360] sm:$0xf0]  ;;  %v14207_v59 = vor.u32 %v19761_v50, %v14204_v51 }
 0x132   : > { %v19605_v63 = vld [vmem:[%s21995_s6 + $0x29c] sm:$0xf0]  ;;  %v19689_v60 = vld [vmem:[%s21995_s6 + $0x544] sm:$0xf] }
 0x133   : > { %v13818_v0 = vld [vmem:[%s21995_s6 + $0x480] sm:$0xf]  ;;  %v13563_v5 = vor.u32 %v19605_v63, %v13562_v61  ;;  %2333 = vmatpush.bf16.msra.mxu0 %v13307_v4  ;;  %v13916_v61 = vld [vmem:[%s21995_s6 + $0x560] sm:$0xf0] }
 0x134   : > { %v19669_v1 = vld [vmem:[%s21995_s6 + $0x49c] sm:$0xf0]  ;;  %v19753_v62 = vld [vmem:[%s21995_s6 + $0x744] sm:$0xf] }
 0x135   : > { %v14074_v2 = vld [vmem:[%s21995_s6 + $0x680] sm:$0xf]  ;;  %v13819_v6 = vor.u32 %v19669_v1, %v13818_v0  ;;  %2346 = vmatpush.bf16.msra.mxu1 %v13563_v5  ;;  %v14172_v63 = vld [vmem:[%s21995_s6 + $0x760] sm:$0xf0]  ;;  %v13407_v0 = vor.u32 %v19561_v53, %v13404_v56  ;;  %v13663_v1 = vor.u32 %v19625_v57, %v13660_v58  ;;  %v13919_v5 = vor.u32 %v19689_v60, %v13916_v61 }
 0x136   : > { %v19733_v3 = vld [vmem:[%s21995_s6 + $0x69c] sm:$0xf0]  ;;  %v19737_v30 = vld [vmem:[%s21995_s6 + $0x6c4] sm:$0xf] }
 0x137   : > { %v13274_v7 = vld [vmem:[%s21995_s6 + $0x40] sm:$0xf]  ;;  %v14075_v10 = vor.u32 %v19733_v3, %v14074_v2  ;;  %2359 = vmatpush.bf16.msra.mxu2 %v13819_v6  ;;  %v19553_v2 = vld [vmem:[%s21995_s6 + $0x104] sm:$0xf]  ;;  %v768_v3 = vld [vmem:[#allocation2 + $0x10] sm:$0xff] }
 0x138   : > { %v19533_v8 = vld [vmem:[%s21995_s6 + $0x5c] sm:$0xf0]  ;;  %v13372_v6 = vld [vmem:[%s21995_s6 + $0x120] sm:$0xf0] }
 0x139   : > { %v13530_v9 = vld [vmem:[%s21995_s6 + $0x240] sm:$0xf]  ;;  %v13275_v16 = vor.u32 %v19533_v8, %v13274_v7  ;;  %2372 = vmatpush.bf16.msra.mxu3 %v14075_v10  ;;  %v19617_v7 = vld [vmem:[%s21995_s6 + $0x304] sm:$0xf]  ;;  %v22135_v8 = vpack.c.bf16 %v768_v3, %v768_v3  ;;  %v769_v10 = vld [vmem:[#allocation2 + $0x18] sm:$0xff] }
 0x13a   : > { %v19597_v11 = vld [vmem:[%s21995_s6 + $0x25c] sm:$0xf0]  ;;  %v19601_v37 = vld [vmem:[%s21995_s6 + $0x284] sm:$0xf] }
 0x13b   : > { %v13786_v12 = vld [vmem:[%s21995_s6 + $0x440] sm:$0xf]  ;;  %v13531_v19 = vor.u32 %v19597_v11, %v13530_v9  ;;  %2334 = vmatpush.bf16.msra.mxu0 %v13275_v16  ;;  %v14175_v11 = vor.u32 %v19753_v62, %v14172_v63  ;;  %v19745_v16 = vld [vmem:[%s21995_s6 + $0x704] sm:$0xf] }
 0x13c   : > { %v19661_v13 = vld [vmem:[%s21995_s6 + $0x45c] sm:$0xf0]  ;;  %v14076_v43 = vld [vmem:[%s21995_s6 + $0x6a0] sm:$0xf0] }
 0x13d   : > { %v14042_v14 = vld [vmem:[%s21995_s6 + $0x640] sm:$0xf]  ;;  %v13787_v20 = vor.u32 %v19661_v13, %v13786_v12  ;;  %2347 = vmatpush.bf16.msra.mxu1 %v13531_v19  ;;  %v13628_v12 = vld [vmem:[%s21995_s6 + $0x320] sm:$0xf0]  ;;  %v767_v19 = vld [vmem:[#allocation2 + $0x8] sm:$0xff] }
 0x13e   : > { %v19725_v15 = vld [vmem:[%s21995_s6 + $0x65c] sm:$0xf0]  ;;  %v19681_v13 = vld [vmem:[%s21995_s6 + $0x504] sm:$0xf] }
 0x13f   : > { %v13242_v17 = vld [vmem:[%s21995_s6] sm:$0xf]  ;;  %v14043_v24 = vor.u32 %v19725_v15, %v14042_v14  ;;  %2360 = vmatpush.bf16.msra.mxu2 %v13787_v20  ;;  %v13884_v14 = vld [vmem:[%s21995_s6 + $0x520] sm:$0xf0]  ;;  %v22142_v15 = vpack.c.bf16 %v769_v10, %v769_v10  ;;  %v13631_v20 = vor.u32 %v19617_v7, %v13628_v12  ;;  %v19646_v10 = vld [vmem:[%s21995_s6 + $0x3e4] sm:$0xf0] }
 0x140   : > { %v19525_v18 = vld [vmem:[%s21995_s6 + $0x1c] sm:$0xf0]  ;;  %v19529_v47 = vld [vmem:[%s21995_s6 + $0x44] sm:$0xf]  ;;  %v19710_v12 = vld [vmem:[%s21995_s6 + $0x5e4] sm:$0xf0] }
 0x141   : > { %v13498_v21 = vld [vmem:[%s21995_s6 + $0x200] sm:$0xf]  ;;  %v13243_v31 = vor.u32 %v19525_v18, %v13242_v17  ;;  %2373 = vmatpush.bf16.msra.mxu3 %v14043_v24  ;;  %v14140_v17 = vld [vmem:[%s21995_s6 + $0x720] sm:$0xf0]  ;;  %v13375_v18 = vor.u32 %v19553_v2, %v13372_v6  ;;  %v13730_v6 = vld [vmem:[%s21995_s6 + $0x3c8] sm:$0xf] }
 0x142   : > { %v19589_v22 = vld [vmem:[%s21995_s6 + $0x21c] sm:$0xf0]  ;;  %v19609_v24 = vld [vmem:[%s21995_s6 + $0x2c4] sm:$0xf] }
 0x143   : > { %v13754_v23 = vld [vmem:[%s21995_s6 + $0x400] sm:$0xf]  ;;  %v13499_v35 = vor.u32 %v19589_v22, %v13498_v21  ;;  %2335 = vmatpush.bf16.msra.mxu0 %v13243_v31  ;;  %v13887_v21 = vor.u32 %v19681_v13, %v13884_v14  ;;  %v19545_v22 = vld [vmem:[%s21995_s6 + $0xc4] sm:$0xf] }
 0x144   : > { %v19653_v25 = vld [vmem:[%s21995_s6 + $0x41c] sm:$0xf0]  ;;  %v14108_v31 = vld [vmem:[%s21995_s6 + $0x6e0] sm:$0xf0] }
 0x145   : > { %v14010_v26 = vld [vmem:[%s21995_s6 + $0x600] sm:$0xf]  ;;  %v13755_v36 = vor.u32 %v19653_v25, %v13754_v23  ;;  %2348 = vmatpush.bf16.msra.mxu1 %v13499_v35  ;;  %v13340_v23 = vld [vmem:[%s21995_s6 + $0xe0] sm:$0xf0]  ;;  %v22152_v25 = vpack.c.bf16 %v767_v19, %v767_v19  ;;  %v14111_v38 = vor.u32 %v19737_v30, %v14108_v31  ;;  %v14210_v30 = vld [vmem:[%s21995_s6 + $0x788] sm:$0xf] }
 0x146   : > { %v19717_v27 = vld [vmem:[%s21995_s6 + $0x61c] sm:$0xf0]  ;;  %v13343_v32 = vor.u32 %v19545_v22, %v13340_v23  ;;  %v19537_v35 = vld [vmem:[%s21995_s6 + $0x84] sm:$0xf]  ;;  %v13442_v22 = vld [vmem:[%s21995_s6 + $0x188] sm:$0xf] }
 0x147   : > { %v14011_v39 = vor.u32 %v19717_v27, %v14010_v26  ;;  %2361 = vmatpush.bf16.msra.mxu2 %v13755_v36  ;;  %2380 = vmatpush.bf16.msrb.mxu0 %v13471_v40  ;;  %v766_v4 = vld [vmem:[#allocation2] sm:$0xff]  ;;  %v14143_v26 = vor.u32 %v19745_v16, %v14140_v17  ;;  %v14242_v16 = vld [vmem:[%s21995_s6 + $0x7c8] sm:$0xf] }
 0x148   : > { %v22137_v9 = vpack.c.bf16 %v766_v4, %v766_v4  ;;  %v13596_v27 = vld [vmem:[%s21995_s6 + $0x2e0] sm:$0xf0]  ;;  %2349 = vmatmul.bf16.vlgmr.msra.gmra.mxu1 %v22152_v25  ;;  %v13474_v4 = vld [vmem:[%s21995_s6 + $0x1c8] sm:$0xf] }
 0x149   : > { %2374 = vmatpush.bf16.msra.mxu3 %v14011_v39  ;;  %2393 = vmatpush.bf16.msrb.mxu1 %v13727_v41  ;;  %v13599_v33 = vor.u32 %v19609_v24, %v13596_v27  ;;  %v13308_v36 = vld [vmem:[%s21995_s6 + $0xa0] sm:$0xf0]  ;;  %v19774_v17 = vld [vmem:[%s21995_s6 + $0x7e4] sm:$0xf0] }
 0x14a   : > { %2362 = vmatmul.bf16.vlgmr.msra.gmra.mxu2 %v22135_v8  ;;  %2336 = vmatmul.bf16.vlgmr.msra.gmra.mxu0 %v22137_v9  ;;  %v13564_v39 = vld [vmem:[%s21995_s6 + $0x2a0] sm:$0xf0]  ;;  %v13311_v44 = vor.u32 %v19537_v35, %v13308_v36  ;;  %v19574_v23 = vld [vmem:[%s21995_s6 + $0x1a4] sm:$0xf0] }
 0x14b   : > { %2406 = vmatpush.bf16.msrb.mxu2 %v13983_v42  ;;  %2381 = vmatpush.bf16.msrb.mxu0 %v13439_v52  ;;  %v19665_v40 = vld [vmem:[%s21995_s6 + $0x484] sm:$0xf]  ;;  %v13567_v45 = vor.u32 %v19601_v37, %v13564_v39  ;;  %v13698_v24 = vld [vmem:[%s21995_s6 + $0x388] sm:$0xf] }
 0x14c   : > { %2375 = vmatmul.bf16.vlgmr.msra.gmra.mxu3 %v22142_v15  ;;  %v13820_v41 = vld [vmem:[%s21995_s6 + $0x4a0] sm:$0xf0]  ;;  %v19638_v27 = vld [vmem:[%s21995_s6 + $0x3a4] sm:$0xf0] }
 0x14d   : > { %2419 = vmatpush.bf16.msrb.mxu3 %v14239_v46  ;;  %2394 = vmatpush.bf16.msrb.mxu1 %v13695_v54  ;;  %v19729_v42 = vld [vmem:[%s21995_s6 + $0x684] sm:$0xf]  ;;  %v13823_v46 = vor.u32 %v19665_v40, %v13820_v41  ;;  %v19766_v31 = vld [vmem:[%s21995_s6 + $0x7a4] sm:$0xf0] }
 0x14e   : > { %v13276_v48 = vld [vmem:[%s21995_s6 + $0x60] sm:$0xf0]  ;;  %v14079_v50 = vor.u32 %v19729_v42, %v14076_v43  ;;  %v13410_v35 = vld [vmem:[%s21995_s6 + $0x148] sm:$0xf] }
 0x14f   : > { %2407 = vmatpush.bf16.msrb.mxu2 %v13951_v55  ;;  %2382 = vmatpush.bf16.msrb.mxu0 %v13407_v0  ;;  %v19593_v49 = vld [vmem:[%s21995_s6 + $0x244] sm:$0xf]  ;;  %v13279_v56 = vor.u32 %v19529_v47, %v13276_v48  ;;  %v19566_v36 = vld [vmem:[%s21995_s6 + $0x164] sm:$0xf0] }
 0x150   : > { %v13532_v51 = vld [vmem:[%s21995_s6 + $0x260] sm:$0xf0]  ;;  %v13666_v37 = vld [vmem:[%s21995_s6 + $0x348] sm:$0xf] }
 0x151   : > { %2420 = vmatpush.bf16.msrb.mxu3 %v14207_v59  ;;  %2395 = vmatpush.bf16.msrb.mxu1 %v13663_v1  ;;  %v19657_v52 = vld [vmem:[%s21995_s6 + $0x444] sm:$0xf]  ;;  %v13535_v59 = vor.u32 %v19593_v49, %v13532_v51  ;;  %v19630_v39 = vld [vmem:[%s21995_s6 + $0x364] sm:$0xf0] }
 0x152   : > { %v13788_v53 = vld [vmem:[%s21995_s6 + $0x460] sm:$0xf0]  ;;  %v13922_v40 = vld [vmem:[%s21995_s6 + $0x548] sm:$0xf] }
 0x153   : > { %2408 = vmatpush.bf16.msrb.mxu2 %v13919_v5  ;;  %2383 = vmatpush.bf16.msrb.mxu0 %v13375_v18  ;;  %v19721_v54 = vld [vmem:[%s21995_s6 + $0x644] sm:$0xf]  ;;  %v13791_v60 = vor.u32 %v19657_v52, %v13788_v53  ;;  %v19582_v5 = vld [vmem:[%s21995_s6 + $0x1e4] sm:$0xf0] }
 0x154   : > { %v14044_v55 = vld [vmem:[%s21995_s6 + $0x660] sm:$0xf0]  ;;  %v13475_v19 = vor.u32 %v19582_v5, %v13474_v4  ;;  %v19694_v41 = vld [vmem:[%s21995_s6 + $0x564] sm:$0xf0] }
 0x155   : > { %2421 = vmatpush.bf16.msrb.mxu3 %v14175_v11  ;;  %2396 = vmatpush.bf16.msrb.mxu1 %v13631_v20  ;;  %v19521_v57 = vld [vmem:[%s21995_s6 + $0x4] sm:$0xf]  ;;  %v14047_v0 = vor.u32 %v19721_v54, %v14044_v55  ;;  %v13986_v11 = vld [vmem:[%s21995_s6 + $0x5c8] sm:$0xf]  ;;  %v13731_v20 = vor.u32 %v19646_v10, %v13730_v6 }
 0x156   : > { %v13244_v58 = vld [vmem:[%s21995_s6 + $0x20] sm:$0xf0]  ;;  %v14178_v42 = vld [vmem:[%s21995_s6 + $0x748] sm:$0xf] }
 0x157   : > { %2409 = vmatpush.bf16.msrb.mxu2 %v13887_v21  ;;  %2384 = vmatpush.bf16.msrb.mxu0 %v13343_v32  ;;  %v19585_v61 = vld [vmem:[%s21995_s6 + $0x204] sm:$0xf]  ;;  %v13247_v7 = vor.u32 %v19521_v57, %v13244_v58  ;;  %v13987_v21 = vor.u32 %v19710_v12, %v13986_v11  ;;  %v13443_v32 = vor.u32 %v19574_v23, %v13442_v22  ;;  %v19758_v43 = vld [vmem:[%s21995_s6 + $0x764] sm:$0xf0] }
 0x158   : > { %v13500_v62 = vld [vmem:[%s21995_s6 + $0x220] sm:$0xf0]  ;;  %v13378_v47 = vld [vmem:[%s21995_s6 + $0x108] sm:$0xf] }
 0x159   : > { %2422 = vmatpush.bf16.msrb.mxu3 %v14143_v26  ;;  %2397 = vmatpush.bf16.msrb.mxu1 %v13599_v33  ;;  %v19649_v63 = vld [vmem:[%s21995_s6 + $0x404] sm:$0xf]  ;;  %v13503_v13 = vor.u32 %v19585_v61, %v13500_v62  ;;  %v14243_v26 = vor.u32 %v19774_v17, %v14242_v16  ;;  %v13699_v33 = vor.u32 %v19638_v27, %v13698_v24  ;;  %v19558_v48 = vld [vmem:[%s21995_s6 + $0x124] sm:$0xf0] }
 0x15a   : > { %v13756_v1 = vld [vmem:[%s21995_s6 + $0x420] sm:$0xf0]  ;;  %v13634_v49 = vld [vmem:[%s21995_s6 + $0x308] sm:$0xf] }
 0x15b   : > { %2410 = vmatpush.bf16.msrb.mxu2 %v13855_v34  ;;  %2385 = vmatpush.bf16.msrb.mxu0 %v13311_v44  ;;  %v19713_v2 = vld [vmem:[%s21995_s6 + $0x604] sm:$0xf]  ;;  %v13759_v14 = vor.u32 %v19649_v63, %v13756_v1  ;;  %v13955_v34 = vor.u32 %v19702_v29, %v13954_v28  ;;  %v13411_v44 = vor.u32 %v19566_v36, %v13410_v35  ;;  %v19622_v51 = vld [vmem:[%s21995_s6 + $0x324] sm:$0xf0] }
 0x15c   : > { %v14012_v3 = vld [vmem:[%s21995_s6 + $0x620] sm:$0xf0]  ;;  %v13890_v52 = vld [vmem:[%s21995_s6 + $0x508] sm:$0xf]  ;;  %v13635_v57 = vor.u32 %v19622_v51, %v13634_v49  ;;  %v19706_v49 = vld [vmem:[%s21995_s6 + $0x5cc] sm:$0xf] }
 0x15d   : > { %2423 = vmatpush.bf16.msrb.mxu3 %v14111_v38  ;;  %2398 = vmatpush.bf16.msrb.mxu1 %v13567_v45  ;;  %v14015_v18 = vor.u32 %v19713_v2, %v14012_v3  ;;  %v14211_v38 = vor.u32 %v19766_v31, %v14210_v30  ;;  %v13667_v45 = vor.u32 %v19630_v39, %v13666_v37  ;;  %v19686_v53 = vld [vmem:[%s21995_s6 + $0x524] sm:$0xf0] }
 0x15e   : > { %v14146_v54 = vld [vmem:[%s21995_s6 + $0x708] sm:$0xf]  ;;  %v13891_v58 = vor.u32 %v19686_v53, %v13890_v52  ;;  %v19770_v53 = vld [vmem:[%s21995_s6 + $0x7cc] sm:$0xf] }
 0x15f   : > { %2411 = vmatpush.bf16.msrb.mxu2 %v13823_v46  ;;  %2386 = vmatpush.bf16.msrb.mxu0 %v13279_v56  ;;  %v13923_v46 = vor.u32 %v19694_v41, %v13922_v40  ;;  %v19750_v55 = vld [vmem:[%s21995_s6 + $0x724] sm:$0xf0]  ;;  %v13379_v56 = vor.u32 %v19558_v48, %v13378_v47  ;;  %v13732_v48 = vld [vmem:[%s21995_s6 + $0x3e8] sm:$0xf0] }
 0x160   : > { %v13602_v61 = vld [vmem:[%s21995_s6 + $0x2c8] sm:$0xf]  ;;  %v14147_v62 = vor.u32 %v19750_v55, %v14146_v54  ;;  %v14244_v54 = vld [vmem:[%s21995_s6 + $0x7e8] sm:$0xf0] }
 0x161   : > { %2424 = vmatpush.bf16.msrb.mxu3 %v14079_v50  ;;  %2399 = vmatpush.bf16.msrb.mxu1 %v13535_v59  ;;  %v14179_v50 = vor.u32 %v19758_v43, %v14178_v42  ;;  %v13346_v59 = vld [vmem:[%s21995_s6 + $0xc8] sm:$0xf] }
 0x162   : > { %v19614_v63 = vld [vmem:[%s21995_s6 + $0x2e4] sm:$0xf0] }
 0x163   : > { %2412 = vmatpush.bf16.msrb.mxu2 %v13791_v60  ;;  %2387 = vmatpush.bf16.msrb.mxu0 %v13247_v7  ;;  %v19550_v60 = vld [vmem:[%s21995_s6 + $0xe4] sm:$0xf0]  ;;  %v13603_v5 = vor.u32 %v19614_v63, %v13602_v61  ;;  %v19634_v61 = vld [vmem:[%s21995_s6 + $0x38c] sm:$0xf] }
 0x164   : > { %v19678_v1 = vld [vmem:[%s21995_s6 + $0x4e4] sm:$0xf0]  ;;  %v13347_v4 = vor.u32 %v19550_v60, %v13346_v59  ;;  %v19570_v59 = vld [vmem:[%s21995_s6 + $0x18c] sm:$0xf] }
 0x165   : > { %2425 = vmatpush.bf16.msrb.mxu3 %v14047_v0  ;;  %2400 = vmatpush.bf16.msrb.mxu1 %v13503_v13  ;;  %v13858_v0 = vld [vmem:[%s21995_s6 + $0x4c8] sm:$0xf]  ;;  %v13444_v60 = vld [vmem:[%s21995_s6 + $0x1a8] sm:$0xf0] }
 0x166   : > { %2388 = vmatmul.bf16.vlgmr.msrb.gmra.mxu0 %v22137_v9  ;;  %v14114_v2 = vld [vmem:[%s21995_s6 + $0x6c8] sm:$0xf]  ;;  %v13859_v6 = vor.u32 %v19678_v1, %v13858_v0  ;;  %v13700_v63 = vld [vmem:[%s21995_s6 + $0x3a8] sm:$0xf0] }
 0x167   : > { %2413 = vmatpush.bf16.msrb.mxu2 %v13759_v14  ;;  %2432 = vmatpush.bf16.msra.mxu0 %v13475_v19  ;;  %v19742_v3 = vld [vmem:[%s21995_s6 + $0x6e4] sm:$0xf0]  ;;  %v19698_v0 = vld [vmem:[%s21995_s6 + $0x58c] sm:$0xf] }
 0x168   : > { %2401 = vmatmul.bf16.vlgmr.msrb.gmra.mxu1 %v22152_v25  ;;  %v13314_v7 = vld [vmem:[%s21995_s6 + $0x88] sm:$0xf]  ;;  %v14115_v12 = vor.u32 %v19742_v3, %v14114_v2  ;;  %v13956_v1 = vld [vmem:[%s21995_s6 + $0x5a8] sm:$0xf0] }
 0x169   : > { %2426 = vmatpush.bf16.msrb.mxu3 %v14015_v18  ;;  %2445 = vmatpush.bf16.msra.mxu1 %v13731_v20  ;;  %v19542_v10 = vld [vmem:[%s21995_s6 + $0xa4] sm:$0xf0]  ;;  %v19762_v2 = vld [vmem:[%s21995_s6 + $0x78c] sm:$0xf] }
 0x16a   : > { %2414 = vmatmul.bf16.vlgmr.msrb.gmra.mxu2 %v22135_v8  ;;  %v13570_v11 = vld [vmem:[%s21995_s6 + $0x288] sm:$0xf]  ;;  %v13315_v19 = vor.u32 %v19542_v10, %v13314_v7  ;;  %v14212_v3 = vld [vmem:[%s21995_s6 + $0x7a8] sm:$0xf0] }
 0x16b   : > { %2458 = vmatpush.bf16.msra.mxu2 %v13987_v21  ;;  %2433 = vmatpush.bf16.msra.mxu0 %v13443_v32  ;;  %v19606_v13 = vld [vmem:[%s21995_s6 + $0x2a4] sm:$0xf0]  ;;  %v19562_v7 = vld [vmem:[%s21995_s6 + $0x14c] sm:$0xf] }
 0x16c   : > { %2427 = vmatmul.bf16.vlgmr.msrb.gmra.mxu3 %v22142_v15  ;;  %v13826_v14 = vld [vmem:[%s21995_s6 + $0x488] sm:$0xf]  ;;  %v13571_v20 = vor.u32 %v19606_v13, %v13570_v11  ;;  %v13412_v10 = vld [vmem:[%s21995_s6 + $0x168] sm:$0xf0] }
 0x16d   : > { %2471 = vmatpush.bf16.msra.mxu3 %v14243_v26  ;;  %2446 = vmatpush.bf16.msra.mxu1 %v13699_v33  ;;  %v19670_v16 = vld [vmem:[%s21995_s6 + $0x4a4] sm:$0xf0]  ;;  %v19626_v11 = vld [vmem:[%s21995_s6 + $0x34c] sm:$0xf] }
 0x16e   : > { %v14082_v17 = vld [vmem:[%s21995_s6 + $0x688] sm:$0xf]  ;;  %v13827_v21 = vor.u32 %v19670_v16, %v13826_v14  ;;  %v13668_v13 = vld [vmem:[%s21995_s6 + $0x368] sm:$0xf0] }
 0x16f   : > { %2459 = vmatpush.bf16.msra.mxu2 %v13955_v34  ;;  %2434 = vmatpush.bf16.msra.mxu0 %v13411_v44  ;;  %v19734_v18 = vld [vmem:[%s21995_s6 + $0x6a4] sm:$0xf0]  ;;  %v19578_v44 = vld [vmem:[%s21995_s6 + $0x1cc] sm:$0xf] }
 0x170   : > { %v13282_v22 = vld [vmem:[%s21995_s6 + $0x48] sm:$0xf]  ;;  %v14083_v26 = vor.u32 %v19734_v18, %v14082_v17  ;;  %v19690_v14 = vld [vmem:[%s21995_s6 + $0x54c] sm:$0xf] }
 0x171   : > { %2472 = vmatpush.bf16.msra.mxu3 %v14211_v38  ;;  %2447 = vmatpush.bf16.msra.mxu1 %v13667_v45  ;;  %v19534_v23 = vld [vmem:[%s21995_s6 + $0x64] sm:$0xf0]  ;;  %v13476_v45 = vld [vmem:[%s21995_s6 + $0x1e8] sm:$0xf0] }
 0x172   : > { %v13538_v24 = vld [vmem:[%s21995_s6 + $0x248] sm:$0xf]  ;;  %v13283_v32 = vor.u32 %v19534_v23, %v13282_v22  ;;  %v13924_v16 = vld [vmem:[%s21995_s6 + $0x568] sm:$0xf0] }
 0x173   : > { %2460 = vmatpush.bf16.msra.mxu2 %v13923_v46  ;;  %2435 = vmatpush.bf16.msra.mxu0 %v13379_v56  ;;  %v19598_v27 = vld [vmem:[%s21995_s6 + $0x264] sm:$0xf0]  ;;  %v19642_v46 = vld [vmem:[%s21995_s6 + $0x3cc] sm:$0xf]  ;;  %v13479_v56 = vor.u32 %v19578_v44, %v13476_v45 }
 0x174   : > { %v13794_v28 = vld [vmem:[%s21995_s6 + $0x448] sm:$0xf]  ;;  %v13539_v35 = vor.u32 %v19598_v27, %v13538_v24  ;;  %v19754_v17 = vld [vmem:[%s21995_s6 + $0x74c] sm:$0xf] }
 0x175   : > { %2473 = vmatpush.bf16.msra.mxu3 %v14179_v50  ;;  %2448 = vmatpush.bf16.msra.mxu1 %v13635_v57  ;;  %v19662_v29 = vld [vmem:[%s21995_s6 + $0x464] sm:$0xf0]  ;;  %v13988_v50 = vld [vmem:[%s21995_s6 + $0x5e8] sm:$0xf0]  ;;  %v13735_v57 = vor.u32 %v19642_v46, %v13732_v48 }
 0x176   : > { %v14050_v30 = vld [vmem:[%s21995_s6 + $0x648] sm:$0xf]  ;;  %v13795_v36 = vor.u32 %v19662_v29, %v13794_v28  ;;  %v14180_v18 = vld [vmem:[%s21995_s6 + $0x768] sm:$0xf0] }
 0x177   : > { %2461 = vmatpush.bf16.msra.mxu2 %v13891_v58  ;;  %2436 = vmatpush.bf16.msra.mxu0 %v13347_v4  ;;  %v19726_v31 = vld [vmem:[%s21995_s6 + $0x664] sm:$0xf0]  ;;  %v13991_v58 = vor.u32 %v19706_v49, %v13988_v50  ;;  %v13447_v4 = vor.u32 %v19570_v59, %v13444_v60  ;;  %v19554_v22 = vld [vmem:[%s21995_s6 + $0x10c] sm:$0xf] }
 0x178   : > { %v13250_v33 = vld [vmem:[%s21995_s6 + $0x8] sm:$0xf]  ;;  %v14051_v40 = vor.u32 %v19726_v31, %v14050_v30  ;;  %v13380_v23 = vld [vmem:[%s21995_s6 + $0x128] sm:$0xf0] }
 0x179   : > { %2474 = vmatpush.bf16.msra.mxu3 %v14147_v62  ;;  %2449 = vmatpush.bf16.msra.mxu1 %v13603_v5  ;;  %v19526_v34 = vld [vmem:[%s21995_s6 + $0x24] sm:$0xf0]  ;;  %v14247_v62 = vor.u32 %v19770_v53, %v14244_v54  ;;  %v13703_v5 = vor.u32 %v19634_v61, %v13700_v63  ;;  %v19618_v24 = vld [vmem:[%s21995_s6 + $0x30c] sm:$0xf] }
 0x17a   : > { %v13506_v37 = vld [vmem:[%s21995_s6 + $0x208] sm:$0xf]  ;;  %v13251_v47 = vor.u32 %v19526_v34, %v13250_v33  ;;  %v13636_v27 = vld [vmem:[%s21995_s6 + $0x328] sm:$0xf0] }
 0x17b   : > { %2462 = vmatpush.bf16.msra.mxu2 %v13859_v6  ;;  %2437 = vmatpush.bf16.msra.mxu0 %v13315_v19  ;;  %v19590_v38 = vld [vmem:[%s21995_s6 + $0x224] sm:$0xf0]  ;;  %v13959_v6 = vor.u32 %v19698_v0, %v13956_v1  ;;  %v13415_v19 = vor.u32 %v19562_v7, %v13412_v10  ;;  %v19682_v28 = vld [vmem:[%s21995_s6 + $0x50c] sm:$0xf]  ;;  %v13639_v33 = vor.u32 %v19618_v24, %v13636_v27  ;;  %v13994_v24 = vld [vmem:[%s21995_s6 + $0x5d0] sm:$0xf] }
 0x17c   : > { %v13762_v39 = vld [vmem:[%s21995_s6 + $0x408] sm:$0xf]  ;;  %v13507_v51 = vor.u32 %v19590_v38, %v13506_v37  ;;  %v13892_v29 = vld [vmem:[%s21995_s6 + $0x528] sm:$0xf0] }
 0x17d   : > { %2475 = vmatpush.bf16.msra.mxu3 %v14115_v12  ;;  %2450 = vmatpush.bf16.msra.mxu1 %v13571_v20  ;;  %v19654_v41 = vld [vmem:[%s21995_s6 + $0x424] sm:$0xf0]  ;;  %v14215_v12 = vor.u32 %v19762_v2, %v14212_v3  ;;  %v13671_v20 = vor.u32 %v19626_v11, %v13668_v13  ;;  %v19746_v30 = vld [vmem:[%s21995_s6 + $0x70c] sm:$0xf]  ;;  %v13895_v34 = vor.u32 %v19682_v28, %v13892_v29  ;;  %v14250_v29 = vld [vmem:[%s21995_s6 + $0x7d0] sm:$0xf] }
 0x17e   : > { %v14018_v42 = vld [vmem:[%s21995_s6 + $0x608] sm:$0xf]  ;;  %v13763_v52 = vor.u32 %v19654_v41, %v13762_v39  ;;  %v14148_v31 = vld [vmem:[%s21995_s6 + $0x728] sm:$0xf0] }
 0x17f   : > { %2463 = vmatpush.bf16.msra.mxu2 %v13827_v21  ;;  %v19718_v43 = vld [vmem:[%s21995_s6 + $0x624] sm:$0xf0]  ;;  %2438 = vmatpush.bf16.msra.mxu0 %v13283_v32  ;;  %v13927_v21 = vor.u32 %v19690_v14, %v13924_v16  ;;  %v13383_v32 = vor.u32 %v19554_v22, %v13380_v23  ;;  %v19610_v37 = vld [vmem:[%s21995_s6 + $0x2cc] sm:$0xf]  ;;  %v14151_v38 = vor.u32 %v19746_v30, %v14148_v31  ;;  %v19647_v23 = vld [vmem:[%s21995_s6 + $0x3ec] sm:$0xf0] }
 0x180   : > { %v14019_v55 = vor.u32 %v19718_v43, %v14018_v42  ;;  %v13604_v39 = vld [vmem:[%s21995_s6 + $0x2e8] sm:$0xf0]  ;;  %v19775_v30 = vld [vmem:[%s21995_s6 + $0x7ec] sm:$0xf0] }
 0x181   : > { %2476 = vmatpush.bf16.msra.mxu3 %v14083_v26  ;;  %2451 = vmatpush.bf16.msra.mxu1 %v13539_v35  ;;  %v14183_v26 = vor.u32 %v19754_v17, %v14180_v18  ;;  %v19546_v35 = vld [vmem:[%s21995_s6 + $0xcc] sm:$0xf]  ;;  %v13607_v45 = vor.u32 %v19610_v37, %v13604_v39  ;;  %v13706_v37 = vld [vmem:[%s21995_s6 + $0x390] sm:$0xf] }
 0x182   : > { %v13860_v41 = vld [vmem:[%s21995_s6 + $0x4e8] sm:$0xf0]  ;;  %v19639_v39 = vld [vmem:[%s21995_s6 + $0x3ac] sm:$0xf0] }
 0x183   : > { %2464 = vmatpush.bf16.msra.mxu2 %v13795_v36  ;;  %2439 = vmatpush.bf16.msra.mxu0 %v13251_v47  ;;  %v13348_v36 = vld [vmem:[%s21995_s6 + $0xe8] sm:$0xf0] }
 0x184   : > { %v19738_v42 = vld [vmem:[%s21995_s6 + $0x6cc] sm:$0xf]  ;;  %v13351_v44 = vor.u32 %v19546_v35, %v13348_v36  ;;  %v13450_v35 = vld [vmem:[%s21995_s6 + $0x190] sm:$0xf] }
 0x185   : > { %2477 = vmatpush.bf16.msra.mxu3 %v14051_v40  ;;  %2452 = vmatpush.bf16.msra.mxu1 %v13507_v51  ;;  %v19674_v40 = vld [vmem:[%s21995_s6 + $0x4cc] sm:$0xf]  ;;  %v19575_v36 = vld [vmem:[%s21995_s6 + $0x1ac] sm:$0xf0] }
 0x186   : > { %2440 = vmatmul.bf16.vlgmr.msra.gmra.mxu0 %v22137_v9  ;;  %v14116_v43 = vld [vmem:[%s21995_s6 + $0x6e8] sm:$0xf0]  ;;  %v13863_v46 = vor.u32 %v19674_v40, %v13860_v41  ;;  %v13962_v40 = vld [vmem:[%s21995_s6 + $0x590] sm:$0xf] }
 0x187   : > { %2465 = vmatpush.bf16.msra.mxu2 %v13763_v52  ;;  %2484 = vmatpush.bf16.msrb.mxu0 %v13479_v56  ;;  %v19538_v47 = vld [vmem:[%s21995_s6 + $0x8c] sm:$0xf]  ;;  %v14119_v50 = vor.u32 %v19738_v42, %v14116_v43  ;;  %v19703_v41 = vld [vmem:[%s21995_s6 + $0x5ac] sm:$0xf0] }
 0x188   : > { %2453 = vmatmul.bf16.vlgmr.msra.gmra.mxu1 %v22152_v25  ;;  %v13316_v48 = vld [vmem:[%s21995_s6 + $0xa8] sm:$0xf0]  ;;  %v14218_v42 = vld [vmem:[%s21995_s6 + $0x790] sm:$0xf] }
 0x189   : > { %2478 = vmatpush.bf16.msra.mxu3 %v14019_v55  ;;  %2497 = vmatpush.bf16.msrb.mxu1 %v13735_v57  ;;  %v19602_v49 = vld [vmem:[%s21995_s6 + $0x28c] sm:$0xf]  ;;  %v13319_v56 = vor.u32 %v19538_v47, %v13316_v48  ;;  %v19767_v43 = vld [vmem:[%s21995_s6 + $0x7ac] sm:$0xf0] }
 0x18a   : > { %2466 = vmatmul.bf16.vlgmr.msra.gmra.mxu2 %v22135_v8  ;;  %v13572_v51 = vld [vmem:[%s21995_s6 + $0x2a8] sm:$0xf0]  ;;  %v13418_v47 = vld [vmem:[%s21995_s6 + $0x150] sm:$0xf] }
 0x18b   : > { %2510 = vmatpush.bf16.msrb.mxu2 %v13991_v58  ;;  %2485 = vmatpush.bf16.msrb.mxu0 %v13447_v4  ;;  %v19666_v52 = vld [vmem:[%s21995_s6 + $0x48c] sm:$0xf]  ;;  %v13575_v57 = vor.u32 %v19602_v49, %v13572_v51  ;;  %v19567_v48 = vld [vmem:[%s21995_s6 + $0x16c] sm:$0xf0] }
 0x18c   : > { %2479 = vmatmul.bf16.vlgmr.msra.gmra.mxu3 %v22142_v15  ;;  %v13828_v53 = vld [vmem:[%s21995_s6 + $0x4a8] sm:$0xf0]  ;;  %v13674_v49 = vld [vmem:[%s21995_s6 + $0x350] sm:$0xf] }
 0x18d   : > { %2523 = vmatpush.bf16.msrb.mxu3 %v14247_v62  ;;  %2498 = vmatpush.bf16.msrb.mxu1 %v13703_v5  ;;  %v19730_v54 = vld [vmem:[%s21995_s6 + $0x68c] sm:$0xf]  ;;  %v13831_v58 = vor.u32 %v19666_v52, %v13828_v53  ;;  %v19631_v51 = vld [vmem:[%s21995_s6 + $0x36c] sm:$0xf0] }
 0x18e   : > { %v14084_v55 = vld [vmem:[%s21995_s6 + $0x6a8] sm:$0xf0]  ;;  %v13930_v52 = vld [vmem:[%s21995_s6 + $0x550] sm:$0xf] }
 0x18f   : > { %2511 = vmatpush.bf16.msrb.mxu2 %v13959_v6  ;;  %2486 = vmatpush.bf16.msrb.mxu0 %v13415_v19  ;;  %v19530_v59 = vld [vmem:[%s21995_s6 + $0x4c] sm:$0xf]  ;;  %v14087_v62 = vor.u32 %v19730_v54, %v14084_v55  ;;  %v13482_v19 = vld [vmem:[%s21995_s6 + $0x1d0] sm:$0xf] }
 0x190   : > { %v13284_v60 = vld [vmem:[%s21995_s6 + $0x68] sm:$0xf0]  ;;  %v19695_v53 = vld [vmem:[%s21995_s6 + $0x56c] sm:$0xf0] }
 0x191   : > { %2524 = vmatpush.bf16.msrb.mxu3 %v14215_v12  ;;  %2499 = vmatpush.bf16.msrb.mxu1 %v13671_v20  ;;  %v19594_v61 = vld [vmem:[%s21995_s6 + $0x24c] sm:$0xf]  ;;  %v13287_v4 = vor.u32 %v19530_v59, %v13284_v60  ;;  %v19583_v20 = vld [vmem:[%s21995_s6 + $0x1ec] sm:$0xf0] }
 0x192   : > { %v13540_v63 = vld [vmem:[%s21995_s6 + $0x268] sm:$0xf0]  ;;  %v14186_v54 = vld [vmem:[%s21995_s6 + $0x750] sm:$0xf] }
 0x193   : > { %2512 = vmatpush.bf16.msrb.mxu2 %v13927_v21  ;;  %2487 = vmatpush.bf16.msrb.mxu0 %v13383_v32  ;;  %v19658_v0 = vld [vmem:[%s21995_s6 + $0x44c] sm:$0xf]  ;;  %v13543_v7 = vor.u32 %v19594_v61, %v13540_v63  ;;  %v13738_v21 = vld [vmem:[%s21995_s6 + $0x3d0] sm:$0xf]  ;;  %v13483_v32 = vor.u32 %v19583_v20, %v13482_v19 }
 0x194   : > { %v13796_v1 = vld [vmem:[%s21995_s6 + $0x468] sm:$0xf0]  ;;  %v19759_v55 = vld [vmem:[%s21995_s6 + $0x76c] sm:$0xf0] }
 0x195   : > { %2525 = vmatpush.bf16.msrb.mxu3 %v14183_v26  ;;  %2500 = vmatpush.bf16.msrb.mxu1 %v13639_v33  ;;  %v19722_v2 = vld [vmem:[%s21995_s6 + $0x64c] sm:$0xf]  ;;  %v13799_v10 = vor.u32 %v19658_v0, %v13796_v1  ;;  %v19711_v26 = vld [vmem:[%s21995_s6 + $0x5ec] sm:$0xf0]  ;;  %v13739_v33 = vor.u32 %v19647_v23, %v13738_v21 }
 0x196   : > { %v14052_v3 = vld [vmem:[%s21995_s6 + $0x668] sm:$0xf0]  ;;  %v13386_v59 = vld [vmem:[%s21995_s6 + $0x110] sm:$0xf] }
 0x197   : > { %2513 = vmatpush.bf16.msrb.mxu2 %v13895_v34  ;;  %2488 = vmatpush.bf16.msrb.mxu0 %v13351_v44  ;;  %v19522_v5 = vld [vmem:[%s21995_s6 + $0xc] sm:$0xf]  ;;  %v14055_v14 = vor.u32 %v19722_v2, %v14052_v3  ;;  %v13995_v34 = vor.u32 %v19711_v26, %v13994_v24  ;;  %v13451_v44 = vor.u32 %v19575_v36, %v13450_v35  ;;  %v19559_v60 = vld [vmem:[%s21995_s6 + $0x12c] sm:$0xf0] }
 0x198   : > { %v13252_v6 = vld [vmem:[%s21995_s6 + $0x28] sm:$0xf0]  ;;  %v13642_v61 = vld [vmem:[%s21995_s6 + $0x310] sm:$0xf] }
 0x199   : > { %2526 = vmatpush.bf16.msrb.mxu3 %v14151_v38  ;;  %2501 = vmatpush.bf16.msrb.mxu1 %v13607_v45  ;;  %v19586_v11 = vld [vmem:[%s21995_s6 + $0x20c] sm:$0xf]  ;;  %v13255_v22 = vor.u32 %v19522_v5, %v13252_v6  ;;  %v14251_v38 = vor.u32 %v19775_v30, %v14250_v29  ;;  %v13707_v45 = vor.u32 %v19639_v39, %v13706_v37  ;;  %v19623_v63 = vld [vmem:[%s21995_s6 + $0x32c] sm:$0xf0] }
 0x19a   : > { %v13508_v12 = vld [vmem:[%s21995_s6 + $0x228] sm:$0xf0]  ;;  %v13898_v0 = vld [vmem:[%s21995_s6 + $0x510] sm:$0xf]  ;;  %v13643_v5 = vor.u32 %v19623_v63, %v13642_v61  ;;  %v19707_v61 = vld [vmem:[%s21995_s6 + $0x5d4] sm:$0xf] }
 0x19b   : > { %2514 = vmatpush.bf16.msrb.mxu2 %v13863_v46  ;;  %2489 = vmatpush.bf16.msrb.mxu0 %v13319_v56  ;;  %v19650_v13 = vld [vmem:[%s21995_s6 + $0x40c] sm:$0xf]  ;;  %v13511_v27 = vor.u32 %v19586_v11, %v13508_v12  ;;  %v13963_v46 = vor.u32 %v19703_v41, %v13962_v40  ;;  %v13419_v56 = vor.u32 %v19567_v48, %v13418_v47  ;;  %v19687_v1 = vld [vmem:[%s21995_s6 + $0x52c] sm:$0xf0] }
 0x19c   : > { %v13764_v16 = vld [vmem:[%s21995_s6 + $0x428] sm:$0xf0]  ;;  %v14154_v2 = vld [vmem:[%s21995_s6 + $0x710] sm:$0xf]  ;;  %v13899_v6 = vor.u32 %v19687_v1, %v13898_v0  ;;  %v19771_v1 = vld [vmem:[%s21995_s6 + $0x7d4] sm:$0xf] }
 0x19d   : > { %2527 = vmatpush.bf16.msrb.mxu3 %v14119_v50  ;;  %2502 = vmatpush.bf16.msrb.mxu1 %v13575_v57  ;;  %v19714_v17 = vld [vmem:[%s21995_s6 + $0x60c] sm:$0xf]  ;;  %v13767_v28 = vor.u32 %v19650_v13, %v13764_v16  ;;  %v14219_v50 = vor.u32 %v19767_v43, %v14218_v42  ;;  %v13675_v57 = vor.u32 %v19631_v51, %v13674_v49  ;;  %v19751_v3 = vld [vmem:[%s21995_s6 + $0x72c] sm:$0xf0] }
 0x19e   : > { %v14020_v18 = vld [vmem:[%s21995_s6 + $0x628] sm:$0xf0]  ;;  %v13610_v11 = vld [vmem:[%s21995_s6 + $0x2d0] sm:$0xf]  ;;  %v14155_v12 = vor.u32 %v19751_v3, %v14154_v2  ;;  %v14252_v2 = vld [vmem:[%s21995_s6 + $0x7f0] sm:$0xf0] }
 0x19f   : > { %2515 = vmatpush.bf16.msrb.mxu2 %v13831_v58  ;;  %2490 = vmatpush.bf16.msrb.mxu0 %v13287_v4  ;;  %v14023_v31 = vor.u32 %v19714_v17, %v14020_v18  ;;  %v13931_v58 = vor.u32 %v19695_v53, %v13930_v52  ;;  %v13387_v4 = vor.u32 %v19559_v60, %v13386_v59  ;;  %v19615_v13 = vld [vmem:[%s21995_s6 + $0x2ec] sm:$0xf0]  ;;  %v13740_v60 = vld [vmem:[%s21995_s6 + $0x3f0] sm:$0xf0] }
 0x1a0   : > { %v19679_v16 = vld [vmem:[%s21995_s6 + $0x4ec] sm:$0xf0]  ;;  %v13611_v20 = vor.u32 %v19615_v13, %v13610_v11  ;;  %v19635_v11 = vld [vmem:[%s21995_s6 + $0x394] sm:$0xf] }
 0x1a1   : > { %2528 = vmatpush.bf16.msrb.mxu3 %v14087_v62  ;;  %2503 = vmatpush.bf16.msrb.mxu1 %v13543_v7  ;;  %v14187_v62 = vor.u32 %v19759_v55, %v14186_v54  ;;  %v13354_v7 = vld [vmem:[%s21995_s6 + $0xd0] sm:$0xf]  ;;  %v13708_v13 = vld [vmem:[%s21995_s6 + $0x3b0] sm:$0xf0] }
 0x1a2   : > { %v14122_v17 = vld [vmem:[%s21995_s6 + $0x6d0] sm:$0xf] }
 0x1a3   : > { %2516 = vmatpush.bf16.msrb.mxu2 %v13799_v10  ;;  %2491 = vmatpush.bf16.msrb.mxu0 %v13255_v22  ;;  %v19551_v10 = vld [vmem:[%s21995_s6 + $0xec] sm:$0xf0] }
 0x1a4   : > { %v19743_v18 = vld [vmem:[%s21995_s6 + $0x6ec] sm:$0xf0]  ;;  %v13355_v19 = vor.u32 %v19551_v10, %v13354_v7  ;;  %v19571_v7 = vld [vmem:[%s21995_s6 + $0x194] sm:$0xf] }
 0x1a5   : > { %2529 = vmatpush.bf16.msrb.mxu3 %v14055_v14  ;;  %2504 = vmatpush.bf16.msrb.mxu1 %v13511_v27  ;;  %v13866_v14 = vld [vmem:[%s21995_s6 + $0x4d0] sm:$0xf]  ;;  %v14123_v26 = vor.u32 %v19743_v18, %v14122_v17  ;;  %v13452_v10 = vld [vmem:[%s21995_s6 + $0x1b0] sm:$0xf0] }
 0x1a6   : > { %2492 = vmatmul.bf16.vlgmr.msrb.gmra.mxu0 %v22137_v9  ;;  %v13867_v21 = vor.u32 %v19679_v16, %v13866_v14  ;;  %v13322_v22 = vld [vmem:[%s21995_s6 + $0x90] sm:$0xf]  ;;  %v19699_v14 = vld [vmem:[%s21995_s6 + $0x594] sm:$0xf] }
 0x1a7   : > { %2517 = vmatpush.bf16.msrb.mxu2 %v13767_v28  ;;  %2536 = vmatpush.bf16.msra.mxu0 %v13483_v32  ;;  %v19543_v23 = vld [vmem:[%s21995_s6 + $0xac] sm:$0xf0]  ;;  %v13964_v16 = vld [vmem:[%s21995_s6 + $0x5b0] sm:$0xf0] }
 0x1a8   : > { %2505 = vmatmul.bf16.vlgmr.msrb.gmra.mxu1 %v22152_v25  ;;  %v13578_v24 = vld [vmem:[%s21995_s6 + $0x290] sm:$0xf]  ;;  %v13323_v32 = vor.u32 %v19543_v23, %v13322_v22  ;;  %v19763_v17 = vld [vmem:[%s21995_s6 + $0x794] sm:$0xf] }
 0x1a9   : > { %2530 = vmatpush.bf16.msrb.mxu3 %v14023_v31  ;;  %2549 = vmatpush.bf16.msra.mxu1 %v13739_v33  ;;  %v19607_v27 = vld [vmem:[%s21995_s6 + $0x2ac] sm:$0xf0]  ;;  %v14220_v18 = vld [vmem:[%s21995_s6 + $0x7b0] sm:$0xf0] }
 0x1aa   : > { %2518 = vmatmul.bf16.vlgmr.msrb.gmra.mxu2 %v22135_v8  ;;  %v13834_v28 = vld [vmem:[%s21995_s6 + $0x490] sm:$0xf]  ;;  %v13579_v33 = vor.u32 %v19607_v27, %v13578_v24  ;;  %v19563_v22 = vld [vmem:[%s21995_s6 + $0x154] sm:$0xf] }
 0x1ab   : > { %2562 = vmatpush.bf16.msra.mxu2 %v13995_v34  ;;  %2537 = vmatpush.bf16.msra.mxu0 %v13451_v44  ;;  %v19671_v29 = vld [vmem:[%s21995_s6 + $0x4ac] sm:$0xf0]  ;;  %v13420_v23 = vld [vmem:[%s21995_s6 + $0x170] sm:$0xf0] }
 0x1ac   : > { %2531 = vmatmul.bf16.vlgmr.msrb.gmra.mxu3 %v22142_v15  ;;  %v14090_v30 = vld [vmem:[%s21995_s6 + $0x690] sm:$0xf]  ;;  %v13835_v34 = vor.u32 %v19671_v29, %v13834_v28  ;;  %v19627_v24 = vld [vmem:[%s21995_s6 + $0x354] sm:$0xf] }
 0x1ad   : > { %2575 = vmatpush.bf16.msra.mxu3 %v14251_v38  ;;  %2550 = vmatpush.bf16.msra.mxu1 %v13707_v45  ;;  %v19735_v31 = vld [vmem:[%s21995_s6 + $0x6ac] sm:$0xf0]  ;;  %v13676_v27 = vld [vmem:[%s21995_s6 + $0x370] sm:$0xf0] }
 0x1ae   : > { %v13290_v35 = vld [vmem:[%s21995_s6 + $0x50] sm:$0xf]  ;;  %v14091_v38 = vor.u32 %v19735_v31, %v14090_v30  ;;  %v19691_v28 = vld [vmem:[%s21995_s6 + $0x554] sm:$0xf] }
 0x1af   : > { %2563 = vmatpush.bf16.msra.mxu2 %v13963_v46  ;;  %2538 = vmatpush.bf16.msra.mxu0 %v13419_v56  ;;  %v19535_v36 = vld [vmem:[%s21995_s6 + $0x6c] sm:$0xf0]  ;;  %v19579_v56 = vld [vmem:[%s21995_s6 + $0x1d4] sm:$0xf] }
 0x1b0   : > { %v13546_v37 = vld [vmem:[%s21995_s6 + $0x250] sm:$0xf]  ;;  %v13291_v44 = vor.u32 %v19535_v36, %v13290_v35  ;;  %v13932_v29 = vld [vmem:[%s21995_s6 + $0x570] sm:$0xf0] }
 0x1b1   : > { %2576 = vmatpush.bf16.msra.mxu3 %v14219_v50  ;;  %2551 = vmatpush.bf16.msra.mxu1 %v13675_v57  ;;  %v19599_v39 = vld [vmem:[%s21995_s6 + $0x26c] sm:$0xf0]  ;;  %v13484_v57 = vld [vmem:[%s21995_s6 + $0x1f0] sm:$0xf0]  ;;  %v13935_v35 = vor.u32 %v19691_v28, %v13932_v29 }
 0x1b2   : > { %v13802_v40 = vld [vmem:[%s21995_s6 + $0x450] sm:$0xf]  ;;  %v13547_v47 = vor.u32 %v19599_v39, %v13546_v37  ;;  %v19755_v30 = vld [vmem:[%s21995_s6 + $0x754] sm:$0xf] }
 0x1b3   : > { %2564 = vmatpush.bf16.msra.mxu2 %v13931_v58  ;;  %2539 = vmatpush.bf16.msra.mxu0 %v13387_v4  ;;  %v19663_v41 = vld [vmem:[%s21995_s6 + $0x46c] sm:$0xf0]  ;;  %v19643_v58 = vld [vmem:[%s21995_s6 + $0x3d4] sm:$0xf]  ;;  %v13487_v4 = vor.u32 %v19579_v56, %v13484_v57 }
 0x1b4   : > { %v14058_v42 = vld [vmem:[%s21995_s6 + $0x650] sm:$0xf]  ;;  %v13803_v48 = vor.u32 %v19663_v41, %v13802_v40  ;;  %v14188_v31 = vld [vmem:[%s21995_s6 + $0x770] sm:$0xf0] }
 0x1b5   : > { %2577 = vmatpush.bf16.msra.mxu3 %v14187_v62  ;;  %2552 = vmatpush.bf16.msra.mxu1 %v13643_v5  ;;  %v19727_v43 = vld [vmem:[%s21995_s6 + $0x66c] sm:$0xf0]  ;;  %v13996_v62 = vld [vmem:[%s21995_s6 + $0x5f0] sm:$0xf0]  ;;  %v13743_v5 = vor.u32 %v19643_v58, %v13740_v60  ;;  %v14191_v39 = vor.u32 %v19755_v30, %v14188_v31 }
 0x1b6   : > { %v13258_v45 = vld [vmem:[%s21995_s6 + $0x10] sm:$0xf]  ;;  %v14059_v52 = vor.u32 %v19727_v43, %v14058_v42  ;;  %v13388_v36 = vld [vmem:[%s21995_s6 + $0x130] sm:$0xf0]  ;;  %v22424_v42 = vld [vmem:[%s603_s5] sm:$0xff] }
 0x1b7   : > { %2565 = vmatpush.bf16.msra.mxu2 %v13899_v6  ;;  %2540 = vmatpush.bf16.msra.mxu0 %v13355_v19  ;;  %v19527_v46 = vld [vmem:[%s21995_s6 + $0x2c] sm:$0xf0]  ;;  %v13999_v6 = vor.u32 %v19707_v61, %v13996_v62  ;;  %v13455_v19 = vor.u32 %v19571_v7, %v13452_v10  ;;  %v19619_v37 = vld [vmem:[%s21995_s6 + $0x314] sm:$0xf] }
 0x1b8   : > { %v13514_v49 = vld [vmem:[%s21995_s6 + $0x210] sm:$0xf]  ;;  %v13259_v59 = vor.u32 %v19527_v46, %v13258_v45  ;;  %v19683_v40 = vld [vmem:[%s21995_s6 + $0x514] sm:$0xf] }
 0x1b9   : > { %2578 = vmatpush.bf16.msra.mxu3 %v14155_v12  ;;  %2553 = vmatpush.bf16.msra.mxu1 %v13611_v20  ;;  %v19591_v50 = vld [vmem:[%s21995_s6 + $0x22c] sm:$0xf0]  ;;  %v14255_v12 = vor.u32 %v19771_v1, %v14252_v2  ;;  %v13711_v20 = vor.u32 %v19635_v11, %v13708_v13  ;;  %v13900_v41 = vld [vmem:[%s21995_s6 + $0x530] sm:$0xf0] }
 0x1ba   : > { %v13770_v51 = vld [vmem:[%s21995_s6 + $0x410] sm:$0xf]  ;;  %v13515_v63 = vor.u32 %v19591_v50, %v13514_v49  ;;  %v19747_v43 = vld [vmem:[%s21995_s6 + $0x714] sm:$0xf] }
 0x1bb   : > { %2566 = vmatpush.bf16.msra.mxu2 %v13867_v21  ;;  %2541 = vmatpush.bf16.msra.mxu0 %v13323_v32  ;;  %v19655_v53 = vld [vmem:[%s21995_s6 + $0x42c] sm:$0xf0]  ;;  %v13967_v21 = vor.u32 %v19699_v14, %v13964_v16  ;;  %v13423_v32 = vor.u32 %v19563_v22, %v13420_v23  ;;  %v19547_v46 = vld [vmem:[%s21995_s6 + $0xd4] sm:$0xf] }
 0x1bc   : > { %v14026_v54 = vld [vmem:[%s21995_s6 + $0x610] sm:$0xf]  ;;  %v13771_v0 = vor.u32 %v19655_v53, %v13770_v51  ;;  %v13356_v49 = vld [vmem:[%s21995_s6 + $0xf0] sm:$0xf0]  ;;  %v1032_v51 = vperm.slane %v22424_v42, 0 }
 0x1bd   : > { %2579 = vmatpush.bf16.msra.mxu3 %v14123_v26  ;;  %2554 = vmatpush.bf16.msra.mxu1 %v13579_v33  ;;  %v19719_v55 = vld [vmem:[%s21995_s6 + $0x62c] sm:$0xf0]  ;;  %v14223_v26 = vor.u32 %v19763_v17, %v14220_v18  ;;  %v19555_v33 = vld [vmem:[%s21995_s6 + $0x114] sm:$0xf]  ;;  %v13359_v58 = vor.u32 %v19547_v46, %v13356_v49  ;;  %v13746_v46 = vld [vmem:[%s21995_s6 + $0x3d8] sm:$0xf] }
 0x1be   : > { %v14027_v3 = vor.u32 %v19719_v55, %v14026_v54  ;;  %v13391_v45 = vor.u32 %v19555_v33, %v13388_v36  ;;  %v19611_v50 = vld [vmem:[%s21995_s6 + $0x2d4] sm:$0xf]  ;;  %v14002_v49 = vld [vmem:[%s21995_s6 + $0x5d8] sm:$0xf] }
 0x1bf   : > { %2567 = vmatpush.bf16.msra.mxu2 %v13835_v34  ;;  %2542 = vmatpush.bf16.msra.mxu0 %v13291_v44  ;;  %v13679_v34 = vor.u32 %v19627_v24, %v13676_v27  ;;  %v14156_v44 = vld [vmem:[%s21995_s6 + $0x730] sm:$0xf0] }
 0x1c0   : > { %v13612_v53 = vld [vmem:[%s21995_s6 + $0x2f0] sm:$0xf0] }
 0x1c1   : > { %2580 = vmatpush.bf16.msra.mxu3 %v14091_v38  ;;  %2555 = vmatpush.bf16.msra.mxu1 %v13547_v47  ;;  %v13644_v38 = vld [vmem:[%s21995_s6 + $0x330] sm:$0xf0]  ;;  %v13615_v60 = vor.u32 %v19611_v50, %v13612_v53  ;;  %v19712_v50 = vld [vmem:[%s21995_s6 + $0x5f4] sm:$0xf0] }
 0x1c2   : > { %v13647_v47 = vor.u32 %v19619_v37, %v13644_v38  ;;  %v19675_v54 = vld [vmem:[%s21995_s6 + $0x4d4] sm:$0xf] }
 0x1c3   : > { %2568 = vmatpush.bf16.msra.mxu2 %v13803_v48  ;;  %2543 = vmatpush.bf16.msra.mxu0 %v13259_v59  ;;  %v13903_v48 = vor.u32 %v19683_v40, %v13900_v41  ;;  %v13868_v55 = vld [vmem:[%s21995_s6 + $0x4f0] sm:$0xf0] }
 0x1c4   : > { %v19739_v56 = vld [vmem:[%s21995_s6 + $0x6d4] sm:$0xf]  ;;  %v13871_v61 = vor.u32 %v19675_v54, %v13868_v55  ;;  %v14258_v54 = vld [vmem:[%s21995_s6 + $0x7d8] sm:$0xf] }
 0x1c5   : > { %2581 = vmatpush.bf16.msra.mxu3 %v14059_v52  ;;  %2556 = vmatpush.bf16.msra.mxu1 %v13515_v63  ;;  %v14159_v52 = vor.u32 %v19747_v43, %v14156_v44  ;;  %v14124_v57 = vld [vmem:[%s21995_s6 + $0x6f0] sm:$0xf0]  ;;  %v2350_v11 = vpop.f32.mrf.mxu1  ;;  %v13490_v44 = vld [vmem:[%s21995_s6 + $0x1d8] sm:$0xf] }
 0x1c6   : > { %2544 = vmatmul.bf16.vlgmr.msra.gmra.mxu0 %v22137_v9  ;;  %v19539_v62 = vld [vmem:[%s21995_s6 + $0x94] sm:$0xf]  ;;  %v14127_v2 = vor.u32 %v19739_v56, %v14124_v57  ;;  %v19776_v55 = vld [vmem:[%s21995_s6 + $0x7f4] sm:$0xf0] }
 0x1c7   : > { %2569 = vmatpush.bf16.msra.mxu2 %v13771_v0  ;;  %2588 = vmatpush.bf16.msrb.mxu0 %v13487_v4  ;;  %v2337_v59 = vpop.f32.mrf.mxu0  ;;  %v13324_v63 = vld [vmem:[%s21995_s6 + $0xb0] sm:$0xf0] }
 0x1c8   : > { %2557 = vmatmul.bf16.vlgmr.msra.gmra.mxu1 %v22152_v25  ;;  %v19603_v0 = vld [vmem:[%s21995_s6 + $0x294] sm:$0xf]  ;;  %v2338_v1 = vadd.f32 %v2337_v59, %v1032_v51  ;;  %v13327_v10 = vor.u32 %v19539_v62, %v13324_v63  ;;  %v19576_v62 = vld [vmem:[%s21995_s6 + $0x1b4] sm:$0xf0] }
 0x1c9   : > { %2582 = vmatpush.bf16.msra.mxu3 %v14027_v3  ;;  %2601 = vmatpush.bf16.msrb.mxu1 %v13743_v5  ;;  %v13580_v3 = vld [vmem:[%s21995_s6 + $0x2b0] sm:$0xf0]  ;;  %v13714_v63 = vld [vmem:[%s21995_s6 + $0x398] sm:$0xf] }
 0x1ca   : > { %2570 = vmatmul.bf16.vlgmr.msra.gmra.mxu2 %v22135_v8  ;;  %v19667_v4 = vld [vmem:[%s21995_s6 + $0x494] sm:$0xf]  ;;  %v2351_v18 = vadd.f32 %v2350_v11, %v2338_v1  ;;  %v14259_v1 = vor.u32 %v19776_v55, %v14258_v54 }
 0x1cb   : > { %2614 = vmatpush.bf16.msrb.mxu2 %v13999_v6  ;;  %2589 = vmatpush.bf16.msrb.mxu0 %v13455_v19  ;;  %v13836_v5 = vld [vmem:[%s21995_s6 + $0x4b0] sm:$0xf0] }
 0x1cc   : > { %2583 = vmatmul.bf16.vlgmr.msra.gmra.mxu3 %v22142_v15  ;;  %v19731_v6 = vld [vmem:[%s21995_s6 + $0x694] sm:$0xf]  ;;  %v13839_v13 = vor.u32 %v19667_v4, %v13836_v5  ;;  %v19704_v4 = vld [vmem:[%s21995_s6 + $0x5b4] sm:$0xf0] }
 0x1cd   : > { %2627 = vmatpush.bf16.msrb.mxu3 %v14255_v12  ;;  %2602 = vmatpush.bf16.msrb.mxu1 %v13711_v20  ;;  %v14092_v7 = vld [vmem:[%s21995_s6 + $0x6b0] sm:$0xf0]  ;;  %v13583_v12 = vor.u32 %v19603_v0, %v13580_v3  ;;  %v2363_v23 = vpop.f32.mrf.mxu2  ;;  %v2352_v51 = vpop.f32.mrf.mxu1  ;;  %v13970_v3 = vld [vmem:[%s21995_s6 + $0x598] sm:$0xf] }
 0x1ce   : > { %v19531_v14 = vld [vmem:[%s21995_s6 + $0x54] sm:$0xf]  ;;  %v14095_v19 = vor.u32 %v19731_v6, %v14092_v7  ;;  %v2364_v27 = vadd.f32 %v2363_v23, %v2351_v18  ;;  %v14226_v5 = vld [vmem:[%s21995_s6 + $0x798] sm:$0xf]  ;;  %v13971_v11 = vor.u32 %v19704_v4, %v13970_v3 }
 0x1cf   : > { %2615 = vmatpush.bf16.msrb.mxu2 %v13967_v21  ;;  %2590 = vmatpush.bf16.msrb.mxu0 %v13423_v32  ;;  %v13292_v16 = vld [vmem:[%s21995_s6 + $0x70] sm:$0xf0]  ;;  %v2376_v28 = vpop.f32.mrf.mxu3  ;;  %v2339_v32 = vpop.f32.mrf.mxu0  ;;  %v19768_v6 = vld [vmem:[%s21995_s6 + $0x7b4] sm:$0xf0] }
 0x1d0   : > { %v19595_v17 = vld [vmem:[%s21995_s6 + $0x254] sm:$0xf]  ;;  %v13295_v29 = vor.u32 %v19531_v14, %v13292_v16  ;;  %v22458_v38 = vadd.f32 %v2376_v28, %v2364_v27  ;;  %v13682_v14 = vld [vmem:[%s21995_s6 + $0x358] sm:$0xf]  ;;  %v14227_v16 = vor.u32 %v19768_v6, %v14226_v5 }
 0x1d1   : > { %2628 = vmatpush.bf16.msrb.mxu3 %v14223_v26  ;;  %2603 = vmatpush.bf16.msrb.mxu1 %v13679_v34  ;;  %v13548_v20 = vld [vmem:[%s21995_s6 + $0x270] sm:$0xf0]  ;;  %v13938_v18 = vld [vmem:[%s21995_s6 + $0x558] sm:$0xf] }
 0x1d2   : > { %v19659_v21 = vld [vmem:[%s21995_s6 + $0x454] sm:$0xf]  ;;  %v13551_v33 = vor.u32 %v19595_v17, %v13548_v20  ;;  %v19632_v17 = vld [vmem:[%s21995_s6 + $0x374] sm:$0xf0] }
 0x1d3   : > { %2616 = vmatpush.bf16.msrb.mxu2 %v13935_v35  ;;  %2591 = vmatpush.bf16.msrb.mxu0 %v13391_v45  ;;  %v13804_v22 = vld [vmem:[%s21995_s6 + $0x470] sm:$0xf0]  ;;  %v19584_v45 = vld [vmem:[%s21995_s6 + $0x1f4] sm:$0xf0] }
 0x1d4   : > { %v19723_v24 = vld [vmem:[%s21995_s6 + $0x654] sm:$0xf]  ;;  %v13807_v34 = vor.u32 %v19659_v21, %v13804_v22  ;;  %v13491_v57 = vor.u32 %v19584_v45, %v13490_v44  ;;  %v14194_v20 = vld [vmem:[%s21995_s6 + $0x758] sm:$0xf] }
 0x1d5   : > { %2629 = vmatpush.bf16.msrb.mxu3 %v14191_v39  ;;  %2604 = vmatpush.bf16.msrb.mxu1 %v13647_v47  ;;  %v14060_v26 = vld [vmem:[%s21995_s6 + $0x670] sm:$0xf0]  ;;  %v19760_v21 = vld [vmem:[%s21995_s6 + $0x774] sm:$0xf0] }
 0x1d6   : > { %v19523_v30 = vld [vmem:[%s21995_s6 + $0x14] sm:$0xf]  ;;  %v14063_v39 = vor.u32 %v19723_v24, %v14060_v26  ;;  %v13394_v23 = vld [vmem:[%s21995_s6 + $0x118] sm:$0xf]  ;;  %v13683_v24 = vor.u32 %v19632_v17, %v13682_v14 }
 0x1d7   : > { %2617 = vmatpush.bf16.msrb.mxu2 %v13903_v48  ;;  %2592 = vmatpush.bf16.msrb.mxu0 %v13359_v58  ;;  %v13260_v31 = vld [vmem:[%s21995_s6 + $0x30] sm:$0xf0]  ;;  %v19648_v48 = vld [vmem:[%s21995_s6 + $0x3f4] sm:$0xf0]  ;;  %v2365_v58 = vpop.f32.mrf.mxu2  ;;  %v2378_v0 = vpop.f32.mrf.mxu3 }
 0x1d8   : > { %v19587_v35 = vld [vmem:[%s21995_s6 + $0x214] sm:$0xf]  ;;  %v13263_v47 = vor.u32 %v19523_v30, %v13260_v31  ;;  %v13747_v59 = vor.u32 %v19648_v48, %v13746_v46  ;;  %v19560_v27 = vld [vmem:[%s21995_s6 + $0x134] sm:$0xf0]  ;;  %v14195_v30 = vor.u32 %v19760_v21, %v14194_v20 }
 0x1d9   : > { %2630 = vmatpush.bf16.msrb.mxu3 %v14159_v52  ;;  %2605 = vmatpush.bf16.msrb.mxu1 %v13615_v60  ;;  %v13516_v36 = vld [vmem:[%s21995_s6 + $0x230] sm:$0xf0]  ;;  %v14003_v60 = vor.u32 %v19712_v50, %v14002_v49  ;;  %v13650_v28 = vld [vmem:[%s21995_s6 + $0x318] sm:$0xf] }
 0x1da   : > { %v19651_v37 = vld [vmem:[%s21995_s6 + $0x414] sm:$0xf]  ;;  %v13519_v52 = vor.u32 %v19587_v35, %v13516_v36  ;;  %v19624_v31 = vld [vmem:[%s21995_s6 + $0x334] sm:$0xf0]  ;;  %v13395_v36 = vor.u32 %v19560_v27, %v13394_v23 }
 0x1db   : > { %2618 = vmatpush.bf16.msrb.mxu2 %v13871_v61  ;;  %2593 = vmatpush.bf16.msrb.mxu0 %v13327_v10  ;;  %v13772_v40 = vld [vmem:[%s21995_s6 + $0x430] sm:$0xf0]  ;;  %v13458_v61 = vld [vmem:[%s21995_s6 + $0x198] sm:$0xf] }
 0x1dc   : > { %v19715_v41 = vld [vmem:[%s21995_s6 + $0x614] sm:$0xf]  ;;  %v13775_v53 = vor.u32 %v19651_v37, %v13772_v40  ;;  %v13459_v7 = vor.u32 %v19576_v62, %v13458_v61  ;;  %v13906_v32 = vld [vmem:[%s21995_s6 + $0x518] sm:$0xf] }
 0x1dd   : > { %2631 = vmatpush.bf16.msrb.mxu3 %v14127_v2  ;;  %2606 = vmatpush.bf16.msrb.mxu1 %v13583_v12  ;;  %v14028_v43 = vld [vmem:[%s21995_s6 + $0x630] sm:$0xf0]  ;;  %v19640_v2 = vld [vmem:[%s21995_s6 + $0x3b4] sm:$0xf0] }
 0x1de   : > { %v14031_v56 = vor.u32 %v19715_v41, %v14028_v43  ;;  %v13715_v10 = vor.u32 %v19640_v2, %v13714_v63  ;;  %v13426_v12 = vld [vmem:[%s21995_s6 + $0x158] sm:$0xf] }
 0x1df   : > { %2619 = vmatpush.bf16.msrb.mxu2 %v13839_v13  ;;  %2594 = vmatpush.bf16.msrb.mxu0 %v13295_v29  ;;  %v19568_v13 = vld [vmem:[%s21995_s6 + $0x174] sm:$0xf0]  ;;  %v1033_v29 = vperm.slane %v22424_v42, 1 }
 0x1e0   : > { %v13427_v22 = vor.u32 %v19568_v13, %v13426_v12  ;;  %v19752_v35 = vld [vmem:[%s21995_s6 + $0x734] sm:$0xf0] }
 0x1e1   : > { %2632 = vmatpush.bf16.msrb.mxu3 %v14095_v19  ;;  %2607 = vmatpush.bf16.msrb.mxu1 %v13551_v33  ;;  %v19696_v19 = vld [vmem:[%s21995_s6 + $0x574] sm:$0xf0] }
 0x1e2   : > { %v13939_v26 = vor.u32 %v19696_v19, %v13938_v18  ;;  %v19688_v33 = vld [vmem:[%s21995_s6 + $0x534] sm:$0xf0] }
 0x1e3   : > { %2620 = vmatpush.bf16.msrb.mxu2 %v13807_v34  ;;  %2595 = vmatpush.bf16.msrb.mxu0 %v13263_v47  ;;  %v14162_v34 = vld [vmem:[%s21995_s6 + $0x718] sm:$0xf]  ;;  %v2389_v37 = vpop.f32.mrf.mxu0  ;;  %v13907_v40 = vor.u32 %v19688_v33, %v13906_v32 }
 0x1e4   : > { %v13362_v41 = vld [vmem:[%s21995_s6 + $0xd8] sm:$0xf]  ;;  %v2390_v45 = vadd.f32 %v2389_v37, %v1033_v29  ;;  %v14163_v47 = vor.u32 %v19752_v35, %v14162_v34 }
 0x1e5   : > { %2633 = vmatpush.bf16.msrb.mxu3 %v14063_v39  ;;  %2608 = vmatpush.bf16.msrb.mxu1 %v13519_v52  ;;  %v13651_v39 = vor.u32 %v19624_v31, %v13650_v28  ;;  %v19552_v43 = vld [vmem:[%s21995_s6 + $0xf4] sm:$0xf0]  ;;  %v2402_v46 = vpop.f32.mrf.mxu1 }
 0x1e6   : > { %2596 = vmatmul.bf16.vlgmr.msrb.gmra.mxu0 %v22137_v9  ;;  %v13618_v44 = vld [vmem:[%s21995_s6 + $0x2d8] sm:$0xf]  ;;  %v13363_v54 = vor.u32 %v19552_v43, %v13362_v41  ;;  %v19644_v41 = vld [vmem:[%s21995_s6 + $0x3dc] sm:$0xf] }
 0x1e7   : > { %2621 = vmatpush.bf16.msrb.mxu2 %v13775_v53  ;;  %2640 = vmatpush.bf16.msra.mxu0 %v13491_v57  ;;  %v19616_v48 = vld [vmem:[%s21995_s6 + $0x2f4] sm:$0xf0]  ;;  %v2403_v53 = vadd.f32 %v2402_v46, %v2390_v45  ;;  %v19708_v45 = vld [vmem:[%s21995_s6 + $0x5dc] sm:$0xf] }
 0x1e8   : > { %2609 = vmatmul.bf16.vlgmr.msrb.gmra.mxu1 %v22152_v25  ;;  %v13874_v49 = vld [vmem:[%s21995_s6 + $0x4d8] sm:$0xf]  ;;  %v13619_v55 = vor.u32 %v19616_v48, %v13618_v44  ;;  %v13748_v44 = vld [vmem:[%s21995_s6 + $0x3f8] sm:$0xf0] }
 0x1e9   : > { %2634 = vmatpush.bf16.msrb.mxu3 %v14031_v56  ;;  %2653 = vmatpush.bf16.msra.mxu1 %v13747_v59  ;;  %v19680_v50 = vld [vmem:[%s21995_s6 + $0x4f4] sm:$0xf0]  ;;  %v14004_v46 = vld [vmem:[%s21995_s6 + $0x5f8] sm:$0xf0] }
 0x1ea   : > { %2622 = vmatmul.bf16.vlgmr.msrb.gmra.mxu2 %v22135_v8  ;;  %v14130_v51 = vld [vmem:[%s21995_s6 + $0x6d8] sm:$0xf]  ;;  %v13875_v56 = vor.u32 %v19680_v50, %v13874_v49  ;;  %v19772_v49 = vld [vmem:[%s21995_s6 + $0x7dc] sm:$0xf] }
 0x1eb   : > { %2666 = vmatpush.bf16.msra.mxu2 %v14003_v60  ;;  %2641 = vmatpush.bf16.msra.mxu0 %v13459_v7  ;;  %v19744_v52 = vld [vmem:[%s21995_s6 + $0x6f4] sm:$0xf0]  ;;  %v2391_v7 = vpop.f32.mrf.mxu0  ;;  %v14260_v50 = vld [vmem:[%s21995_s6 + $0x7f8] sm:$0xf0] }
 0x1ec   : > { %2635 = vmatmul.bf16.vlgmr.msrb.gmra.mxu3 %v22142_v15  ;;  %v13330_v57 = vld [vmem:[%s21995_s6 + $0x98] sm:$0xf]  ;;  %v14131_v61 = vor.u32 %v19744_v52, %v14130_v51 }
 0x1ed   : > { %2679 = vmatpush.bf16.msra.mxu3 %v14259_v1  ;;  %2654 = vmatpush.bf16.msra.mxu1 %v13715_v10  ;;  %v19544_v58 = vld [vmem:[%s21995_s6 + $0xb4] sm:$0xf0]  ;;  %v2415_v60 = vpop.f32.mrf.mxu2 }
 0x1ee   : > { %v13586_v59 = vld [vmem:[%s21995_s6 + $0x298] sm:$0xf]  ;;  %v2416_v1 = vadd.f32 %v2415_v60, %v2403_v53  ;;  %v13331_v5 = vor.u32 %v19544_v58, %v13330_v57  ;;  %v13751_v53 = vor.u32 %v19644_v41, %v13748_v44  ;;  %v19636_v57 = vld [vmem:[%s21995_s6 + $0x39c] sm:$0xf]  ;;  %v14263_v58 = vor.u32 %v19772_v49, %v14260_v50 }
 0x1ef   : > { %2667 = vmatpush.bf16.msra.mxu2 %v13971_v11  ;;  %2642 = vmatpush.bf16.msra.mxu0 %v13427_v22  ;;  %v19608_v62 = vld [vmem:[%s21995_s6 + $0x2b4] sm:$0xf0]  ;;  %v2428_v2 = vpop.f32.mrf.mxu3  ;;  %v19700_v60 = vld [vmem:[%s21995_s6 + $0x59c] sm:$0xf] }
 0x1f0   : > { %v13842_v63 = vld [vmem:[%s21995_s6 + $0x498] sm:$0xf]  ;;  %v22516_v6 = vadd.f32 %v2428_v2, %v2416_v1  ;;  %v13587_v10 = vor.u32 %v19608_v62, %v13586_v59  ;;  %v13716_v59 = vld [vmem:[%s21995_s6 + $0x3b8] sm:$0xf0] }
 0x1f1   : > { %2680 = vmatpush.bf16.msra.mxu3 %v14227_v16  ;;  %2655 = vmatpush.bf16.msra.mxu1 %v13683_v24  ;;  %v19672_v0 = vld [vmem:[%s21995_s6 + $0x4b4] sm:$0xf0]  ;;  %v2404_v16 = vpop.f32.mrf.mxu1  ;;  %v19764_v62 = vld [vmem:[%s21995_s6 + $0x79c] sm:$0xf]  ;;  %v13719_v1 = vor.u32 %v19636_v57, %v13716_v59 }
 0x1f2   : > { %v14098_v3 = vld [vmem:[%s21995_s6 + $0x698] sm:$0xf]  ;;  %v13843_v11 = vor.u32 %v19672_v0, %v13842_v63  ;;  %v14228_v63 = vld [vmem:[%s21995_s6 + $0x7b8] sm:$0xf0] }
 0x1f3   : > { %2668 = vmatpush.bf16.msra.mxu2 %v13939_v26  ;;  %2643 = vmatpush.bf16.msra.mxu0 %v13395_v36  ;;  %v19736_v4 = vld [vmem:[%s21995_s6 + $0x6b4] sm:$0xf0]  ;;  %v14231_v7 = vor.u32 %v19764_v62, %v14228_v63  ;;  %v13876_v41 = vld [vmem:[%s21995_s6 + $0x4f8] sm:$0xf0] }
 0x1f4   : > { %v13298_v12 = vld [vmem:[%s21995_s6 + $0x58] sm:$0xf]  ;;  %v14099_v17 = vor.u32 %v19736_v4, %v14098_v3  ;;  %v19564_v3 = vld [vmem:[%s21995_s6 + $0x15c] sm:$0xf] }
 0x1f5   : > { %2681 = vmatpush.bf16.msra.mxu3 %v14195_v30  ;;  %2656 = vmatpush.bf16.msra.mxu1 %v13651_v39  ;;  %v19536_v13 = vld [vmem:[%s21995_s6 + $0x74] sm:$0xf0]  ;;  %v2417_v32 = vpop.f32.mrf.mxu2  ;;  %v19580_v39 = vld [vmem:[%s21995_s6 + $0x1dc] sm:$0xf] }
 0x1f6   : > { %v13554_v14 = vld [vmem:[%s21995_s6 + $0x258] sm:$0xf]  ;;  %v13299_v23 = vor.u32 %v19536_v13, %v13298_v12  ;;  %v13428_v4 = vld [vmem:[%s21995_s6 + $0x178] sm:$0xf0] }
 0x1f7   : > { %2669 = vmatpush.bf16.msra.mxu2 %v13907_v40  ;;  %2644 = vmatpush.bf16.msra.mxu0 %v13363_v54  ;;  %v19600_v18 = vld [vmem:[%s21995_s6 + $0x274] sm:$0xf0]  ;;  %v2430_v37 = vpop.f32.mrf.mxu3  ;;  %v13492_v40 = vld [vmem:[%s21995_s6 + $0x1f8] sm:$0xf0]  ;;  %v14007_v54 = vor.u32 %v19708_v45, %v14004_v46  ;;  %v13431_v16 = vor.u32 %v19564_v3, %v13428_v4 }
 0x1f8   : > { %v13810_v19 = vld [vmem:[%s21995_s6 + $0x458] sm:$0xf]  ;;  %v13555_v27 = vor.u32 %v19600_v18, %v13554_v14  ;;  %v13495_v52 = vor.u32 %v19580_v39, %v13492_v40  ;;  %v13940_v12 = vld [vmem:[%s21995_s6 + $0x578] sm:$0xf0] }
 0x1f9   : > { %2682 = vmatpush.bf16.msra.mxu3 %v14163_v47  ;;  %2657 = vmatpush.bf16.msra.mxu1 %v13619_v55  ;;  %v19664_v20 = vld [vmem:[%s21995_s6 + $0x474] sm:$0xf0]  ;;  %v19572_v55 = vld [vmem:[%s21995_s6 + $0x19c] sm:$0xf] }
 0x1fa   : > { %v14066_v21 = vld [vmem:[%s21995_s6 + $0x658] sm:$0xf]  ;;  %v13811_v28 = vor.u32 %v19664_v20, %v13810_v19  ;;  %v19756_v13 = vld [vmem:[%s21995_s6 + $0x75c] sm:$0xf] }
 0x1fb   : > { %2670 = vmatpush.bf16.msra.mxu2 %v13875_v56  ;;  %v19728_v22 = vld [vmem:[%s21995_s6 + $0x674] sm:$0xf0]  ;;  %2645 = vmatpush.bf16.msra.mxu0 %v13331_v5  ;;  %v13460_v56 = vld [vmem:[%s21995_s6 + $0x1b8] sm:$0xf0] }
 0x1fc   : > { %v13266_v24 = vld [vmem:[%s21995_s6 + $0x18] sm:$0xf]  ;;  %v14067_v33 = vor.u32 %v19728_v22, %v14066_v21  ;;  %v13463_v0 = vor.u32 %v19572_v55, %v13460_v56  ;;  %v19628_v5 = vld [vmem:[%s21995_s6 + $0x35c] sm:$0xf] }
 0x1fd   : > { %2683 = vmatpush.bf16.msra.mxu3 %v14131_v61  ;;  %v19528_v26 = vld [vmem:[%s21995_s6 + $0x34] sm:$0xf0]  ;;  %2658 = vmatpush.bf16.msra.mxu1 %v13587_v10  ;;  %v13972_v61 = vld [vmem:[%s21995_s6 + $0x5b8] sm:$0xf0] }
 0x1fe   : > { %v13522_v29 = vld [vmem:[%s21995_s6 + $0x218] sm:$0xf]  ;;  %v13267_v43 = vor.u32 %v19528_v26, %v13266_v24  ;;  %v13975_v2 = vor.u32 %v19700_v60, %v13972_v61  ;;  %v13684_v10 = vld [vmem:[%s21995_s6 + $0x378] sm:$0xf0] }
 0x1ff   : > { %2671 = vmatpush.bf16.msra.mxu2 %v13843_v11  ;;  %v19592_v30 = vld [vmem:[%s21995_s6 + $0x234] sm:$0xf0]  ;;  %2646 = vmatpush.bf16.msra.mxu0 %v13299_v23  ;;  %v19692_v11 = vld [vmem:[%s21995_s6 + $0x55c] sm:$0xf] }
 0x200   : > { %v13778_v31 = vld [vmem:[%s21995_s6 + $0x418] sm:$0xf]  ;;  %v13523_v47 = vor.u32 %v19592_v30, %v13522_v29  ;;  %v14196_v14 = vld [vmem:[%s21995_s6 + $0x778] sm:$0xf0]  ;;  %v13943_v18 = vor.u32 %v19692_v11, %v13940_v12 }
 0x201   : > { %2684 = vmatpush.bf16.msra.mxu3 %v14099_v17  ;;  %v19656_v34 = vld [vmem:[%s21995_s6 + $0x434] sm:$0xf0]  ;;  %2659 = vmatpush.bf16.msra.mxu1 %v13555_v27  ;;  %v13687_v17 = vor.u32 %v19628_v5, %v13684_v10  ;;  %v19556_v19 = vld [vmem:[%s21995_s6 + $0x11c] sm:$0xf]  ;;  %v14199_v22 = vor.u32 %v19756_v13, %v14196_v14 }
 0x202   : > { %v14034_v35 = vld [vmem:[%s21995_s6 + $0x618] sm:$0xf]  ;;  %v13779_v48 = vor.u32 %v19656_v34, %v13778_v31  ;;  %v13396_v20 = vld [vmem:[%s21995_s6 + $0x138] sm:$0xf0] }
 0x203   : > { %v19720_v36 = vld [vmem:[%s21995_s6 + $0x634] sm:$0xf0]  ;;  %2672 = vmatpush.bf16.msra.mxu2 %v13811_v28  ;;  %2647 = vmatpush.bf16.msra.mxu0 %v13267_v43  ;;  %v19620_v21 = vld [vmem:[%s21995_s6 + $0x31c] sm:$0xf]  ;;  %v13399_v29 = vor.u32 %v19556_v19, %v13396_v20  ;;  %v22570_v30 = vpop.f32.mrf.mxu0 }
 0x204   : > { %v14035_v51 = vor.u32 %v19720_v36, %v14034_v35  ;;  %v13652_v23 = vld [vmem:[%s21995_s6 + $0x338] sm:$0xf0] }
 0x205   : > { %2685 = vmatpush.bf16.msra.mxu3 %v14067_v33  ;;  %2660 = vmatpush.bf16.msra.mxu1 %v13523_v47  ;;  %v19684_v24 = vld [vmem:[%s21995_s6 + $0x51c] sm:$0xf]  ;;  %v13655_v31 = vor.u32 %v19620_v21, %v13652_v23  ;;  %v22575_v36 = vpop.f32.mrf.mxu1 }
 0x206   : > { %2648 = vmatmul.bf16.vlgmr.msra.gmra.mxu0 %v22137_v9  ;;  %v13908_v26 = vld [vmem:[%s21995_s6 + $0x538] sm:$0xf0] }
 0x207   : > { %2673 = vmatpush.bf16.msra.mxu2 %v13779_v48  ;;  %2692 = vmatpush.bf16.msrb.mxu0 %v13495_v52  ;;  %v19748_v27 = vld [vmem:[%s21995_s6 + $0x71c] sm:$0xf]  ;;  %v13911_v32 = vor.u32 %v19684_v24, %v13908_v26 }
 0x208   : > { %2661 = vmatmul.bf16.vlgmr.msra.gmra.mxu1 %v22152_v25  ;;  %v14164_v28 = vld [vmem:[%s21995_s6 + $0x738] sm:$0xf0] }
 0x209   : > { %2686 = vmatpush.bf16.msra.mxu3 %v14035_v51  ;;  %2705 = vmatpush.bf16.msrb.mxu1 %v13751_v53  ;;  %v19548_v33 = vld [vmem:[%s21995_s6 + $0xdc] sm:$0xf]  ;;  %v14167_v37 = vor.u32 %v19748_v27, %v14164_v28  ;;  %v14490_v28 = vld [vmem:[%s22007_s30 + $0x1c0] sm:$0xf] }
 0x20a   : > { %2674 = vmatmul.bf16.vlgmr.msra.gmra.mxu2 %v22135_v8  ;;  %v13364_v34 = vld [vmem:[%s21995_s6 + $0xf8] sm:$0xf0] }
 0x20b   : > { %2718 = vmatpush.bf16.msrb.mxu2 %v14007_v54  ;;  %2693 = vmatpush.bf16.msrb.mxu0 %v13463_v0  ;;  %v19612_v35 = vld [vmem:[%s21995_s6 + $0x2dc] sm:$0xf]  ;;  %v13367_v45 = vor.u32 %v19548_v33, %v13364_v34  ;;  %v2443_v60 = vpop.f32.mrf.mxu0  ;;  %v19901_v33 = vld [vmem:[%s22007_s30 + $0x3dc] sm:$0xf0] }
 0x20c   : > { %2687 = vmatmul.bf16.vlgmr.msra.gmra.mxu3 %v22142_v15  ;;  %v13620_v39 = vld [vmem:[%s21995_s6 + $0x2f8] sm:$0xf0]  ;;  %v15002_v34 = vld [vmem:[%s22007_s30 + $0x5c0] sm:$0xf] }
 0x20d   : > { %2731 = vmatpush.bf16.msrb.mxu3 %v14263_v58  ;;  %2706 = vmatpush.bf16.msrb.mxu1 %v13719_v1  ;;  %v19676_v40 = vld [vmem:[%s21995_s6 + $0x4dc] sm:$0xf]  ;;  %v13623_v46 = vor.u32 %v19612_v35, %v13620_v39  ;;  %v22585_v51 = vpop.f32.mrf.mxu2  ;;  %v19965_v35 = vld [vmem:[%s22007_s30 + $0x5dc] sm:$0xf0] }
 0x20e   : > { %v19740_v43 = vld [vmem:[%s21995_s6 + $0x6dc] sm:$0xf]  ;;  %v13879_v47 = vor.u32 %v19676_v40, %v13876_v41 }
 0x20f   : > { %2719 = vmatpush.bf16.msrb.mxu2 %v13975_v2  ;;  %2694 = vmatpush.bf16.msrb.mxu0 %v13431_v16  ;;  %v14132_v44 = vld [vmem:[%s21995_s6 + $0x6f8] sm:$0xf0]  ;;  %v22590_v56 = vpop.f32.mrf.mxu3  ;;  %v2456_v2 = vpop.f32.mrf.mxu1 }
 0x210   : > { %v19540_v48 = vld [vmem:[%s21995_s6 + $0x9c] sm:$0xf]  ;;  %v14135_v52 = vor.u32 %v19740_v43, %v14132_v44  ;;  %v15258_v43 = vld [vmem:[%s22007_s30 + $0x7c0] sm:$0xf] }
 0x211   : > { %2732 = vmatpush.bf16.msrb.mxu3 %v14231_v7  ;;  %2707 = vmatpush.bf16.msrb.mxu1 %v13687_v17  ;;  %v13332_v49 = vld [vmem:[%s21995_s6 + $0xb8] sm:$0xf0]  ;;  %v20029_v44 = vld [vmem:[%s22007_s30 + $0x7dc] sm:$0xf0] }
 0x212   : > { %v19604_v50 = vld [vmem:[%s21995_s6 + $0x29c] sm:$0xf]  ;;  %v13335_v59 = vor.u32 %v19540_v48, %v13332_v49  ;;  %v19829_v48 = vld [vmem:[%s22007_s30 + $0x19c] sm:$0xf0] }
 0x213   : > { %2720 = vmatpush.bf16.msrb.mxu2 %v13943_v18  ;;  %2695 = vmatpush.bf16.msrb.mxu0 %v13399_v29  ;;  %v13588_v53 = vld [vmem:[%s21995_s6 + $0x2b8] sm:$0xf0]  ;;  %v19837_v29 = vld [vmem:[%s22007_s30 + $0x1dc] sm:$0xf0] }
 0x214   : > { %v19668_v54 = vld [vmem:[%s21995_s6 + $0x49c] sm:$0xf]  ;;  %v13591_v61 = vor.u32 %v19604_v50, %v13588_v53  ;;  %v14491_v41 = vor.u32 %v19837_v29, %v14490_v28  ;;  %v14714_v49 = vld [vmem:[%s22007_s30 + $0x380] sm:$0xf] }
 0x215   : > { %2733 = vmatpush.bf16.msrb.mxu3 %v14199_v22  ;;  %2708 = vmatpush.bf16.msrb.mxu1 %v13655_v31  ;;  %v13844_v55 = vld [vmem:[%s21995_s6 + $0x4b8] sm:$0xf0]  ;;  %v2469_v21 = vpop.f32.mrf.mxu2  ;;  %v14746_v31 = vld [vmem:[%s22007_s30 + $0x3c0] sm:$0xf] }
 0x216   : > { %v19732_v57 = vld [vmem:[%s21995_s6 + $0x69c] sm:$0xf]  ;;  %v13847_v62 = vor.u32 %v19668_v54, %v13844_v55  ;;  %v19893_v50 = vld [vmem:[%s22007_s30 + $0x39c] sm:$0xf0]  ;;  %v15259_v54 = vor.u32 %v20029_v44, %v15258_v43 }
 0x217   : > { %2721 = vmatpush.bf16.msrb.mxu2 %v13911_v32  ;;  %v14100_v58 = vld [vmem:[%s21995_s6 + $0x6b8] sm:$0xf0]  ;;  %2696 = vmatpush.bf16.msrb.mxu0 %v13367_v45  ;;  %v2482_v27 = vpop.f32.mrf.mxu3  ;;  %v14747_v45 = vor.u32 %v19901_v33, %v14746_v31  ;;  %v19957_v53 = vld [vmem:[%s22007_s30 + $0x59c] sm:$0xf0] }
 0x218   : > { %v19532_v63 = vld [vmem:[%s21995_s6 + $0x5c] sm:$0xf]  ;;  %v14103_v3 = vor.u32 %v19732_v57, %v14100_v58  ;;  %v15226_v57 = vld [vmem:[%s22007_s30 + $0x780] sm:$0xf] }
 0x219   : > { %2734 = vmatpush.bf16.msrb.mxu3 %v14167_v37  ;;  %2709 = vmatpush.bf16.msrb.mxu1 %v13623_v46  ;;  %v13300_v0 = vld [vmem:[%s21995_s6 + $0x78] sm:$0xf0]  ;;  %v15003_v46 = vor.u32 %v19965_v35, %v15002_v34  ;;  %v20021_v58 = vld [vmem:[%s22007_s30 + $0x79c] sm:$0xf0] }
 0x21a   : > { %v19596_v1 = vld [vmem:[%s21995_s6 + $0x25c] sm:$0xf]  ;;  %v13303_v12 = vor.u32 %v19532_v63, %v13300_v0  ;;  %v14682_v63 = vld [vmem:[%s22007_s30 + $0x340] sm:$0xf] }
 0x21b   : > { %2722 = vmatpush.bf16.msrb.mxu2 %v13879_v47  ;;  %v13556_v4 = vld [vmem:[%s21995_s6 + $0x278] sm:$0xf0]  ;;  %2697 = vmatpush.bf16.msrb.mxu0 %v13335_v59  ;;  %v14458_v47 = vld [vmem:[%s22007_s30 + $0x180] sm:$0xf]  ;;  %v14715_v59 = vor.u32 %v19893_v50, %v14714_v49 }
 0x21c   : > { %v19660_v5 = vld [vmem:[%s21995_s6 + $0x45c] sm:$0xf]  ;;  %v13559_v16 = vor.u32 %v19596_v1, %v13556_v4  ;;  %v14459_v55 = vor.u32 %v19829_v48, %v14458_v47  ;;  %v19885_v0 = vld [vmem:[%s22007_s30 + $0x35c] sm:$0xf0] }
 0x21d   : > { %2735 = vmatpush.bf16.msrb.mxu3 %v14135_v52  ;;  %v13812_v7 = vld [vmem:[%s21995_s6 + $0x478] sm:$0xf0]  ;;  %2710 = vmatpush.bf16.msrb.mxu1 %v13591_v61  ;;  %v14970_v52 = vld [vmem:[%s22007_s30 + $0x580] sm:$0xf] }
 0x21e   : > { %v19724_v10 = vld [vmem:[%s21995_s6 + $0x65c] sm:$0xf]  ;;  %v13815_v17 = vor.u32 %v19660_v5, %v13812_v7  ;;  %v14971_v60 = vor.u32 %v19957_v53, %v14970_v52  ;;  %v14426_v61 = vld [vmem:[%s22007_s30 + $0x140] sm:$0xf] }
 0x21f   : > { %v14068_v11 = vld [vmem:[%s21995_s6 + $0x678] sm:$0xf0]  ;;  %2723 = vmatpush.bf16.msrb.mxu2 %v13847_v62  ;;  %2698 = vmatpush.bf16.msrb.mxu0 %v13303_v12  ;;  %v19821_v62 = vld [vmem:[%s22007_s30 + $0x15c] sm:$0xf0] }
 0x220   : > { %v19524_v13 = vld [vmem:[%s21995_s6 + $0x1c] sm:$0xf]  ;;  %v14071_v22 = vor.u32 %v19724_v10, %v14068_v11  ;;  %v14938_v1 = vld [vmem:[%s22007_s30 + $0x540] sm:$0xf]  ;;  %v14427_v4 = vor.u32 %v19821_v62, %v14426_v61 }
 0x221   : > { %v13268_v14 = vld [vmem:[%s21995_s6 + $0x38] sm:$0xf0]  ;;  %2736 = vmatpush.bf16.msrb.mxu3 %v14103_v3  ;;  %2711 = vmatpush.bf16.msrb.mxu1 %v13559_v16  ;;  %v19949_v2 = vld [vmem:[%s22007_s30 + $0x55c] sm:$0xf0]  ;;  %v15227_v3 = vor.u32 %v20021_v58, %v15226_v57  ;;  %v1035_v16 = vperm.slane %v22424_v42, 3 }
 0x222   : > { %v19588_v18 = vld [vmem:[%s21995_s6 + $0x21c] sm:$0xf]  ;;  %v13271_v32 = vor.u32 %v19524_v13, %v13268_v14  ;;  %v20013_v5 = vld [vmem:[%s22007_s30 + $0x75c] sm:$0xf0]  ;;  %v14939_v7 = vor.u32 %v19949_v2, %v14938_v1  ;;  %v1034_v14 = vperm.slane %v22424_v42, 2 }
 0x223   : > { %v13524_v19 = vld [vmem:[%s21995_s6 + $0x238] sm:$0xf0]  ;;  %2724 = vmatpush.bf16.msrb.mxu2 %v13815_v17  ;;  %v14394_v10 = vld [vmem:[%s22007_s30 + $0x100] sm:$0xf]  ;;  %v2493_v21 = vpop.f32.mrf.mxu0 }
 0x224   : > { %v19652_v20 = vld [vmem:[%s21995_s6 + $0x41c] sm:$0xf]  ;;  %v13527_v37 = vor.u32 %v19588_v18, %v13524_v19  ;;  %2699 = vmatpush.bf16.msrb.mxu0 %v13271_v32  ;;  %v19813_v11 = vld [vmem:[%s22007_s30 + $0x11c] sm:$0xf0]  ;;  %v2442_v32 = vadd.f32 %v22570_v30, %v1034_v14  ;;  %v2494_v33 = vadd.f32 %v2493_v21, %v1035_v16 }
 0x225   : > { %v13780_v23 = vld [vmem:[%s21995_s6 + $0x438] sm:$0xf0]  ;;  %2737 = vmatpush.bf16.msrb.mxu3 %v14071_v22  ;;  %v14650_v12 = vld [vmem:[%s22007_s30 + $0x300] sm:$0xf]  ;;  %v14395_v18 = vor.u32 %v19813_v11, %v14394_v10  ;;  %v2506_v42 = vpop.f32.mrf.mxu1 }
 0x226   : > { %v19716_v24 = vld [vmem:[%s21995_s6 + $0x61c] sm:$0xf]  ;;  %v13783_v39 = vor.u32 %v19652_v20, %v13780_v23  ;;  %2712 = vmatpush.bf16.msrb.mxu1 %v13527_v37  ;;  %v14906_v13 = vld [vmem:[%s22007_s30 + $0x500] sm:$0xf]  ;;  %v2455_v50 = vadd.f32 %v22575_v36, %v2442_v32  ;;  %v2507_v52 = vadd.f32 %v2506_v42, %v2494_v33  ;;  %v2745_v33 = vmax.f32 %v22516_v6, 0.0 }
 0x227   : > { %v14036_v26 = vld [vmem:[%s21995_s6 + $0x638] sm:$0xf0]  ;;  %2700 = vmatmul.bf16.vlgmr.msrb.gmra.mxu0 %v22137_v9  ;;  %v15194_v9 = vld [vmem:[%s22007_s30 + $0x740] sm:$0xf] }
 0x228   : > { %v14039_v40 = vor.u32 %v19716_v24, %v14036_v26  ;;  %2725 = vmatpush.bf16.msrb.mxu2 %v13783_v39  ;;  %5850 = vmatpush.bf16.msra.mxu0 %v14491_v41  ;;  %v15195_v17 = vor.u32 %v20013_v5, %v15194_v9  ;;  %v15162_v19 = vld [vmem:[%s22007_s30 + $0x700] sm:$0xf]  ;;  %v22700_v6 = vpack.c.bf16 %v2745_v33, %v2745_v33 }
 0x229   : > { %2713 = vmatmul.bf16.vlgmr.msrb.gmra.mxu1 %v22152_v25  ;;  %v14683_v25 = vor.u32 %v19885_v0, %v14682_v63  ;;  %v20005_v20 = vld [vmem:[%s22007_s30 + $0x71c] sm:$0xf0] }
 0x22a   : > { %2738 = vmatpush.bf16.msrb.mxu3 %v14039_v40  ;;  %5863 = vmatpush.bf16.msra.mxu1 %v14747_v45  ;;  %v14362_v24 = vld [vmem:[%s22007_s30 + $0xc0] sm:$0xf]  ;;  %v15163_v34 = vor.u32 %v20005_v20, %v15162_v19 }
 0x22b   : > { %2726 = vmatmul.bf16.vlgmr.msrb.gmra.mxu2 %v22135_v8  ;;  %v19877_v8 = vld [vmem:[%s22007_s30 + $0x31c] sm:$0xf0]  ;;  %v2495_v58 = vpop.f32.mrf.mxu0 }
 0x22c   : > { %5876 = vmatpush.bf16.msra.mxu2 %v15003_v46  ;;  %5851 = vmatpush.bf16.msra.mxu0 %v14459_v55  ;;  %v14651_v22 = vor.u32 %v19877_v8, %v14650_v12  ;;  %v19805_v26 = vld [vmem:[%s22007_s30 + $0xdc] sm:$0xf0] }
 0x22d   : > { %2739 = vmatmul.bf16.vlgmr.msrb.gmra.mxu3 %v22142_v15  ;;  %v19941_v15 = vld [vmem:[%s22007_s30 + $0x51c] sm:$0xf0]  ;;  %v14363_v35 = vor.u32 %v19805_v26, %v14362_v24  ;;  %v2519_v30 = vpop.f32.mrf.mxu2  ;;  %v2508_v63 = vpop.f32.mrf.mxu1 }
 0x22e   : > { %5889 = vmatpush.bf16.msra.mxu3 %v15259_v54  ;;  %5864 = vmatpush.bf16.msra.mxu1 %v14715_v59  ;;  %v14907_v23 = vor.u32 %v19941_v15, %v14906_v13  ;;  %v14618_v27 = vld [vmem:[%s22007_s30 + $0x2c0] sm:$0xf] }
 0x22f   : > { %v19869_v28 = vld [vmem:[%s22007_s30 + $0x2dc] sm:$0xf0]  ;;  %v2532_v49 = vpop.f32.mrf.mxu3 }
 0x230   : > { %5877 = vmatpush.bf16.msra.mxu2 %v14971_v60  ;;  %5852 = vmatpush.bf16.msra.mxu0 %v14427_v4  ;;  %v14874_v29 = vld [vmem:[%s22007_s30 + $0x4c0] sm:$0xf]  ;;  %v14619_v40 = vor.u32 %v19869_v28, %v14618_v27  ;;  %v2520_v4 = vadd.f32 %v2519_v30, %v2507_v52  ;;  %v2744_v28 = vmax.f32 %v22458_v38, 0.0 }
 0x231   : > { %v19933_v31 = vld [vmem:[%s22007_s30 + $0x4dc] sm:$0xf0] }
 0x232   : > { %5890 = vmatpush.bf16.msra.mxu3 %v15227_v3  ;;  %5865 = vmatpush.bf16.msra.mxu1 %v14683_v25  ;;  %v15130_v37 = vld [vmem:[%s22007_s30 + $0x6c0] sm:$0xf]  ;;  %v14875_v41 = vor.u32 %v19933_v31, %v14874_v29  ;;  %v2468_v3 = vadd.f32 %v22585_v51, %v2455_v50  ;;  %v2533_v20 = vadd.f32 %v2532_v49, %v2520_v4 }
 0x233   : > { %v19997_v39 = vld [vmem:[%s22007_s30 + $0x6dc] sm:$0xf0] }
 0x234   : > { %5878 = vmatpush.bf16.msra.mxu2 %v14939_v7  ;;  %5853 = vmatpush.bf16.msra.mxu0 %v14395_v18  ;;  %v14330_v43 = vld [vmem:[%s22007_s30 + $0x80] sm:$0xf]  ;;  %v15131_v53 = vor.u32 %v19997_v39, %v15130_v37  ;;  %v2481_v19 = vadd.f32 %v22590_v56, %v2468_v3 }
 0x235   : > { %v19797_v44 = vld [vmem:[%s22007_s30 + $0x9c] sm:$0xf0]  ;;  %v2521_v15 = vpop.f32.mrf.mxu2 }
 0x236   : > { %5891 = vmatpush.bf16.msra.mxu3 %v15195_v17  ;;  %5866 = vmatpush.bf16.msra.mxu1 %v14651_v22  ;;  %v14586_v45 = vld [vmem:[%s22007_s30 + $0x280] sm:$0xf]  ;;  %v14331_v54 = vor.u32 %v19797_v44, %v14330_v43 }
 0x237   : > { %v19861_v46 = vld [vmem:[%s22007_s30 + $0x29c] sm:$0xf0]  ;;  %v2534_v18 = vpop.f32.mrf.mxu3 }
 0x238   : > { %5879 = vmatpush.bf16.msra.mxu2 %v14907_v23  ;;  %v14842_v47 = vld [vmem:[%s22007_s30 + $0x480] sm:$0xf]  ;;  %5854 = vmatpush.bf16.msra.mxu0 %v14363_v35  ;;  %v14587_v59 = vor.u32 %v19861_v46, %v14586_v45 }
 0x239   : > { %v19925_v48 = vld [vmem:[%s22007_s30 + $0x49c] sm:$0xf0] }
 0x23a   : > { %5892 = vmatpush.bf16.msra.mxu3 %v15163_v34  ;;  %v15098_v55 = vld [vmem:[%s22007_s30 + $0x680] sm:$0xf]  ;;  %5867 = vmatpush.bf16.msra.mxu1 %v14619_v40  ;;  %v14843_v60 = vor.u32 %v19925_v48, %v14842_v47  ;;  %v2746_v40 = vmax.f32 %v2481_v19, 0.0  ;;  %v22698_v47 = vpack.c.bf16 %v2744_v28, %v2744_v28 }
 0x23b   : > { %v19989_v57 = vld [vmem:[%s22007_s30 + $0x69c] sm:$0xf0] }
 0x23c   : > { %5880 = vmatpush.bf16.msra.mxu2 %v14875_v41  ;;  %v14298_v61 = vld [vmem:[%s22007_s30 + $0x40] sm:$0xf]  ;;  %5855 = vmatpush.bf16.msra.mxu0 %v14331_v54  ;;  %v15099_v9 = vor.u32 %v19989_v57, %v15098_v55  ;;  %v2747_v41 = vmax.f32 %v2533_v20, 0.0  ;;  %v22703_v52 = vpack.c.bf16 %v2746_v40, %v2746_v40 }
 0x23d   : > { %v19789_v36 = vld [vmem:[%s22007_s30 + $0x5c] sm:$0xf0] }
 0x23e   : > { %v14554_v62 = vld [vmem:[%s22007_s30 + $0x240] sm:$0xf]  ;;  %5893 = vmatpush.bf16.msra.mxu3 %v15131_v53  ;;  %v14299_v5 = vor.u32 %v19789_v36, %v14298_v61  ;;  %5868 = vmatpush.bf16.msra.mxu1 %v14587_v59  ;;  %v22705_v53 = vpack.c.bf16 %v2747_v41, %v2747_v41 }
 0x23f   : > { %v19853_v0 = vld [vmem:[%s22007_s30 + $0x25c] sm:$0xf0] }
 0x240   : > { %v14810_v1 = vld [vmem:[%s22007_s30 + $0x440] sm:$0xf]  ;;  %5881 = vmatpush.bf16.msra.mxu2 %v14843_v60  ;;  %v14555_v11 = vor.u32 %v19853_v0, %v14554_v62  ;;  %5856 = vmatpush.bf16.msra.mxu0 %v14299_v5 }
 0x241   : > { %v19917_v2 = vld [vmem:[%s22007_s30 + $0x45c] sm:$0xf0] }
 0x242   : > { %v15066_v25 = vld [vmem:[%s22007_s30 + $0x640] sm:$0xf]  ;;  %v14811_v12 = vor.u32 %v19917_v2, %v14810_v1  ;;  %5894 = vmatpush.bf16.msra.mxu3 %v15099_v9  ;;  %5869 = vmatpush.bf16.msra.mxu1 %v14555_v11  ;;  %v22722_v2 = vld [vmem:[%s603_s5] sm:$0xff]  ;;  %s25933_s5 = sld [smem:[#allocation40_spill]] }
 0x243   : > { %v19981_v7 = vld [vmem:[%s22007_s30 + $0x65c] sm:$0xf0]  ;;  %v1036_v3 = vperm.slane %v22722_v2, 4  ;;  %v2545_v11 = vpop.f32.mrf.mxu0 }
 0x244   : > { %v14266_v10 = vld [vmem:[%s22007_s30] sm:$0xf]  ;;  %v15067_v24 = vor.u32 %v19981_v7, %v15066_v25  ;;  %5882 = vmatpush.bf16.msra.mxu2 %v14811_v12 }
 0x245   : > { %v19781_v8 = vld [vmem:[%s22007_s30 + $0x1c] sm:$0xf0]  ;;  %v2558_v15 = vpop.f32.mrf.mxu1 }
 0x246   : > { %v14522_v51 = vld [vmem:[%s22007_s30 + $0x200] sm:$0xf]  ;;  %v14267_v26 = vor.u32 %v19781_v8, %v14266_v10  ;;  %5895 = vmatpush.bf16.msra.mxu3 %v15067_v24 }
 0x247   : > { %v19845_v13 = vld [vmem:[%s22007_s30 + $0x21c] sm:$0xf0] }
 0x248   : > { %v14778_v14 = vld [vmem:[%s22007_s30 + $0x400] sm:$0xf]  ;;  %v14523_v56 = vor.u32 %v19845_v13, %v14522_v51  ;;  %5857 = vmatpush.bf16.msra.mxu0 %v14267_v26  ;;  %v2546_v13 = vadd.f32 %v2545_v11, %v1036_v3  ;;  %v19825_v11 = vld [vmem:[%s22007_s30 + $0x184] sm:$0xf]  ;;  %s12926_s8 = scalar_lea.hbm %s25933_s5, %s19513_s29 }
 0x249   : > { %v19909_v16 = vld [vmem:[%s22007_s30 + $0x41c] sm:$0xf0]  ;;  %s12930_s11 = sshll.u32 %s12926_s8, 4  ;;  %s12931_s11 = int_to_ptr.hbm [resolvable:$true] %s12930_s11 }
 0x24a   : > { %v15514_v17 = vld [vmem:[%s22007_s30 + $0x9c0] sm:$0xf]  ;;  %v14779_v29 = vor.u32 %v19909_v16, %v14778_v14  ;;  %5870 = vmatpush.bf16.msra.mxu1 %v14523_v56  ;;  %v2559_v18 = vadd.f32 %v2558_v15, %v2546_v13  ;;  %v19889_v13 = vld [vmem:[%s22007_s30 + $0x384] sm:$0xf] }
 0x24b   : > { %v20093_v21 = vld [vmem:[%s22007_s30 + $0x9dc] sm:$0xf0]  ;;  %5858 = vmatmul.bf16.vlgmr.msra.gmra.mxu0 %v22698_v47  ;;  %v14716_v15 = vld [vmem:[%s22007_s30 + $0x3a0] sm:$0xf0] }
 0x24c   : > { %v15770_v22 = vld [vmem:[%s22007_s30 + $0xbc0] sm:$0xf]  ;;  %v15515_v34 = vor.u32 %v20093_v21, %v15514_v17  ;;  %5883 = vmatpush.bf16.msra.mxu2 %v14779_v29 }
 0x24d   : > { %v20157_v23 = vld [vmem:[%s22007_s30 + $0xbdc] sm:$0xf0]  ;;  %5871 = vmatmul.bf16.vlgmr.msra.gmra.mxu1 %v22700_v6  ;;  %v2571_v26 = vpop.f32.mrf.mxu2  ;;  %v2560_v40 = vpop.f32.mrf.mxu1 }
 0x24e   : > { %v16026_v27 = vld [vmem:[%s22007_s30 + $0xdc0] sm:$0xf]  ;;  %v15771_v35 = vor.u32 %v20157_v23, %v15770_v22  ;;  %5902 = vmatpush.bf16.msrb.mxu0 %v15515_v34  ;;  %v2572_v29 = vadd.f32 %v2571_v26, %v2559_v18  ;;  %v2547_v34 = vpop.f32.mrf.mxu0  ;;  %v14396_v40 = vld [vmem:[%s22007_s30 + $0x120] sm:$0xf0] }
 0x24f   : > { %v20221_v42 = vld [vmem:[%s22007_s30 + $0xddc] sm:$0xf0]  ;;  %5884 = vmatmul.bf16.vlgmr.msra.gmra.mxu2 %v22703_v52 }
 0x250   : > { %v15034_v31 = vld [vmem:[%s22007_s30 + $0x600] sm:$0xf]  ;;  %v16027_v38 = vor.u32 %v20221_v42, %v16026_v27  ;;  %5915 = vmatpush.bf16.msrb.mxu1 %v15771_v35  ;;  %v2584_v42 = vpop.f32.mrf.mxu3 }
 0x251   : > { %v19973_v32 = vld [vmem:[%s22007_s30 + $0x61c] sm:$0xf0] }
 0x252   : > { %v15482_v37 = vld [vmem:[%s22007_s30 + $0x980] sm:$0xf]  ;;  %v15035_v45 = vor.u32 %v19973_v32, %v15034_v31  ;;  %5928 = vmatpush.bf16.msrb.mxu2 %v16027_v38  ;;  %v2585_v38 = vadd.f32 %v2584_v42, %v2572_v29  ;;  %v19881_v42 = vld [vmem:[%s22007_s30 + $0x344] sm:$0xf] }
 0x253   : > { %v20085_v39 = vld [vmem:[%s22007_s30 + $0x99c] sm:$0xf0] }
 0x254   : > { %v15738_v43 = vld [vmem:[%s22007_s30 + $0xb80] sm:$0xf]  ;;  %v15483_v48 = vor.u32 %v20085_v39, %v15482_v37  ;;  %5896 = vmatpush.bf16.msra.mxu3 %v15035_v45 }
 0x255   : > { %v20149_v44 = vld [vmem:[%s22007_s30 + $0xb9c] sm:$0xf0] }
 0x256   : > { %v15994_v30 = vld [vmem:[%s22007_s30 + $0xd80] sm:$0xf]  ;;  %v15739_v49 = vor.u32 %v20149_v44, %v15738_v43  ;;  %5903 = vmatpush.bf16.msrb.mxu0 %v15483_v48 }
 0x257   : > { %v20213_v46 = vld [vmem:[%s22007_s30 + $0xd9c] sm:$0xf0]  ;;  %5897 = vmatmul.bf16.vlgmr.msra.gmra.mxu3 %v22705_v53 }
 0x258   : > { %v15450_v50 = vld [vmem:[%s22007_s30 + $0x940] sm:$0xf]  ;;  %v15995_v58 = vor.u32 %v20213_v46, %v15994_v30  ;;  %5916 = vmatpush.bf16.msrb.mxu1 %v15739_v49 }
 0x259   : > { %v20077_v54 = vld [vmem:[%s22007_s30 + $0x95c] sm:$0xf0] }
 0x25a   : > { %v15706_v55 = vld [vmem:[%s22007_s30 + $0xb40] sm:$0xf]  ;;  %v15451_v61 = vor.u32 %v20077_v54, %v15450_v50  ;;  %5929 = vmatpush.bf16.msrb.mxu2 %v15995_v58  ;;  %v19833_v54 = vld [vmem:[%s22007_s30 + $0x1c4] sm:$0xf] }
 0x25b   : > { %v20141_v57 = vld [vmem:[%s22007_s30 + $0xb5c] sm:$0xf0] }
 0x25c   : > { %v15962_v59 = vld [vmem:[%s22007_s30 + $0xd40] sm:$0xf]  ;;  %v15707_v36 = vor.u32 %v20141_v57, %v15706_v55  ;;  %5904 = vmatpush.bf16.msrb.mxu0 %v15451_v61  ;;  %v2573_v55 = vpop.f32.mrf.mxu2  ;;  %v19897_v61 = vld [vmem:[%s22007_s30 + $0x3c4] sm:$0xf] }
 0x25d   : > { %v20205_v60 = vld [vmem:[%s22007_s30 + $0xd5c] sm:$0xf0] }
 0x25e   : > { %v15418_v62 = vld [vmem:[%s22007_s30 + $0x900] sm:$0xf]  ;;  %v15963_v4 = vor.u32 %v20205_v60, %v15962_v59  ;;  %5917 = vmatpush.bf16.msrb.mxu1 %v15707_v36  ;;  %v14492_v60 = vld [vmem:[%s22007_s30 + $0x1e0] sm:$0xf0] }
 0x25f   : > { %v20069_v63 = vld [vmem:[%s22007_s30 + $0x91c] sm:$0xf0]  ;;  %v14748_v36 = vld [vmem:[%s22007_s30 + $0x3e0] sm:$0xf0] }
 0x260   : > { %v15674_v0 = vld [vmem:[%s22007_s30 + $0xb00] sm:$0xf]  ;;  %v15419_v25 = vor.u32 %v20069_v63, %v15418_v62  ;;  %5930 = vmatpush.bf16.msrb.mxu2 %v15963_v4  ;;  %v2586_v62 = vpop.f32.mrf.mxu3 }
 0x261   : > { %v20133_v1 = vld [vmem:[%s22007_s30 + $0xb1c] sm:$0xf0] }
 0x262   : > { %v15930_v9 = vld [vmem:[%s22007_s30 + $0xd00] sm:$0xf]  ;;  %v15675_v7 = vor.u32 %v20133_v1, %v15674_v0  ;;  %5905 = vmatpush.bf16.msrb.mxu0 %v15419_v25  ;;  %v2748_v0 = vmax.f32 %v2585_v38, 0.0  ;;  %v15004_v25 = vld [vmem:[%s22007_s30 + $0x5e0] sm:$0xf0]  ;;  %v1037_v38 = vperm.slane %v22722_v2, 5 }
 0x263   : > { %v20197_v5 = vld [vmem:[%s22007_s30 + $0xd1c] sm:$0xf0] }
 0x264   : > { %v15386_v10 = vld [vmem:[%s22007_s30 + $0x8c0] sm:$0xf]  ;;  %v15931_v14 = vor.u32 %v20197_v5, %v15930_v9  ;;  %5918 = vmatpush.bf16.msrb.mxu1 %v15675_v7  ;;  %v19961_v5 = vld [vmem:[%s22007_s30 + $0x5c4] sm:$0xf]  ;;  %v14495_v7 = vor.u32 %v19833_v54, %v14492_v60 }
 0x265   : > { %v20061_v12 = vld [vmem:[%s22007_s30 + $0x8dc] sm:$0xf0]  ;;  %v15007_v18 = vor.u32 %v19961_v5, %v15004_v25  ;;  %v14620_v60 = vld [vmem:[%s22007_s30 + $0x2e0] sm:$0xf0]  ;;  %v2610_v62 = vpop.f32.mrf.mxu1 }
 0x266   : > { %v15642_v8 = vld [vmem:[%s22007_s30 + $0xac0] sm:$0xf]  ;;  %v15387_v19 = vor.u32 %v20061_v12, %v15386_v10  ;;  %5931 = vmatpush.bf16.msrb.mxu2 %v15931_v14  ;;  %v14751_v10 = vor.u32 %v19897_v61, %v14748_v36  ;;  %v19793_v5 = vld [vmem:[%s22007_s30 + $0x84] sm:$0xf] }
 0x267   : > { %v20125_v51 = vld [vmem:[%s22007_s30 + $0xadc] sm:$0xf0] }
 0x268   : > { %v15898_v16 = vld [vmem:[%s22007_s30 + $0xcc0] sm:$0xf]  ;;  %v15643_v20 = vor.u32 %v20125_v51, %v15642_v8  ;;  %5906 = vmatpush.bf16.msrb.mxu0 %v15387_v19  ;;  %v14460_v51 = vld [vmem:[%s22007_s30 + $0x1a0] sm:$0xf0] }
 0x269   : > { %v20189_v17 = vld [vmem:[%s22007_s30 + $0xcdc] sm:$0xf0]  ;;  %v19953_v19 = vld [vmem:[%s22007_s30 + $0x584] sm:$0xf] }
 0x26a   : > { %v15354_v21 = vld [vmem:[%s22007_s30 + $0x880] sm:$0xf]  ;;  %v15899_v27 = vor.u32 %v20189_v17, %v15898_v16  ;;  %5919 = vmatpush.bf16.msrb.mxu1 %v15643_v20  ;;  %v22765_v17 = vpack.c.bf16 %v2748_v0, %v2748_v0  ;;  %v14972_v20 = vld [vmem:[%s22007_s30 + $0x5a0] sm:$0xf0] }
 0x26b   : > { %v20053_v22 = vld [vmem:[%s22007_s30 + $0x89c] sm:$0xf0]  ;;  %v14975_v29 = vor.u32 %v19953_v19, %v14972_v20  ;;  %v19929_v0 = vld [vmem:[%s22007_s30 + $0x4c4] sm:$0xf] }
 0x26c   : > { %v15610_v23 = vld [vmem:[%s22007_s30 + $0xa80] sm:$0xf]  ;;  %v15355_v31 = vor.u32 %v20053_v22, %v15354_v21  ;;  %5932 = vmatpush.bf16.msrb.mxu2 %v15899_v27  ;;  %v14463_v21 = vor.u32 %v19825_v11, %v14460_v51  ;;  %v14719_v22 = vor.u32 %v19889_v13, %v14716_v15  ;;  %v14428_v27 = vld [vmem:[%s22007_s30 + $0x160] sm:$0xf0] }
 0x26d   : > { %v20117_v24 = vld [vmem:[%s22007_s30 + $0xa9c] sm:$0xf0]  ;;  %v19857_v11 = vld [vmem:[%s22007_s30 + $0x284] sm:$0xf]  ;;  %v2623_v51 = vpop.f32.mrf.mxu2 }
 0x26e   : > { %v15866_v28 = vld [vmem:[%s22007_s30 + $0xc80] sm:$0xf]  ;;  %v15611_v32 = vor.u32 %v20117_v24, %v15610_v23  ;;  %5907 = vmatpush.bf16.msrb.mxu0 %v15355_v31  ;;  %v19817_v23 = vld [vmem:[%s22007_s30 + $0x144] sm:$0xf] }
 0x26f   : > { %v20181_v56 = vld [vmem:[%s22007_s30 + $0xc9c] sm:$0xf0]  ;;  %v19945_v31 = vld [vmem:[%s22007_s30 + $0x544] sm:$0xf] }
 0x270   : > { %v15322_v33 = vld [vmem:[%s22007_s30 + $0x840] sm:$0xf]  ;;  %v15867_v41 = vor.u32 %v20181_v56, %v15866_v28  ;;  %5920 = vmatpush.bf16.msrb.mxu1 %v15611_v32  ;;  %v14684_v28 = vld [vmem:[%s22007_s30 + $0x360] sm:$0xf0] }
 0x271   : > { %v20045_v35 = vld [vmem:[%s22007_s30 + $0x85c] sm:$0xf0]  ;;  %v14940_v32 = vld [vmem:[%s22007_s30 + $0x560] sm:$0xf0]  ;;  %v14687_v34 = vor.u32 %v19881_v42, %v14684_v28 }
 0x272   : > { %v15578_v37 = vld [vmem:[%s22007_s30 + $0xa40] sm:$0xf]  ;;  %v15323_v30 = vor.u32 %v20045_v35, %v15322_v33  ;;  %5933 = vmatpush.bf16.msrb.mxu2 %v15867_v41  ;;  %v14431_v33 = vor.u32 %v19817_v23, %v14428_v27  ;;  %v19809_v35 = vld [vmem:[%s22007_s30 + $0x104] sm:$0xf] }
 0x273   : > { %v20109_v39 = vld [vmem:[%s22007_s30 + $0xa5c] sm:$0xf0]  ;;  %v19873_v41 = vld [vmem:[%s22007_s30 + $0x304] sm:$0xf] }
 0x274   : > { %v15834_v43 = vld [vmem:[%s22007_s30 + $0xc40] sm:$0xf]  ;;  %v15579_v46 = vor.u32 %v20109_v39, %v15578_v37  ;;  %5908 = vmatpush.bf16.msrb.mxu0 %v15323_v30  ;;  %v19937_v30 = vld [vmem:[%s22007_s30 + $0x504] sm:$0xf] }
 0x275   : > { %v20173_v44 = vld [vmem:[%s22007_s30 + $0xc5c] sm:$0xf0]  ;;  %v19849_v27 = vld [vmem:[%s22007_s30 + $0x244] sm:$0xf] }
 0x276   : > { %v15290_v45 = vld [vmem:[%s22007_s30 + $0x800] sm:$0xf]  ;;  %v15835_v57 = vor.u32 %v20173_v44, %v15834_v43  ;;  %5921 = vmatpush.bf16.msrb.mxu1 %v15579_v46  ;;  %v14652_v43 = vld [vmem:[%s22007_s30 + $0x320] sm:$0xf0] }
 0x277   : > { %v20037_v48 = vld [vmem:[%s22007_s30 + $0x81c] sm:$0xf0]  ;;  %v14908_v46 = vld [vmem:[%s22007_s30 + $0x520] sm:$0xf0] }
 0x278   : > { %v15546_v49 = vld [vmem:[%s22007_s30 + $0xa00] sm:$0xf]  ;;  %v15291_v4 = vor.u32 %v20037_v48, %v15290_v45  ;;  %5934 = vmatpush.bf16.msrb.mxu2 %v15835_v57  ;;  %v14943_v45 = vor.u32 %v19945_v31, %v14940_v32  ;;  %v14399_v48 = vor.u32 %v19809_v35, %v14396_v40  ;;  %v2597_v57 = vpop.f32.mrf.mxu0  ;;  %v14556_v42 = vld [vmem:[%s22007_s30 + $0x260] sm:$0xf0] }
 0x279   : > { %v20101_v50 = vld [vmem:[%s22007_s30 + $0xa1c] sm:$0xf0]  ;;  %v2598_v36 = vadd.f32 %v2597_v57, %v1037_v38  ;;  %v19841_v35 = vld [vmem:[%s22007_s30 + $0x204] sm:$0xf] }
 0x27a   : > { %v16282_v58 = vld [vmem:[%s22007_s30 + $0xfc0] sm:$0xf]  ;;  %v15547_v9 = vor.u32 %v20101_v50, %v15546_v49  ;;  %5909 = vmatpush.bf16.msrb.mxu0 %v15291_v4  ;;  %v14655_v49 = vor.u32 %v19873_v41, %v14652_v43  ;;  %v19801_v50 = vld [vmem:[%s22007_s30 + $0xc4] sm:$0xf]  ;;  %v14559_v41 = vor.u32 %v19849_v27, %v14556_v42 }
 0x27b   : > { %v20285_v59 = vld [vmem:[%s22007_s30 + $0xfdc] sm:$0xf0]  ;;  %v14524_v43 = vld [vmem:[%s22007_s30 + $0x220] sm:$0xf0] }
 0x27c   : > { %v16283_v63 = vor.u32 %v20285_v59, %v16282_v58  ;;  %v15802_v1 = vld [vmem:[%s22007_s30 + $0xc00] sm:$0xf]  ;;  %5922 = vmatpush.bf16.msrb.mxu1 %v15547_v9  ;;  %v14364_v58 = vld [vmem:[%s22007_s30 + $0xe0] sm:$0xf0] }
 0x27d   : > { %v20165_v3 = vld [vmem:[%s22007_s30 + $0xc1c] sm:$0xf0]  ;;  %5910 = vmatmul.bf16.vlgmr.msrb.gmra.mxu0 %v22765_v17  ;;  %v19865_v59 = vld [vmem:[%s22007_s30 + $0x2c4] sm:$0xf]  ;;  %v14367_v4 = vor.u32 %v19801_v50, %v14364_v58  ;;  %v2625_v50 = vpop.f32.mrf.mxu2 }
 0x27e   : > { %5941 = vmatpush.bf16.msrb.mxu3 %v16283_v63  ;;  %v16250_v12 = vld [vmem:[%s22007_s30 + $0xf80] sm:$0xf]  ;;  %v15803_v14 = vor.u32 %v20165_v3, %v15802_v1  ;;  %5954 = vmatpush.bf16.msra.mxu0 %v14495_v7  ;;  %v14911_v63 = vor.u32 %v19937_v30, %v14908_v46  ;;  %v14876_v1 = vld [vmem:[%s22007_s30 + $0x4e0] sm:$0xf0]  ;;  %v2611_v3 = vadd.f32 %v2610_v62, %v2598_v36 }
 0x27f   : > { %v20277_v8 = vld [vmem:[%s22007_s30 + $0xf9c] sm:$0xf0]  ;;  %v14623_v9 = vor.u32 %v19865_v59, %v14620_v60  ;;  %v14879_v13 = vor.u32 %v19929_v0, %v14876_v1  ;;  %v15516_v30 = vld [vmem:[%s22007_s30 + $0x9e0] sm:$0xf0] }
 0x280   : > { %v16251_v16 = vor.u32 %v20277_v8, %v16250_v12  ;;  %5967 = vmatpush.bf16.msra.mxu1 %v14751_v10  ;;  %v16218_v24 = vld [vmem:[%s22007_s30 + $0xf40] sm:$0xf]  ;;  %5935 = vmatpush.bf16.msrb.mxu2 %v15803_v14  ;;  %v14332_v10 = vld [vmem:[%s22007_s30 + $0xa0] sm:$0xf0]  ;;  %v2624_v15 = vadd.f32 %v2623_v51, %v2611_v3  ;;  %v2636_v14 = vpop.f32.mrf.mxu3  ;;  %v2599_v28 = vpop.f32.mrf.mxu0 }
 0x281   : > { %v20269_v26 = vld [vmem:[%s22007_s30 + $0xf5c] sm:$0xf0]  ;;  %v14588_v12 = vld [vmem:[%s22007_s30 + $0x2a0] sm:$0xf0]  ;;  %v14335_v19 = vor.u32 %v19793_v5, %v14332_v10 }
 0x282   : > { %5942 = vmatpush.bf16.msrb.mxu3 %v16251_v16  ;;  %v16219_v56 = vor.u32 %v20269_v26, %v16218_v24  ;;  %5955 = vmatpush.bf16.msra.mxu0 %v14463_v21  ;;  %v16186_v37 = vld [vmem:[%s22007_s30 + $0xf00] sm:$0xf]  ;;  %v19921_v16 = vld [vmem:[%s22007_s30 + $0x484] sm:$0xf]  ;;  %v14591_v20 = vor.u32 %v19857_v11, %v14588_v12  ;;  %v2637_v24 = vadd.f32 %v2636_v14, %v2624_v15 }
 0x283   : > { %v20261_v39 = vld [vmem:[%s22007_s30 + $0xf1c] sm:$0xf0]  ;;  %v19785_v21 = vld [vmem:[%s22007_s30 + $0x44] sm:$0xf] }
 0x284   : > { %5980 = vmatpush.bf16.msra.mxu2 %v15007_v18  ;;  %5968 = vmatpush.bf16.msra.mxu1 %v14719_v22  ;;  %v16187_v44 = vor.u32 %v20261_v39, %v16186_v37  ;;  %v16154_v54 = vld [vmem:[%s22007_s30 + $0xec0] sm:$0xf]  ;;  %v14844_v18 = vld [vmem:[%s22007_s30 + $0x4a0] sm:$0xf0]  ;;  %v2749_v32 = vmax.f32 %v2637_v24, 0.0 }
 0x285   : > { %v20253_v55 = vld [vmem:[%s22007_s30 + $0xedc] sm:$0xf0]  ;;  %v14300_v26 = vld [vmem:[%s22007_s30 + $0x60] sm:$0xf0]  ;;  %v14847_v31 = vor.u32 %v19921_v16, %v14844_v18 }
 0x286   : > { %5943 = vmatpush.bf16.msrb.mxu3 %v16219_v56  ;;  %5956 = vmatpush.bf16.msra.mxu0 %v14431_v33  ;;  %v16155_v61 = vor.u32 %v20253_v55, %v16154_v54  ;;  %v16122_v25 = vld [vmem:[%s22007_s30 + $0xe80] sm:$0xf]  ;;  %v19777_v33 = vld [vmem:[%s22007_s30 + $0x4] sm:$0xf]  ;;  %v14303_v40 = vor.u32 %v19785_v21, %v14300_v26 }
 0x287   : > { %v20245_v7 = vld [vmem:[%s22007_s30 + $0xe9c] sm:$0xf0]  ;;  %v19913_v37 = vld [vmem:[%s22007_s30 + $0x444] sm:$0xf] }
 0x288   : > { %5981 = vmatpush.bf16.msra.mxu2 %v14975_v29  ;;  %5969 = vmatpush.bf16.msra.mxu1 %v14687_v34  ;;  %v16123_v8 = vor.u32 %v20245_v7, %v16122_v25  ;;  %v16090_v22 = vld [vmem:[%s22007_s30 + $0xe40] sm:$0xf]  ;;  %v2612_v29 = vpop.f32.mrf.mxu1  ;;  %v14268_v34 = vld [vmem:[%s22007_s30 + $0x20] sm:$0xf0]  ;;  %v2638_v59 = vpop.f32.mrf.mxu3 }
 0x289   : > { %v20237_v23 = vld [vmem:[%s22007_s30 + $0xe5c] sm:$0xf0]  ;;  %v14812_v39 = vld [vmem:[%s22007_s30 + $0x460] sm:$0xf0]  ;;  %v14271_v62 = vor.u32 %v19777_v33, %v14268_v34 }
 0x28a   : > { %5944 = vmatpush.bf16.msrb.mxu3 %v16187_v44  ;;  %5957 = vmatpush.bf16.msra.mxu0 %v14399_v48  ;;  %v16091_v56 = vor.u32 %v20237_v23, %v16090_v22  ;;  %v20089_v44 = vld [vmem:[%s22007_s30 + $0x9c4] sm:$0xf]  ;;  %v16058_v38 = vld [vmem:[%s22007_s30 + $0xe00] sm:$0xf]  ;;  %v14815_v54 = vor.u32 %v19913_v37, %v14812_v39 }
 0x28b   : > { %v20153_v46 = vld [vmem:[%s22007_s30 + $0xbc4] sm:$0xf]  ;;  %v20229_v48 = vld [vmem:[%s22007_s30 + $0xe1c] sm:$0xf0]  ;;  %v15519_v0 = vor.u32 %v20089_v44, %v15516_v30 }
 0x28c   : > { %5982 = vmatpush.bf16.msra.mxu2 %v14943_v45  ;;  %5970 = vmatpush.bf16.msra.mxu1 %v14655_v49  ;;  %v22817_v45 = vpack.c.bf16 %v2749_v32, %v2749_v32  ;;  %v15772_v49 = vld [vmem:[%s22007_s30 + $0xbe0] sm:$0xf0]  ;;  %v16059_v55 = vor.u32 %v20229_v48, %v16058_v38 }
 0x28d   : > { %v20025_v57 = vld [vmem:[%s22007_s30 + $0x7c4] sm:$0xf]  ;;  %v15775_v1 = vor.u32 %v20153_v46, %v15772_v49  ;;  %v2675_v59 = vpop.f32.mrf.mxu2 }
 0x28e   : > { %5945 = vmatpush.bf16.msrb.mxu3 %v16155_v61  ;;  %5958 = vmatpush.bf16.msra.mxu0 %v14367_v4  ;;  %v15260_v58 = vld [vmem:[%s22007_s30 + $0x7e0] sm:$0xf0] }
 0x28f   : > { %5923 = vmatmul.bf16.vlgmr.msrb.gmra.mxu1 %v22817_v45  ;;  %v19905_v60 = vld [vmem:[%s22007_s30 + $0x404] sm:$0xf]  ;;  %v15263_v36 = vor.u32 %v20025_v57, %v15260_v58 }
 0x290   : > { %5983 = vmatpush.bf16.msra.mxu2 %v14911_v63  ;;  %5971 = vmatpush.bf16.msra.mxu1 %v14623_v9  ;;  %v14780_v61 = vld [vmem:[%s22007_s30 + $0x420] sm:$0xf0]  ;;  %v14527_v63 = vor.u32 %v19841_v35, %v14524_v43  ;;  %v2662_v44 = vpop.f32.mrf.mxu1 }
 0x291   : > { %v20081_v3 = vld [vmem:[%s22007_s30 + $0x984] sm:$0xf]  ;;  %v14783_v25 = vor.u32 %v19905_v60, %v14780_v61  ;;  %v2688_v61 = vpop.f32.mrf.mxu3 }
 0x292   : > { %5946 = vmatpush.bf16.msrb.mxu3 %v16123_v8  ;;  %5959 = vmatpush.bf16.msra.mxu0 %v14335_v19  ;;  %v15484_v4 = vld [vmem:[%s22007_s30 + $0x9a0] sm:$0xf0] }
 0x293   : > { %v20145_v9 = vld [vmem:[%s22007_s30 + $0xb84] sm:$0xf]  ;;  %v15487_v12 = vor.u32 %v20081_v3, %v15484_v4 }
 0x294   : > { %5984 = vmatpush.bf16.msra.mxu2 %v14879_v13  ;;  %5972 = vmatpush.bf16.msra.mxu1 %v14591_v20  ;;  %v15740_v5 = vld [vmem:[%s22007_s30 + $0xba0] sm:$0xf0] }
 0x295   : > { %v20017_v7 = vld [vmem:[%s22007_s30 + $0x784] sm:$0xf]  ;;  %v15743_v8 = vor.u32 %v20145_v9, %v15740_v5 }
 0x296   : > { %5947 = vmatpush.bf16.msrb.mxu3 %v16091_v56  ;;  %5960 = vmatpush.bf16.msra.mxu0 %v14303_v40  ;;  %v15228_v10 = vld [vmem:[%s22007_s30 + $0x7a0] sm:$0xf0]  ;;  %v1038_v56 = vperm.slane %v22722_v2, 6 }
 0x297   : > { %v15231_v11 = vor.u32 %v20017_v7, %v15228_v10  ;;  %v20073_v51 = vld [vmem:[%s22007_s30 + $0x944] sm:$0xf] }
 0x298   : > { %5985 = vmatpush.bf16.msra.mxu2 %v14847_v31  ;;  %5973 = vmatpush.bf16.msra.mxu1 %v14559_v41  ;;  %v20009_v13 = vld [vmem:[%s22007_s30 + $0x744] sm:$0xf]  ;;  %v2649_v41 = vpop.f32.mrf.mxu0 }
 0x299   : > { %v15196_v15 = vld [vmem:[%s22007_s30 + $0x760] sm:$0xf0]  ;;  %v2650_v43 = vadd.f32 %v2649_v41, %v1038_v56  ;;  %v14722_v41 = vld [vmem:[%s22007_s30 + $0x388] sm:$0xf] }
 0x29a   : > { %5948 = vmatpush.bf16.msrb.mxu3 %v16059_v55  ;;  %5961 = vmatpush.bf16.msra.mxu0 %v14271_v62  ;;  %v15452_v14 = vld [vmem:[%s22007_s30 + $0x960] sm:$0xf0]  ;;  %v15199_v19 = vor.u32 %v20009_v13, %v15196_v15 }
 0x29b   : > { %v20137_v16 = vld [vmem:[%s22007_s30 + $0xb44] sm:$0xf]  ;;  %v15455_v20 = vor.u32 %v20073_v51, %v15452_v14  ;;  %v2663_v50 = vadd.f32 %v2662_v44, %v2650_v43  ;;  %v19894_v43 = vld [vmem:[%s22007_s30 + $0x3a4] sm:$0xf0] }
 0x29c   : > { %5986 = vmatpush.bf16.msra.mxu2 %v14815_v54  ;;  %5974 = vmatpush.bf16.msra.mxu1 %v14527_v63  ;;  %v15708_v18 = vld [vmem:[%s22007_s30 + $0xb60] sm:$0xf0] }
 0x29d   : > { %5962 = vmatmul.bf16.vlgmr.msra.gmra.mxu0 %v22698_v47  ;;  %v15711_v21 = vor.u32 %v20137_v16, %v15708_v18  ;;  %v20065_v22 = vld [vmem:[%s22007_s30 + $0x904] sm:$0xf]  ;;  %v2676_v60 = vadd.f32 %v2675_v59, %v2663_v50  ;;  %v19822_v50 = vld [vmem:[%s22007_s30 + $0x164] sm:$0xf0] }
 0x29e   : > { %5993 = vmatpush.bf16.msra.mxu3 %v15263_v36  ;;  %6006 = vmatpush.bf16.msrb.mxu0 %v15519_v0  ;;  %v20001_v23 = vld [vmem:[%s22007_s30 + $0x704] sm:$0xf] }
 0x29f   : > { %v15164_v24 = vld [vmem:[%s22007_s30 + $0x720] sm:$0xf0]  ;;  %5975 = vmatmul.bf16.vlgmr.msra.gmra.mxu1 %v22700_v6 }
 0x2a0   : > { %6019 = vmatpush.bf16.msrb.mxu1 %v15775_v1  ;;  %5987 = vmatpush.bf16.msra.mxu2 %v14783_v25  ;;  %v15420_v26 = vld [vmem:[%s22007_s30 + $0x920] sm:$0xf0]  ;;  %v15167_v28 = vor.u32 %v20001_v23, %v15164_v24  ;;  %v2689_v25 = vadd.f32 %v2688_v61, %v2676_v60  ;;  %v2651_v7 = vpop.f32.mrf.mxu0  ;;  %v19838_v24 = vld [vmem:[%s22007_s30 + $0x1e4] sm:$0xf0] }
 0x2a1   : > { %v20129_v27 = vld [vmem:[%s22007_s30 + $0xb04] sm:$0xf]  ;;  %v15423_v29 = vor.u32 %v20065_v22, %v15420_v26  ;;  %v14754_v26 = vld [vmem:[%s22007_s30 + $0x3c8] sm:$0xf] }
 0x2a2   : > { %5994 = vmatpush.bf16.msra.mxu3 %v15231_v11  ;;  %6007 = vmatpush.bf16.msrb.mxu0 %v15487_v12  ;;  %v15676_v42 = vld [vmem:[%s22007_s30 + $0xb20] sm:$0xf0]  ;;  %v2664_v12 = vpop.f32.mrf.mxu1  ;;  %v2750_v13 = vmax.f32 %v2689_v25, 0.0  ;;  %v14402_v61 = vld [vmem:[%s22007_s30 + $0x108] sm:$0xf] }
 0x2a3   : > { %v15679_v31 = vor.u32 %v20129_v27, %v15676_v42  ;;  %v20057_v32 = vld [vmem:[%s22007_s30 + $0x8c4] sm:$0xf]  ;;  %v19902_v27 = vld [vmem:[%s22007_s30 + $0x3e4] sm:$0xf0] }
 0x2a4   : > { %6020 = vmatpush.bf16.msrb.mxu1 %v15743_v8  ;;  %v19993_v33 = vld [vmem:[%s22007_s30 + $0x6c4] sm:$0xf]  ;;  %v22876_v22 = vpack.c.bf16 %v2750_v13, %v2750_v13  ;;  %v14370_v25 = vld [vmem:[%s22007_s30 + $0xc8] sm:$0xf] }
 0x2a5   : > { %v15132_v34 = vld [vmem:[%s22007_s30 + $0x6e0] sm:$0xf0]  ;;  %v19806_v7 = vld [vmem:[%s22007_s30 + $0xe4] sm:$0xf0] }
 0x2a6   : > { %5995 = vmatpush.bf16.msra.mxu3 %v15199_v19  ;;  %6008 = vmatpush.bf16.msrb.mxu0 %v15455_v20  ;;  %v15388_v35 = vld [vmem:[%s22007_s30 + $0x8e0] sm:$0xf0]  ;;  %v15135_v40 = vor.u32 %v19993_v33, %v15132_v34  ;;  %v14498_v20 = vld [vmem:[%s22007_s30 + $0x1c8] sm:$0xf]  ;;  %v2690_v33 = vpop.f32.mrf.mxu3 }
 0x2a7   : > { %v20121_v37 = vld [vmem:[%s22007_s30 + $0xac4] sm:$0xf]  ;;  %v15391_v38 = vor.u32 %v20057_v32, %v15388_v35  ;;  %5936 = vmatmul.bf16.vlgmr.msrb.gmra.mxu2 %v22876_v22  ;;  %v14499_v34 = vor.u32 %v19838_v24, %v14498_v20  ;;  %v14755_v35 = vor.u32 %v19902_v27, %v14754_v26  ;;  %v14594_v20 = vld [vmem:[%s22007_s30 + $0x288] sm:$0xf] }
 0x2a8   : > { %6021 = vmatpush.bf16.msrb.mxu1 %v15711_v21  ;;  %v15644_v39 = vld [vmem:[%s22007_s30 + $0xae0] sm:$0xf0]  ;;  %v2701_v12 = vpop.f32.mrf.mxu0  ;;  %v14562_v33 = vld [vmem:[%s22007_s30 + $0x248] sm:$0xf] }
 0x2a9   : > { %v15647_v30 = vor.u32 %v20121_v37, %v15644_v39  ;;  %v20049_v46 = vld [vmem:[%s22007_s30 + $0x884] sm:$0xf]  ;;  %v14466_v37 = vld [vmem:[%s22007_s30 + $0x188] sm:$0xf] }
 0x2aa   : > { %5996 = vmatpush.bf16.msra.mxu3 %v15167_v28  ;;  %6009 = vmatpush.bf16.msrb.mxu0 %v15423_v29  ;;  %v19985_v48 = vld [vmem:[%s22007_s30 + $0x684] sm:$0xf]  ;;  %v2677_v28 = vpop.f32.mrf.mxu2 }
 0x2ab   : > { %v15100_v49 = vld [vmem:[%s22007_s30 + $0x6a0] sm:$0xf0] }
 0x2ac   : > { %6022 = vmatpush.bf16.msrb.mxu1 %v15679_v31  ;;  %v15356_v54 = vld [vmem:[%s22007_s30 + $0x8a0] sm:$0xf0]  ;;  %v15103_v58 = vor.u32 %v19985_v48, %v15100_v49  ;;  %v14434_v48 = vld [vmem:[%s22007_s30 + $0x148] sm:$0xf] }
 0x2ad   : > { %v20113_v55 = vld [vmem:[%s22007_s30 + $0xa84] sm:$0xf]  ;;  %v15359_v36 = vor.u32 %v20049_v46, %v15356_v54  ;;  %v14723_v46 = vor.u32 %v19894_v43, %v14722_v41  ;;  %v14690_v54 = vld [vmem:[%s22007_s30 + $0x348] sm:$0xf]  ;;  %v14435_v59 = vor.u32 %v19822_v50, %v14434_v48 }
 0x2ae   : > { %v15612_v57 = vld [vmem:[%s22007_s30 + $0xaa0] sm:$0xf0]  ;;  %5997 = vmatpush.bf16.msra.mxu3 %v15135_v40  ;;  %6010 = vmatpush.bf16.msrb.mxu0 %v15391_v38  ;;  %v19830_v40 = vld [vmem:[%s22007_s30 + $0x1a4] sm:$0xf0] }
 0x2af   : > { %v15615_v62 = vor.u32 %v20113_v55, %v15612_v57  ;;  %v20041_v63 = vld [vmem:[%s22007_s30 + $0x844] sm:$0xf]  ;;  %v19886_v55 = vld [vmem:[%s22007_s30 + $0x364] sm:$0xf0] }
 0x2b0   : > { %6023 = vmatpush.bf16.msrb.mxu1 %v15647_v30  ;;  %v19977_v0 = vld [vmem:[%s22007_s30 + $0x644] sm:$0xf]  ;;  %v14467_v30 = vor.u32 %v19830_v40, %v14466_v37  ;;  %v14691_v60 = vor.u32 %v19886_v55, %v14690_v54  ;;  %v2703_v37 = vpop.f32.mrf.mxu0  ;;  %v19966_v50 = vld [vmem:[%s22007_s30 + $0x5e4] sm:$0xf0] }
 0x2b1   : > { %v15068_v1 = vld [vmem:[%s22007_s30 + $0x660] sm:$0xf0]  ;;  %v14274_v54 = vld [vmem:[%s22007_s30 + $0x8] sm:$0xf] }
 0x2b2   : > { %v15324_v3 = vld [vmem:[%s22007_s30 + $0x860] sm:$0xf0]  ;;  %5998 = vmatpush.bf16.msra.mxu3 %v15103_v58  ;;  %v15071_v5 = vor.u32 %v19977_v0, %v15068_v1  ;;  %6011 = vmatpush.bf16.msrb.mxu0 %v15359_v36  ;;  %v19878_v0 = vld [vmem:[%s22007_s30 + $0x324] sm:$0xf0]  ;;  %v1039_v1 = vperm.slane %v22722_v2, 7 }
 0x2b3   : > { %v20105_v4 = vld [vmem:[%s22007_s30 + $0xa44] sm:$0xf]  ;;  %v15327_v15 = vor.u32 %v20041_v63, %v15324_v3  ;;  %v14658_v63 = vld [vmem:[%s22007_s30 + $0x308] sm:$0xf] }
 0x2b4   : > { %v15580_v9 = vld [vmem:[%s22007_s30 + $0xa60] sm:$0xf0]  ;;  %6024 = vmatpush.bf16.msrb.mxu1 %v15615_v62  ;;  %v19814_v62 = vld [vmem:[%s22007_s30 + $0x124] sm:$0xf0] }
 0x2b5   : > { %v20217_v10 = vld [vmem:[%s22007_s30 + $0xdc4] sm:$0xf]  ;;  %v15583_v14 = vor.u32 %v20105_v4, %v15580_v9  ;;  %v14403_v9 = vor.u32 %v19814_v62, %v14402_v61  ;;  %v19782_v55 = vld [vmem:[%s22007_s30 + $0x24] sm:$0xf0] }
 0x2b6   : > { %v16028_v11 = vld [vmem:[%s22007_s30 + $0xde0] sm:$0xf0]  ;;  %5999 = vmatpush.bf16.msra.mxu3 %v15071_v5  ;;  %6012 = vmatpush.bf16.msrb.mxu0 %v15327_v15  ;;  %v14659_v5 = vor.u32 %v19878_v0, %v14658_v63  ;;  %v15522_v61 = vld [vmem:[%s22007_s30 + $0x9c8] sm:$0xf] }
 0x2b7   : > { %v20033_v8 = vld [vmem:[%s22007_s30 + $0x804] sm:$0xf]  ;;  %v16031_v23 = vor.u32 %v20217_v10, %v16028_v11  ;;  %v14626_v10 = vld [vmem:[%s22007_s30 + $0x2c8] sm:$0xf]  ;;  %5988 = vmatmul.bf16.vlgmr.msra.gmra.mxu2 %v22703_v52 }
 0x2b8   : > { %v15292_v51 = vld [vmem:[%s22007_s30 + $0x820] sm:$0xf0]  ;;  %6025 = vmatpush.bf16.msrb.mxu1 %v15583_v14  ;;  %v19870_v11 = vld [vmem:[%s22007_s30 + $0x2e4] sm:$0xf0]  ;;  %v14371_v14 = vor.u32 %v19806_v7, %v14370_v25 }
 0x2b9   : > { %v20097_v16 = vld [vmem:[%s22007_s30 + $0xa04] sm:$0xf]  ;;  %v15295_v31 = vor.u32 %v20033_v8, %v15292_v51  ;;  %6032 = vmatpush.bf16.msrb.mxu2 %v16031_v23  ;;  %v2714_v8 = vpop.f32.mrf.mxu1  ;;  %v2702_v51 = vadd.f32 %v2701_v12, %v1039_v1  ;;  %v15778_v0 = vld [vmem:[%s22007_s30 + $0xbc8] sm:$0xf] }
 0x2ba   : > { %v19969_v18 = vld [vmem:[%s22007_s30 + $0x604] sm:$0xf]  ;;  %v20158_v1 = vld [vmem:[%s22007_s30 + $0xbe4] sm:$0xf0] }
 0x2bb   : > { %v15548_v19 = vld [vmem:[%s22007_s30 + $0xa20] sm:$0xf0]  ;;  %6013 = vmatpush.bf16.msrb.mxu0 %v15295_v31  ;;  %v2715_v23 = vadd.f32 %v2714_v8, %v2702_v51  ;;  %v2740_v31 = vpop.f32.mrf.mxu3  ;;  %v14978_v7 = vld [vmem:[%s22007_s30 + $0x588] sm:$0xf] }
 0x2bc   : > { %v15036_v21 = vld [vmem:[%s22007_s30 + $0x620] sm:$0xf0]  ;;  %v15551_v32 = vor.u32 %v20097_v16, %v15548_v19  ;;  %v14627_v16 = vor.u32 %v19870_v11, %v14626_v10  ;;  %v19798_v19 = vld [vmem:[%s22007_s30 + $0xa4] sm:$0xf0] }
 0x2bd   : > { %v15039_v42 = vor.u32 %v19969_v18, %v15036_v21  ;;  %v20209_v56 = vld [vmem:[%s22007_s30 + $0xd84] sm:$0xf]  ;;  %v14338_v18 = vld [vmem:[%s22007_s30 + $0x88] sm:$0xf] }
 0x2be   : > { %v15996_v29 = vld [vmem:[%s22007_s30 + $0xda0] sm:$0xf0]  ;;  %6026 = vmatpush.bf16.msrb.mxu1 %v15551_v32  ;;  %6014 = vmatmul.bf16.vlgmr.msrb.gmra.mxu0 %v22765_v17  ;;  %v19862_v21 = vld [vmem:[%s22007_s30 + $0x2a4] sm:$0xf0] }
 0x2bf   : > { %6000 = vmatpush.bf16.msra.mxu3 %v15039_v42  ;;  %v15999_v39 = vor.u32 %v20209_v56, %v15996_v29  ;;  %v20201_v44 = vld [vmem:[%s22007_s30 + $0xd44] sm:$0xf]  ;;  %6058 = vmatpush.bf16.msra.mxu0 %v14499_v34  ;;  %v14339_v42 = vor.u32 %v19798_v19, %v14338_v18  ;;  %v14595_v28 = vor.u32 %v19862_v21, %v14594_v20  ;;  %v14306_v56 = vld [vmem:[%s22007_s30 + $0x48] sm:$0xf]  ;;  %v2727_v29 = vpop.f32.mrf.mxu2 }
 0x2c0   : > { %v15964_v38 = vld [vmem:[%s22007_s30 + $0xd60] sm:$0xf0]  ;;  %v19790_v32 = vld [vmem:[%s22007_s30 + $0x64] sm:$0xf0] }
 0x2c1   : > { %6033 = vmatpush.bf16.msrb.mxu2 %v15999_v39  ;;  %v15967_v49 = vor.u32 %v20201_v44, %v15964_v38  ;;  %6027 = vmatmul.bf16.vlgmr.msrb.gmra.mxu1 %v22817_v45  ;;  %v20193_v57 = vld [vmem:[%s22007_s30 + $0xd04] sm:$0xf]  ;;  %v19854_v34 = vld [vmem:[%s22007_s30 + $0x264] sm:$0xf0]  ;;  %v2716_v39 = vpop.f32.mrf.mxu1 }
 0x2c2   : > { %6071 = vmatpush.bf16.msra.mxu1 %v14755_v35  ;;  %v15932_v58 = vld [vmem:[%s22007_s30 + $0xd20] sm:$0xf0]  ;;  %v2728_v35 = vadd.f32 %v2727_v29, %v2715_v23  ;;  %v14563_v48 = vor.u32 %v19854_v34, %v14562_v33  ;;  %v19958_v10 = vld [vmem:[%s22007_s30 + $0x5a4] sm:$0xf0] }
 0x2c3   : > { %6059 = vmatpush.bf16.msra.mxu0 %v14467_v30  ;;  %v15935_v36 = vor.u32 %v20193_v57, %v15932_v58  ;;  %v20185_v3 = vld [vmem:[%s22007_s30 + $0xcc4] sm:$0xf]  ;;  %v14530_v57 = vld [vmem:[%s22007_s30 + $0x208] sm:$0xf]  ;;  %v2742_v12 = vpop.f32.mrf.mxu3 }
 0x2c4   : > { %v15900_v4 = vld [vmem:[%s22007_s30 + $0xce0] sm:$0xf0]  ;;  %v2741_v30 = vadd.f32 %v2740_v31, %v2728_v35  ;;  %v19846_v58 = vld [vmem:[%s22007_s30 + $0x224] sm:$0xf0] }
 0x2c5   : > { %6034 = vmatpush.bf16.msrb.mxu2 %v15967_v49  ;;  %v15903_v2 = vor.u32 %v20185_v3, %v15900_v4  ;;  %v20177_v13 = vld [vmem:[%s22007_s30 + $0xc84] sm:$0xf]  ;;  %v15010_v49 = vld [vmem:[%s22007_s30 + $0x5c8] sm:$0xf] }
 0x2c6   : > { %6072 = vmatpush.bf16.msra.mxu1 %v14723_v46  ;;  %v15868_v15 = vld [vmem:[%s22007_s30 + $0xca0] sm:$0xf0]  ;;  %v14307_v46 = vor.u32 %v19790_v32, %v14306_v56  ;;  %v15011_v63 = vor.u32 %v19966_v50, %v15010_v49  ;;  %v15490_v51 = vld [vmem:[%s22007_s30 + $0x988] sm:$0xf] }
 0x2c7   : > { %6060 = vmatpush.bf16.msra.mxu0 %v14435_v59  ;;  %v15871_v24 = vor.u32 %v20177_v13, %v15868_v15  ;;  %v20169_v26 = vld [vmem:[%s22007_s30 + $0xc44] sm:$0xf]  ;;  %v2751_v59 = vmax.f32 %v2741_v30, 0.0  ;;  %v2729_v11 = vpop.f32.mrf.mxu2  ;;  %v20086_v13 = vld [vmem:[%s22007_s30 + $0x9a4] sm:$0xf0] }
 0x2c8   : > { %v15836_v27 = vld [vmem:[%s22007_s30 + $0xc60] sm:$0xf0]  ;;  %v20150_v18 = vld [vmem:[%s22007_s30 + $0xba4] sm:$0xf0] }
 0x2c9   : > { %6035 = vmatpush.bf16.msrb.mxu2 %v15935_v36  ;;  %v15839_v40 = vor.u32 %v20169_v26, %v15836_v27  ;;  %v20161_v41 = vld [vmem:[%s22007_s30 + $0xc04] sm:$0xf]  ;;  %v20094_v36 = vld [vmem:[%s22007_s30 + $0x9e4] sm:$0xf0]  ;;  %v22937_v4 = vpack.c.bf16 %v2751_v59, %v2751_v59 }
 0x2ca   : > { %6073 = vmatpush.bf16.msra.mxu1 %v14691_v60  ;;  %v15804_v43 = vld [vmem:[%s22007_s30 + $0xc20] sm:$0xf0]  ;;  %v15523_v8 = vor.u32 %v20094_v36, %v15522_v61  ;;  %v14946_v21 = vld [vmem:[%s22007_s30 + $0x548] sm:$0xf]  ;;  %v5859_v61 = vpop.f32.mrf.mxu0 }
 0x2cb   : > { %6061 = vmatpush.bf16.msra.mxu0 %v14403_v9  ;;  %v20281_v44 = vld [vmem:[%s22007_s30 + $0xfc4] sm:$0xf]  ;;  %v15807_v60 = vor.u32 %v20161_v41, %v15804_v43  ;;  %v14275_v9 = vor.u32 %v19782_v55, %v14274_v54  ;;  %5949 = vmatmul.bf16.vlgmr.msrb.gmra.mxu3 %v22937_v4  ;;  %v19950_v23 = vld [vmem:[%s22007_s30 + $0x564] sm:$0xf0] }
 0x2cc   : > { %v16284_v38 = vld [vmem:[%s22007_s30 + $0xfe0] sm:$0xf0]  ;;  %v15458_v27 = vld [vmem:[%s22007_s30 + $0x948] sm:$0xf]  ;;  %v14947_v29 = vor.u32 %v19950_v23, %v14946_v21 }
 0x2cd   : > { %6036 = vmatpush.bf16.msrb.mxu2 %v15903_v2  ;;  %v16287_v62 = vor.u32 %v20281_v44, %v16284_v38  ;;  %v20273_v3 = vld [vmem:[%s22007_s30 + $0xf84] sm:$0xf]  ;;  %v15779_v2 = vor.u32 %v20158_v1, %v15778_v0  ;;  %v20142_v31 = vld [vmem:[%s22007_s30 + $0xb64] sm:$0xf0] }
 0x2ce   : > { %6074 = vmatpush.bf16.msra.mxu1 %v14659_v5  ;;  %v14531_v5 = vor.u32 %v19846_v58, %v14530_v57  ;;  %v16252_v25 = vld [vmem:[%s22007_s30 + $0xfa0] sm:$0xf0]  ;;  %v14914_v35 = vld [vmem:[%s22007_s30 + $0x508] sm:$0xf] }
 0x2cf   : > { %6062 = vmatpush.bf16.msra.mxu0 %v14371_v14  ;;  %6045 = vmatpush.bf16.msrb.mxu3 %v16287_v62  ;;  %v16255_v15 = vor.u32 %v20273_v3, %v16252_v25  ;;  %v14979_v14 = vor.u32 %v19958_v10, %v14978_v7  ;;  %v20265_v19 = vld [vmem:[%s22007_s30 + $0xf44] sm:$0xf]  ;;  %v19942_v37 = vld [vmem:[%s22007_s30 + $0x524] sm:$0xf0] }
 0x2d0   : > { %v16220_v20 = vld [vmem:[%s22007_s30 + $0xf60] sm:$0xf0]  ;;  %v15426_v43 = vld [vmem:[%s22007_s30 + $0x908] sm:$0xf]  ;;  %v14915_v30 = vor.u32 %v19942_v37, %v14914_v35 }
 0x2d1   : > { %6037 = vmatpush.bf16.msrb.mxu2 %v15871_v24  ;;  %v15491_v24 = vor.u32 %v20086_v13, %v15490_v51  ;;  %v16223_v56 = vor.u32 %v20265_v19, %v16220_v20  ;;  %v20257_v32 = vld [vmem:[%s22007_s30 + $0xf04] sm:$0xf]  ;;  %v20070_v44 = vld [vmem:[%s22007_s30 + $0x924] sm:$0xf0] }
 0x2d2   : > { %6075 = vmatpush.bf16.msra.mxu1 %v14627_v16  ;;  %v15746_v16 = vld [vmem:[%s22007_s30 + $0xb88] sm:$0xf]  ;;  %v16188_v34 = vld [vmem:[%s22007_s30 + $0xf20] sm:$0xf0]  ;;  %v15427_v57 = vor.u32 %v20070_v44, %v15426_v43 }
 0x2d3   : > { %6063 = vmatpush.bf16.msra.mxu0 %v14339_v42  ;;  %v15747_v26 = vor.u32 %v20150_v18, %v15746_v16  ;;  %v20078_v42 = vld [vmem:[%s22007_s30 + $0x964] sm:$0xf0]  ;;  %6046 = vmatpush.bf16.msrb.mxu3 %v16255_v15  ;;  %v16191_v38 = vor.u32 %v20257_v32, %v16188_v34  ;;  %v20249_v49 = vld [vmem:[%s22007_s30 + $0xec4] sm:$0xf] }
 0x2d4   : > { %v22958_v33 = vld [vmem:[%s22014_s15] sm:$0xff]  ;;  %v15459_v39 = vor.u32 %v20078_v42, %v15458_v27  ;;  %v5885_v42 = vpop.f32.mrf.mxu2 }
 0x2d5   : > { %6038 = vmatpush.bf16.msrb.mxu2 %v15839_v40  ;;  %v3274_v41 = vperm.slane %v22958_v33, 0  ;;  %v16156_v50 = vld [vmem:[%s22007_s30 + $0xee0] sm:$0xf0]  ;;  %v14882_v54 = vld [vmem:[%s22007_s30 + $0x4c8] sm:$0xf] }
 0x2d6   : > { %6076 = vmatpush.bf16.msra.mxu1 %v14595_v28  ;;  %v15714_v28 = vld [vmem:[%s22007_s30 + $0xb48] sm:$0xf]  ;;  %v16159_v36 = vor.u32 %v20249_v49, %v16156_v50  ;;  %v20241_v1 = vld [vmem:[%s22007_s30 + $0xe84] sm:$0xf] }
 0x2d7   : > { %6064 = vmatpush.bf16.msra.mxu0 %v14307_v46  ;;  %v15715_v40 = vor.u32 %v20142_v31, %v15714_v28  ;;  %6047 = vmatpush.bf16.msrb.mxu3 %v16223_v56  ;;  %v15682_v46 = vld [vmem:[%s22007_s30 + $0xb08] sm:$0xf]  ;;  %v5860_v3 = vadd.f32 %v5859_v61, %v3274_v41  ;;  %v20233_v16 = vld [vmem:[%s22007_s30 + $0xe44] sm:$0xf]  ;;  %v5861_v28 = vpop.f32.mrf.mxu0 }
 0x2d8   : > { %v19934_v55 = vld [vmem:[%s22007_s30 + $0x4e4] sm:$0xf0]  ;;  %v16092_v18 = vld [vmem:[%s22007_s30 + $0xe60] sm:$0xf0]  ;;  %v19882_v28 = vld [vmem:[%s22007_s30 + $0x34c] sm:$0xf] }
 0x2d9   : > { %6039 = vmatpush.bf16.msrb.mxu2 %v15807_v60  ;;  %v15394_v59 = vld [vmem:[%s22007_s30 + $0x8c8] sm:$0xf]  ;;  %v14883_v62 = vor.u32 %v19934_v55, %v14882_v54  ;;  %v16095_v56 = vor.u32 %v20233_v16, %v16092_v18  ;;  %v20225_v32 = vld [vmem:[%s22007_s30 + $0xe04] sm:$0xf] }
 0x2da   : > { %6077 = vmatpush.bf16.msra.mxu1 %v14563_v48  ;;  %v20134_v48 = vld [vmem:[%s22007_s30 + $0xb24] sm:$0xf0]  ;;  %v16060_v34 = vld [vmem:[%s22007_s30 + $0xe20] sm:$0xf0]  ;;  %v5898_v43 = vpop.f32.mrf.mxu3 }
 0x2db   : > { %6065 = vmatpush.bf16.msra.mxu0 %v14275_v9  ;;  %v15683_v58 = vor.u32 %v20134_v48, %v15682_v46  ;;  %v20062_v60 = vld [vmem:[%s22007_s30 + $0x8e4] sm:$0xf0]  ;;  %6048 = vmatpush.bf16.msrb.mxu3 %v16191_v38  ;;  %v5872_v9 = vpop.f32.mrf.mxu1  ;;  %v16063_v55 = vor.u32 %v20225_v32, %v16060_v34 }
 0x2dc   : > { %6040 = vmatmul.bf16.vlgmr.msrb.gmra.mxu2 %v22876_v22  ;;  %v20126_v0 = vld [vmem:[%s22007_s30 + $0xae4] sm:$0xf0]  ;;  %v15395_v10 = vor.u32 %v20062_v60, %v15394_v59  ;;  %v5873_v11 = vadd.f32 %v5872_v9, %v5860_v3  ;;  %6001 = vmatmul.bf16.vlgmr.msra.gmra.mxu3 %v22705_v53 }
 0x2dd   : > { %6084 = vmatpush.bf16.msra.mxu2 %v15011_v63  ;;  %v15650_v63 = vld [vmem:[%s22007_s30 + $0xac8] sm:$0xf] }
 0x2de   : > { %6078 = vmatpush.bf16.msra.mxu1 %v14531_v5  ;;  %6066 = vmatmul.bf16.vlgmr.msra.gmra.mxu0 %v22698_v47  ;;  %v16124_v5 = vld [vmem:[%s22007_s30 + $0xea0] sm:$0xf0]  ;;  %v14850_v25 = vld [vmem:[%s22007_s30 + $0x488] sm:$0xf]  ;;  %v15651_v12 = vor.u32 %v20126_v0, %v15650_v63  ;;  %v5886_v35 = vadd.f32 %v5885_v42, %v5873_v11  ;;  %v19898_v63 = vld [vmem:[%s22007_s30 + $0x3cc] sm:$0xf] }
 0x2df   : > { %6110 = vmatpush.bf16.msrb.mxu0 %v15523_v8  ;;  %v19926_v7 = vld [vmem:[%s22007_s30 + $0x4a4] sm:$0xf0]  ;;  %6049 = vmatpush.bf16.msrb.mxu3 %v16159_v36  ;;  %v16127_v51 = vor.u32 %v20241_v1, %v16124_v5  ;;  %v19834_v36 = vld [vmem:[%s22007_s30 + $0x1cc] sm:$0xf] }
 0x2e0   : > { %v15362_v8 = vld [vmem:[%s22007_s30 + $0x888] sm:$0xf]  ;;  %v14851_v13 = vor.u32 %v19926_v7, %v14850_v25  ;;  %v23003_v48 = vadd.f32 %v5898_v43, %v5886_v35  ;;  %v14756_v1 = vld [vmem:[%s22007_s30 + $0x3e8] sm:$0xf0] }
 0x2e1   : > { %6085 = vmatpush.bf16.msra.mxu2 %v14979_v14  ;;  %6079 = vmatmul.bf16.vlgmr.msra.gmra.mxu1 %v22700_v6  ;;  %v15618_v15 = vld [vmem:[%s22007_s30 + $0xa88] sm:$0xf]  ;;  %v14436_v42 = vld [vmem:[%s22007_s30 + $0x168] sm:$0xf0] }
 0x2e2   : > { %6123 = vmatpush.bf16.msrb.mxu1 %v15779_v2  ;;  %v20054_v2 = vld [vmem:[%s22007_s30 + $0x8a4] sm:$0xf0]  ;;  %v14404_v43 = vld [vmem:[%s22007_s30 + $0x128] sm:$0xf0] }
 0x2e3   : > { %6111 = vmatpush.bf16.msrb.mxu0 %v15491_v24  ;;  %v20118_v14 = vld [vmem:[%s22007_s30 + $0xaa4] sm:$0xf0]  ;;  %v15363_v21 = vor.u32 %v20054_v2, %v15362_v8  ;;  %6050 = vmatpush.bf16.msrb.mxu3 %v16127_v51  ;;  %v5874_v37 = vpop.f32.mrf.mxu1  ;;  %v19826_v2 = vld [vmem:[%s22007_s30 + $0x18c] sm:$0xf] }
 0x2e4   : > { %v14818_v19 = vld [vmem:[%s22007_s30 + $0x448] sm:$0xf]  ;;  %v15619_v23 = vor.u32 %v20118_v14, %v15618_v15  ;;  %v14468_v51 = vld [vmem:[%s22007_s30 + $0x1a8] sm:$0xf0] }
 0x2e5   : > { %6086 = vmatpush.bf16.msra.mxu2 %v14947_v29  ;;  %v19918_v20 = vld [vmem:[%s22007_s30 + $0x464] sm:$0xf0]  ;;  %v14724_v14 = vld [vmem:[%s22007_s30 + $0x3a8] sm:$0xf0] }
 0x2e6   : > { %6124 = vmatpush.bf16.msrb.mxu1 %v15747_v26  ;;  %v15330_v24 = vld [vmem:[%s22007_s30 + $0x848] sm:$0xf]  ;;  %v14819_v29 = vor.u32 %v19918_v20, %v14818_v19  ;;  %v5900_v19 = vpop.f32.mrf.mxu3 }
 0x2e7   : > { %6112 = vmatpush.bf16.msrb.mxu0 %v15459_v39  ;;  %v20046_v26 = vld [vmem:[%s22007_s30 + $0x864] sm:$0xf0]  ;;  %6051 = vmatpush.bf16.msrb.mxu3 %v16095_v56 }
 0x2e8   : > { %v15586_v27 = vld [vmem:[%s22007_s30 + $0xa48] sm:$0xf]  ;;  %v15331_v44 = vor.u32 %v20046_v26, %v15330_v24 }
 0x2e9   : > { %6087 = vmatpush.bf16.msra.mxu2 %v14915_v30  ;;  %v20110_v31 = vld [vmem:[%s22007_s30 + $0xa64] sm:$0xf0] }
 0x2ea   : > { %6125 = vmatpush.bf16.msrb.mxu1 %v15715_v40  ;;  %v14786_v39 = vld [vmem:[%s22007_s30 + $0x408] sm:$0xf]  ;;  %v15587_v49 = vor.u32 %v20110_v31, %v15586_v27  ;;  %v19818_v27 = vld [vmem:[%s22007_s30 + $0x14c] sm:$0xf] }
 0x2eb   : > { %6113 = vmatpush.bf16.msrb.mxu0 %v15427_v57  ;;  %v19910_v40 = vld [vmem:[%s22007_s30 + $0x424] sm:$0xf0]  ;;  %6052 = vmatpush.bf16.msrb.mxu3 %v16063_v55  ;;  %v14439_v37 = vor.u32 %v19818_v27, %v14436_v42 }
 0x2ec   : > { %v15266_v41 = vld [vmem:[%s22007_s30 + $0x7c8] sm:$0xf]  ;;  %v14787_v57 = vor.u32 %v19910_v40, %v14786_v39 }
 0x2ed   : > { %6088 = vmatpush.bf16.msra.mxu2 %v14883_v62  ;;  %v20030_v38 = vld [vmem:[%s22007_s30 + $0x7e4] sm:$0xf0]  ;;  %v14500_v62 = vld [vmem:[%s22007_s30 + $0x1e8] sm:$0xf0] }
 0x2ee   : > { %6126 = vmatpush.bf16.msrb.mxu1 %v15683_v58  ;;  %v16034_v30 = vld [vmem:[%s22007_s30 + $0xdc8] sm:$0xf]  ;;  %v15267_v60 = vor.u32 %v20030_v38, %v15266_v41  ;;  %v14503_v11 = vor.u32 %v19834_v36, %v14500_v62  ;;  %6053 = vmatmul.bf16.vlgmr.msrb.gmra.mxu3 %v22937_v4  ;;  %v19810_v41 = vld [vmem:[%s22007_s30 + $0x10c] sm:$0xf] }
 0x2ef   : > { %6114 = vmatpush.bf16.msrb.mxu0 %v15395_v10  ;;  %v20222_v46 = vld [vmem:[%s22007_s30 + $0xde4] sm:$0xf0]  ;;  %v5887_v10 = vpop.f32.mrf.mxu2  ;;  %v14407_v55 = vor.u32 %v19810_v41, %v14404_v43  ;;  %v19778_v41 = vld [vmem:[%s22007_s30 + $0xc] sm:$0xf] }
 0x2f0   : > { %v15298_v50 = vld [vmem:[%s22007_s30 + $0x808] sm:$0xf]  ;;  %v16035_v61 = vor.u32 %v20222_v46, %v16034_v30  ;;  %6097 = vmatpush.bf16.msra.mxu3 %v15267_v60  ;;  %v14660_v30 = vld [vmem:[%s22007_s30 + $0x328] sm:$0xf0] }
 0x2f1   : > { %6089 = vmatpush.bf16.msra.mxu2 %v14851_v13  ;;  %v20038_v54 = vld [vmem:[%s22007_s30 + $0x824] sm:$0xf0]  ;;  %v19890_v13 = vld [vmem:[%s22007_s30 + $0x38c] sm:$0xf] }
 0x2f2   : > { %6127 = vmatpush.bf16.msrb.mxu1 %v15651_v12  ;;  %v15554_v58 = vld [vmem:[%s22007_s30 + $0xa08] sm:$0xf]  ;;  %v15299_v0 = vor.u32 %v20038_v54, %v15298_v50  ;;  %v14759_v12 = vor.u32 %v19898_v63, %v14756_v1  ;;  %v14727_v24 = vor.u32 %v19890_v13, %v14724_v14  ;;  %v14372_v60 = vld [vmem:[%s22007_s30 + $0xe8] sm:$0xf0] }
 0x2f3   : > { %6115 = vmatpush.bf16.msrb.mxu0 %v15363_v21  ;;  %v20102_v59 = vld [vmem:[%s22007_s30 + $0xa24] sm:$0xf0]  ;;  %v14628_v63 = vld [vmem:[%s22007_s30 + $0x2e8] sm:$0xf0] }
 0x2f4   : > { %v15234_v3 = vld [vmem:[%s22007_s30 + $0x788] sm:$0xf]  ;;  %v15555_v5 = vor.u32 %v20102_v59, %v15554_v58  ;;  %v19802_v59 = vld [vmem:[%s22007_s30 + $0xcc] sm:$0xf] }
 0x2f5   : > { %6090 = vmatpush.bf16.msra.mxu2 %v14819_v29  ;;  %v20022_v9 = vld [vmem:[%s22007_s30 + $0x7a4] sm:$0xf0]  ;;  %v14692_v29 = vld [vmem:[%s22007_s30 + $0x368] sm:$0xf0] }
 0x2f6   : > { %6128 = vmatpush.bf16.msrb.mxu1 %v15619_v23  ;;  %v16002_v25 = vld [vmem:[%s22007_s30 + $0xd88] sm:$0xf]  ;;  %v15235_v8 = vor.u32 %v20022_v9, %v15234_v3  ;;  %v14471_v23 = vor.u32 %v19826_v2, %v14468_v51  ;;  %v14695_v39 = vor.u32 %v19882_v28, %v14692_v29  ;;  %v14596_v2 = vld [vmem:[%s22007_s30 + $0x2a8] sm:$0xf0] }
 0x2f7   : > { %6116 = vmatpush.bf16.msrb.mxu0 %v15331_v44  ;;  %v20214_v7 = vld [vmem:[%s22007_s30 + $0xda4] sm:$0xf0]  ;;  %v19874_v44 = vld [vmem:[%s22007_s30 + $0x30c] sm:$0xf] }
 0x2f8   : > { %v16003_v15 = vor.u32 %v20214_v7, %v16002_v25  ;;  %v15202_v16 = vld [vmem:[%s22007_s30 + $0x748] sm:$0xf]  ;;  %6098 = vmatpush.bf16.msra.mxu3 %v15235_v8  ;;  %v14375_v25 = vor.u32 %v19802_v59, %v14372_v60  ;;  %v19858_v8 = vld [vmem:[%s22007_s30 + $0x28c] sm:$0xf] }
 0x2f9   : > { %6091 = vmatpush.bf16.msra.mxu2 %v14787_v57  ;;  %v20014_v18 = vld [vmem:[%s22007_s30 + $0x764] sm:$0xf0]  ;;  %v14663_v57 = vor.u32 %v19874_v44, %v14660_v30  ;;  %v14599_v19 = vor.u32 %v19858_v8, %v14596_v2  ;;  %v14276_v43 = vld [vmem:[%s22007_s30 + $0x28] sm:$0xf0] }
 0x2fa   : > { %6129 = vmatpush.bf16.msrb.mxu1 %v15587_v49  ;;  %v15970_v20 = vld [vmem:[%s22007_s30 + $0xd48] sm:$0xf]  ;;  %v15203_v26 = vor.u32 %v20014_v18, %v15202_v16  ;;  %v5911_v36 = vpop.f32.mrf.mxu0  ;;  %v19786_v18 = vld [vmem:[%s22007_s30 + $0x4c] sm:$0xf]  ;;  %v14279_v59 = vor.u32 %v19778_v41, %v14276_v43 }
 0x2fb   : > { %6117 = vmatpush.bf16.msrb.mxu0 %v15299_v0  ;;  %v20206_v21 = vld [vmem:[%s22007_s30 + $0xd64] sm:$0xf0]  ;;  %v23052_v3 = vadd.f32 %v5911_v36, %v23003_v48  ;;  %v19842_v44 = vld [vmem:[%s22007_s30 + $0x20c] sm:$0xf] }
 0x2fc   : > { %6092 = vmatmul.bf16.vlgmr.msra.gmra.mxu2 %v22703_v52  ;;  %v15971_v56 = vor.u32 %v20206_v21, %v15970_v20  ;;  %v15170_v31 = vld [vmem:[%s22007_s30 + $0x708] sm:$0xf]  ;;  %6099 = vmatpush.bf16.msra.mxu3 %v15203_v26  ;;  %v14308_v21 = vld [vmem:[%s22007_s30 + $0x68] sm:$0xf0] }
 0x2fd   : > { %6136 = vmatpush.bf16.msrb.mxu2 %v16035_v61  ;;  %v20006_v32 = vld [vmem:[%s22007_s30 + $0x724] sm:$0xf0]  ;;  %v19866_v61 = vld [vmem:[%s22007_s30 + $0x2cc] sm:$0xf] }
 0x2fe   : > { %6130 = vmatpush.bf16.msrb.mxu1 %v15555_v5  ;;  %6118 = vmatmul.bf16.vlgmr.msrb.gmra.mxu0 %v22765_v17  ;;  %v15938_v34 = vld [vmem:[%s22007_s30 + $0xd08] sm:$0xf]  ;;  %v15171_v40 = vor.u32 %v20006_v32, %v15170_v31  ;;  %v14631_v7 = vor.u32 %v19866_v61, %v14628_v63  ;;  %v19954_v61 = vld [vmem:[%s22007_s30 + $0x58c] sm:$0xf] }
 0x2ff   : > { %6162 = vmatpush.bf16.msra.mxu0 %v14503_v11  ;;  %v20198_v35 = vld [vmem:[%s22007_s30 + $0xd24] sm:$0xf0]  ;;  %v19794_v11 = vld [vmem:[%s22007_s30 + $0x8c] sm:$0xf] }
 0x300   : > { %v15939_v38 = vor.u32 %v20198_v35, %v15938_v34  ;;  %v15138_v46 = vld [vmem:[%s22007_s30 + $0x6c8] sm:$0xf]  ;;  %6100 = vmatpush.bf16.msra.mxu3 %v15171_v40  ;;  %v14311_v34 = vor.u32 %v19786_v18, %v14308_v21  ;;  %v19962_v35 = vld [vmem:[%s22007_s30 + $0x5cc] sm:$0xf] }
 0x301   : > { %6137 = vmatpush.bf16.msrb.mxu2 %v16003_v15  ;;  %6131 = vmatmul.bf16.vlgmr.msrb.gmra.mxu1 %v22817_v45  ;;  %v19998_v49 = vld [vmem:[%s22007_s30 + $0x6e4] sm:$0xf0]  ;;  %v14980_v36 = vld [vmem:[%s22007_s30 + $0x5a8] sm:$0xf0] }
 0x302   : > { %6175 = vmatpush.bf16.msra.mxu1 %v14759_v12  ;;  %v15906_v50 = vld [vmem:[%s22007_s30 + $0xcc8] sm:$0xf]  ;;  %v15139_v58 = vor.u32 %v19998_v49, %v15138_v46  ;;  %v14340_v12 = vld [vmem:[%s22007_s30 + $0xa8] sm:$0xf0] }
 0x303   : > { %6163 = vmatpush.bf16.msra.mxu0 %v14471_v23  ;;  %v20190_v54 = vld [vmem:[%s22007_s30 + $0xce4] sm:$0xf0]  ;;  %v14343_v16 = vor.u32 %v19794_v11, %v14340_v12  ;;  %v19850_v23 = vld [vmem:[%s22007_s30 + $0x24c] sm:$0xf] }
 0x304   : > { %v15907_v62 = vor.u32 %v20190_v54, %v15906_v50  ;;  %v15106_v0 = vld [vmem:[%s22007_s30 + $0x688] sm:$0xf]  ;;  %6101 = vmatpush.bf16.msra.mxu3 %v15139_v58  ;;  %v14532_v46 = vld [vmem:[%s22007_s30 + $0x228] sm:$0xf0] }
 0x305   : > { %6138 = vmatpush.bf16.msrb.mxu2 %v15971_v56  ;;  %v19990_v1 = vld [vmem:[%s22007_s30 + $0x6a4] sm:$0xf0]  ;;  %v5913_v56 = vpop.f32.mrf.mxu0  ;;  %v20090_v49 = vld [vmem:[%s22007_s30 + $0x9cc] sm:$0xf] }
 0x306   : > { %6176 = vmatpush.bf16.msra.mxu1 %v14727_v24  ;;  %v15874_v9 = vld [vmem:[%s22007_s30 + $0xc88] sm:$0xf]  ;;  %v15107_v10 = vor.u32 %v19990_v1, %v15106_v0  ;;  %v14564_v24 = vld [vmem:[%s22007_s30 + $0x268] sm:$0xf0] }
 0x307   : > { %6164 = vmatpush.bf16.msra.mxu0 %v14439_v37  ;;  %v20182_v5 = vld [vmem:[%s22007_s30 + $0xca4] sm:$0xf0]  ;;  %v15012_v37 = vld [vmem:[%s22007_s30 + $0x5e8] sm:$0xf0] }
 0x308   : > { %v15875_v48 = vor.u32 %v20182_v5, %v15874_v9  ;;  %v15074_v51 = vld [vmem:[%s22007_s30 + $0x648] sm:$0xf]  ;;  %6102 = vmatpush.bf16.msra.mxu3 %v15107_v10  ;;  %v15524_v50 = vld [vmem:[%s22007_s30 + $0x9e8] sm:$0xf0]  ;;  %v15015_v54 = vor.u32 %v19962_v35, %v15012_v37 }
 0x309   : > { %6139 = vmatpush.bf16.msrb.mxu2 %v15939_v38  ;;  %v19982_v13 = vld [vmem:[%s22007_s30 + $0x664] sm:$0xf0]  ;;  %v15527_v63 = vor.u32 %v20090_v49, %v15524_v50  ;;  %v20082_v1 = vld [vmem:[%s22007_s30 + $0x98c] sm:$0xf] }
 0x30a   : > { %6177 = vmatpush.bf16.msra.mxu1 %v14695_v39  ;;  %v15842_v15 = vld [vmem:[%s22007_s30 + $0xc48] sm:$0xf]  ;;  %v15075_v20 = vor.u32 %v19982_v13, %v15074_v51  ;;  %v14567_v39 = vor.u32 %v19850_v23, %v14564_v24  ;;  %v15492_v9 = vld [vmem:[%s22007_s30 + $0x9a8] sm:$0xf0] }
 0x30b   : > { %6165 = vmatpush.bf16.msra.mxu0 %v14407_v55  ;;  %v20174_v14 = vld [vmem:[%s22007_s30 + $0xc64] sm:$0xf0]  ;;  %v20154_v55 = vld [vmem:[%s22007_s30 + $0xbcc] sm:$0xf]  ;;  %v15495_v2 = vor.u32 %v20082_v1, %v15492_v9 }
 0x30c   : > { %v15843_v26 = vor.u32 %v20174_v14, %v15842_v15  ;;  %v15042_v27 = vld [vmem:[%s22007_s30 + $0x608] sm:$0xf]  ;;  %6103 = vmatpush.bf16.msra.mxu3 %v15075_v20  ;;  %v15748_v10 = vld [vmem:[%s22007_s30 + $0xba8] sm:$0xf0]  ;;  %v5924_v18 = vpop.f32.mrf.mxu1 }
 0x30d   : > { %6140 = vmatpush.bf16.msrb.mxu2 %v15907_v62  ;;  %v19974_v42 = vld [vmem:[%s22007_s30 + $0x624] sm:$0xf0]  ;;  %v14535_v62 = vor.u32 %v19842_v44, %v14532_v46  ;;  %v19946_v8 = vld [vmem:[%s22007_s30 + $0x54c] sm:$0xf]  ;;  %v23106_v23 = vadd.f32 %v5924_v18, %v23052_v3 }
 0x30e   : > { %6178 = vmatpush.bf16.msra.mxu1 %v14663_v57  ;;  %v15810_v28 = vld [vmem:[%s22007_s30 + $0xc08] sm:$0xf]  ;;  %v15043_v40 = vor.u32 %v19974_v42, %v15042_v27  ;;  %v15780_v57 = vld [vmem:[%s22007_s30 + $0xbe8] sm:$0xf0] }
 0x30f   : > { %6166 = vmatpush.bf16.msra.mxu0 %v14375_v25  ;;  %v20166_v29 = vld [vmem:[%s22007_s30 + $0xc24] sm:$0xf0]  ;;  %v15783_v0 = vor.u32 %v20154_v55, %v15780_v57  ;;  %v14983_v25 = vor.u32 %v19954_v61, %v14980_v36  ;;  %v20074_v13 = vld [vmem:[%s22007_s30 + $0x94c] sm:$0xf]  ;;  %v3275_v61 = vperm.slane %v22958_v33, 1 }
 0x310   : > { %v16290_v31 = vld [vmem:[%s22007_s30 + $0xfc8] sm:$0xf]  ;;  %v15811_v38 = vor.u32 %v20166_v29, %v15810_v28  ;;  %6104 = vmatpush.bf16.msra.mxu3 %v15043_v40  ;;  %v15460_v15 = vld [vmem:[%s22007_s30 + $0x968] sm:$0xf0] }
 0x311   : > { %6141 = vmatpush.bf16.msrb.mxu2 %v15875_v48  ;;  %v20286_v32 = vld [vmem:[%s22007_s30 + $0xfe4] sm:$0xf0]  ;;  %v14948_v48 = vld [vmem:[%s22007_s30 + $0x568] sm:$0xf0]  ;;  %v15463_v42 = vor.u32 %v20074_v13, %v15460_v15 }
 0x312   : > { %6179 = vmatpush.bf16.msra.mxu1 %v14631_v7  ;;  %v16291_v30 = vor.u32 %v20286_v32, %v16290_v31  ;;  %v16258_v58 = vld [vmem:[%s22007_s30 + $0xf88] sm:$0xf]  ;;  %v20146_v7 = vld [vmem:[%s22007_s30 + $0xb8c] sm:$0xf] }
 0x313   : > { %6167 = vmatpush.bf16.msra.mxu0 %v14343_v16  ;;  %v20278_v60 = vld [vmem:[%s22007_s30 + $0xfa4] sm:$0xf0]  ;;  %6105 = vmatmul.bf16.vlgmr.msra.gmra.mxu3 %v22705_v53  ;;  %v15751_v51 = vor.u32 %v20146_v7, %v15748_v10  ;;  %v14951_v16 = vor.u32 %v19946_v8, %v14948_v48  ;;  %v15716_v20 = vld [vmem:[%s22007_s30 + $0xb68] sm:$0xf0] }
 0x314   : > { %6149 = vmatpush.bf16.msrb.mxu3 %v16291_v30  ;;  %v16259_v5 = vor.u32 %v20278_v60, %v16258_v58  ;;  %v16226_v11 = vld [vmem:[%s22007_s30 + $0xf48] sm:$0xf]  ;;  %v14916_v27 = vld [vmem:[%s22007_s30 + $0x528] sm:$0xf0]  ;;  %v5926_v50 = vpop.f32.mrf.mxu1 }
 0x315   : > { %6142 = vmatpush.bf16.msrb.mxu2 %v15843_v26  ;;  %v20270_v12 = vld [vmem:[%s22007_s30 + $0xf64] sm:$0xf0]  ;;  %v19938_v26 = vld [vmem:[%s22007_s30 + $0x50c] sm:$0xf] }
 0x316   : > { %6180 = vmatpush.bf16.msra.mxu1 %v14599_v19  ;;  %v16227_v14 = vor.u32 %v20270_v12, %v16226_v11  ;;  %v20138_v19 = vld [vmem:[%s22007_s30 + $0xb4c] sm:$0xf]  ;;  %v16194_v21 = vld [vmem:[%s22007_s30 + $0xf08] sm:$0xf]  ;;  %v14919_v3 = vor.u32 %v19938_v26, %v14916_v27 }
 0x317   : > { %6168 = vmatpush.bf16.msra.mxu0 %v14311_v34  ;;  %v20262_v24 = vld [vmem:[%s22007_s30 + $0xf24] sm:$0xf0]  ;;  %v15719_v28 = vor.u32 %v20138_v19, %v15716_v20  ;;  %v20066_v56 = vld [vmem:[%s22007_s30 + $0x90c] sm:$0xf] }
 0x318   : > { %6150 = vmatpush.bf16.msrb.mxu3 %v16259_v5  ;;  %v15428_v29 = vld [vmem:[%s22007_s30 + $0x928] sm:$0xf0]  ;;  %v16195_v31 = vor.u32 %v20262_v24, %v16194_v21  ;;  %v16162_v35 = vld [vmem:[%s22007_s30 + $0xec8] sm:$0xf] }
 0x319   : > { %6143 = vmatpush.bf16.msrb.mxu2 %v15811_v38  ;;  %v20130_v32 = vld [vmem:[%s22007_s30 + $0xb0c] sm:$0xf]  ;;  %v20254_v37 = vld [vmem:[%s22007_s30 + $0xee4] sm:$0xf0]  ;;  %v15431_v41 = vor.u32 %v20066_v56, %v15428_v29 }
 0x31a   : > { %6181 = vmatpush.bf16.msra.mxu1 %v14567_v39  ;;  %v15684_v34 = vld [vmem:[%s22007_s30 + $0xb28] sm:$0xf0]  ;;  %v5963_v30 = vpop.f32.mrf.mxu0  ;;  %v16163_v46 = vor.u32 %v20254_v37, %v16162_v35  ;;  %v16130_v57 = vld [vmem:[%s22007_s30 + $0xe88] sm:$0xf] }
 0x31b   : > { %6169 = vmatpush.bf16.msra.mxu0 %v14279_v59  ;;  %v19930_v39 = vld [vmem:[%s22007_s30 + $0x4cc] sm:$0xf]  ;;  %v15687_v43 = vor.u32 %v20130_v32, %v15684_v34  ;;  %v20246_v58 = vld [vmem:[%s22007_s30 + $0xea4] sm:$0xf0]  ;;  %v5964_v12 = vadd.f32 %v5963_v30, %v3275_v61  ;;  %v14762_v30 = vld [vmem:[%s22007_s30 + $0x3d0] sm:$0xf] }
 0x31c   : > { %6144 = vmatmul.bf16.vlgmr.msrb.gmra.mxu2 %v22876_v22  ;;  %6151 = vmatpush.bf16.msrb.mxu3 %v16227_v14  ;;  %v14884_v40 = vld [vmem:[%s22007_s30 + $0x4e8] sm:$0xf0]  ;;  %v16131_v1 = vor.u32 %v20246_v58, %v16130_v57  ;;  %v16098_v7 = vld [vmem:[%s22007_s30 + $0xe48] sm:$0xf]  ;;  %v5976_v18 = vpop.f32.mrf.mxu1 }
 0x31d   : > { %6188 = vmatpush.bf16.msra.mxu2 %v15015_v54  ;;  %v20058_v44 = vld [vmem:[%s22007_s30 + $0x8cc] sm:$0xf]  ;;  %v14887_v49 = vor.u32 %v19930_v39, %v14884_v40  ;;  %v20238_v10 = vld [vmem:[%s22007_s30 + $0xe64] sm:$0xf0]  ;;  %v23142_v24 = vadd.f32 %v5976_v18, %v5964_v12  ;;  %v14442_v12 = vld [vmem:[%s22007_s30 + $0x150] sm:$0xf] }
 0x31e   : > { %6182 = vmatpush.bf16.msra.mxu1 %v14535_v62  ;;  %6170 = vmatmul.bf16.vlgmr.msra.gmra.mxu0 %v22698_v47  ;;  %v15396_v38 = vld [vmem:[%s22007_s30 + $0x8e8] sm:$0xf0]  ;;  %v16099_v14 = vor.u32 %v20238_v10, %v16098_v7  ;;  %v16066_v20 = vld [vmem:[%s22007_s30 + $0xe08] sm:$0xf] }
 0x31f   : > { %6214 = vmatpush.bf16.msrb.mxu0 %v15527_v63  ;;  %v20122_v54 = vld [vmem:[%s22007_s30 + $0xacc] sm:$0xf]  ;;  %v15399_v36 = vor.u32 %v20058_v44, %v15396_v38  ;;  %v20230_v21 = vld [vmem:[%s22007_s30 + $0xe24] sm:$0xf0]  ;;  %v14506_v44 = vld [vmem:[%s22007_s30 + $0x1d0] sm:$0xf] }
 0x320   : > { %6152 = vmatpush.bf16.msrb.mxu3 %v16195_v31  ;;  %v15652_v55 = vld [vmem:[%s22007_s30 + $0xae8] sm:$0xf0]  ;;  %v16067_v32 = vor.u32 %v20230_v21, %v16066_v20  ;;  %v19839_v38 = vld [vmem:[%s22007_s30 + $0x1ec] sm:$0xf0] }
 0x321   : > { %6189 = vmatpush.bf16.msra.mxu2 %v14983_v25  ;;  %6183 = vmatmul.bf16.vlgmr.msra.gmra.mxu1 %v22700_v6  ;;  %v19922_v59 = vld [vmem:[%s22007_s30 + $0x48c] sm:$0xf]  ;;  %v15655_v62 = vor.u32 %v20122_v54, %v15652_v55  ;;  %v14410_v21 = vld [vmem:[%s22007_s30 + $0x110] sm:$0xf] }
 0x322   : > { %6227 = vmatpush.bf16.msrb.mxu1 %v15783_v0  ;;  %v14852_v60 = vld [vmem:[%s22007_s30 + $0x4a8] sm:$0xf0]  ;;  %v5965_v15 = vpop.f32.mrf.mxu0 }
 0x323   : > { %6215 = vmatpush.bf16.msrb.mxu0 %v15495_v2  ;;  %v20050_v63 = vld [vmem:[%s22007_s30 + $0x88c] sm:$0xf]  ;;  %v14855_v9 = vor.u32 %v19922_v59, %v14852_v60  ;;  %v14507_v60 = vor.u32 %v19839_v38, %v14506_v44 }
 0x324   : > { %v15364_v0 = vld [vmem:[%s22007_s30 + $0x8a8] sm:$0xf0]  ;;  %6153 = vmatpush.bf16.msrb.mxu3 %v16163_v46  ;;  %v19903_v46 = vld [vmem:[%s22007_s30 + $0x3ec] sm:$0xf0]  ;;  %v5978_v59 = vpop.f32.mrf.mxu1 }
 0x325   : > { %6190 = vmatpush.bf16.msra.mxu2 %v14951_v16  ;;  %v20114_v5 = vld [vmem:[%s22007_s30 + $0xa8c] sm:$0xf]  ;;  %v15367_v8 = vor.u32 %v20050_v63, %v15364_v0  ;;  %v14763_v61 = vor.u32 %v19903_v46, %v14762_v30  ;;  %v14634_v30 = vld [vmem:[%s22007_s30 + $0x2d0] sm:$0xf] }
 0x326   : > { %6228 = vmatpush.bf16.msrb.mxu1 %v15751_v51  ;;  %v15620_v25 = vld [vmem:[%s22007_s30 + $0xaa8] sm:$0xf0]  ;;  %v19871_v46 = vld [vmem:[%s22007_s30 + $0x2ec] sm:$0xf0] }
 0x327   : > { %6216 = vmatpush.bf16.msrb.mxu0 %v15463_v42  ;;  %v19914_v11 = vld [vmem:[%s22007_s30 + $0x44c] sm:$0xf]  ;;  %v15623_v48 = vor.u32 %v20114_v5, %v15620_v25  ;;  %v14635_v59 = vor.u32 %v19871_v46, %v14634_v30  ;;  %v14986_v46 = vld [vmem:[%s22007_s30 + $0x590] sm:$0xf] }
 0x328   : > { %v14820_v33 = vld [vmem:[%s22007_s30 + $0x468] sm:$0xf0]  ;;  %6154 = vmatpush.bf16.msrb.mxu3 %v16131_v1  ;;  %v14730_v1 = vld [vmem:[%s22007_s30 + $0x390] sm:$0xf] }
 0x329   : > { %6191 = vmatpush.bf16.msra.mxu2 %v14919_v3  ;;  %v20042_v2 = vld [vmem:[%s22007_s30 + $0x84c] sm:$0xf]  ;;  %v14823_v16 = vor.u32 %v19914_v11, %v14820_v33 }
 0x32a   : > { %6229 = vmatpush.bf16.msrb.mxu1 %v15719_v28  ;;  %v15332_v51 = vld [vmem:[%s22007_s30 + $0x868] sm:$0xf0] }
 0x32b   : > { %6217 = vmatpush.bf16.msrb.mxu0 %v15431_v41  ;;  %v20106_v13 = vld [vmem:[%s22007_s30 + $0xa4c] sm:$0xf]  ;;  %v15335_v31 = vor.u32 %v20042_v2, %v15332_v51  ;;  %v14698_v51 = vld [vmem:[%s22007_s30 + $0x350] sm:$0xf] }
 0x32c   : > { %v15588_v19 = vld [vmem:[%s22007_s30 + $0xa68] sm:$0xf0]  ;;  %6155 = vmatpush.bf16.msrb.mxu3 %v16099_v14 }
 0x32d   : > { %6192 = vmatpush.bf16.msra.mxu2 %v14887_v49  ;;  %v19906_v26 = vld [vmem:[%s22007_s30 + $0x40c] sm:$0xf]  ;;  %v15591_v3 = vor.u32 %v20106_v13, %v15588_v19  ;;  %v19887_v13 = vld [vmem:[%s22007_s30 + $0x36c] sm:$0xf0] }
 0x32e   : > { %6230 = vmatpush.bf16.msrb.mxu1 %v15687_v43  ;;  %v14788_v27 = vld [vmem:[%s22007_s30 + $0x428] sm:$0xf0]  ;;  %v14699_v20 = vor.u32 %v19887_v13, %v14698_v51  ;;  %v19855_v13 = vld [vmem:[%s22007_s30 + $0x26c] sm:$0xf0] }
 0x32f   : > { %6218 = vmatpush.bf16.msrb.mxu0 %v15399_v36  ;;  %v20026_v42 = vld [vmem:[%s22007_s30 + $0x7cc] sm:$0xf]  ;;  %v14791_v34 = vor.u32 %v19906_v26, %v14788_v27  ;;  %v14474_v36 = vld [vmem:[%s22007_s30 + $0x190] sm:$0xf] }
 0x330   : > { %v15268_v28 = vld [vmem:[%s22007_s30 + $0x7e8] sm:$0xf0]  ;;  %6156 = vmatpush.bf16.msrb.mxu3 %v16067_v32  ;;  %v19815_v26 = vld [vmem:[%s22007_s30 + $0x12c] sm:$0xf0] }
 0x331   : > { %6193 = vmatpush.bf16.msra.mxu2 %v14855_v9  ;;  %v20218_v56 = vld [vmem:[%s22007_s30 + $0xdcc] sm:$0xf]  ;;  %v15271_v40 = vor.u32 %v20026_v42, %v15268_v28  ;;  %v19895_v9 = vld [vmem:[%s22007_s30 + $0x3ac] sm:$0xf0] }
 0x332   : > { %6231 = vmatpush.bf16.msrb.mxu1 %v15655_v62  ;;  %v16036_v29 = vld [vmem:[%s22007_s30 + $0xde8] sm:$0xf0]  ;;  %v19831_v62 = vld [vmem:[%s22007_s30 + $0x1ac] sm:$0xf0]  ;;  %v14731_v33 = vor.u32 %v19895_v9, %v14730_v1 }
 0x333   : > { %6219 = vmatpush.bf16.msrb.mxu0 %v15367_v8  ;;  %v20034_v35 = vld [vmem:[%s22007_s30 + $0x80c] sm:$0xf]  ;;  %v16039_v41 = vor.u32 %v20218_v56, %v16036_v29  ;;  %6157 = vmatmul.bf16.vlgmr.msrb.gmra.mxu3 %v22937_v4  ;;  %v14475_v11 = vor.u32 %v19831_v62, %v14474_v36  ;;  %v19823_v8 = vld [vmem:[%s22007_s30 + $0x16c] sm:$0xf0] }
 0x334   : > { %v15300_v37 = vld [vmem:[%s22007_s30 + $0x828] sm:$0xf0]  ;;  %6201 = vmatpush.bf16.msra.mxu3 %v15271_v40  ;;  %v14443_v19 = vor.u32 %v19823_v8, %v14442_v12  ;;  %v14666_v28 = vld [vmem:[%s22007_s30 + $0x310] sm:$0xf] }
 0x335   : > { %6194 = vmatpush.bf16.msra.mxu2 %v14823_v16  ;;  %v20098_v39 = vld [vmem:[%s22007_s30 + $0xa0c] sm:$0xf]  ;;  %v15303_v57 = vor.u32 %v20034_v35, %v15300_v37  ;;  %v19879_v56 = vld [vmem:[%s22007_s30 + $0x32c] sm:$0xf0]  ;;  %v14411_v37 = vor.u32 %v19815_v26, %v14410_v21 }
 0x336   : > { %6232 = vmatpush.bf16.msrb.mxu1 %v15623_v48  ;;  %v15556_v43 = vld [vmem:[%s22007_s30 + $0xa28] sm:$0xf0]  ;;  %v14378_v40 = vld [vmem:[%s22007_s30 + $0xd0] sm:$0xf] }
 0x337   : > { %v20018_v49 = vld [vmem:[%s22007_s30 + $0x78c] sm:$0xf]  ;;  %6220 = vmatpush.bf16.msrb.mxu0 %v15335_v31  ;;  %v15559_v58 = vor.u32 %v20098_v39, %v15556_v43  ;;  %v14667_v39 = vor.u32 %v19879_v56, %v14666_v28  ;;  %v5937_v43 = vpop.f32.mrf.mxu2  ;;  %v14602_v62 = vld [vmem:[%s22007_s30 + $0x290] sm:$0xf] }
 0x338   : > { %v15236_v50 = vld [vmem:[%s22007_s30 + $0x7a8] sm:$0xf0]  ;;  %v19791_v12 = vld [vmem:[%s22007_s30 + $0x6c] sm:$0xf0] }
 0x339   : > { %v20210_v54 = vld [vmem:[%s22007_s30 + $0xd8c] sm:$0xf]  ;;  %6195 = vmatpush.bf16.msra.mxu2 %v14791_v34  ;;  %v15239_v63 = vor.u32 %v20018_v49, %v15236_v50  ;;  %v23200_v50 = vadd.f32 %v5937_v43, %v23106_v23  ;;  %v14570_v8 = vld [vmem:[%s22007_s30 + $0x250] sm:$0xf] }
 0x33a   : > { %6233 = vmatpush.bf16.msrb.mxu1 %v15591_v3  ;;  %v16004_v55 = vld [vmem:[%s22007_s30 + $0xda8] sm:$0xf0]  ;;  %v15018_v21 = vld [vmem:[%s22007_s30 + $0x5d0] sm:$0xf] }
 0x33b   : > { %v16007_v0 = vor.u32 %v20210_v54, %v16004_v55  ;;  %v20010_v5 = vld [vmem:[%s22007_s30 + $0x74c] sm:$0xf]  ;;  %6221 = vmatpush.bf16.msrb.mxu0 %v15303_v57  ;;  %6202 = vmatpush.bf16.msra.mxu3 %v15239_v63  ;;  %v23190_v34 = vpop.f32.mrf.mxu0  ;;  %v19863_v63 = vld [vmem:[%s22007_s30 + $0x2ac] sm:$0xf0] }
 0x33c   : > { %6196 = vmatmul.bf16.vlgmr.msra.gmra.mxu2 %v22703_v52  ;;  %v15204_v25 = vld [vmem:[%s22007_s30 + $0x768] sm:$0xf0]  ;;  %v19967_v26 = vld [vmem:[%s22007_s30 + $0x5ec] sm:$0xf0] }
 0x33d   : > { %6240 = vmatpush.bf16.msrb.mxu2 %v16039_v41  ;;  %v20202_v7 = vld [vmem:[%s22007_s30 + $0xd4c] sm:$0xf]  ;;  %v15207_v48 = vor.u32 %v20010_v5, %v15204_v25  ;;  %v19807_v41 = vld [vmem:[%s22007_s30 + $0xec] sm:$0xf0] }
 0x33e   : > { %v15972_v10 = vld [vmem:[%s22007_s30 + $0xd68] sm:$0xf0]  ;;  %6234 = vmatpush.bf16.msrb.mxu1 %v15559_v58  ;;  %6222 = vmatmul.bf16.vlgmr.msrb.gmra.mxu0 %v22765_v17  ;;  %v23192_v35 = vpop.f32.mrf.mxu1  ;;  %v14379_v58 = vor.u32 %v19807_v41, %v14378_v40  ;;  %v15530_v40 = vld [vmem:[%s22007_s30 + $0x9d0] sm:$0xf] }
 0x33f   : > { %6266 = vmatpush.bf16.msra.mxu0 %v14507_v60  ;;  %v15975_v2 = vor.u32 %v20202_v7, %v15972_v10  ;;  %v20002_v15 = vld [vmem:[%s22007_s30 + $0x70c] sm:$0xf]  ;;  %6203 = vmatpush.bf16.msra.mxu3 %v15207_v48  ;;  %v14346_v60 = vld [vmem:[%s22007_s30 + $0x90] sm:$0xf]  ;;  %v5939_v48 = vpop.f32.mrf.mxu2 }
 0x340   : > { %v15172_v14 = vld [vmem:[%s22007_s30 + $0x728] sm:$0xf0]  ;;  %v20095_v41 = vld [vmem:[%s22007_s30 + $0x9ec] sm:$0xf0] }
 0x341   : > { %6241 = vmatpush.bf16.msrb.mxu2 %v16007_v0  ;;  %6235 = vmatmul.bf16.vlgmr.msrb.gmra.mxu1 %v22817_v45  ;;  %v20194_v16 = vld [vmem:[%s22007_s30 + $0xd0c] sm:$0xf]  ;;  %v15175_v27 = vor.u32 %v20002_v15, %v15172_v14  ;;  %v15786_v43 = vld [vmem:[%s22007_s30 + $0xbd0] sm:$0xf] }
 0x342   : > { %6279 = vmatpush.bf16.msra.mxu1 %v14763_v61  ;;  %v15940_v18 = vld [vmem:[%s22007_s30 + $0xd28] sm:$0xf0]  ;;  %v19799_v61 = vld [vmem:[%s22007_s30 + $0xac] sm:$0xf0] }
 0x343   : > { %6267 = vmatpush.bf16.msra.mxu0 %v14475_v11  ;;  %v15943_v42 = vor.u32 %v20194_v16, %v15940_v18  ;;  %v19994_v29 = vld [vmem:[%s22007_s30 + $0x6cc] sm:$0xf]  ;;  %6204 = vmatpush.bf16.msra.mxu3 %v15175_v27  ;;  %v6017_v25 = vpop.f32.mrf.mxu0  ;;  %v14347_v10 = vor.u32 %v19799_v61, %v14346_v60  ;;  %v14603_v11 = vor.u32 %v19863_v63, %v14602_v62  ;;  %v15498_v61 = vld [vmem:[%s22007_s30 + $0x990] sm:$0xf] }
 0x344   : > { %v15140_v31 = vld [vmem:[%s22007_s30 + $0x6e8] sm:$0xf0]  ;;  %v15754_v63 = vld [vmem:[%s22007_s30 + $0xb90] sm:$0xf] }
 0x345   : > { %6242 = vmatpush.bf16.msrb.mxu2 %v15975_v2  ;;  %v20186_v3 = vld [vmem:[%s22007_s30 + $0xccc] sm:$0xf]  ;;  %v15143_v44 = vor.u32 %v19994_v29, %v15140_v31  ;;  %v14282_v29 = vld [vmem:[%s22007_s30 + $0x10] sm:$0xf] }
 0x346   : > { %6280 = vmatpush.bf16.msra.mxu1 %v14731_v33  ;;  %v15908_v32 = vld [vmem:[%s22007_s30 + $0xce8] sm:$0xf0]  ;;  %v6030_v7 = vpop.f32.mrf.mxu1  ;;  %v14314_v33 = vld [vmem:[%s22007_s30 + $0x50] sm:$0xf] }
 0x347   : > { %6268 = vmatpush.bf16.msra.mxu0 %v14443_v19  ;;  %v15911_v38 = vor.u32 %v20186_v3, %v15908_v32  ;;  %v19986_v49 = vld [vmem:[%s22007_s30 + $0x68c] sm:$0xf]  ;;  %6205 = vmatpush.bf16.msra.mxu3 %v15143_v44  ;;  %v14315_v27 = vor.u32 %v19791_v12, %v14314_v33  ;;  %v19783_v31 = vld [vmem:[%s22007_s30 + $0x2c] sm:$0xf0] }
 0x348   : > { %v15108_v54 = vld [vmem:[%s22007_s30 + $0x6a8] sm:$0xf0]  ;;  %v14538_v3 = vld [vmem:[%s22007_s30 + $0x210] sm:$0xf] }
 0x349   : > { %6243 = vmatpush.bf16.msrb.mxu2 %v15943_v42  ;;  %v20178_v55 = vld [vmem:[%s22007_s30 + $0xc8c] sm:$0xf]  ;;  %v15111_v36 = vor.u32 %v19986_v49, %v15108_v54  ;;  %v14571_v42 = vor.u32 %v19855_v13, %v14570_v8  ;;  %v20159_v44 = vld [vmem:[%s22007_s30 + $0xbec] sm:$0xf0]  ;;  %v5989_v54 = vpop.f32.mrf.mxu2 }
 0x34a   : > { %6281 = vmatpush.bf16.msra.mxu1 %v14699_v20  ;;  %v15876_v57 = vld [vmem:[%s22007_s30 + $0xca8] sm:$0xf0]  ;;  %v19959_v49 = vld [vmem:[%s22007_s30 + $0x5ac] sm:$0xf0]  ;;  %v15787_v60 = vor.u32 %v20159_v44, %v15786_v43 }
 0x34b   : > { %6269 = vmatpush.bf16.msra.mxu0 %v14411_v37  ;;  %v15879_v23 = vor.u32 %v20178_v55, %v15876_v57  ;;  %v19978_v0 = vld [vmem:[%s22007_s30 + $0x64c] sm:$0xf]  ;;  %6206 = vmatpush.bf16.msra.mxu3 %v15111_v36  ;;  %v15019_v37 = vor.u32 %v19967_v26, %v15018_v21  ;;  %v14283_v55 = vor.u32 %v19783_v31, %v14282_v29  ;;  %v20087_v36 = vld [vmem:[%s22007_s30 + $0x9ac] sm:$0xf0] }
 0x34c   : > { %v15076_v1 = vld [vmem:[%s22007_s30 + $0x668] sm:$0xf0]  ;;  %v14987_v62 = vor.u32 %v19959_v49, %v14986_v46  ;;  %v15499_v25 = vor.u32 %v20087_v36, %v15498_v61  ;;  %v15722_v8 = vld [vmem:[%s22007_s30 + $0xb50] sm:$0xf] }
 0x34d   : > { %6244 = vmatpush.bf16.msrb.mxu2 %v15911_v38  ;;  %v20170_v9 = vld [vmem:[%s22007_s30 + $0xc4c] sm:$0xf]  ;;  %v15079_v2 = vor.u32 %v19978_v0, %v15076_v1  ;;  %v20151_v0 = vld [vmem:[%s22007_s30 + $0xbac] sm:$0xf0] }
 0x34e   : > { %6282 = vmatpush.bf16.msra.mxu1 %v14667_v39  ;;  %v15844_v5 = vld [vmem:[%s22007_s30 + $0xc68] sm:$0xf0]  ;;  %v19847_v39 = vld [vmem:[%s22007_s30 + $0x22c] sm:$0xf0]  ;;  %v15755_v7 = vor.u32 %v20151_v0, %v15754_v63 }
 0x34f   : > { %6270 = vmatpush.bf16.msra.mxu0 %v14379_v58  ;;  %v15847_v51 = vor.u32 %v20170_v9, %v15844_v5  ;;  %v19970_v15 = vld [vmem:[%s22007_s30 + $0x60c] sm:$0xf]  ;;  %6207 = vmatpush.bf16.msra.mxu3 %v15079_v2  ;;  %v14539_v57 = vor.u32 %v19847_v39, %v14538_v3  ;;  %v23238_v58 = vadd.f32 %v5989_v54, %v23142_v24  ;;  %v14954_v24 = vld [vmem:[%s22007_s30 + $0x550] sm:$0xf] }
 0x350   : > { %v15044_v14 = vld [vmem:[%s22007_s30 + $0x628] sm:$0xf0]  ;;  %v19951_v5 = vld [vmem:[%s22007_s30 + $0x56c] sm:$0xf0] }
 0x351   : > { %6245 = vmatpush.bf16.msrb.mxu2 %v15879_v23  ;;  %v20162_v16 = vld [vmem:[%s22007_s30 + $0xc0c] sm:$0xf]  ;;  %v15047_v28 = vor.u32 %v19970_v15, %v15044_v14  ;;  %v14955_v12 = vor.u32 %v19951_v5, %v14954_v24  ;;  %v20143_v48 = vld [vmem:[%s22007_s30 + $0xb6c] sm:$0xf0]  ;;  %v5991_v14 = vpop.f32.mrf.mxu2 }
 0x352   : > { %6283 = vmatpush.bf16.msra.mxu1 %v14635_v59  ;;  %v15812_v18 = vld [vmem:[%s22007_s30 + $0xc28] sm:$0xf0]  ;;  %v15531_v59 = vor.u32 %v20095_v41, %v15530_v40  ;;  %v14922_v13 = vld [vmem:[%s22007_s30 + $0x510] sm:$0xf] }
 0x353   : > { %v20282_v19 = vld [vmem:[%s22007_s30 + $0xfcc] sm:$0xf]  ;;  %6271 = vmatpush.bf16.msra.mxu0 %v14347_v10  ;;  %v15815_v56 = vor.u32 %v20162_v16, %v15812_v18  ;;  %6208 = vmatpush.bf16.msra.mxu3 %v15047_v28  ;;  %v15466_v10 = vld [vmem:[%s22007_s30 + $0x950] sm:$0xf]  ;;  %v15723_v18 = vor.u32 %v20143_v48, %v15722_v8 }
 0x354   : > { %v16292_v20 = vld [vmem:[%s22007_s30 + $0xfe8] sm:$0xf0]  ;;  %v19943_v15 = vld [vmem:[%s22007_s30 + $0x52c] sm:$0xf0] }
 0x355   : > { %6246 = vmatpush.bf16.msrb.mxu2 %v15847_v51  ;;  %v16295_v32 = vor.u32 %v20282_v19, %v16292_v20  ;;  %v20274_v38 = vld [vmem:[%s22007_s30 + $0xf8c] sm:$0xf]  ;;  %v15434_v21 = vld [vmem:[%s22007_s30 + $0x910] sm:$0xf] }
 0x356   : > { %6284 = vmatpush.bf16.msra.mxu1 %v14603_v11  ;;  %v16260_v30 = vld [vmem:[%s22007_s30 + $0xfa8] sm:$0xf0]  ;;  %6209 = vmatmul.bf16.vlgmr.msra.gmra.mxu3 %v22705_v53  ;;  %v20079_v11 = vld [vmem:[%s22007_s30 + $0x96c] sm:$0xf0] }
 0x357   : > { %6272 = vmatpush.bf16.msra.mxu0 %v14315_v27  ;;  %6253 = vmatpush.bf16.msrb.mxu3 %v16295_v32  ;;  %v16263_v23 = vor.u32 %v20274_v38, %v16260_v30  ;;  %v20266_v1 = vld [vmem:[%s22007_s30 + $0xf4c] sm:$0xf]  ;;  %v15467_v16 = vor.u32 %v20079_v11, %v15466_v10  ;;  %v20071_v26 = vld [vmem:[%s22007_s30 + $0x92c] sm:$0xf0]  ;;  %v5950_v30 = vpop.f32.mrf.mxu3 }
 0x358   : > { %v16228_v9 = vld [vmem:[%s22007_s30 + $0xf68] sm:$0xf0]  ;;  %v15690_v28 = vld [vmem:[%s22007_s30 + $0xb10] sm:$0xf]  ;;  %v15435_v40 = vor.u32 %v20071_v26, %v15434_v21 }
 0x359   : > { %6247 = vmatpush.bf16.msrb.mxu2 %v15815_v56  ;;  %v16231_v33 = vor.u32 %v20266_v1, %v16228_v9  ;;  %v20258_v2 = vld [vmem:[%s22007_s30 + $0xf0c] sm:$0xf]  ;;  %v20135_v56 = vld [vmem:[%s22007_s30 + $0xb2c] sm:$0xf0] }
 0x35a   : > { %6285 = vmatpush.bf16.msra.mxu1 %v14571_v42  ;;  %v16196_v51 = vld [vmem:[%s22007_s30 + $0xf28] sm:$0xf0]  ;;  %v14923_v42 = vor.u32 %v19943_v15, %v14922_v13  ;;  %v14890_v3 = vld [vmem:[%s22007_s30 + $0x4d0] sm:$0xf]  ;;  %v15691_v41 = vor.u32 %v20135_v56, %v15690_v28 }
 0x35b   : > { %6273 = vmatpush.bf16.msra.mxu0 %v14283_v55  ;;  %6254 = vmatpush.bf16.msrb.mxu3 %v16263_v23  ;;  %v23261_v19 = vld [vmem:[%s22014_s15] sm:$0xff]  ;;  %v16199_v27 = vor.u32 %v20258_v2, %v16196_v51  ;;  %v19935_v32 = vld [vmem:[%s22007_s30 + $0x4ec] sm:$0xf0] }
 0x35c   : > { %6248 = vmatmul.bf16.vlgmr.msrb.gmra.mxu2 %v22876_v22  ;;  %v3276_v20 = vperm.slane %v23261_v19, 2  ;;  %v20250_v29 = vld [vmem:[%s22007_s30 + $0xecc] sm:$0xf]  ;;  %v15402_v43 = vld [vmem:[%s22007_s30 + $0x8d0] sm:$0xf]  ;;  %v14891_v49 = vor.u32 %v19935_v32, %v14890_v3 }
 0x35d   : > { %6292 = vmatpush.bf16.msra.mxu2 %v15019_v37  ;;  %v16164_v31 = vld [vmem:[%s22007_s30 + $0xee8] sm:$0xf0]  ;;  %v6067_v37 = vpop.f32.mrf.mxu0  ;;  %v20063_v44 = vld [vmem:[%s22007_s30 + $0x8ec] sm:$0xf0] }
 0x35e   : > { %6286 = vmatpush.bf16.msra.mxu1 %v14539_v57  ;;  %6274 = vmatmul.bf16.vlgmr.msra.gmra.mxu0 %v22698_v47  ;;  %v6080_v39 = vpop.f32.mrf.mxu1  ;;  %v6068_v38 = vadd.f32 %v6067_v37, %v3276_v20  ;;  %v16167_v46 = vor.u32 %v20250_v29, %v16164_v31  ;;  %v15658_v54 = vld [vmem:[%s22007_s30 + $0xad0] sm:$0xf]  ;;  %v20242_v57 = vld [vmem:[%s22007_s30 + $0xe8c] sm:$0xf]  ;;  %v15403_v63 = vor.u32 %v20063_v44, %v15402_v43 }
 0x35f   : > { %6318 = vmatpush.bf16.msrb.mxu0 %v15531_v59  ;;  %6255 = vmatpush.bf16.msrb.mxu3 %v16231_v33  ;;  %v20127_v55 = vld [vmem:[%s22007_s30 + $0xaec] sm:$0xf0]  ;;  %v23278_v59 = vadd.f32 %v5950_v30, %v23200_v50  ;;  %v16100_v10 = vld [vmem:[%s22007_s30 + $0xe68] sm:$0xf0]  ;;  %v5952_v14 = vpop.f32.mrf.mxu3 }
 0x360   : > { %v14858_v61 = vld [vmem:[%s22007_s30 + $0x490] sm:$0xf]  ;;  %v23283_v23 = vadd.f32 %v6080_v39, %v6068_v38  ;;  %v15659_v0 = vor.u32 %v20127_v55, %v15658_v54  ;;  %v20226_v21 = vld [vmem:[%s22007_s30 + $0xe0c] sm:$0xf]  ;;  %v14508_v54 = vld [vmem:[%s22007_s30 + $0x1f0] sm:$0xf0] }
 0x361   : > { %6293 = vmatpush.bf16.msra.mxu2 %v14987_v62  ;;  %6287 = vmatmul.bf16.vlgmr.msra.gmra.mxu1 %v22700_v6  ;;  %v19927_v36 = vld [vmem:[%s22007_s30 + $0x4ac] sm:$0xf0]  ;;  %v23285_v62 = vpop.f32.mrf.mxu2  ;;  %v16068_v26 = vld [vmem:[%s22007_s30 + $0xe28] sm:$0xf0]  ;;  %v19899_v55 = vld [vmem:[%s22007_s30 + $0x3d4] sm:$0xf] }
 0x362   : > { %6331 = vmatpush.bf16.msrb.mxu1 %v15787_v60  ;;  %v16132_v60 = vld [vmem:[%s22007_s30 + $0xea8] sm:$0xf0]  ;;  %v15370_v1 = vld [vmem:[%s22007_s30 + $0x890] sm:$0xf]  ;;  %v14859_v24 = vor.u32 %v19927_v36, %v14858_v61  ;;  %v16071_v39 = vor.u32 %v20226_v21, %v16068_v26  ;;  %v14444_v14 = vld [vmem:[%s22007_s30 + $0x170] sm:$0xf0] }
 0x363   : > { %6319 = vmatpush.bf16.msrb.mxu0 %v15499_v25  ;;  %6256 = vmatpush.bf16.msrb.mxu3 %v16199_v27  ;;  %v20055_v50 = vld [vmem:[%s22007_s30 + $0x8ac] sm:$0xf0]  ;;  %v16135_v9 = vor.u32 %v20242_v57, %v16132_v60  ;;  %v14764_v57 = vld [vmem:[%s22007_s30 + $0x3f0] sm:$0xf0] }
 0x364   : > { %v15626_v5 = vld [vmem:[%s22007_s30 + $0xa90] sm:$0xf]  ;;  %v15371_v48 = vor.u32 %v20055_v50, %v15370_v1  ;;  %v19883_v21 = vld [vmem:[%s22007_s30 + $0x354] sm:$0xf] }
 0x365   : > { %6294 = vmatpush.bf16.msra.mxu2 %v14955_v12  ;;  %v20119_v25 = vld [vmem:[%s22007_s30 + $0xaac] sm:$0xf0]  ;;  %v6069_v12 = vpop.f32.mrf.mxu0  ;;  %v14700_v26 = vld [vmem:[%s22007_s30 + $0x370] sm:$0xf0] }
 0x366   : > { %6332 = vmatpush.bf16.msrb.mxu1 %v15755_v7  ;;  %v20234_v7 = vld [vmem:[%s22007_s30 + $0xe4c] sm:$0xf]  ;;  %v14826_v11 = vld [vmem:[%s22007_s30 + $0x450] sm:$0xf]  ;;  %v6082_v8 = vpop.f32.mrf.mxu1  ;;  %v15627_v2 = vor.u32 %v20119_v25, %v15626_v5  ;;  %v14767_v5 = vor.u32 %v19899_v55, %v14764_v57  ;;  %v19827_v25 = vld [vmem:[%s22007_s30 + $0x194] sm:$0xf] }
 0x367   : > { %6320 = vmatpush.bf16.msrb.mxu0 %v15467_v16  ;;  %6257 = vmatpush.bf16.msrb.mxu3 %v16167_v46  ;;  %v19919_v33 = vld [vmem:[%s22007_s30 + $0x46c] sm:$0xf0]  ;;  %v16103_v16 = vor.u32 %v20234_v7, %v16100_v10  ;;  %v14476_v7 = vld [vmem:[%s22007_s30 + $0x1b0] sm:$0xf0] }
 0x368   : > { %v15338_v51 = vld [vmem:[%s22007_s30 + $0x850] sm:$0xf]  ;;  %v14732_v12 = vld [vmem:[%s22007_s30 + $0x3b0] sm:$0xf0] }
 0x369   : > { %6295 = vmatpush.bf16.msra.mxu2 %v14923_v42  ;;  %v20047_v13 = vld [vmem:[%s22007_s30 + $0x86c] sm:$0xf0]  ;;  %v6043_v56 = vpop.f32.mrf.mxu2  ;;  %v19803_v57 = vld [vmem:[%s22007_s30 + $0xd4] sm:$0xf] }
 0x36a   : > { %6333 = vmatpush.bf16.msrb.mxu1 %v15723_v18  ;;  %v15594_v15 = vld [vmem:[%s22007_s30 + $0xa50] sm:$0xf]  ;;  %v14827_v18 = vor.u32 %v19919_v33, %v14826_v11  ;;  %v15339_v32 = vor.u32 %v20047_v13, %v15338_v51  ;;  %v19891_v33 = vld [vmem:[%s22007_s30 + $0x394] sm:$0xf]  ;;  %v14479_v13 = vor.u32 %v19827_v25, %v14476_v7 }
 0x36b   : > { %6321 = vmatpush.bf16.msrb.mxu0 %v15435_v40  ;;  %6258 = vmatpush.bf16.msrb.mxu3 %v16135_v9  ;;  %v20111_v20 = vld [vmem:[%s22007_s30 + $0xa6c] sm:$0xf0] }
 0x36c   : > { %v14794_v27 = vld [vmem:[%s22007_s30 + $0x410] sm:$0xf]  ;;  %v15595_v37 = vor.u32 %v20111_v20, %v15594_v15  ;;  %v14735_v15 = vor.u32 %v19891_v33, %v14732_v12  ;;  %v19795_v12 = vld [vmem:[%s22007_s30 + $0x94] sm:$0xf] }
 0x36d   : > { %6296 = vmatpush.bf16.msra.mxu2 %v14891_v49  ;;  %v19911_v42 = vld [vmem:[%s22007_s30 + $0x42c] sm:$0xf0]  ;;  %v19835_v49 = vld [vmem:[%s22007_s30 + $0x1d4] sm:$0xf] }
 0x36e   : > { %6334 = vmatpush.bf16.msrb.mxu1 %v15691_v41  ;;  %v15274_v28 = vld [vmem:[%s22007_s30 + $0x7d0] sm:$0xf]  ;;  %v14795_v40 = vor.u32 %v19911_v42, %v14794_v27 }
 0x36f   : > { %6322 = vmatpush.bf16.msrb.mxu0 %v15403_v63  ;;  %v20031_v29 = vld [vmem:[%s22007_s30 + $0x7ec] sm:$0xf0]  ;;  %6259 = vmatpush.bf16.msrb.mxu3 %v16103_v16 }
 0x370   : > { %v16042_v31 = vld [vmem:[%s22007_s30 + $0xdd0] sm:$0xf]  ;;  %v15275_v38 = vor.u32 %v20031_v29, %v15274_v28 }
 0x371   : > { %6297 = vmatpush.bf16.msra.mxu2 %v14859_v24  ;;  %v20223_v3 = vld [vmem:[%s22007_s30 + $0xdec] sm:$0xf0]  ;;  %v14511_v24 = vor.u32 %v19835_v49, %v14508_v54 }
 0x372   : > { %6335 = vmatpush.bf16.msrb.mxu1 %v15659_v0  ;;  %v15306_v41 = vld [vmem:[%s22007_s30 + $0x810] sm:$0xf]  ;;  %v16043_v30 = vor.u32 %v20223_v3, %v16042_v31  ;;  %v6002_v0 = vpop.f32.mrf.mxu3  ;;  %v14703_v3 = vor.u32 %v19883_v21, %v14700_v26  ;;  %v19787_v21 = vld [vmem:[%s22007_s30 + $0x54] sm:$0xf] }
 0x373   : > { %6323 = vmatpush.bf16.msrb.mxu0 %v15371_v48  ;;  %v20039_v43 = vld [vmem:[%s22007_s30 + $0x82c] sm:$0xf0]  ;;  %6260 = vmatpush.bf16.msrb.mxu3 %v16071_v39  ;;  %v6003_v9 = vadd.f32 %v6002_v0, %v23238_v58  ;;  %v14636_v0 = vld [vmem:[%s22007_s30 + $0x2f0] sm:$0xf0] }
 0x374   : > { %v15562_v44 = vld [vmem:[%s22007_s30 + $0xa10] sm:$0xf]  ;;  %v15307_v1 = vor.u32 %v20039_v43, %v15306_v41  ;;  %v19875_v41 = vld [vmem:[%s22007_s30 + $0x314] sm:$0xf] }
 0x375   : > { %6298 = vmatpush.bf16.msra.mxu2 %v14827_v18  ;;  %v20103_v46 = vld [vmem:[%s22007_s30 + $0xa2c] sm:$0xf0]  ;;  %v6016_v48 = vadd.f32 %v23190_v34, %v6003_v9  ;;  %v19819_v34 = vld [vmem:[%s22007_s30 + $0x154] sm:$0xf] }
 0x376   : > { %6336 = vmatpush.bf16.msrb.mxu1 %v15627_v2  ;;  %v15242_v60 = vld [vmem:[%s22007_s30 + $0x790] sm:$0xf]  ;;  %v15563_v50 = vor.u32 %v20103_v46, %v15562_v44  ;;  %6261 = vmatmul.bf16.vlgmr.msrb.gmra.mxu3 %v22937_v4  ;;  %v14447_v31 = vor.u32 %v19819_v34, %v14444_v14  ;;  %v14668_v43 = vld [vmem:[%s22007_s30 + $0x330] sm:$0xf0] }
 0x377   : > { %6324 = vmatpush.bf16.msrb.mxu0 %v15339_v32  ;;  %v20023_v61 = vld [vmem:[%s22007_s30 + $0x7ac] sm:$0xf0]  ;;  %6305 = vmatpush.bf16.msra.mxu3 %v15275_v38  ;;  %v6029_v16 = vadd.f32 %v23192_v35, %v6016_v48  ;;  %v19811_v32 = vld [vmem:[%s22007_s30 + $0x114] sm:$0xf]  ;;  %v14671_v55 = vor.u32 %v19875_v41, %v14668_v43 }
 0x378   : > { %v16010_v36 = vld [vmem:[%s22007_s30 + $0xd90] sm:$0xf]  ;;  %v15243_v10 = vor.u32 %v20023_v61, %v15242_v60  ;;  %v14380_v60 = vld [vmem:[%s22007_s30 + $0xf0] sm:$0xf0] }
 0x379   : > { %v20215_v63 = vld [vmem:[%s22007_s30 + $0xdac] sm:$0xf0]  ;;  %6299 = vmatpush.bf16.msra.mxu2 %v14795_v40  ;;  %v6042_v35 = vadd.f32 %v23285_v62, %v6029_v16  ;;  %v14316_v26 = vld [vmem:[%s22007_s30 + $0x70] sm:$0xf0] }
 0x37a   : > { %6337 = vmatpush.bf16.msrb.mxu1 %v15595_v37  ;;  %v16011_v11 = vor.u32 %v20215_v63, %v16010_v36  ;;  %v15210_v8 = vld [vmem:[%s22007_s30 + $0x750] sm:$0xf]  ;;  %v6004_v29 = vpop.f32.mrf.mxu3  ;;  %v14412_v37 = vld [vmem:[%s22007_s30 + $0x130] sm:$0xf0] }
 0x37b   : > { %v20015_v2 = vld [vmem:[%s22007_s30 + $0x76c] sm:$0xf0]  ;;  %6325 = vmatpush.bf16.msrb.mxu0 %v15307_v1  ;;  %6306 = vmatpush.bf16.msra.mxu3 %v15243_v10  ;;  %v23351_v46 = vpop.f32.mrf.mxu0  ;;  %v14415_v54 = vor.u32 %v19811_v32, %v14412_v37  ;;  %v19867_v63 = vld [vmem:[%s22007_s30 + $0x2d4] sm:$0xf] }
 0x37c   : > { %6300 = vmatmul.bf16.vlgmr.msra.gmra.mxu2 %v22703_v52  ;;  %v15978_v58 = vld [vmem:[%s22007_s30 + $0xd50] sm:$0xf]  ;;  %v15211_v18 = vor.u32 %v20015_v2, %v15210_v8  ;;  %v14639_v33 = vor.u32 %v19867_v63, %v14636_v0  ;;  %v14348_v8 = vld [vmem:[%s22007_s30 + $0xb0] sm:$0xf0] }
 0x37d   : > { %6344 = vmatpush.bf16.msrb.mxu2 %v16043_v30  ;;  %v20207_v51 = vld [vmem:[%s22007_s30 + $0xd6c] sm:$0xf0]  ;;  %v19859_v2 = vld [vmem:[%s22007_s30 + $0x294] sm:$0xf] }
 0x37e   : > { %6338 = vmatpush.bf16.msrb.mxu1 %v15563_v50  ;;  %v15979_v20 = vor.u32 %v20207_v51, %v15978_v58  ;;  %v15178_v27 = vld [vmem:[%s22007_s30 + $0x710] sm:$0xf]  ;;  %6326 = vmatmul.bf16.vlgmr.msrb.gmra.mxu0 %v22765_v17  ;;  %v23353_v49 = vpop.f32.mrf.mxu1  ;;  %v14604_v58 = vld [vmem:[%s22007_s30 + $0x2b0] sm:$0xf0] }
 0x37f   : > { %6370 = vmatpush.bf16.msra.mxu0 %v14511_v24  ;;  %v20007_v42 = vld [vmem:[%s22007_s30 + $0x72c] sm:$0xf0]  ;;  %6307 = vmatpush.bf16.msra.mxu3 %v15211_v18  ;;  %v6093_v50 = vpop.f32.mrf.mxu2  ;;  %v14351_v18 = vor.u32 %v19795_v12, %v14348_v8  ;;  %v19963_v41 = vld [vmem:[%s22007_s30 + $0x5d4] sm:$0xf] }
 0x380   : > { %v15946_v28 = vld [vmem:[%s22007_s30 + $0xd10] sm:$0xf]  ;;  %v15179_v39 = vor.u32 %v20007_v42, %v15178_v27  ;;  %v23364_v25 = vadd.f32 %v6093_v50, %v23283_v23  ;;  %v19851_v27 = vld [vmem:[%s22007_s30 + $0x254] sm:$0xf] }
 0x381   : > { %6345 = vmatpush.bf16.msrb.mxu2 %v16011_v11  ;;  %6339 = vmatmul.bf16.vlgmr.msrb.gmra.mxu1 %v22817_v45  ;;  %v20199_v56 = vld [vmem:[%s22007_s30 + $0xd2c] sm:$0xf0]  ;;  %v14383_v11 = vor.u32 %v19803_v57, %v14380_v60  ;;  %v15020_v43 = vld [vmem:[%s22007_s30 + $0x5f0] sm:$0xf0] }
 0x382   : > { %6383 = vmatpush.bf16.msra.mxu1 %v14767_v5  ;;  %v15947_v40 = vor.u32 %v20199_v56, %v15946_v28  ;;  %v15146_v44 = vld [vmem:[%s22007_s30 + $0x6d0] sm:$0xf]  ;;  %v6054_v7 = vpop.f32.mrf.mxu3  ;;  %v14572_v56 = vld [vmem:[%s22007_s30 + $0x270] sm:$0xf0] }
 0x383   : > { %6371 = vmatpush.bf16.msra.mxu0 %v14479_v13  ;;  %v19999_v62 = vld [vmem:[%s22007_s30 + $0x6ec] sm:$0xf0]  ;;  %6308 = vmatpush.bf16.msra.mxu3 %v15179_v39  ;;  %v23366_v10 = vadd.f32 %v6054_v7, %v6042_v35  ;;  %v6121_v14 = vpop.f32.mrf.mxu0  ;;  %v19843_v57 = vld [vmem:[%s22007_s30 + $0x214] sm:$0xf] }
 0x384   : > { %v15914_v38 = vld [vmem:[%s22007_s30 + $0xcd0] sm:$0xf]  ;;  %v15147_v61 = vor.u32 %v19999_v62, %v15146_v44  ;;  %v14319_v44 = vor.u32 %v19787_v21, %v14316_v26  ;;  %v14575_v62 = vor.u32 %v19851_v27, %v14572_v56  ;;  %v20091_v63 = vld [vmem:[%s22007_s30 + $0x9d4] sm:$0xf] }
 0x385   : > { %6346 = vmatpush.bf16.msrb.mxu2 %v15979_v20  ;;  %v20191_v30 = vld [vmem:[%s22007_s30 + $0xcec] sm:$0xf0]  ;;  %v14607_v20 = vor.u32 %v19859_v2, %v14604_v58  ;;  %v15532_v0 = vld [vmem:[%s22007_s30 + $0x9f0] sm:$0xf0] }
 0x386   : > { %6384 = vmatpush.bf16.msra.mxu1 %v14735_v15  ;;  %v15915_v36 = vor.u32 %v20191_v30, %v15914_v38  ;;  %v15114_v1 = vld [vmem:[%s22007_s30 + $0x690] sm:$0xf]  ;;  %v6134_v16 = vpop.f32.mrf.mxu1  ;;  %v15788_v50 = vld [vmem:[%s22007_s30 + $0xbf0] sm:$0xf0]  ;;  %v15535_v12 = vor.u32 %v20091_v63, %v15532_v0 }
 0x387   : > { %6372 = vmatpush.bf16.msra.mxu0 %v14447_v31  ;;  %v19991_v9 = vld [vmem:[%s22007_s30 + $0x6ac] sm:$0xf0]  ;;  %6309 = vmatpush.bf16.msra.mxu3 %v15147_v61  ;;  %v6095_v31 = vpop.f32.mrf.mxu2  ;;  %v15023_v61 = vor.u32 %v19963_v41, %v15020_v43  ;;  %v14988_v7 = vld [vmem:[%s22007_s30 + $0x5b0] sm:$0xf0] }
 0x388   : > { %v15882_v24 = vld [vmem:[%s22007_s30 + $0xc90] sm:$0xf]  ;;  %v15115_v48 = vor.u32 %v19991_v9, %v15114_v1  ;;  %v20155_v1 = vld [vmem:[%s22007_s30 + $0xbd4] sm:$0xf] }
 0x389   : > { %6347 = vmatpush.bf16.msrb.mxu2 %v15947_v40  ;;  %v20183_v5 = vld [vmem:[%s22007_s30 + $0xcac] sm:$0xf0]  ;;  %v15791_v8 = vor.u32 %v20155_v1, %v15788_v50  ;;  %v19947_v14 = vld [vmem:[%s22007_s30 + $0x554] sm:$0xf] }
 0x38a   : > { %6385 = vmatpush.bf16.msra.mxu1 %v14703_v3  ;;  %v15883_v23 = vor.u32 %v20183_v5, %v15882_v24  ;;  %v15082_v51 = vld [vmem:[%s22007_s30 + $0x650] sm:$0xf]  ;;  %v6056_v39 = vpop.f32.mrf.mxu3  ;;  %v19955_v5 = vld [vmem:[%s22007_s30 + $0x594] sm:$0xf] }
 0x38b   : > { %6373 = vmatpush.bf16.msra.mxu0 %v14415_v54  ;;  %v19983_v13 = vld [vmem:[%s22007_s30 + $0x66c] sm:$0xf0]  ;;  %6310 = vmatpush.bf16.msra.mxu3 %v15115_v48  ;;  %v19779_v54 = vld [vmem:[%s22007_s30 + $0x14] sm:$0xf]  ;;  %v14991_v58 = vor.u32 %v19955_v5, %v14988_v7  ;;  %v3277_v39 = vperm.slane %v23261_v19, 3 }
 0x38c   : > { %v15850_v15 = vld [vmem:[%s22007_s30 + $0xc50] sm:$0xf]  ;;  %v15083_v42 = vor.u32 %v19983_v13, %v15082_v51  ;;  %v20083_v48 = vld [vmem:[%s22007_s30 + $0x994] sm:$0xf] }
 0x38d   : > { %6348 = vmatpush.bf16.msrb.mxu2 %v15915_v36  ;;  %v20175_v34 = vld [vmem:[%s22007_s30 + $0xc6c] sm:$0xf0]  ;;  %v14540_v36 = vld [vmem:[%s22007_s30 + $0x230] sm:$0xf0] }
 0x38e   : > { %6386 = vmatpush.bf16.msra.mxu1 %v14671_v55  ;;  %v15851_v28 = vor.u32 %v20175_v34, %v15850_v15  ;;  %v15050_v35 = vld [vmem:[%s22007_s30 + $0x610] sm:$0xf]  ;;  %v14284_v55 = vld [vmem:[%s22007_s30 + $0x30] sm:$0xf0] }
 0x38f   : > { %6374 = vmatpush.bf16.msra.mxu0 %v14383_v11  ;;  %v19975_v29 = vld [vmem:[%s22007_s30 + $0x62c] sm:$0xf0]  ;;  %6311 = vmatpush.bf16.msra.mxu3 %v15083_v42  ;;  %v14287_v11 = vor.u32 %v19779_v54, %v14284_v55  ;;  %v20147_v51 = vld [vmem:[%s22007_s30 + $0xb94] sm:$0xf] }
 0x390   : > { %v15818_v3 = vld [vmem:[%s22007_s30 + $0xc10] sm:$0xf]  ;;  %v15051_v38 = vor.u32 %v19975_v29, %v15050_v35  ;;  %v15756_v13 = vld [vmem:[%s22007_s30 + $0xbb0] sm:$0xf0] }
 0x391   : > { %6349 = vmatpush.bf16.msrb.mxu2 %v15883_v23  ;;  %v20167_v32 = vld [vmem:[%s22007_s30 + $0xc2c] sm:$0xf0]  ;;  %v15500_v23 = vld [vmem:[%s22007_s30 + $0x9b0] sm:$0xf0] }
 0x392   : > { %6387 = vmatpush.bf16.msra.mxu1 %v14639_v33  ;;  %v16298_v37 = vld [vmem:[%s22007_s30 + $0xfd0] sm:$0xf]  ;;  %v15819_v30 = vor.u32 %v20167_v32, %v15818_v3  ;;  %v14543_v33 = vor.u32 %v19843_v57, %v14540_v36  ;;  %v14956_v16 = vld [vmem:[%s22007_s30 + $0x570] sm:$0xf0] }
 0x393   : > { %v20287_v40 = vld [vmem:[%s22007_s30 + $0xfec] sm:$0xf0]  ;;  %6375 = vmatpush.bf16.msra.mxu0 %v14351_v18  ;;  %6312 = vmatpush.bf16.msra.mxu3 %v15051_v38  ;;  %v15503_v18 = vor.u32 %v20083_v48, %v15500_v23  ;;  %v20075_v21 = vld [vmem:[%s22007_s30 + $0x954] sm:$0xf]  ;;  %v14959_v42 = vor.u32 %v19947_v14, %v14956_v16 }
 0x394   : > { %v16299_v60 = vor.u32 %v20287_v40, %v16298_v37  ;;  %v16266_v9 = vld [vmem:[%s22007_s30 + $0xf90] sm:$0xf]  ;;  %v15468_v26 = vld [vmem:[%s22007_s30 + $0x970] sm:$0xf0] }
 0x395   : > { %6350 = vmatpush.bf16.msrb.mxu2 %v15851_v28  ;;  %v20279_v24 = vld [vmem:[%s22007_s30 + $0xfac] sm:$0xf0]  ;;  %v20139_v28 = vld [vmem:[%s22007_s30 + $0xb54] sm:$0xf]  ;;  %v15471_v32 = vor.u32 %v20075_v21, %v15468_v26 }
 0x396   : > { %6388 = vmatpush.bf16.msra.mxu1 %v14607_v20  ;;  %v16267_v2 = vor.u32 %v20279_v24, %v16266_v9  ;;  %v16234_v15 = vld [vmem:[%s22007_s30 + $0xf50] sm:$0xf]  ;;  %6313 = vmatmul.bf16.vlgmr.msra.gmra.mxu3 %v22705_v53  ;;  %v15759_v20 = vor.u32 %v20147_v51, %v15756_v13  ;;  %v15724_v56 = vld [vmem:[%s22007_s30 + $0xb70] sm:$0xf0]  ;;  %v6106_v24 = vpop.f32.mrf.mxu3 }
 0x397   : > { %6376 = vmatpush.bf16.msra.mxu0 %v14319_v44  ;;  %6357 = vmatpush.bf16.msrb.mxu3 %v16299_v60  ;;  %v20271_v34 = vld [vmem:[%s22007_s30 + $0xf6c] sm:$0xf0]  ;;  %v19939_v31 = vld [vmem:[%s22007_s30 + $0x514] sm:$0xf]  ;;  %v15727_v37 = vor.u32 %v20139_v28, %v15724_v56 }
 0x398   : > { %v16235_v27 = vor.u32 %v20271_v34, %v16234_v15  ;;  %v16202_v35 = vld [vmem:[%s22007_s30 + $0xf10] sm:$0xf]  ;;  %v14924_v3 = vld [vmem:[%s22007_s30 + $0x530] sm:$0xf0] }
 0x399   : > { %6351 = vmatpush.bf16.msrb.mxu2 %v15819_v30  ;;  %v20263_v29 = vld [vmem:[%s22007_s30 + $0xf2c] sm:$0xf0]  ;;  %v20067_v40 = vld [vmem:[%s22007_s30 + $0x914] sm:$0xf]  ;;  %v14927_v44 = vor.u32 %v19939_v31, %v14924_v3 }
 0x39a   : > { %6389 = vmatpush.bf16.msra.mxu1 %v14575_v62  ;;  %v15436_v41 = vld [vmem:[%s22007_s30 + $0x930] sm:$0xf0]  ;;  %v16203_v43 = vor.u32 %v20263_v29, %v16202_v35  ;;  %v16170_v30 = vld [vmem:[%s22007_s30 + $0xed0] sm:$0xf] }
 0x39b   : > { %6377 = vmatpush.bf16.msra.mxu0 %v14287_v11  ;;  %6358 = vmatpush.bf16.msrb.mxu3 %v16267_v2  ;;  %v20131_v62 = vld [vmem:[%s22007_s30 + $0xb14] sm:$0xf]  ;;  %v20255_v54 = vld [vmem:[%s22007_s30 + $0xeec] sm:$0xf0]  ;;  %v6171_v60 = vpop.f32.mrf.mxu0  ;;  %v15439_v36 = vor.u32 %v20067_v40, %v15436_v41 }
 0x39c   : > { %6352 = vmatmul.bf16.vlgmr.msrb.gmra.mxu2 %v22876_v22  ;;  %v15692_v38 = vld [vmem:[%s22007_s30 + $0xb30] sm:$0xf0]  ;;  %v6172_v19 = vadd.f32 %v6171_v60, %v3277_v39  ;;  %v16171_v50 = vor.u32 %v20255_v54, %v16170_v30  ;;  %v16138_v11 = vld [vmem:[%s22007_s30 + $0xe90] sm:$0xf] }
 0x39d   : > { %6396 = vmatpush.bf16.msra.mxu2 %v15023_v61  ;;  %v19931_v55 = vld [vmem:[%s22007_s30 + $0x4d4] sm:$0xf]  ;;  %v15695_v63 = vor.u32 %v20131_v62, %v15692_v38  ;;  %v20247_v48 = vld [vmem:[%s22007_s30 + $0xeac] sm:$0xf0] }
 0x39e   : > { %6390 = vmatpush.bf16.msra.mxu1 %v14543_v33  ;;  %6378 = vmatmul.bf16.vlgmr.msra.gmra.mxu0 %v22698_v47  ;;  %v14892_v57 = vld [vmem:[%s22007_s30 + $0x4f0] sm:$0xf0]  ;;  %v6184_v61 = vpop.f32.mrf.mxu1  ;;  %v20239_v26 = vld [vmem:[%s22007_s30 + $0xe6c] sm:$0xf0]  ;;  %v6108_v39 = vpop.f32.mrf.mxu3 }
 0x39f   : > { %6422 = vmatpush.bf16.msrb.mxu0 %v15535_v12  ;;  %6359 = vmatpush.bf16.msrb.mxu3 %v16235_v27  ;;  %v20059_v0 = vld [vmem:[%s22007_s30 + $0x8d4] sm:$0xf]  ;;  %v14895_v9 = vor.u32 %v19931_v55, %v14892_v57  ;;  %v23434_v33 = vadd.f32 %v6184_v61, %v6172_v19  ;;  %v6107_v12 = vadd.f32 %v6106_v24, %v23364_v25  ;;  %v16074_v41 = vld [vmem:[%s22007_s30 + $0xe10] sm:$0xf] }
 0x3a0   : > { %v15404_v1 = vld [vmem:[%s22007_s30 + $0x8f0] sm:$0xf0]  ;;  %v16139_v25 = vor.u32 %v20247_v48, %v16138_v11  ;;  %v14770_v11 = vld [vmem:[%s22007_s30 + $0x3d8] sm:$0xf] }
 0x3a1   : > { %6397 = vmatpush.bf16.msra.mxu2 %v14991_v58  ;;  %6391 = vmatmul.bf16.vlgmr.msra.gmra.mxu1 %v22700_v6  ;;  %v20123_v5 = vld [vmem:[%s22007_s30 + $0xad4] sm:$0xf]  ;;  %v6120_v58 = vadd.f32 %v23351_v46, %v6107_v12  ;;  %v15407_v51 = vor.u32 %v20059_v0, %v15404_v1  ;;  %v19904_v12 = vld [vmem:[%s22007_s30 + $0x3f4] sm:$0xf0] }
 0x3a2   : > { %6435 = vmatpush.bf16.msrb.mxu1 %v15791_v8  ;;  %v15660_v7 = vld [vmem:[%s22007_s30 + $0xaf0] sm:$0xf0]  ;;  %v6145_v8 = vpop.f32.mrf.mxu2 }
 0x3a3   : > { %6423 = vmatpush.bf16.msrb.mxu0 %v15503_v18  ;;  %6360 = vmatpush.bf16.msrb.mxu3 %v16203_v43  ;;  %v19923_v23 = vld [vmem:[%s22007_s30 + $0x494] sm:$0xf]  ;;  %v15663_v13 = vor.u32 %v20123_v5, %v15660_v7  ;;  %v6133_v21 = vadd.f32 %v23353_v49, %v6120_v58  ;;  %v6173_v46 = vpop.f32.mrf.mxu0  ;;  %v20231_v43 = vld [vmem:[%s22007_s30 + $0xe2c] sm:$0xf0]  ;;  %v14514_v5 = vld [vmem:[%s22007_s30 + $0x1d8] sm:$0xf] }
 0x3a4   : > { %v14860_v2 = vld [vmem:[%s22007_s30 + $0x4b0] sm:$0xf0]  ;;  %v16075_v19 = vor.u32 %v20231_v43, %v16074_v41  ;;  %v19840_v7 = vld [vmem:[%s22007_s30 + $0x1f4] sm:$0xf0] }
 0x3a5   : > { %6398 = vmatpush.bf16.msra.mxu2 %v14959_v42  ;;  %v20051_v15 = vld [vmem:[%s22007_s30 + $0x894] sm:$0xf]  ;;  %v14863_v14 = vor.u32 %v19923_v23, %v14860_v2  ;;  %v23450_v56 = vadd.f32 %v6145_v8, %v6133_v21 }
 0x3a6   : > { %6436 = vmatpush.bf16.msrb.mxu1 %v15759_v20  ;;  %v15372_v34 = vld [vmem:[%s22007_s30 + $0x8b0] sm:$0xf0]  ;;  %v16106_v20 = vld [vmem:[%s22007_s30 + $0xe50] sm:$0xf]  ;;  %v6186_v28 = vpop.f32.mrf.mxu1 }
 0x3a7   : > { %6424 = vmatpush.bf16.msrb.mxu0 %v15471_v32  ;;  %6361 = vmatpush.bf16.msrb.mxu3 %v16171_v50  ;;  %v20115_v16 = vld [vmem:[%s22007_s30 + $0xa94] sm:$0xf]  ;;  %v15375_v35 = vor.u32 %v20051_v15, %v15372_v34  ;;  %v16107_v32 = vor.u32 %v20239_v26, %v16106_v20  ;;  %v14771_v15 = vor.u32 %v19904_v12, %v14770_v11  ;;  %v14482_v34 = vld [vmem:[%s22007_s30 + $0x198] sm:$0xf] }
 0x3a8   : > { %v15628_v18 = vld [vmem:[%s22007_s30 + $0xab0] sm:$0xf0]  ;;  %v19896_v20 = vld [vmem:[%s22007_s30 + $0x3b4] sm:$0xf0] }
 0x3a9   : > { %6399 = vmatpush.bf16.msra.mxu2 %v14927_v44  ;;  %v19915_v27 = vld [vmem:[%s22007_s30 + $0x454] sm:$0xf]  ;;  %v15631_v29 = vor.u32 %v20115_v16, %v15628_v18  ;;  %v14738_v18 = vld [vmem:[%s22007_s30 + $0x398] sm:$0xf] }
 0x3aa   : > { %6437 = vmatpush.bf16.msrb.mxu1 %v15727_v37  ;;  %v14828_v42 = vld [vmem:[%s22007_s30 + $0x470] sm:$0xf0]  ;;  %v6147_v44 = vpop.f32.mrf.mxu2  ;;  %v14739_v28 = vor.u32 %v19896_v20, %v14738_v18  ;;  %v14610_v18 = vld [vmem:[%s22007_s30 + $0x298] sm:$0xf] }
 0x3ab   : > { %6425 = vmatpush.bf16.msrb.mxu0 %v15439_v36  ;;  %v20043_v31 = vld [vmem:[%s22007_s30 + $0x854] sm:$0xf]  ;;  %6362 = vmatpush.bf16.msrb.mxu3 %v16139_v25  ;;  %v14831_v37 = vor.u32 %v19915_v27, %v14828_v42  ;;  %v19832_v25 = vld [vmem:[%s22007_s30 + $0x1b4] sm:$0xf0] }
 0x3ac   : > { %v15340_v49 = vld [vmem:[%s22007_s30 + $0x870] sm:$0xf0]  ;;  %v14483_v46 = vor.u32 %v19832_v25, %v14482_v34  ;;  %v19864_v20 = vld [vmem:[%s22007_s30 + $0x2b4] sm:$0xf0] }
 0x3ad   : > { %6400 = vmatpush.bf16.msra.mxu2 %v14895_v9  ;;  %v20107_v3 = vld [vmem:[%s22007_s30 + $0xa54] sm:$0xf]  ;;  %v15343_v60 = vor.u32 %v20043_v31, %v15340_v49 }
 0x3ae   : > { %6438 = vmatpush.bf16.msrb.mxu1 %v15695_v63  ;;  %v15596_v40 = vld [vmem:[%s22007_s30 + $0xa70] sm:$0xf0] }
 0x3af   : > { %6426 = vmatpush.bf16.msrb.mxu0 %v15407_v51  ;;  %v19907_v62 = vld [vmem:[%s22007_s30 + $0x414] sm:$0xf]  ;;  %v15599_v61 = vor.u32 %v20107_v3, %v15596_v40  ;;  %6363 = vmatpush.bf16.msrb.mxu3 %v16107_v32  ;;  %v14706_v3 = vld [vmem:[%s22007_s30 + $0x358] sm:$0xf] }
 0x3b0   : > { %v14796_v38 = vld [vmem:[%s22007_s30 + $0x430] sm:$0xf0]  ;;  %v19888_v32 = vld [vmem:[%s22007_s30 + $0x374] sm:$0xf0] }
 0x3b1   : > { %6401 = vmatpush.bf16.msra.mxu2 %v14863_v14  ;;  %v20027_v30 = vld [vmem:[%s22007_s30 + $0x7d4] sm:$0xf]  ;;  %v14799_v36 = vor.u32 %v19907_v62, %v14796_v38  ;;  %v14707_v44 = vor.u32 %v19888_v32, %v14706_v3  ;;  %v14418_v62 = vld [vmem:[%s22007_s30 + $0x118] sm:$0xf] }
 0x3b2   : > { %6439 = vmatpush.bf16.msrb.mxu1 %v15663_v13  ;;  %v15276_v54 = vld [vmem:[%s22007_s30 + $0x7f0] sm:$0xf0]  ;;  %v14515_v13 = vor.u32 %v19840_v7, %v14514_v5  ;;  %v19816_v38 = vld [vmem:[%s22007_s30 + $0x134] sm:$0xf0] }
 0x3b3   : > { %v20219_v55 = vld [vmem:[%s22007_s30 + $0xdd4] sm:$0xf]  ;;  %6427 = vmatpush.bf16.msrb.mxu0 %v15375_v35  ;;  %v15279_v50 = vor.u32 %v20027_v30, %v15276_v54  ;;  %6364 = vmatpush.bf16.msrb.mxu3 %v16075_v19  ;;  %v14450_v35 = vld [vmem:[%s22007_s30 + $0x158] sm:$0xf] }
 0x3b4   : > { %v16044_v57 = vld [vmem:[%s22007_s30 + $0xdf0] sm:$0xf0]  ;;  %v14578_v3 = vld [vmem:[%s22007_s30 + $0x258] sm:$0xf] }
 0x3b5   : > { %6402 = vmatpush.bf16.msra.mxu2 %v14831_v37  ;;  %v20035_v63 = vld [vmem:[%s22007_s30 + $0x814] sm:$0xf]  ;;  %v16047_v9 = vor.u32 %v20219_v55, %v16044_v57  ;;  %v14674_v55 = vld [vmem:[%s22007_s30 + $0x318] sm:$0xf] }
 0x3b6   : > { %6440 = vmatpush.bf16.msrb.mxu1 %v15631_v29  ;;  %v15308_v0 = vld [vmem:[%s22007_s30 + $0x830] sm:$0xf0]  ;;  %6365 = vmatmul.bf16.vlgmr.msrb.gmra.mxu3 %v22937_v4  ;;  %v19824_v29 = vld [vmem:[%s22007_s30 + $0x174] sm:$0xf0]  ;;  %v6158_v11 = vpop.f32.mrf.mxu3 }
 0x3b7   : > { %v20099_v1 = vld [vmem:[%s22007_s30 + $0xa14] sm:$0xf]  ;;  %6428 = vmatpush.bf16.msrb.mxu0 %v15343_v60  ;;  %v15311_v58 = vor.u32 %v20035_v63, %v15308_v0  ;;  %6409 = vmatpush.bf16.msra.mxu3 %v15279_v50  ;;  %v14451_v43 = vor.u32 %v19824_v29, %v14450_v35  ;;  %v19880_v57 = vld [vmem:[%s22007_s30 + $0x334] sm:$0xf0]  ;;  %v14611_v29 = vor.u32 %v19864_v20, %v14610_v18 }
 0x3b8   : > { %v15564_v24 = vld [vmem:[%s22007_s30 + $0xa30] sm:$0xf0]  ;;  %v14675_v50 = vor.u32 %v19880_v57, %v14674_v55  ;;  %v15026_v55 = vld [vmem:[%s22007_s30 + $0x5d8] sm:$0xf] }
 0x3b9   : > { %v20019_v8 = vld [vmem:[%s22007_s30 + $0x794] sm:$0xf]  ;;  %6403 = vmatpush.bf16.msra.mxu2 %v14799_v36  ;;  %v15567_v51 = vor.u32 %v20099_v1, %v15564_v24  ;;  %v14419_v1 = vor.u32 %v19816_v38, %v14418_v62  ;;  %v19808_v24 = vld [vmem:[%s22007_s30 + $0xf4] sm:$0xf0] }
 0x3ba   : > { %6441 = vmatpush.bf16.msrb.mxu1 %v15599_v61  ;;  %v15244_v48 = vld [vmem:[%s22007_s30 + $0x7b0] sm:$0xf0]  ;;  %v19968_v57 = vld [vmem:[%s22007_s30 + $0x5f4] sm:$0xf0] }
 0x3bb   : > { %v20211_v23 = vld [vmem:[%s22007_s30 + $0xd94] sm:$0xf]  ;;  %v15247_v14 = vor.u32 %v20019_v8, %v15244_v48  ;;  %6429 = vmatpush.bf16.msrb.mxu0 %v15311_v58  ;;  %v23504_v63 = vpop.f32.mrf.mxu0  ;;  %v14642_v8 = vld [vmem:[%s22007_s30 + $0x2d8] sm:$0xf] }
 0x3bc   : > { %v16012_v2 = vld [vmem:[%s22007_s30 + $0xdb0] sm:$0xf0]  ;;  %6404 = vmatmul.bf16.vlgmr.msra.gmra.mxu2 %v22703_v52  ;;  %v19872_v48 = vld [vmem:[%s22007_s30 + $0x2f4] sm:$0xf0] }
 0x3bd   : > { %6448 = vmatpush.bf16.msrb.mxu2 %v16047_v9  ;;  %v16015_v16 = vor.u32 %v20211_v23, %v16012_v2  ;;  %v20011_v21 = vld [vmem:[%s22007_s30 + $0x754] sm:$0xf]  ;;  %6410 = vmatpush.bf16.msra.mxu3 %v15247_v14  ;;  %v14386_v9 = vld [vmem:[%s22007_s30 + $0xd8] sm:$0xf]  ;;  %v23514_v2 = vadd.f32 %v6158_v11, %v23450_v56  ;;  %v14643_v25 = vor.u32 %v19872_v48, %v14642_v8 }
 0x3be   : > { %v15212_v26 = vld [vmem:[%s22007_s30 + $0x770] sm:$0xf0]  ;;  %6442 = vmatpush.bf16.msrb.mxu1 %v15567_v51  ;;  %6430 = vmatmul.bf16.vlgmr.msrb.gmra.mxu0 %v22765_v17  ;;  %v23506_v0 = vpop.f32.mrf.mxu1  ;;  %v14387_v34 = vor.u32 %v19808_v24, %v14386_v9  ;;  %v14354_v14 = vld [vmem:[%s22007_s30 + $0x98] sm:$0xf] }
 0x3bf   : > { %v20203_v27 = vld [vmem:[%s22007_s30 + $0xd54] sm:$0xf]  ;;  %6474 = vmatpush.bf16.msra.mxu0 %v14515_v13  ;;  %v15215_v31 = vor.u32 %v20011_v21, %v15212_v26  ;;  %v6197_v12 = vpop.f32.mrf.mxu2  ;;  %v14546_v9 = vld [vmem:[%s22007_s30 + $0x218] sm:$0xf] }
 0x3c0   : > { %v15980_v42 = vld [vmem:[%s22007_s30 + $0xd70] sm:$0xf0]  ;;  %v23517_v58 = vadd.f32 %v6197_v12, %v23434_v33  ;;  %v15538_v11 = vld [vmem:[%s22007_s30 + $0x9d8] sm:$0xf] }
 0x3c1   : > { %6449 = vmatpush.bf16.msrb.mxu2 %v16015_v16  ;;  %v15983_v49 = vor.u32 %v20203_v27, %v15980_v42  ;;  %v20003_v37 = vld [vmem:[%s22007_s30 + $0x714] sm:$0xf]  ;;  %6443 = vmatmul.bf16.vlgmr.msrb.gmra.mxu1 %v22817_v45  ;;  %v19800_v16 = vld [vmem:[%s22007_s30 + $0xb4] sm:$0xf0] }
 0x3c2   : > { %6487 = vmatpush.bf16.msra.mxu1 %v14771_v15  ;;  %v15180_v39 = vld [vmem:[%s22007_s30 + $0x730] sm:$0xf0]  ;;  %6411 = vmatpush.bf16.msra.mxu3 %v15215_v31  ;;  %v14355_v35 = vor.u32 %v19800_v16, %v14354_v14  ;;  %v14322_v31 = vld [vmem:[%s22007_s30 + $0x58] sm:$0xf] }
 0x3c3   : > { %v20195_v40 = vld [vmem:[%s22007_s30 + $0xd14] sm:$0xf]  ;;  %6475 = vmatpush.bf16.msra.mxu0 %v14483_v46  ;;  %v15183_v30 = vor.u32 %v20003_v37, %v15180_v39  ;;  %v6225_v46 = vpop.f32.mrf.mxu0  ;;  %v6160_v39 = vpop.f32.mrf.mxu3  ;;  %v20096_v12 = vld [vmem:[%s22007_s30 + $0x9f4] sm:$0xf0] }
 0x3c4   : > { %v15948_v41 = vld [vmem:[%s22007_s30 + $0xd30] sm:$0xf0]  ;;  %v15794_v8 = vld [vmem:[%s22007_s30 + $0xbd8] sm:$0xf]  ;;  %v15539_v14 = vor.u32 %v20096_v12, %v15538_v11 }
 0x3c5   : > { %6450 = vmatpush.bf16.msrb.mxu2 %v15983_v49  ;;  %v15951_v54 = vor.u32 %v20195_v40, %v15948_v41  ;;  %v19995_v60 = vld [vmem:[%s22007_s30 + $0x6d4] sm:$0xf]  ;;  %v19792_v49 = vld [vmem:[%s22007_s30 + $0x74] sm:$0xf0] }
 0x3c6   : > { %6488 = vmatpush.bf16.msra.mxu1 %v14739_v28  ;;  %v15148_v61 = vld [vmem:[%s22007_s30 + $0x6f0] sm:$0xf0]  ;;  %6412 = vmatpush.bf16.msra.mxu3 %v15183_v30  ;;  %v6238_v28 = vpop.f32.mrf.mxu1  ;;  %v19856_v41 = vld [vmem:[%s22007_s30 + $0x274] sm:$0xf0] }
 0x3c7   : > { %v20187_v19 = vld [vmem:[%s22007_s30 + $0xcd4] sm:$0xf]  ;;  %6476 = vmatpush.bf16.msra.mxu0 %v14451_v43  ;;  %v15151_v5 = vor.u32 %v19995_v60, %v15148_v61  ;;  %v6199_v40 = vpop.f32.mrf.mxu2  ;;  %v14323_v60 = vor.u32 %v19792_v49, %v14322_v31  ;;  %v14579_v61 = vor.u32 %v19856_v41, %v14578_v3  ;;  %v20160_v48 = vld [vmem:[%s22007_s30 + $0xbf4] sm:$0xf0] }
 0x3c8   : > { %v15916_v36 = vld [vmem:[%s22007_s30 + $0xcf0] sm:$0xf0]  ;;  %v15795_v16 = vor.u32 %v20160_v48, %v15794_v8  ;;  %v14962_v46 = vld [vmem:[%s22007_s30 + $0x558] sm:$0xf] }
 0x3c9   : > { %6451 = vmatpush.bf16.msrb.mxu2 %v15951_v54  ;;  %v15919_v7 = vor.u32 %v20187_v19, %v15916_v36  ;;  %v19987_v23 = vld [vmem:[%s22007_s30 + $0x694] sm:$0xf]  ;;  %v19952_v28 = vld [vmem:[%s22007_s30 + $0x574] sm:$0xf0] }
 0x3ca   : > { %6489 = vmatpush.bf16.msra.mxu1 %v14707_v44  ;;  %v15116_v51 = vld [vmem:[%s22007_s30 + $0x6b0] sm:$0xf0]  ;;  %6413 = vmatpush.bf16.msra.mxu3 %v15151_v5  ;;  %v15027_v5 = vor.u32 %v19968_v57, %v15026_v55  ;;  %v15474_v31 = vld [vmem:[%s22007_s30 + $0x958] sm:$0xf] }
 0x3cb   : > { %v20179_v13 = vld [vmem:[%s22007_s30 + $0xc94] sm:$0xf]  ;;  %6477 = vmatpush.bf16.msra.mxu0 %v14419_v1  ;;  %v15119_v56 = vor.u32 %v19987_v23, %v15116_v51  ;;  %v14290_v1 = vld [vmem:[%s22007_s30 + $0x18] sm:$0xf] }
 0x3cc   : > { %v15884_v15 = vld [vmem:[%s22007_s30 + $0xcb0] sm:$0xf0]  ;;  %v20080_v49 = vld [vmem:[%s22007_s30 + $0x974] sm:$0xf0] }
 0x3cd   : > { %6452 = vmatpush.bf16.msrb.mxu2 %v15919_v7  ;;  %v15887_v33 = vor.u32 %v20179_v13, %v15884_v15  ;;  %v19979_v21 = vld [vmem:[%s22007_s30 + $0x654] sm:$0xf]  ;;  %v19848_v7 = vld [vmem:[%s22007_s30 + $0x234] sm:$0xf0] }
 0x3ce   : > { %6490 = vmatpush.bf16.msra.mxu1 %v14675_v50  ;;  %v15084_v26 = vld [vmem:[%s22007_s30 + $0x670] sm:$0xf0]  ;;  %6414 = vmatpush.bf16.msra.mxu3 %v15119_v56  ;;  %v19784_v50 = vld [vmem:[%s22007_s30 + $0x34] sm:$0xf0] }
 0x3cf   : > { %v20171_v27 = vld [vmem:[%s22007_s30 + $0xc54] sm:$0xf]  ;;  %6478 = vmatpush.bf16.msra.mxu0 %v14387_v34  ;;  %v15087_v32 = vor.u32 %v19979_v21, %v15084_v26  ;;  %v14994_v13 = vld [vmem:[%s22007_s30 + $0x598] sm:$0xf]  ;;  %v14291_v34 = vor.u32 %v19784_v50, %v14290_v1 }
 0x3d0   : > { %v15852_v42 = vld [vmem:[%s22007_s30 + $0xc70] sm:$0xf0]  ;;  %v19960_v15 = vld [vmem:[%s22007_s30 + $0x5b4] sm:$0xf0] }
 0x3d1   : > { %6453 = vmatpush.bf16.msrb.mxu2 %v15887_v33  ;;  %v15855_v37 = vor.u32 %v20171_v27, %v15852_v42  ;;  %v19971_v43 = vld [vmem:[%s22007_s30 + $0x614] sm:$0xf]  ;;  %v15506_v56 = vld [vmem:[%s22007_s30 + $0x998] sm:$0xf]  ;;  %v14995_v20 = vor.u32 %v19960_v15, %v14994_v13 }
 0x3d2   : > { %6491 = vmatpush.bf16.msra.mxu1 %v14643_v25  ;;  %v15052_v44 = vld [vmem:[%s22007_s30 + $0x630] sm:$0xf0]  ;;  %6415 = vmatpush.bf16.msra.mxu3 %v15087_v32  ;;  %v14547_v25 = vor.u32 %v19848_v7, %v14546_v9  ;;  %v20088_v33 = vld [vmem:[%s22007_s30 + $0x9b4] sm:$0xf0]  ;;  %v14963_v32 = vor.u32 %v19952_v28, %v14962_v46 }
 0x3d3   : > { %v20163_v62 = vld [vmem:[%s22007_s30 + $0xc14] sm:$0xf]  ;;  %6479 = vmatpush.bf16.msra.mxu0 %v14355_v35  ;;  %v15055_v19 = vor.u32 %v19971_v43, %v15052_v44  ;;  %v15762_v21 = vld [vmem:[%s22007_s30 + $0xb98] sm:$0xf]  ;;  %v15507_v35 = vor.u32 %v20088_v33, %v15506_v56 }
 0x3d4   : > { %v15820_v38 = vld [vmem:[%s22007_s30 + $0xc30] sm:$0xf0]  ;;  %v20152_v26 = vld [vmem:[%s22007_s30 + $0xbb4] sm:$0xf0] }
 0x3d5   : > { %v20283_v30 = vld [vmem:[%s22007_s30 + $0xfd4] sm:$0xf]  ;;  %6454 = vmatpush.bf16.msrb.mxu2 %v15855_v37  ;;  %v15823_v36 = vor.u32 %v20163_v62, %v15820_v38  ;;  %v15730_v37 = vld [vmem:[%s22007_s30 + $0xb58] sm:$0xf]  ;;  %v15475_v62 = vor.u32 %v20080_v49, %v15474_v31 }
 0x3d6   : > { %v16300_v54 = vld [vmem:[%s22007_s30 + $0xff0] sm:$0xf0]  ;;  %6492 = vmatpush.bf16.msra.mxu1 %v14611_v29  ;;  %6416 = vmatpush.bf16.msra.mxu3 %v15055_v19  ;;  %v15763_v29 = vor.u32 %v20152_v26, %v15762_v21  ;;  %v20144_v39 = vld [vmem:[%s22007_s30 + $0xb74] sm:$0xf0] }
 0x3d7   : > { %v16303_v24 = vor.u32 %v20283_v30, %v16300_v54  ;;  %v20275_v23 = vld [vmem:[%s22007_s30 + $0xf94] sm:$0xf]  ;;  %6480 = vmatpush.bf16.msra.mxu0 %v14323_v60  ;;  %v14930_v43 = vld [vmem:[%s22007_s30 + $0x518] sm:$0xf]  ;;  %v15731_v38 = vor.u32 %v20144_v39, %v15730_v37  ;;  %v23575_v30 = vld [vmem:[%s22014_s15] sm:$0xff] }
 0x3d8   : > { %v16268_v51 = vld [vmem:[%s22007_s30 + $0xfb0] sm:$0xf0]  ;;  %v19944_v44 = vld [vmem:[%s22007_s30 + $0x534] sm:$0xf0]  ;;  %v3278_v54 = vperm.slane %v23575_v30, 4 }
 0x3d9   : > { %6455 = vmatpush.bf16.msrb.mxu2 %v15823_v36  ;;  %v16271_v18 = vor.u32 %v20275_v23, %v16268_v51  ;;  %v20267_v27 = vld [vmem:[%s22007_s30 + $0xf54] sm:$0xf]  ;;  %6417 = vmatmul.bf16.vlgmr.msra.gmra.mxu3 %v22705_v53  ;;  %v15442_v55 = vld [vmem:[%s22007_s30 + $0x918] sm:$0xf]  ;;  %v6210_v15 = vpop.f32.mrf.mxu3 }
 0x3da   : > { %6493 = vmatpush.bf16.msra.mxu1 %v14579_v61  ;;  %6461 = vmatpush.bf16.msrb.mxu3 %v16303_v24  ;;  %v16236_v42 = vld [vmem:[%s22007_s30 + $0xf70] sm:$0xf0]  ;;  %v20072_v57 = vld [vmem:[%s22007_s30 + $0x934] sm:$0xf0]  ;;  %v14931_v61 = vor.u32 %v19944_v44, %v14930_v43  ;;  %v6211_v33 = vadd.f32 %v6210_v15, %v23517_v58 }
 0x3db   : > { %6481 = vmatpush.bf16.msra.mxu0 %v14291_v34  ;;  %v16239_v3 = vor.u32 %v20267_v27, %v16236_v42  ;;  %v20259_v40 = vld [vmem:[%s22007_s30 + $0xf14] sm:$0xf]  ;;  %v15698_v19 = vld [vmem:[%s22007_s30 + $0xb18] sm:$0xf]  ;;  %v15443_v12 = vor.u32 %v20072_v57, %v15442_v55 }
 0x3dc   : > { %6456 = vmatmul.bf16.vlgmr.msrb.gmra.mxu2 %v22876_v22  ;;  %v16204_v41 = vld [vmem:[%s22007_s30 + $0xf30] sm:$0xf0]  ;;  %v20136_v36 = vld [vmem:[%s22007_s30 + $0xb34] sm:$0xf0]  ;;  %v6224_v26 = vadd.f32 %v23504_v63, %v6211_v33  ;;  %v19900_v33 = vld [vmem:[%s22007_s30 + $0x3dc] sm:$0xf] }
 0x3dd   : > { %6500 = vmatpush.bf16.msra.mxu2 %v15027_v5  ;;  %v16207_v60 = vor.u32 %v20259_v40, %v16204_v41  ;;  %v20251_v1 = vld [vmem:[%s22007_s30 + $0xed4] sm:$0xf]  ;;  %v14898_v9 = vld [vmem:[%s22007_s30 + $0x4d8] sm:$0xf]  ;;  %v6275_v5 = vpop.f32.mrf.mxu0  ;;  %v15699_v8 = vor.u32 %v20136_v36, %v15698_v19 }
 0x3de   : > { %6494 = vmatpush.bf16.msra.mxu1 %v14547_v25  ;;  %6462 = vmatpush.bf16.msrb.mxu3 %v16271_v18  ;;  %v16172_v50 = vld [vmem:[%s22007_s30 + $0xef0] sm:$0xf0]  ;;  %v19936_v24 = vld [vmem:[%s22007_s30 + $0x4f4] sm:$0xf0]  ;;  %v6288_v7 = vpop.f32.mrf.mxu1  ;;  %v6276_v11 = vadd.f32 %v6275_v5, %v3278_v54 }
 0x3df   : > { %6526 = vmatpush.bf16.msrb.mxu0 %v15539_v14  ;;  %v15410_v48 = vld [vmem:[%s22007_s30 + $0x8d8] sm:$0xf]  ;;  %v16175_v51 = vor.u32 %v20251_v1, %v16172_v50  ;;  %v14899_v13 = vor.u32 %v19936_v24, %v14898_v9  ;;  %v6249_v34 = vpop.f32.mrf.mxu2  ;;  %v16140_v18 = vld [vmem:[%s22007_s30 + $0xeb0] sm:$0xf0] }
 0x3e0   : > { %6482 = vmatmul.bf16.vlgmr.msra.gmra.mxu0 %v22698_v47  ;;  %v20064_v23 = vld [vmem:[%s22007_s30 + $0x8f4] sm:$0xf0]  ;;  %v23591_v56 = vadd.f32 %v6288_v7, %v6276_v11  ;;  %v20235_v49 = vld [vmem:[%s22007_s30 + $0xe54] sm:$0xf] }
 0x3e1   : > { %6501 = vmatpush.bf16.msra.mxu2 %v14995_v20  ;;  %6495 = vmatmul.bf16.vlgmr.msra.gmra.mxu1 %v22700_v6  ;;  %v15666_v25 = vld [vmem:[%s22007_s30 + $0xad8] sm:$0xf]  ;;  %v15411_v27 = vor.u32 %v20064_v23, %v15410_v48  ;;  %v6212_v57 = vpop.f32.mrf.mxu3  ;;  %v20227_v19 = vld [vmem:[%s22007_s30 + $0xe14] sm:$0xf] }
 0x3e2   : > { %6539 = vmatpush.bf16.msrb.mxu1 %v15795_v16  ;;  %6463 = vmatpush.bf16.msrb.mxu3 %v16239_v3  ;;  %v20128_v14 = vld [vmem:[%s22007_s30 + $0xaf4] sm:$0xf0]  ;;  %v20243_v16 = vld [vmem:[%s22007_s30 + $0xe94] sm:$0xf]  ;;  %v6237_v3 = vadd.f32 %v23506_v0, %v6224_v26  ;;  %v14708_v57 = vld [vmem:[%s22007_s30 + $0x378] sm:$0xf0] }
 0x3e3   : > { %6527 = vmatpush.bf16.msrb.mxu0 %v15507_v35  ;;  %v14866_v20 = vld [vmem:[%s22007_s30 + $0x498] sm:$0xf]  ;;  %v15667_v42 = vor.u32 %v20128_v14, %v15666_v25  ;;  %v16143_v35 = vor.u32 %v20243_v16, %v16140_v18  ;;  %v16076_v36 = vld [vmem:[%s22007_s30 + $0xe30] sm:$0xf0]  ;;  %v19836_v14 = vld [vmem:[%s22007_s30 + $0x1dc] sm:$0xf] }
 0x3e4   : > { %v19928_v21 = vld [vmem:[%s22007_s30 + $0x4b4] sm:$0xf0]  ;;  %v23607_v41 = vadd.f32 %v6249_v34, %v6237_v3  ;;  %v14516_v16 = vld [vmem:[%s22007_s30 + $0x1f8] sm:$0xf0] }
 0x3e5   : > { %6502 = vmatpush.bf16.msra.mxu2 %v14963_v32  ;;  %v15378_v46 = vld [vmem:[%s22007_s30 + $0x898] sm:$0xf]  ;;  %v14867_v58 = vor.u32 %v19928_v21, %v14866_v20  ;;  %v16108_v32 = vld [vmem:[%s22007_s30 + $0xe70] sm:$0xf0]  ;;  %v6277_v63 = vpop.f32.mrf.mxu0  ;;  %v14772_v18 = vld [vmem:[%s22007_s30 + $0x3f8] sm:$0xf0] }
 0x3e6   : > { %6540 = vmatpush.bf16.msrb.mxu1 %v15763_v29  ;;  %6464 = vmatpush.bf16.msrb.mxu3 %v16207_v60  ;;  %v20056_v28 = vld [vmem:[%s22007_s30 + $0x8b4] sm:$0xf0]  ;;  %v6290_v40 = vpop.f32.mrf.mxu1  ;;  %v16111_v54 = vor.u32 %v20235_v49, %v16108_v32  ;;  %v19892_v3 = vld [vmem:[%s22007_s30 + $0x39c] sm:$0xf] }
 0x3e7   : > { %6528 = vmatpush.bf16.msrb.mxu0 %v15475_v62  ;;  %v15634_v29 = vld [vmem:[%s22007_s30 + $0xa98] sm:$0xf]  ;;  %v15379_v43 = vor.u32 %v20056_v28, %v15378_v46  ;;  %v6251_v60 = vpop.f32.mrf.mxu2  ;;  %v14519_v28 = vor.u32 %v19836_v14, %v14516_v16  ;;  %v14740_v32 = vld [vmem:[%s22007_s30 + $0x3b8] sm:$0xf0] }
 0x3e8   : > { %v20120_v31 = vld [vmem:[%s22007_s30 + $0xab4] sm:$0xf0]  ;;  %v19804_v14 = vld [vmem:[%s22007_s30 + $0xdc] sm:$0xf] }
 0x3e9   : > { %6503 = vmatpush.bf16.msra.mxu2 %v14931_v61  ;;  %v14834_v37 = vld [vmem:[%s22007_s30 + $0x458] sm:$0xf]  ;;  %v15635_v44 = vor.u32 %v20120_v31, %v15634_v29  ;;  %v14484_v29 = vld [vmem:[%s22007_s30 + $0x1b8] sm:$0xf0] }
 0x3ea   : > { %6541 = vmatpush.bf16.msrb.mxu1 %v15731_v38  ;;  %6465 = vmatpush.bf16.msrb.mxu3 %v16175_v51  ;;  %v19920_v39 = vld [vmem:[%s22007_s30 + $0x474] sm:$0xf0]  ;;  %v14388_v16 = vld [vmem:[%s22007_s30 + $0xf8] sm:$0xf0] }
 0x3eb   : > { %6529 = vmatpush.bf16.msrb.mxu0 %v15443_v12  ;;  %v15346_v62 = vld [vmem:[%s22007_s30 + $0x858] sm:$0xf]  ;;  %v14835_v55 = vor.u32 %v19920_v39, %v14834_v37 }
 0x3ec   : > { %v20048_v0 = vld [vmem:[%s22007_s30 + $0x874] sm:$0xf0] }
 0x3ed   : > { %6504 = vmatpush.bf16.msra.mxu2 %v14899_v13  ;;  %v15602_v38 = vld [vmem:[%s22007_s30 + $0xa58] sm:$0xf]  ;;  %v15347_v11 = vor.u32 %v20048_v0, %v15346_v62  ;;  %v19820_v62 = vld [vmem:[%s22007_s30 + $0x15c] sm:$0xf] }
 0x3ee   : > { %6542 = vmatpush.bf16.msrb.mxu1 %v15699_v8  ;;  %6466 = vmatpush.bf16.msrb.mxu3 %v16143_v35  ;;  %v20112_v61 = vld [vmem:[%s22007_s30 + $0xa74] sm:$0xf0]  ;;  %v16079_v8 = vor.u32 %v20227_v19, %v16076_v36  ;;  %v14775_v35 = vor.u32 %v19900_v33, %v14772_v18  ;;  %v14452_v0 = vld [vmem:[%s22007_s30 + $0x178] sm:$0xf0] }
 0x3ef   : > { %6530 = vmatpush.bf16.msrb.mxu0 %v15411_v27  ;;  %v14802_v1 = vld [vmem:[%s22007_s30 + $0x418] sm:$0xf]  ;;  %v15603_v12 = vor.u32 %v20112_v61, %v15602_v38 }
 0x3f0   : > { %v19912_v50 = vld [vmem:[%s22007_s30 + $0x434] sm:$0xf0] }
 0x3f1   : > { %6505 = vmatpush.bf16.msra.mxu2 %v14867_v58  ;;  %v15282_v9 = vld [vmem:[%s22007_s30 + $0x7d8] sm:$0xf]  ;;  %v14803_v48 = vor.u32 %v19912_v50, %v14802_v1  ;;  %v19828_v58 = vld [vmem:[%s22007_s30 + $0x19c] sm:$0xf]  ;;  %v14455_v1 = vor.u32 %v19820_v62, %v14452_v0 }
 0x3f2   : > { %6543 = vmatpush.bf16.msrb.mxu1 %v15667_v42  ;;  %v20032_v24 = vld [vmem:[%s22007_s30 + $0x7f4] sm:$0xf0]  ;;  %6467 = vmatpush.bf16.msrb.mxu3 %v16111_v54 }
 0x3f3   : > { %v16050_v5 = vld [vmem:[%s22007_s30 + $0xdd8] sm:$0xf]  ;;  %6531 = vmatpush.bf16.msrb.mxu0 %v15379_v43  ;;  %v15283_v15 = vor.u32 %v20032_v24, %v15282_v9  ;;  %v14487_v43 = vor.u32 %v19828_v58, %v14484_v29  ;;  %v19812_v9 = vld [vmem:[%s22007_s30 + $0x11c] sm:$0xf] }
 0x3f4   : > { %v20224_v7 = vld [vmem:[%s22007_s30 + $0xdf4] sm:$0xf0]  ;;  %v14420_v24 = vld [vmem:[%s22007_s30 + $0x138] sm:$0xf0] }
 0x3f5   : > { %6506 = vmatpush.bf16.msra.mxu2 %v14835_v55  ;;  %v15314_v23 = vld [vmem:[%s22007_s30 + $0x818] sm:$0xf]  ;;  %v16051_v34 = vor.u32 %v20224_v7, %v16050_v5  ;;  %v19884_v55 = vld [vmem:[%s22007_s30 + $0x35c] sm:$0xf] }
 0x3f6   : > { %6544 = vmatpush.bf16.msrb.mxu1 %v15635_v44  ;;  %v20040_v51 = vld [vmem:[%s22007_s30 + $0x834] sm:$0xf0]  ;;  %6468 = vmatpush.bf16.msrb.mxu3 %v16079_v8  ;;  %v14743_v44 = vor.u32 %v19892_v3, %v14740_v32  ;;  %v14711_v50 = vor.u32 %v19884_v55, %v14708_v57  ;;  %v19796_v3 = vld [vmem:[%s22007_s30 + $0x9c] sm:$0xf] }
 0x3f7   : > { %v15570_v13 = vld [vmem:[%s22007_s30 + $0xa18] sm:$0xf]  ;;  %6532 = vmatpush.bf16.msrb.mxu0 %v15347_v11  ;;  %v15315_v42 = vor.u32 %v20040_v51, %v15314_v23  ;;  %v19876_v11 = vld [vmem:[%s22007_s30 + $0x31c] sm:$0xf] }
 0x3f8   : > { %v20104_v25 = vld [vmem:[%s22007_s30 + $0xa34] sm:$0xf0]  ;;  %v14356_v32 = vld [vmem:[%s22007_s30 + $0xb8] sm:$0xf0] }
 0x3f9   : > { %v15250_v20 = vld [vmem:[%s22007_s30 + $0x798] sm:$0xf]  ;;  %6507 = vmatpush.bf16.msra.mxu2 %v14803_v48  ;;  %v15571_v46 = vor.u32 %v20104_v25, %v15570_v13  ;;  %6469 = vmatmul.bf16.vlgmr.msrb.gmra.mxu3 %v22937_v4  ;;  %v19788_v55 = vld [vmem:[%s22007_s30 + $0x5c] sm:$0xf] }
 0x3fa   : > { %6545 = vmatpush.bf16.msrb.mxu1 %v15603_v12  ;;  %v20024_v21 = vld [vmem:[%s22007_s30 + $0x7b4] sm:$0xf0]  ;;  %6513 = vmatpush.bf16.msra.mxu3 %v15283_v15  ;;  %v14676_v12 = vld [vmem:[%s22007_s30 + $0x338] sm:$0xf0] }
 0x3fb   : > { %v16018_v26 = vld [vmem:[%s22007_s30 + $0xd98] sm:$0xf]  ;;  %v15251_v31 = vor.u32 %v20024_v21, %v15250_v20  ;;  %6533 = vmatpush.bf16.msrb.mxu0 %v15315_v42  ;;  %v23661_v13 = vpop.f32.mrf.mxu0  ;;  %v14679_v25 = vor.u32 %v19876_v11, %v14676_v12  ;;  %v6262_v20 = vpop.f32.mrf.mxu3  ;;  %v14324_v57 = vld [vmem:[%s22007_s30 + $0x78] sm:$0xf0] }
 0x3fc   : > { %v20216_v27 = vld [vmem:[%s22007_s30 + $0xdb4] sm:$0xf0]  ;;  %6508 = vmatmul.bf16.vlgmr.msra.gmra.mxu2 %v22703_v52 }
 0x3fd   : > { %6552 = vmatpush.bf16.msrb.mxu2 %v16051_v34  ;;  %v16019_v49 = vor.u32 %v20216_v27, %v16018_v26  ;;  %v15218_v37 = vld [vmem:[%s22007_s30 + $0x758] sm:$0xf]  ;;  %v14423_v34 = vor.u32 %v19812_v9, %v14420_v24  ;;  %v19868_v26 = vld [vmem:[%s22007_s30 + $0x2dc] sm:$0xf] }
 0x3fe   : > { %v20016_v39 = vld [vmem:[%s22007_s30 + $0x774] sm:$0xf0]  ;;  %6546 = vmatpush.bf16.msrb.mxu1 %v15571_v46  ;;  %6514 = vmatpush.bf16.msra.mxu3 %v15251_v31  ;;  %v23663_v15 = vpop.f32.mrf.mxu1  ;;  %v14644_v27 = vld [vmem:[%s22007_s30 + $0x2f8] sm:$0xf0]  ;;  %v23671_v46 = vadd.f32 %v6262_v20, %v23607_v41  ;;  %v14391_v31 = vor.u32 %v19804_v14, %v14388_v16 }
 0x3ff   : > { %v15986_v63 = vld [vmem:[%s22007_s30 + $0xd58] sm:$0xf]  ;;  %6578 = vmatpush.bf16.msra.mxu0 %v14519_v28  ;;  %v15219_v38 = vor.u32 %v20016_v39, %v15218_v37  ;;  %v6301_v21 = vpop.f32.mrf.mxu2  ;;  %v19860_v37 = vld [vmem:[%s22007_s30 + $0x29c] sm:$0xf] }
 0x400   : > { %v20208_v40 = vld [vmem:[%s22007_s30 + $0xd74] sm:$0xf0]  ;;  %6534 = vmatmul.bf16.vlgmr.msrb.gmra.mxu0 %v22765_v17  ;;  %v23674_v28 = vadd.f32 %v6301_v21, %v23591_v56  ;;  %v14612_v39 = vld [vmem:[%s22007_s30 + $0x2b8] sm:$0xf0] }
 0x401   : > { %6553 = vmatpush.bf16.msrb.mxu2 %v16019_v49  ;;  %v15987_v54 = vor.u32 %v20208_v40, %v15986_v63  ;;  %v15186_v60 = vld [vmem:[%s22007_s30 + $0x718] sm:$0xf]  ;;  %6547 = vmatmul.bf16.vlgmr.msrb.gmra.mxu1 %v22817_v45  ;;  %v14647_v49 = vor.u32 %v19868_v26, %v14644_v27  ;;  %v19780_v14 = vld [vmem:[%s22007_s30 + $0x1c] sm:$0xf] }
 0x402   : > { %6591 = vmatpush.bf16.msra.mxu1 %v14775_v35  ;;  %v20008_v61 = vld [vmem:[%s22007_s30 + $0x734] sm:$0xf0]  ;;  %6515 = vmatpush.bf16.msra.mxu3 %v15219_v38  ;;  %v14359_v38 = vor.u32 %v19796_v3, %v14356_v32  ;;  %v14292_v16 = vld [vmem:[%s22007_s30 + $0x38] sm:$0xf0] }
 0x403   : > { %v15954_v19 = vld [vmem:[%s22007_s30 + $0xd18] sm:$0xf]  ;;  %6579 = vmatpush.bf16.msra.mxu0 %v14487_v43  ;;  %v15187_v5 = vor.u32 %v20008_v61, %v15186_v60  ;;  %v6329_v62 = vpop.f32.mrf.mxu0  ;;  %v19852_v60 = vld [vmem:[%s22007_s30 + $0x25c] sm:$0xf]  ;;  %v14295_v3 = vor.u32 %v19780_v14, %v14292_v16 }
 0x404   : > { %v20200_v36 = vld [vmem:[%s22007_s30 + $0xd34] sm:$0xf0]  ;;  %v14548_v21 = vld [vmem:[%s22007_s30 + $0x238] sm:$0xf0] }
 0x405   : > { %6554 = vmatpush.bf16.msrb.mxu2 %v15987_v54  ;;  %v15955_v7 = vor.u32 %v20200_v36, %v15954_v19  ;;  %v15154_v8 = vld [vmem:[%s22007_s30 + $0x6d8] sm:$0xf]  ;;  %v14615_v54 = vor.u32 %v19860_v37, %v14612_v39  ;;  %v6264_v36 = vpop.f32.mrf.mxu3  ;;  %v20092_v26 = vld [vmem:[%s22007_s30 + $0x9dc] sm:$0xf] }
 0x406   : > { %6592 = vmatpush.bf16.msra.mxu1 %v14743_v44  ;;  %v20000_v48 = vld [vmem:[%s22007_s30 + $0x6f4] sm:$0xf0]  ;;  %6516 = vmatpush.bf16.msra.mxu3 %v15187_v5  ;;  %v6342_v0 = vpop.f32.mrf.mxu1  ;;  %v15540_v27 = vld [vmem:[%s22007_s30 + $0x9f8] sm:$0xf0] }
 0x407   : > { %v15922_v23 = vld [vmem:[%s22007_s30 + $0xcd8] sm:$0xf]  ;;  %6580 = vmatpush.bf16.msra.mxu0 %v14455_v1  ;;  %v15155_v33 = vor.u32 %v20000_v48, %v15154_v8  ;;  %v6303_v1 = vpop.f32.mrf.mxu2  ;;  %v19964_v8 = vld [vmem:[%s22007_s30 + $0x5dc] sm:$0xf] }
 0x408   : > { %v20192_v51 = vld [vmem:[%s22007_s30 + $0xcf4] sm:$0xf0]  ;;  %v15028_v48 = vld [vmem:[%s22007_s30 + $0x5f8] sm:$0xf0] }
 0x409   : > { %6555 = vmatpush.bf16.msrb.mxu2 %v15955_v7  ;;  %v15923_v18 = vor.u32 %v20192_v51, %v15922_v23  ;;  %v15122_v42 = vld [vmem:[%s22007_s30 + $0x698] sm:$0xf]  ;;  %v14327_v23 = vor.u32 %v19788_v55, %v14324_v57  ;;  %v15031_v20 = vor.u32 %v19964_v8, %v15028_v48  ;;  %v20084_v37 = vld [vmem:[%s22007_s30 + $0x99c] sm:$0xf]  ;;  %v3279_v8 = vperm.slane %v23575_v30, 5 }
 0x40a   : > { %6593 = vmatpush.bf16.msra.mxu1 %v14711_v50  ;;  %v19992_v35 = vld [vmem:[%s22007_s30 + $0x6b4] sm:$0xf0]  ;;  %6517 = vmatpush.bf16.msra.mxu3 %v15155_v33  ;;  %v14580_v50 = vld [vmem:[%s22007_s30 + $0x278] sm:$0xf0] }
 0x40b   : > { %v15890_v58 = vld [vmem:[%s22007_s30 + $0xc98] sm:$0xf]  ;;  %6581 = vmatpush.bf16.msra.mxu0 %v14423_v34  ;;  %v15123_v41 = vor.u32 %v19992_v35, %v15122_v42  ;;  %v14583_v51 = vor.u32 %v19852_v60, %v14580_v50  ;;  %v19844_v33 = vld [vmem:[%s22007_s30 + $0x21c] sm:$0xf] }
 0x40c   : > { %v20184_v29 = vld [vmem:[%s22007_s30 + $0xcb4] sm:$0xf0]  ;;  %v20156_v42 = vld [vmem:[%s22007_s30 + $0xbdc] sm:$0xf]  ;;  %v14551_v32 = vor.u32 %v19844_v33, %v14548_v21 }
 0x40d   : > { %6556 = vmatpush.bf16.msrb.mxu2 %v15923_v18  ;;  %v15891_v56 = vor.u32 %v20184_v29, %v15890_v58  ;;  %v15090_v63 = vld [vmem:[%s22007_s30 + $0x658] sm:$0xf]  ;;  %v15796_v35 = vld [vmem:[%s22007_s30 + $0xbf8] sm:$0xf0] }
 0x40e   : > { %6594 = vmatpush.bf16.msra.mxu1 %v14679_v25  ;;  %v19984_v40 = vld [vmem:[%s22007_s30 + $0x674] sm:$0xf0]  ;;  %6518 = vmatpush.bf16.msra.mxu3 %v15123_v41  ;;  %v15543_v41 = vor.u32 %v20092_v26, %v15540_v27  ;;  %v15508_v39 = vld [vmem:[%s22007_s30 + $0x9b8] sm:$0xf0] }
 0x40f   : > { %v15858_v43 = vld [vmem:[%s22007_s30 + $0xc58] sm:$0xf]  ;;  %6582 = vmatpush.bf16.msra.mxu0 %v14391_v31  ;;  %v15091_v61 = vor.u32 %v19984_v40, %v15090_v63  ;;  %v19956_v31 = vld [vmem:[%s22007_s30 + $0x59c] sm:$0xf]  ;;  %v15511_v55 = vor.u32 %v20084_v37, %v15508_v39 }
 0x410   : > { %v20176_v44 = vld [vmem:[%s22007_s30 + $0xc74] sm:$0xf0]  ;;  %v20076_v60 = vld [vmem:[%s22007_s30 + $0x95c] sm:$0xf] }
 0x411   : > { %6557 = vmatpush.bf16.msrb.mxu2 %v15891_v56  ;;  %v15859_v19 = vor.u32 %v20176_v44, %v15858_v43  ;;  %v15058_v9 = vld [vmem:[%s22007_s30 + $0x618] sm:$0xf]  ;;  %v15799_v56 = vor.u32 %v20156_v42, %v15796_v35  ;;  %v20148_v43 = vld [vmem:[%s22007_s30 + $0xb9c] sm:$0xf] }
 0x412   : > { %6595 = vmatpush.bf16.msra.mxu1 %v14647_v49  ;;  %v19976_v24 = vld [vmem:[%s22007_s30 + $0x634] sm:$0xf0]  ;;  %6519 = vmatpush.bf16.msra.mxu3 %v15091_v61  ;;  %v14996_v49 = vld [vmem:[%s22007_s30 + $0x5b8] sm:$0xf0] }
 0x413   : > { %v15826_v5 = vld [vmem:[%s22007_s30 + $0xc18] sm:$0xf]  ;;  %6583 = vmatpush.bf16.msra.mxu0 %v14359_v38  ;;  %v15059_v34 = vor.u32 %v19976_v24, %v15058_v9  ;;  %v14999_v40 = vor.u32 %v19956_v31, %v14996_v49  ;;  %v15764_v44 = vld [vmem:[%s22007_s30 + $0xbb8] sm:$0xf0] }
 0x414   : > { %v20168_v7 = vld [vmem:[%s22007_s30 + $0xc34] sm:$0xf0]  ;;  %v19948_v38 = vld [vmem:[%s22007_s30 + $0x55c] sm:$0xf]  ;;  %v15767_v57 = vor.u32 %v20148_v43, %v15764_v44 }
 0x415   : > { %v16306_v11 = vld [vmem:[%s22007_s30 + $0xfd8] sm:$0xf]  ;;  %6558 = vmatpush.bf16.msrb.mxu2 %v15859_v19  ;;  %v15827_v25 = vor.u32 %v20168_v7, %v15826_v5  ;;  %v15476_v61 = vld [vmem:[%s22007_s30 + $0x978] sm:$0xf0] }
 0x416   : > { %v20288_v12 = vld [vmem:[%s22007_s30 + $0xff4] sm:$0xf0]  ;;  %6596 = vmatpush.bf16.msra.mxu1 %v14615_v54  ;;  %6520 = vmatpush.bf16.msra.mxu3 %v15059_v34  ;;  %v14964_v54 = vld [vmem:[%s22007_s30 + $0x578] sm:$0xf0] }
 0x417   : > { %v16307_v18 = vor.u32 %v20288_v12, %v16306_v11  ;;  %v16274_v58 = vld [vmem:[%s22007_s30 + $0xf98] sm:$0xf]  ;;  %6584 = vmatpush.bf16.msra.mxu0 %v14327_v23  ;;  %v14967_v36 = vor.u32 %v19948_v38, %v14964_v54  ;;  %v20140_v1 = vld [vmem:[%s22007_s30 + $0xb5c] sm:$0xf]  ;;  %v15479_v11 = vor.u32 %v20076_v60, %v15476_v61 }
 0x418   : > { %v20280_v29 = vld [vmem:[%s22007_s30 + $0xfb4] sm:$0xf0]  ;;  %v15732_v50 = vld [vmem:[%s22007_s30 + $0xb78] sm:$0xf0] }
 0x419   : > { %6559 = vmatpush.bf16.msrb.mxu2 %v15827_v25  ;;  %v16275_v63 = vor.u32 %v20280_v29, %v16274_v58  ;;  %v16242_v62 = vld [vmem:[%s22007_s30 + $0xf58] sm:$0xf]  ;;  %6521 = vmatmul.bf16.vlgmr.msra.gmra.mxu3 %v22705_v53  ;;  %v19940_v5 = vld [vmem:[%s22007_s30 + $0x51c] sm:$0xf]  ;;  %v15735_v12 = vor.u32 %v20140_v1, %v15732_v50  ;;  %v6314_v29 = vpop.f32.mrf.mxu3 }
 0x41a   : > { %6597 = vmatpush.bf16.msra.mxu1 %v14583_v51  ;;  %6565 = vmatpush.bf16.msrb.mxu3 %v16307_v18  ;;  %v20272_v0 = vld [vmem:[%s22007_s30 + $0xf74] sm:$0xf0]  ;;  %v14932_v7 = vld [vmem:[%s22007_s30 + $0x538] sm:$0xf0] }
 0x41b   : > { %6585 = vmatpush.bf16.msra.mxu0 %v14295_v3  ;;  %v16243_v19 = vor.u32 %v20272_v0, %v16242_v62  ;;  %v16210_v9 = vld [vmem:[%s22007_s30 + $0xf18] sm:$0xf]  ;;  %v20068_v48 = vld [vmem:[%s22007_s30 + $0x91c] sm:$0xf]  ;;  %v6379_v18 = vpop.f32.mrf.mxu0 }
 0x41c   : > { %6560 = vmatmul.bf16.vlgmr.msrb.gmra.mxu2 %v22876_v22  ;;  %v20264_v24 = vld [vmem:[%s22007_s30 + $0xf34] sm:$0xf0]  ;;  %v15444_v23 = vld [vmem:[%s22007_s30 + $0x938] sm:$0xf0]  ;;  %v6380_v30 = vadd.f32 %v6379_v18, %v3279_v8 }
 0x41d   : > { %6604 = vmatpush.bf16.msra.mxu2 %v15031_v20  ;;  %v20132_v51 = vld [vmem:[%s22007_s30 + $0xb1c] sm:$0xf]  ;;  %v16178_v25 = vld [vmem:[%s22007_s30 + $0xed8] sm:$0xf]  ;;  %v15447_v21 = vor.u32 %v20068_v48, %v15444_v23 }
 0x41e   : > { %6598 = vmatpush.bf16.msra.mxu1 %v14551_v32  ;;  %6566 = vmatpush.bf16.msrb.mxu3 %v16275_v63  ;;  %v15700_v34 = vld [vmem:[%s22007_s30 + $0xb38] sm:$0xf0]  ;;  %v20256_v14 = vld [vmem:[%s22007_s30 + $0xef4] sm:$0xf0]  ;;  %v6392_v20 = vpop.f32.mrf.mxu1 }
 0x41f   : > { %6630 = vmatpush.bf16.msrb.mxu0 %v15543_v41  ;;  %v19932_v16 = vld [vmem:[%s22007_s30 + $0x4dc] sm:$0xf]  ;;  %v15703_v26 = vor.u32 %v20132_v51, %v15700_v34  ;;  %v16179_v35 = vor.u32 %v20256_v14, %v16178_v25  ;;  %v6353_v31 = vpop.f32.mrf.mxu2  ;;  %v16146_v32 = vld [vmem:[%s22007_s30 + $0xe98] sm:$0xf]  ;;  %v23745_v41 = vadd.f32 %v6392_v20, %v6380_v30 }
 0x420   : > { %6586 = vmatmul.bf16.vlgmr.msra.gmra.mxu0 %v22698_v47  ;;  %v16211_v47 = vor.u32 %v20264_v24, %v16210_v9  ;;  %v14900_v33 = vld [vmem:[%s22007_s30 + $0x4f8] sm:$0xf0]  ;;  %v20248_v37 = vld [vmem:[%s22007_s30 + $0xeb4] sm:$0xf0] }
 0x421   : > { %6605 = vmatpush.bf16.msra.mxu2 %v14999_v40  ;;  %6599 = vmatmul.bf16.vlgmr.msra.gmra.mxu1 %v22700_v6  ;;  %v14935_v6 = vor.u32 %v19940_v5, %v14932_v7  ;;  %v20060_v27 = vld [vmem:[%s22007_s30 + $0x8dc] sm:$0xf]  ;;  %v14903_v58 = vor.u32 %v19932_v16, %v14900_v33  ;;  %v16147_v38 = vor.u32 %v20248_v37, %v16146_v32  ;;  %v20240_v61 = vld [vmem:[%s22007_s30 + $0xe74] sm:$0xf0]  ;;  %v6316_v8 = vpop.f32.mrf.mxu3  ;;  %v20413_v32 = vld [vmem:[%s22017_s3 + $0x3dc] sm:$0xf0] }
 0x422   : > { %6643 = vmatpush.bf16.msrb.mxu1 %v15799_v56  ;;  %6567 = vmatpush.bf16.msrb.mxu3 %v16243_v19  ;;  %v15412_v42 = vld [vmem:[%s22007_s30 + $0x8f8] sm:$0xf0]  ;;  %v6315_v56 = vadd.f32 %v6314_v29, %v23674_v28 }
 0x423   : > { %6631 = vmatpush.bf16.msrb.mxu0 %v15511_v55  ;;  %v20124_v49 = vld [vmem:[%s22007_s30 + $0xadc] sm:$0xf]  ;;  %v15415_v43 = vor.u32 %v20060_v27, %v15412_v42 }
 0x424   : > { %v15668_v3 = vld [vmem:[%s22007_s30 + $0xaf8] sm:$0xf0]  ;;  %v6328_v40 = vadd.f32 %v23661_v13, %v6315_v56  ;;  %v6381_v13 = vpop.f32.mrf.mxu0 }
 0x425   : > { %6606 = vmatpush.bf16.msra.mxu2 %v14967_v36  ;;  %v19924_v39 = vld [vmem:[%s22007_s30 + $0x49c] sm:$0xf]  ;;  %v15671_v44 = vor.u32 %v20124_v49, %v15668_v3  ;;  %v20349_v49 = vld [vmem:[%s22017_s3 + $0x1dc] sm:$0xf0] }
 0x426   : > { %6644 = vmatpush.bf16.msrb.mxu1 %v15767_v57  ;;  %6568 = vmatpush.bf16.msrb.mxu3 %v16211_v47  ;;  %v14868_v63 = vld [vmem:[%s22007_s30 + $0x4b8] sm:$0xf0]  ;;  %v16114_v57 = vld [vmem:[%s22007_s30 + $0xe58] sm:$0xf]  ;;  %v6341_v60 = vadd.f32 %v23663_v15, %v6328_v40  ;;  %v6394_v1 = vpop.f32.mrf.mxu1  ;;  %v16794_v3 = vld [vmem:[%s22017_s3 + $0x3c0] sm:$0xf] }
 0x427   : > { %6632 = vmatpush.bf16.msrb.mxu0 %v15479_v11  ;;  %v20052_v62 = vld [vmem:[%s22007_s30 + $0x89c] sm:$0xf]  ;;  %v14871_v28 = vor.u32 %v19924_v39, %v14868_v63  ;;  %v16115_v11 = vor.u32 %v20240_v61, %v16114_v57  ;;  %v6355_v48 = vpop.f32.mrf.mxu2  ;;  %v16082_v47 = vld [vmem:[%s22007_s30 + $0xe18] sm:$0xf]  ;;  %v20405_v57 = vld [vmem:[%s22017_s3 + $0x39c] sm:$0xf0] }
 0x428   : > { %v15380_v0 = vld [vmem:[%s22007_s30 + $0x8b8] sm:$0xf0]  ;;  %v23761_v50 = vadd.f32 %v6353_v31, %v6341_v60  ;;  %v16538_v31 = vld [vmem:[%s22017_s3 + $0x1c0] sm:$0xf] }
 0x429   : > { %6607 = vmatpush.bf16.msra.mxu2 %v14935_v6  ;;  %v20116_v54 = vld [vmem:[%s22007_s30 + $0xa9c] sm:$0xf]  ;;  %v15383_v9 = vor.u32 %v20052_v62, %v15380_v0  ;;  %v20232_v6 = vld [vmem:[%s22007_s30 + $0xe34] sm:$0xf0]  ;;  %v16795_v62 = vor.u32 %v20413_v32, %v16794_v3  ;;  %v16506_v0 = vld [vmem:[%s22017_s3 + $0x180] sm:$0xf] }
 0x42a   : > { %6645 = vmatpush.bf16.msrb.mxu1 %v15735_v12  ;;  %6569 = vmatpush.bf16.msrb.mxu3 %v16179_v35  ;;  %v15636_v55 = vld [vmem:[%s22007_s30 + $0xab8] sm:$0xf0]  ;;  %v16083_v30 = vor.u32 %v20232_v6, %v16082_v47  ;;  %v16442_v6 = vld [vmem:[%s22017_s3 + $0x100] sm:$0xf] }
 0x42b   : > { %6633 = vmatpush.bf16.msrb.mxu0 %v15447_v21  ;;  %v19916_v19 = vld [vmem:[%s22007_s30 + $0x45c] sm:$0xf]  ;;  %v15639_v24 = vor.u32 %v20116_v54, %v15636_v55  ;;  %v16762_v55 = vld [vmem:[%s22017_s3 + $0x380] sm:$0xf] }
 0x42c   : > { %v14836_v36 = vld [vmem:[%s22007_s30 + $0x478] sm:$0xf0]  ;;  %v16763_v1 = vor.u32 %v20405_v57, %v16762_v55  ;;  %v20381_v3 = vld [vmem:[%s22017_s3 + $0x2dc] sm:$0xf0] }
 0x42d   : > { %6608 = vmatpush.bf16.msra.mxu2 %v14903_v58  ;;  %v20044_v5 = vld [vmem:[%s22007_s30 + $0x85c] sm:$0xf]  ;;  %v14839_v12 = vor.u32 %v19916_v19, %v14836_v36 }
 0x42e   : > { %6646 = vmatpush.bf16.msrb.mxu1 %v15703_v26  ;;  %v15348_v15 = vld [vmem:[%s22007_s30 + $0x878] sm:$0xf0]  ;;  %6570 = vmatpush.bf16.msrb.mxu3 %v16147_v38  ;;  %v20341_v38 = vld [vmem:[%s22017_s3 + $0x19c] sm:$0xf0] }
 0x42f   : > { %6634 = vmatpush.bf16.msrb.mxu0 %v15415_v43  ;;  %v20108_v7 = vld [vmem:[%s22007_s30 + $0xa5c] sm:$0xf]  ;;  %v15351_v18 = vor.u32 %v20044_v5, %v15348_v15  ;;  %v16507_v13 = vor.u32 %v20341_v38, %v16506_v0  ;;  %v16730_v15 = vld [vmem:[%s22017_s3 + $0x340] sm:$0xf] }
 0x430   : > { %v15604_v23 = vld [vmem:[%s22007_s30 + $0xa78] sm:$0xf0]  ;;  %v16634_v38 = vld [vmem:[%s22017_s3 + $0x280] sm:$0xf] }
 0x431   : > { %6609 = vmatpush.bf16.msra.mxu2 %v14871_v28  ;;  %v19908_v51 = vld [vmem:[%s22007_s30 + $0x41c] sm:$0xf]  ;;  %v15607_v20 = vor.u32 %v20108_v7, %v15604_v23  ;;  %v20397_v7 = vld [vmem:[%s22017_s3 + $0x35c] sm:$0xf0] }
 0x432   : > { %6647 = vmatpush.bf16.msrb.mxu1 %v15671_v44  ;;  %v14804_v34 = vld [vmem:[%s22007_s30 + $0x438] sm:$0xf0]  ;;  %6571 = vmatpush.bf16.msrb.mxu3 %v16115_v11  ;;  %v16539_v44 = vor.u32 %v20349_v49, %v16538_v31  ;;  %v16731_v47 = vor.u32 %v20397_v7, %v16730_v15  ;;  %v16666_v49 = vld [vmem:[%s22017_s3 + $0x2c0] sm:$0xf] }
 0x433   : > { %v20028_v25 = vld [vmem:[%s22007_s30 + $0x7dc] sm:$0xf]  ;;  %6635 = vmatpush.bf16.msrb.mxu0 %v15383_v9  ;;  %v14807_v21 = vor.u32 %v19908_v51, %v14804_v34  ;;  %v16474_v9 = vld [vmem:[%s22017_s3 + $0x140] sm:$0xf] }
 0x434   : > { %v15284_v14 = vld [vmem:[%s22007_s30 + $0x7f8] sm:$0xf0]  ;;  %v20325_v51 = vld [vmem:[%s22017_s3 + $0x11c] sm:$0xf0] }
 0x435   : > { %v20220_v16 = vld [vmem:[%s22007_s30 + $0xddc] sm:$0xf]  ;;  %6610 = vmatpush.bf16.msra.mxu2 %v14839_v12  ;;  %v15287_v35 = vor.u32 %v20028_v25, %v15284_v14  ;;  %v20389_v25 = vld [vmem:[%s22017_s3 + $0x31c] sm:$0xf0] }
 0x436   : > { %v16052_v33 = vld [vmem:[%s22007_s30 + $0xdf8] sm:$0xf0]  ;;  %6648 = vmatpush.bf16.msrb.mxu1 %v15639_v24  ;;  %6572 = vmatpush.bf16.msrb.mxu3 %v16083_v30  ;;  %v20333_v24 = vld [vmem:[%s22017_s3 + $0x15c] sm:$0xf0] }
 0x437   : > { %v20036_v26 = vld [vmem:[%s22007_s30 + $0x81c] sm:$0xf]  ;;  %v16055_v58 = vor.u32 %v20220_v16, %v16052_v33  ;;  %6636 = vmatpush.bf16.msrb.mxu0 %v15351_v18  ;;  %v16475_v23 = vor.u32 %v20333_v24, %v16474_v9  ;;  %v20301_v9 = vld [vmem:[%s22017_s3 + $0x5c] sm:$0xf0] }
 0x438   : > { %v15316_v27 = vld [vmem:[%s22007_s30 + $0x838] sm:$0xf0]  ;;  %v16602_v24 = vld [vmem:[%s22017_s3 + $0x240] sm:$0xf] }
 0x439   : > { %v20100_v42 = vld [vmem:[%s22007_s30 + $0xa1c] sm:$0xf]  ;;  %6611 = vmatpush.bf16.msra.mxu2 %v14807_v21  ;;  %v15319_v40 = vor.u32 %v20036_v26, %v15316_v27  ;;  %6573 = vmatmul.bf16.vlgmr.msrb.gmra.mxu3 %v22937_v4  ;;  %v16443_v21 = vor.u32 %v20325_v51, %v16442_v6  ;;  %v16410_v27 = vld [vmem:[%s22017_s3 + $0xc0] sm:$0xf] }
 0x43a   : > { %v15572_v29 = vld [vmem:[%s22007_s30 + $0xa38] sm:$0xf0]  ;;  %6649 = vmatpush.bf16.msrb.mxu1 %v15607_v20  ;;  %6617 = vmatpush.bf16.msra.mxu3 %v15287_v35  ;;  %v17050_v51 = vld [vmem:[%s22017_s3 + $0x5c0] sm:$0xf] }
 0x43b   : > { %v20020_v56 = vld [vmem:[%s22007_s30 + $0x79c] sm:$0xf]  ;;  %v15575_v43 = vor.u32 %v20100_v42, %v15572_v29  ;;  %6637 = vmatpush.bf16.msrb.mxu0 %v15319_v40  ;;  %v23815_v20 = vpop.f32.mrf.mxu0  ;;  %v20317_v42 = vld [vmem:[%s22017_s3 + $0xdc] sm:$0xf0]  ;;  %v23821_v29 = vpop.f32.mrf.mxu3  ;;  %v16667_v40 = vor.u32 %v20381_v3, %v16666_v49 }
 0x43c   : > { %v15252_v37 = vld [vmem:[%s22007_s30 + $0x7b8] sm:$0xf0]  ;;  %6612 = vmatmul.bf16.vlgmr.msra.gmra.mxu2 %v22703_v52  ;;  %v20669_v49 = vld [vmem:[%s22017_s3 + $0xbdc] sm:$0xf0] }
 0x43d   : > { %v20212_v39 = vld [vmem:[%s22007_s30 + $0xd9c] sm:$0xf]  ;;  %6656 = vmatpush.bf16.msrb.mxu2 %v16055_v58  ;;  %v15255_v28 = vor.u32 %v20020_v56, %v15252_v37 }
 0x43e   : > { %v16020_v63 = vld [vmem:[%s22007_s30 + $0xdb8] sm:$0xf0]  ;;  %6650 = vmatpush.bf16.msrb.mxu1 %v15575_v43  ;;  %6638 = vmatmul.bf16.vlgmr.msrb.gmra.mxu0 %v22765_v17  ;;  %v23817_v30 = vpop.f32.mrf.mxu1  ;;  %v16378_v43 = vld [vmem:[%s22017_s3 + $0x80] sm:$0xf] }
 0x43f   : > { %v16023_v54 = vor.u32 %v20212_v39, %v16020_v63  ;;  %v20012_v60 = vld [vmem:[%s22007_s30 + $0x75c] sm:$0xf]  ;;  %9788 = vmatpush.bf16.msra.mxu0 %v16539_v44  ;;  %6618 = vmatpush.bf16.msra.mxu3 %v15255_v28  ;;  %v23823_v31 = vpop.f32.mrf.mxu2  ;;  %v16411_v63 = vor.u32 %v20317_v42, %v16410_v27  ;;  %v20309_v44 = vld [vmem:[%s22017_s3 + $0x9c] sm:$0xf0] }
 0x440   : > { %v15220_v61 = vld [vmem:[%s22007_s30 + $0x778] sm:$0xf0]  ;;  %v20373_v28 = vld [vmem:[%s22017_s3 + $0x29c] sm:$0xf0] }
 0x441   : > { %v20204_v19 = vld [vmem:[%s22007_s30 + $0xd5c] sm:$0xf]  ;;  %6657 = vmatpush.bf16.msrb.mxu2 %v16023_v54  ;;  %v15223_v52 = vor.u32 %v20012_v60, %v15220_v61  ;;  %6651 = vmatmul.bf16.vlgmr.msrb.gmra.mxu1 %v22817_v45  ;;  %v16698_v45 = vld [vmem:[%s22017_s3 + $0x300] sm:$0xf] }
 0x442   : > { %v15988_v36 = vld [vmem:[%s22007_s30 + $0xd78] sm:$0xf0]  ;;  %9801 = vmatpush.bf16.msra.mxu1 %v16795_v62  ;;  %v16699_v26 = vor.u32 %v20389_v25, %v16698_v45  ;;  %v20357_v27 = vld [vmem:[%s22017_s3 + $0x21c] sm:$0xf0] }
 0x443   : > { %v15991_v5 = vor.u32 %v20204_v19, %v15988_v36  ;;  %v20004_v11 = vld [vmem:[%s22007_s30 + $0x71c] sm:$0xf]  ;;  %9789 = vmatpush.bf16.msra.mxu0 %v16507_v13  ;;  %6619 = vmatpush.bf16.msra.mxu3 %v15223_v52  ;;  %v6433_v61 = vpop.f32.mrf.mxu0  ;;  %v16379_v36 = vor.u32 %v20309_v44, %v16378_v43  ;;  %v16635_v13 = vor.u32 %v20373_v28, %v16634_v38  ;;  %v6368_v15 = vpop.f32.mrf.mxu3  ;;  %v17562_v42 = vld [vmem:[%s22017_s3 + $0x9c0] sm:$0xf]  ;;  %v6683_v43 = vmax.f32 %v23366_v10, 0.0 }
 0x444   : > { %v15188_v12 = vld [vmem:[%s22007_s30 + $0x738] sm:$0xf0]  ;;  %v20597_v38 = vld [vmem:[%s22017_s3 + $0x99c] sm:$0xf0] }
 0x445   : > { %v20196_v8 = vld [vmem:[%s22007_s30 + $0xd1c] sm:$0xf]  ;;  %6658 = vmatpush.bf16.msrb.mxu2 %v15991_v5  ;;  %v15191_v17 = vor.u32 %v20004_v11, %v15188_v12  ;;  %v20365_v11 = vld [vmem:[%s22017_s3 + $0x25c] sm:$0xf0] }
 0x446   : > { %v15956_v48 = vld [vmem:[%s22007_s30 + $0xd38] sm:$0xf0]  ;;  %9802 = vmatpush.bf16.msra.mxu1 %v16763_v1  ;;  %v6446_v19 = vpop.f32.mrf.mxu1  ;;  %v16346_v1 = vld [vmem:[%s22017_s3 + $0x40] sm:$0xf]  ;;  %v16603_v45 = vor.u32 %v20365_v11, %v16602_v24 }
 0x447   : > { %v15959_v34 = vor.u32 %v20196_v8, %v15956_v48  ;;  %v19996_v14 = vld [vmem:[%s22007_s30 + $0x6dc] sm:$0xf]  ;;  %9790 = vmatpush.bf16.msra.mxu0 %v16475_v23  ;;  %6620 = vmatpush.bf16.msra.mxu3 %v15191_v17  ;;  %v6407_v7 = vpop.f32.mrf.mxu2  ;;  %v20477_v17 = vld [vmem:[%s22017_s3 + $0x5dc] sm:$0xf0] }
 0x448   : > { %v15156_v16 = vld [vmem:[%s22007_s30 + $0x6f8] sm:$0xf0]  ;;  %v16986_v10 = vld [vmem:[%s22017_s3 + $0x540] sm:$0xf] }
 0x449   : > { %v20188_v33 = vld [vmem:[%s22007_s30 + $0xcdc] sm:$0xf]  ;;  %6659 = vmatpush.bf16.msrb.mxu2 %v15959_v34  ;;  %v15159_v35 = vor.u32 %v19996_v14, %v15156_v16  ;;  %v16347_v34 = vor.u32 %v20301_v9, %v16346_v1  ;;  %v16314_v16 = vld [vmem:[%s22017_s3] sm:$0xf] }
 0x44a   : > { %v15924_v18 = vld [vmem:[%s22007_s30 + $0xcf8] sm:$0xf0]  ;;  %9803 = vmatpush.bf16.msra.mxu1 %v16731_v47  ;;  %v20461_v61 = vld [vmem:[%s22017_s3 + $0x55c] sm:$0xf0] }
 0x44b   : > { %v15927_v58 = vor.u32 %v20188_v33, %v15924_v18  ;;  %v19988_v32 = vld [vmem:[%s22007_s30 + $0x69c] sm:$0xf]  ;;  %9791 = vmatpush.bf16.msra.mxu0 %v16443_v21  ;;  %6621 = vmatpush.bf16.msra.mxu3 %v15159_v35  ;;  %v20293_v33 = vld [vmem:[%s22017_s3 + $0x1c] sm:$0xf0]  ;;  %v16987_v24 = vor.u32 %v20461_v61, %v16986_v10 }
 0x44c   : > { %v15124_v56 = vld [vmem:[%s22007_s30 + $0x6b8] sm:$0xf0]  ;;  %v16570_v18 = vld [vmem:[%s22017_s3 + $0x200] sm:$0xf] }
 0x44d   : > { %v20180_v37 = vld [vmem:[%s22007_s30 + $0xc9c] sm:$0xf]  ;;  %6660 = vmatpush.bf16.msrb.mxu2 %v15927_v58  ;;  %v15127_v62 = vor.u32 %v19988_v32, %v15124_v56  ;;  %v20605_v35 = vld [vmem:[%s22017_s3 + $0x9dc] sm:$0xf0] }
 0x44e   : > { %v15892_v39 = vld [vmem:[%s22007_s30 + $0xcb8] sm:$0xf0]  ;;  %9804 = vmatpush.bf16.msra.mxu1 %v16699_v26  ;;  %v17051_v26 = vor.u32 %v20477_v17, %v17050_v51  ;;  %v17818_v58 = vld [vmem:[%s22017_s3 + $0xbc0] sm:$0xf]  ;;  %v17563_v44 = vor.u32 %v20605_v35, %v17562_v42 }
 0x44f   : > { %v15895_v0 = vor.u32 %v20180_v37, %v15892_v39  ;;  %v19980_v54 = vld [vmem:[%s22007_s30 + $0x65c] sm:$0xf]  ;;  %9792 = vmatpush.bf16.msra.mxu0 %v16411_v63  ;;  %6622 = vmatpush.bf16.msra.mxu3 %v15127_v62  ;;  %v17018_v56 = vld [vmem:[%s22017_s3 + $0x580] sm:$0xf]  ;;  %v6682_v39 = vmax.f32 %v23278_v59, 0.0  ;;  %v16315_v63 = vor.u32 %v20293_v33, %v16314_v16  ;;  %v17819_v62 = vor.u32 %v20669_v49, %v17818_v58 }
 0x450   : > { %v15092_v55 = vld [vmem:[%s22007_s30 + $0x678] sm:$0xf0]  ;;  %v20469_v37 = vld [vmem:[%s22017_s3 + $0x59c] sm:$0xf0] }
 0x451   : > { %v20172_v57 = vld [vmem:[%s22007_s30 + $0xc5c] sm:$0xf]  ;;  %6661 = vmatpush.bf16.msrb.mxu2 %v15895_v0  ;;  %v15095_v52 = vor.u32 %v19980_v54, %v15092_v55  ;;  %v17530_v0 = vld [vmem:[%s22017_s3 + $0x980] sm:$0xf]  ;;  %v17019_v54 = vor.u32 %v20469_v37, %v17018_v56  ;;  %v23875_v19 = vpack.c.bf16 %v6682_v39, %v6682_v39 }
 0x452   : > { %v15860_v60 = vld [vmem:[%s22007_s30 + $0xc78] sm:$0xf0]  ;;  %9805 = vmatpush.bf16.msra.mxu1 %v16667_v40  ;;  %v16571_v40 = vor.u32 %v20357_v27, %v16570_v18  ;;  %v17786_v55 = vld [vmem:[%s22017_s3 + $0xb80] sm:$0xf] }
 0x453   : > { %v15863_v5 = vor.u32 %v20172_v57, %v15860_v60  ;;  %v19972_v12 = vld [vmem:[%s22007_s30 + $0x61c] sm:$0xf]  ;;  %9793 = vmatpush.bf16.msra.mxu0 %v16379_v36  ;;  %6623 = vmatpush.bf16.msra.mxu3 %v15095_v52  ;;  %v20661_v59 = vld [vmem:[%s22017_s3 + $0xb9c] sm:$0xf0]  ;;  %v23877_v36 = vpack.c.bf16 %v6683_v43, %v6683_v43 }
 0x454   : > { %v15060_v8 = vld [vmem:[%s22007_s30 + $0x638] sm:$0xf0]  ;;  %v20589_v1 = vld [vmem:[%s22017_s3 + $0x95c] sm:$0xf0] }
 0x455   : > { %v20164_v48 = vld [vmem:[%s22007_s30 + $0xc1c] sm:$0xf]  ;;  %6662 = vmatpush.bf16.msrb.mxu2 %v15863_v5  ;;  %v15063_v25 = vor.u32 %v19972_v12, %v15060_v8  ;;  %v17754_v52 = vld [vmem:[%s22017_s3 + $0xb40] sm:$0xf] }
 0x456   : > { %v15828_v23 = vld [vmem:[%s22007_s30 + $0xc38] sm:$0xf0]  ;;  %9806 = vmatpush.bf16.msra.mxu1 %v16635_v13  ;;  %v17787_v13 = vor.u32 %v20661_v59, %v17786_v55  ;;  %v20653_v5 = vld [vmem:[%s22017_s3 + $0xb5c] sm:$0xf0] }
 0x457   : > { %v20284_v47 = vld [vmem:[%s22007_s30 + $0xfdc] sm:$0xf]  ;;  %v15831_v14 = vor.u32 %v20164_v48, %v15828_v23  ;;  %9794 = vmatpush.bf16.msra.mxu0 %v16347_v34  ;;  %6624 = vmatpush.bf16.msra.mxu3 %v15063_v25  ;;  %v16954_v11 = vld [vmem:[%s22017_s3 + $0x500] sm:$0xf]  ;;  %v17755_v48 = vor.u32 %v20653_v5, %v17754_v52  ;;  %v23890_v23 = vld [vmem:[%s22014_s15] sm:$0xff] }
 0x458   : > { %v16308_v6 = vld [vmem:[%s22007_s30 + $0xff8] sm:$0xf0]  ;;  %v20453_v12 = vld [vmem:[%s22017_s3 + $0x51c] sm:$0xf0] }
 0x459   : > { %v16311_v21 = vor.u32 %v20284_v47, %v16308_v6  ;;  %v20276_v3 = vld [vmem:[%s22007_s30 + $0xf9c] sm:$0xf]  ;;  %6663 = vmatpush.bf16.msrb.mxu2 %v15831_v14  ;;  %v3280_v47 = vperm.slane %v23890_v23, 6  ;;  %v17466_v6 = vld [vmem:[%s22017_s3 + $0x900] sm:$0xf]  ;;  %v16955_v34 = vor.u32 %v20453_v12, %v16954_v11 }
 0x45a   : > { %9807 = vmatpush.bf16.msra.mxu1 %v16603_v45  ;;  %v16276_v32 = vld [vmem:[%s22007_s30 + $0xfb8] sm:$0xf0]  ;;  %6625 = vmatmul.bf16.vlgmr.msra.gmra.mxu3 %v22705_v53  ;;  %v17531_v53 = vor.u32 %v20597_v38, %v17530_v0  ;;  %v20581_v51 = vld [vmem:[%s22017_s3 + $0x91c] sm:$0xf0] }
 0x45b   : > { %6669 = vmatpush.bf16.msrb.mxu3 %v16311_v21  ;;  %v16279_v28 = vor.u32 %v20276_v3, %v16276_v32  ;;  %v20268_v57 = vld [vmem:[%s22007_s30 + $0xf5c] sm:$0xf]  ;;  %9795 = vmatpush.bf16.msra.mxu0 %v16315_v63  ;;  %v17722_v45 = vld [vmem:[%s22017_s3 + $0xb00] sm:$0xf]  ;;  %v17467_v42 = vor.u32 %v20581_v51, %v17466_v6 }
 0x45c   : > { %6664 = vmatmul.bf16.vlgmr.msrb.gmra.mxu2 %v22876_v22  ;;  %v16244_v60 = vld [vmem:[%s22007_s30 + $0xf78] sm:$0xf0]  ;;  %v17498_v22 = vld [vmem:[%s22017_s3 + $0x940] sm:$0xf]  ;;  %v23903_v56 = vpop.f32.mrf.mxu3 }
 0x45d   : > { %9814 = vmatpush.bf16.msra.mxu2 %v17051_v26  ;;  %v16247_v9 = vor.u32 %v20268_v57, %v16244_v60  ;;  %v20260_v15 = vld [vmem:[%s22007_s30 + $0xf1c] sm:$0xf]  ;;  %v17499_v8 = vor.u32 %v20589_v1, %v17498_v22  ;;  %v20645_v25 = vld [vmem:[%s22017_s3 + $0xb1c] sm:$0xf0]  ;;  %v6483_v21 = vpop.f32.mrf.mxu0 }
 0x45e   : > { %9808 = vmatpush.bf16.msra.mxu1 %v16571_v40  ;;  %9796 = vmatmul.bf16.vlgmr.msra.gmra.mxu0 %v23875_v19  ;;  %v16212_v7 = vld [vmem:[%s22007_s30 + $0xf38] sm:$0xf0]  ;;  %v16922_v33 = vld [vmem:[%s22017_s3 + $0x4c0] sm:$0xf]  ;;  %v6496_v26 = vpop.f32.mrf.mxu1  ;;  %v6484_v27 = vadd.f32 %v6483_v21, %v3280_v47  ;;  %v17723_v35 = vor.u32 %v20645_v25, %v17722_v45 }
 0x45f   : > { %9840 = vmatpush.bf16.msrb.mxu0 %v17563_v44  ;;  %6670 = vmatpush.bf16.msrb.mxu3 %v16279_v28  ;;  %v16215_v17 = vor.u32 %v20260_v15, %v16212_v7  ;;  %v20252_v14 = vld [vmem:[%s22007_s30 + $0xedc] sm:$0xf]  ;;  %v20445_v18 = vld [vmem:[%s22017_s3 + $0x4dc] sm:$0xf0]  ;;  %v23905_v37 = vpop.f32.mrf.mxu2 }
 0x460   : > { %v16180_v16 = vld [vmem:[%s22007_s30 + $0xef8] sm:$0xf0]  ;;  %v17434_v58 = vld [vmem:[%s22017_s3 + $0x8c0] sm:$0xf]  ;;  %v16923_v32 = vor.u32 %v20445_v18, %v16922_v33  ;;  %v23910_v43 = vadd.f32 %v6496_v26, %v6484_v27  ;;  %v6684_v33 = vmax.f32 %v23514_v2, 0.0  ;;  %v6367_v26 = vadd.f32 %v23821_v29, %v23761_v50 }
 0x461   : > { %9815 = vmatpush.bf16.msra.mxu2 %v17019_v54  ;;  %9809 = vmatmul.bf16.vlgmr.msra.gmra.mxu1 %v23877_v36  ;;  %v20573_v49 = vld [vmem:[%s22017_s3 + $0x8dc] sm:$0xf0]  ;;  %v16183_v3 = vor.u32 %v20252_v14, %v16180_v16  ;;  %v20244_v40 = vld [vmem:[%s22007_s30 + $0xe9c] sm:$0xf]  ;;  %v6406_v50 = vadd.f32 %v23823_v31, %v23745_v41 }
 0x462   : > { %9853 = vmatpush.bf16.msrb.mxu1 %v17819_v62  ;;  %v17690_v39 = vld [vmem:[%s22017_s3 + $0xac0] sm:$0xf]  ;;  %v16148_v44 = vld [vmem:[%s22007_s30 + $0xeb8] sm:$0xf0]  ;;  %v17435_v38 = vor.u32 %v20573_v49, %v17434_v58 }
 0x463   : > { %9841 = vmatpush.bf16.msrb.mxu0 %v17531_v53  ;;  %6671 = vmatpush.bf16.msrb.mxu3 %v16247_v9  ;;  %v20637_v63 = vld [vmem:[%s22017_s3 + $0xadc] sm:$0xf0]  ;;  %v16151_v59 = vor.u32 %v20244_v40, %v16148_v44  ;;  %v20236_v61 = vld [vmem:[%s22007_s30 + $0xe5c] sm:$0xf]  ;;  %v20409_v40 = vld [vmem:[%s22017_s3 + $0x3c4] sm:$0xf]  ;;  %v6419_v41 = vadd.f32 %v23903_v56, %v6406_v50 }
 0x464   : > { %v16890_v62 = vld [vmem:[%s22017_s3 + $0x480] sm:$0xf]  ;;  %v17691_v28 = vor.u32 %v20637_v63, %v17690_v39  ;;  %v16116_v53 = vld [vmem:[%s22007_s30 + $0xe78] sm:$0xf0]  ;;  %v16540_v39 = vld [vmem:[%s22017_s3 + $0x1e0] sm:$0xf0] }
 0x465   : > { %9816 = vmatpush.bf16.msra.mxu2 %v16987_v24  ;;  %v20437_v0 = vld [vmem:[%s22017_s3 + $0x49c] sm:$0xf0]  ;;  %v6485_v1 = vpop.f32.mrf.mxu0  ;;  %v16119_v11 = vor.u32 %v20236_v61, %v16116_v53  ;;  %v20228_v6 = vld [vmem:[%s22007_s30 + $0xe1c] sm:$0xf]  ;;  %v16796_v44 = vld [vmem:[%s22017_s3 + $0x3e0] sm:$0xf0] }
 0x466   : > { %9854 = vmatpush.bf16.msrb.mxu1 %v17787_v13  ;;  %v17402_v54 = vld [vmem:[%s22017_s3 + $0x880] sm:$0xf]  ;;  %v16891_v57 = vor.u32 %v20437_v0, %v16890_v62  ;;  %v6498_v9 = vpop.f32.mrf.mxu1  ;;  %v16084_v51 = vld [vmem:[%s22007_s30 + $0xe38] sm:$0xf0]  ;;  %v20401_v53 = vld [vmem:[%s22017_s3 + $0x384] sm:$0xf] }
 0x467   : > { %9842 = vmatpush.bf16.msrb.mxu0 %v17499_v8  ;;  %6672 = vmatpush.bf16.msrb.mxu3 %v16215_v17  ;;  %v20565_v55 = vld [vmem:[%s22017_s3 + $0x89c] sm:$0xf0]  ;;  %v6420_v8 = vpop.f32.mrf.mxu3  ;;  %v16087_v27 = vor.u32 %v20228_v6, %v16084_v51  ;;  %v20377_v50 = vld [vmem:[%s22017_s3 + $0x2c4] sm:$0xf]  ;;  %s765_s30 = scalar_lea.vmem [#allocation20], %s22002_s1  ;;  %s21556_s1 = scalar_lea.hbm %s25933_s5, 24 }
 0x468   : > { %v17658_v60 = vld [vmem:[%s22017_s3 + $0xa80] sm:$0xf]  ;;  %v17403_v24 = vor.u32 %v20565_v55, %v17402_v54  ;;  %v6686_v54 = vmax.f32 %v6367_v26, 0.0  ;;  %v20393_v8 = vld [vmem:[%s22017_s3 + $0x344] sm:$0xf]  ;;  %s12928_s15 = sshll.u32 %s765_s30, 4  ;;  %s12929_s15 = int_to_ptr.vmem [resolvable:$true] %s12928_s15 }
 0x469   : > { %9817 = vmatpush.bf16.msra.mxu2 %v16955_v34  ;;  %v20629_v10 = vld [vmem:[%s22017_s3 + $0xa9c] sm:$0xf0] }
 0x46a   : > { %9855 = vmatpush.bf16.msrb.mxu1 %v17755_v48  ;;  %v16858_v13 = vld [vmem:[%s22017_s3 + $0x440] sm:$0xf]  ;;  %v17659_v52 = vor.u32 %v20629_v10, %v17658_v60  ;;  %v6459_v48 = vpop.f32.mrf.mxu2  ;;  %v20337_v60 = vld [vmem:[%s22017_s3 + $0x184] sm:$0xf] }
 0x46b   : > { %9843 = vmatpush.bf16.msrb.mxu0 %v17467_v42  ;;  %6673 = vmatpush.bf16.msrb.mxu3 %v16183_v3  ;;  %v20429_v22 = vld [vmem:[%s22017_s3 + $0x45c] sm:$0xf0]  ;;  %v16508_v10 = vld [vmem:[%s22017_s3 + $0x1a0] sm:$0xf0] }
 0x46c   : > { %v17370_v5 = vld [vmem:[%s22017_s3 + $0x840] sm:$0xf]  ;;  %v16859_v12 = vor.u32 %v20429_v22, %v16858_v13  ;;  %v16764_v13 = vld [vmem:[%s22017_s3 + $0x3a0] sm:$0xf0] }
 0x46d   : > { %9818 = vmatpush.bf16.msra.mxu2 %v16923_v32  ;;  %v20557_v15 = vld [vmem:[%s22017_s3 + $0x85c] sm:$0xf0]  ;;  %v20345_v32 = vld [vmem:[%s22017_s3 + $0x1c4] sm:$0xf] }
 0x46e   : > { %9856 = vmatpush.bf16.msrb.mxu1 %v17723_v35  ;;  %v17626_v7 = vld [vmem:[%s22017_s3 + $0xa40] sm:$0xf]  ;;  %v17371_v18 = vor.u32 %v20557_v15, %v17370_v5  ;;  %v16543_v31 = vor.u32 %v20345_v32, %v16540_v39  ;;  %v6432_v5 = vadd.f32 %v23815_v20, %v6419_v41  ;;  %v16767_v15 = vor.u32 %v20401_v53, %v16764_v13  ;;  %v16732_v48 = vld [vmem:[%s22017_s3 + $0x360] sm:$0xf0] }
 0x46f   : > { %9844 = vmatpush.bf16.msrb.mxu0 %v17435_v38  ;;  %6674 = vmatpush.bf16.msrb.mxu3 %v16151_v59  ;;  %v20621_v47 = vld [vmem:[%s22017_s3 + $0xa5c] sm:$0xf0]  ;;  %v20313_v39 = vld [vmem:[%s22017_s3 + $0xc4] sm:$0xf] }
 0x470   : > { %v16826_v17 = vld [vmem:[%s22017_s3 + $0x400] sm:$0xf]  ;;  %v17627_v21 = vor.u32 %v20621_v47, %v17626_v7  ;;  %v20329_v7 = vld [vmem:[%s22017_s3 + $0x144] sm:$0xf] }
 0x471   : > { %9819 = vmatpush.bf16.msra.mxu2 %v16891_v57  ;;  %v20421_v34 = vld [vmem:[%s22017_s3 + $0x41c] sm:$0xf0]  ;;  %v16799_v57 = vor.u32 %v20409_v40, %v16796_v44  ;;  %v20369_v53 = vld [vmem:[%s22017_s3 + $0x284] sm:$0xf] }
 0x472   : > { %9857 = vmatpush.bf16.msrb.mxu1 %v17691_v28  ;;  %v17306_v45 = vld [vmem:[%s22017_s3 + $0x7c0] sm:$0xf]  ;;  %v16827_v42 = vor.u32 %v20421_v34, %v16826_v17  ;;  %v23952_v28 = vpack.c.bf16 %v6684_v33, %v6684_v33  ;;  %v6445_v34 = vadd.f32 %v23817_v30, %v6432_v5  ;;  %v16636_v13 = vld [vmem:[%s22017_s3 + $0x2a0] sm:$0xf0] }
 0x473   : > { %v20541_v25 = vld [vmem:[%s22017_s3 + $0x7dc] sm:$0xf0]  ;;  %9845 = vmatpush.bf16.msrb.mxu0 %v17403_v24  ;;  %6675 = vmatpush.bf16.msrb.mxu3 %v16119_v11  ;;  %v16476_v11 = vld [vmem:[%s22017_s3 + $0x160] sm:$0xf0] }
 0x474   : > { %v18074_v14 = vld [vmem:[%s22017_s3 + $0xdc0] sm:$0xf]  ;;  %v17307_v49 = vor.u32 %v20541_v25, %v17306_v45  ;;  %v16479_v45 = vor.u32 %v20329_v7, %v16476_v11  ;;  %v16735_v25 = vor.u32 %v20393_v8, %v16732_v48  ;;  %v16639_v11 = vor.u32 %v20369_v53, %v16636_v13  ;;  %v20585_v13 = vld [vmem:[%s22017_s3 + $0x944] sm:$0xf] }
 0x475   : > { %v20733_v16 = vld [vmem:[%s22017_s3 + $0xddc] sm:$0xf0]  ;;  %9820 = vmatpush.bf16.msra.mxu2 %v16859_v12 }
 0x476   : > { %9858 = vmatpush.bf16.msrb.mxu1 %v17659_v52  ;;  %v17338_v35 = vld [vmem:[%s22017_s3 + $0x800] sm:$0xf]  ;;  %v18075_v63 = vor.u32 %v20733_v16, %v18074_v14  ;;  %v23965_v52 = vpack.c.bf16 %v6686_v54, %v6686_v54  ;;  %v20321_v14 = vld [vmem:[%s22017_s3 + $0x104] sm:$0xf] }
 0x477   : > { %v20549_v2 = vld [vmem:[%s22017_s3 + $0x81c] sm:$0xf0]  ;;  %9846 = vmatpush.bf16.msrb.mxu0 %v17371_v18  ;;  %6676 = vmatpush.bf16.msrb.mxu3 %v16087_v27  ;;  %v16444_v16 = vld [vmem:[%s22017_s3 + $0x120] sm:$0xf0] }
 0x478   : > { %v17594_v58 = vld [vmem:[%s22017_s3 + $0xa00] sm:$0xf]  ;;  %v17339_v55 = vor.u32 %v20549_v2, %v17338_v35  ;;  %v20385_v18 = vld [vmem:[%s22017_s3 + $0x304] sm:$0xf] }
 0x479   : > { %v20613_v3 = vld [vmem:[%s22017_s3 + $0xa1c] sm:$0xf0]  ;;  %9821 = vmatpush.bf16.msra.mxu2 %v16827_v42 }
 0x47a   : > { %v17274_v62 = vld [vmem:[%s22017_s3 + $0x780] sm:$0xf]  ;;  %9859 = vmatpush.bf16.msrb.mxu1 %v17627_v21  ;;  %v17595_v59 = vor.u32 %v20613_v3, %v17594_v58  ;;  %6677 = vmatmul.bf16.vlgmr.msrb.gmra.mxu3 %v22937_v4  ;;  %v16511_v4 = vor.u32 %v20337_v60, %v16508_v10  ;;  %v16700_v21 = vld [vmem:[%s22017_s3 + $0x320] sm:$0xf0]  ;;  %v16447_v3 = vor.u32 %v20321_v14, %v16444_v16  ;;  %v6685_v16 = vmax.f32 %v23671_v46, 0.0 }
 0x47b   : > { %v20533_v29 = vld [vmem:[%s22017_s3 + $0x79c] sm:$0xf0]  ;;  %9827 = vmatpush.bf16.msra.mxu3 %v17307_v49  ;;  %9847 = vmatpush.bf16.msrb.mxu0 %v17339_v55  ;;  %v6458_v49 = vadd.f32 %v23905_v37, %v6445_v34  ;;  %v16703_v32 = vor.u32 %v20385_v18, %v16700_v21  ;;  %v20305_v60 = vld [vmem:[%s22017_s3 + $0x84] sm:$0xf] }
 0x47c   : > { %v18042_v0 = vld [vmem:[%s22017_s3 + $0xd80] sm:$0xf]  ;;  %v17275_v61 = vor.u32 %v20533_v29, %v17274_v62  ;;  %9822 = vmatmul.bf16.vlgmr.msra.gmra.mxu2 %v23952_v28  ;;  %v6470_v40 = vpop.f32.mrf.mxu3  ;;  %v16412_v62 = vld [vmem:[%s22017_s3 + $0xe0] sm:$0xf0] }
 0x47d   : > { %v20725_v38 = vld [vmem:[%s22017_s3 + $0xd9c] sm:$0xf0]  ;;  %9866 = vmatpush.bf16.msrb.mxu2 %v18075_v63  ;;  %v23986_v2 = vpop.f32.mrf.mxu0  ;;  %v16668_v29 = vld [vmem:[%s22017_s3 + $0x2e0] sm:$0xf0] }
 0x47e   : > { %v17242_v22 = vld [vmem:[%s22017_s3 + $0x740] sm:$0xf]  ;;  %v18043_v1 = vor.u32 %v20725_v38, %v18042_v0  ;;  %9860 = vmatpush.bf16.msrb.mxu1 %v17595_v59  ;;  %9848 = vmatmul.bf16.vlgmr.msrb.gmra.mxu0 %v23965_v52  ;;  %v23988_v58 = vpop.f32.mrf.mxu1  ;;  %v6471_v0 = vadd.f32 %v6470_v40, %v6458_v49  ;;  %v20473_v21 = vld [vmem:[%s22017_s3 + $0x5c4] sm:$0xf] }
 0x47f   : > { %v20525_v56 = vld [vmem:[%s22017_s3 + $0x75c] sm:$0xf0]  ;;  %9892 = vmatpush.bf16.msra.mxu0 %v16543_v31  ;;  %9828 = vmatpush.bf16.msra.mxu3 %v17275_v61  ;;  %v23992_v44 = vpop.f32.mrf.mxu2  ;;  %v16415_v31 = vor.u32 %v20313_v39, %v16412_v62  ;;  %v16380_v61 = vld [vmem:[%s22017_s3 + $0xa0] sm:$0xf0] }
 0x480   : > { %v18010_v9 = vld [vmem:[%s22017_s3 + $0xd40] sm:$0xf]  ;;  %v17243_v12 = vor.u32 %v20525_v56, %v17242_v22  ;;  %v6687_v41 = vmax.f32 %v6471_v0, 0.0  ;;  %v16383_v7 = vor.u32 %v20305_v60, %v16380_v61  ;;  %v16572_v49 = vld [vmem:[%s22017_s3 + $0x220] sm:$0xf0] }
 0x481   : > { %v20717_v24 = vld [vmem:[%s22017_s3 + $0xd5c] sm:$0xf0]  ;;  %9867 = vmatpush.bf16.msrb.mxu2 %v18043_v1  ;;  %v20665_v39 = vld [vmem:[%s22017_s3 + $0xbc4] sm:$0xf] }
 0x482   : > { %9905 = vmatpush.bf16.msra.mxu1 %v16799_v57  ;;  %v17210_v47 = vld [vmem:[%s22017_s3 + $0x700] sm:$0xf]  ;;  %v18011_v6 = vor.u32 %v20717_v24, %v18010_v9  ;;  %v16671_v57 = vor.u32 %v20377_v50, %v16668_v29  ;;  %v24005_v22 = vpack.c.bf16 %v6687_v41, %v6687_v41  ;;  %v20465_v50 = vld [vmem:[%s22017_s3 + $0x584] sm:$0xf] }
 0x483   : > { %v20517_v20 = vld [vmem:[%s22017_s3 + $0x71c] sm:$0xf0]  ;;  %9893 = vmatpush.bf16.msra.mxu0 %v16511_v4  ;;  %9829 = vmatpush.bf16.msra.mxu3 %v17243_v12  ;;  %v20297_v12 = vld [vmem:[%s22017_s3 + $0x44] sm:$0xf] }
 0x484   : > { %v17978_v51 = vld [vmem:[%s22017_s3 + $0xd00] sm:$0xf]  ;;  %v17211_v33 = vor.u32 %v20517_v20, %v17210_v47  ;;  %9861 = vmatmul.bf16.vlgmr.msrb.gmra.mxu1 %v24005_v22  ;;  %v6472_v48 = vpop.f32.mrf.mxu3  ;;  %v20361_v20 = vld [vmem:[%s22017_s3 + $0x244] sm:$0xf] }
 0x485   : > { %v20709_v17 = vld [vmem:[%s22017_s3 + $0xd1c] sm:$0xf0]  ;;  %9868 = vmatpush.bf16.msrb.mxu2 %v18011_v6  ;;  %v6537_v24 = vpop.f32.mrf.mxu0  ;;  %v16348_v6 = vld [vmem:[%s22017_s3 + $0x60] sm:$0xf0] }
 0x486   : > { %9906 = vmatpush.bf16.msra.mxu1 %v16767_v15  ;;  %v17178_v26 = vld [vmem:[%s22017_s3 + $0x6c0] sm:$0xf]  ;;  %v17979_v27 = vor.u32 %v20709_v17, %v17978_v51  ;;  %v6550_v5 = vpop.f32.mrf.mxu1  ;;  %v16604_v51 = vld [vmem:[%s22017_s3 + $0x260] sm:$0xf0] }
 0x487   : > { %v20509_v42 = vld [vmem:[%s22017_s3 + $0x6dc] sm:$0xf0]  ;;  %9894 = vmatpush.bf16.msra.mxu0 %v16479_v45  ;;  %9830 = vmatpush.bf16.msra.mxu3 %v17211_v33  ;;  %v6511_v47 = vpop.f32.mrf.mxu2  ;;  %v16351_v33 = vor.u32 %v20297_v12, %v16348_v6  ;;  %v16607_v18 = vor.u32 %v20361_v20, %v16604_v51  ;;  %v17020_v29 = vld [vmem:[%s22017_s3 + $0x5a0] sm:$0xf0] }
 0x488   : > { %v17946_v35 = vld [vmem:[%s22017_s3 + $0xcc0] sm:$0xf]  ;;  %v17179_v63 = vor.u32 %v20509_v42, %v17178_v26  ;;  %v17052_v26 = vld [vmem:[%s22017_s3 + $0x5e0] sm:$0xf0] }
 0x489   : > { %v20701_v30 = vld [vmem:[%s22017_s3 + $0xcdc] sm:$0xf0]  ;;  %9869 = vmatpush.bf16.msrb.mxu2 %v17979_v27  ;;  %v20289_v42 = vld [vmem:[%s22017_s3 + $0x4] sm:$0xf]  ;;  %v17055_v40 = vor.u32 %v20473_v21, %v17052_v26 }
 0x48a   : > { %9907 = vmatpush.bf16.msra.mxu1 %v16735_v25  ;;  %v17947_v37 = vor.u32 %v20701_v30, %v17946_v35  ;;  %v17146_v38 = vld [vmem:[%s22017_s3 + $0x680] sm:$0xf]  ;;  %v16316_v35 = vld [vmem:[%s22017_s3 + $0x20] sm:$0xf0] }
 0x48b   : > { %v20501_v54 = vld [vmem:[%s22017_s3 + $0x69c] sm:$0xf0]  ;;  %9895 = vmatpush.bf16.msra.mxu0 %v16447_v3  ;;  %9831 = vmatpush.bf16.msra.mxu3 %v17179_v63  ;;  %v20353_v30 = vld [vmem:[%s22017_s3 + $0x204] sm:$0xf]  ;;  %v16319_v62 = vor.u32 %v20289_v42, %v16316_v35 }
 0x48c   : > { %v17914_v55 = vld [vmem:[%s22017_s3 + $0xc80] sm:$0xf]  ;;  %v17147_v10 = vor.u32 %v20501_v54, %v17146_v38  ;;  %v20601_v3 = vld [vmem:[%s22017_s3 + $0x9c4] sm:$0xf]  ;;  %v24033_v38 = vpack.c.bf16 %v6685_v16, %v6685_v16 }
 0x48d   : > { %v20693_v59 = vld [vmem:[%s22017_s3 + $0xc9c] sm:$0xf0]  ;;  %9870 = vmatpush.bf16.msrb.mxu2 %v17947_v37  ;;  %v17820_v63 = vld [vmem:[%s22017_s3 + $0xbe0] sm:$0xf0]  ;;  %v16575_v37 = vor.u32 %v20353_v30, %v16572_v49 }
 0x48e   : > { %9908 = vmatpush.bf16.msra.mxu1 %v16703_v32  ;;  %v17114_v1 = vld [vmem:[%s22017_s3 + $0x640] sm:$0xf]  ;;  %v17915_v9 = vor.u32 %v20693_v59, %v17914_v55  ;;  %v17564_v32 = vld [vmem:[%s22017_s3 + $0x9e0] sm:$0xf0]  ;;  %v17823_v54 = vor.u32 %v20665_v39, %v17820_v63 }
 0x48f   : > { %v20493_v56 = vld [vmem:[%s22017_s3 + $0x65c] sm:$0xf0]  ;;  %9896 = vmatpush.bf16.msra.mxu0 %v16415_v31  ;;  %9832 = vmatpush.bf16.msra.mxu3 %v17147_v10  ;;  %v17567_v0 = vor.u32 %v20601_v3, %v17564_v32  ;;  %v20593_v55 = vld [vmem:[%s22017_s3 + $0x984] sm:$0xf] }
 0x490   : > { %v17882_v4 = vld [vmem:[%s22017_s3 + $0xc40] sm:$0xf]  ;;  %v17115_v8 = vor.u32 %v20493_v56, %v17114_v1  ;;  %v17532_v59 = vld [vmem:[%s22017_s3 + $0x9a0] sm:$0xf0] }
 0x491   : > { %v20685_v15 = vld [vmem:[%s22017_s3 + $0xc5c] sm:$0xf0]  ;;  %9871 = vmatpush.bf16.msrb.mxu2 %v17915_v9  ;;  %v20657_v41 = vld [vmem:[%s22017_s3 + $0xb84] sm:$0xf]  ;;  %v17535_v61 = vor.u32 %v20593_v55, %v17532_v59 }
 0x492   : > { %9909 = vmatpush.bf16.msra.mxu1 %v16671_v57  ;;  %v17082_v17 = vld [vmem:[%s22017_s3 + $0x600] sm:$0xf]  ;;  %v17883_v45 = vor.u32 %v20685_v15, %v17882_v4  ;;  %v17788_v31 = vld [vmem:[%s22017_s3 + $0xba0] sm:$0xf0]  ;;  %v17023_v57 = vor.u32 %v20465_v50, %v17020_v29 }
 0x493   : > { %v20485_v34 = vld [vmem:[%s22017_s3 + $0x61c] sm:$0xf0]  ;;  %9897 = vmatpush.bf16.msra.mxu0 %v16383_v7  ;;  %9833 = vmatpush.bf16.msra.mxu3 %v17115_v8  ;;  %v20457_v60 = vld [vmem:[%s22017_s3 + $0x544] sm:$0xf]  ;;  %v17791_v53 = vor.u32 %v20657_v41, %v17788_v31 }
 0x494   : > { %v17850_v25 = vld [vmem:[%s22017_s3 + $0xc00] sm:$0xf]  ;;  %v17083_v27 = vor.u32 %v20485_v34, %v17082_v17  ;;  %v16988_v10 = vld [vmem:[%s22017_s3 + $0x560] sm:$0xf0] }
 0x495   : > { %v20677_v14 = vld [vmem:[%s22017_s3 + $0xc1c] sm:$0xf0]  ;;  %9872 = vmatpush.bf16.msrb.mxu2 %v17883_v45  ;;  %v17500_v1 = vld [vmem:[%s22017_s3 + $0x960] sm:$0xf0]  ;;  %v16991_v24 = vor.u32 %v20457_v60, %v16988_v10 }
 0x496   : > { %9910 = vmatpush.bf16.msra.mxu1 %v16639_v11  ;;  %v17851_v46 = vor.u32 %v20677_v14, %v17850_v25  ;;  %v20649_v56 = vld [vmem:[%s22017_s3 + $0xb44] sm:$0xf]  ;;  %v17503_v15 = vor.u32 %v20585_v13, %v17500_v1  ;;  %v3281_v11 = vperm.slane %v23890_v23, 7  ;;  %v20797_v55 = vld [vmem:[%s22017_s3 + $0xfdc] sm:$0xf0] }
 0x497   : > { %9898 = vmatpush.bf16.msra.mxu0 %v16351_v33  ;;  %9834 = vmatpush.bf16.msra.mxu3 %v17083_v27  ;;  %v17756_v9 = vld [vmem:[%s22017_s3 + $0xb60] sm:$0xf0] }
 0x498   : > { %v20449_v5 = vld [vmem:[%s22017_s3 + $0x504] sm:$0xf]  ;;  %v17759_v7 = vor.u32 %v20649_v56, %v17756_v9 }
 0x499   : > { %9873 = vmatpush.bf16.msrb.mxu2 %v17851_v46  ;;  %v16956_v4 = vld [vmem:[%s22017_s3 + $0x520] sm:$0xf0] }
 0x49a   : > { %9911 = vmatpush.bf16.msra.mxu1 %v16607_v18  ;;  %9835 = vmatmul.bf16.vlgmr.msra.gmra.mxu3 %v24033_v38  ;;  %v20577_v12 = vld [vmem:[%s22017_s3 + $0x904] sm:$0xf]  ;;  %v16959_v6 = vor.u32 %v20449_v5, %v16956_v4  ;;  %v20789_v5 = vld [vmem:[%s22017_s3 + $0xf9c] sm:$0xf0] }
 0x49b   : > { %9899 = vmatpush.bf16.msra.mxu0 %v16319_v62  ;;  %v17468_v8 = vld [vmem:[%s22017_s3 + $0x920] sm:$0xf0] }
 0x49c   : > { %v20641_v48 = vld [vmem:[%s22017_s3 + $0xb04] sm:$0xf]  ;;  %v17471_v45 = vor.u32 %v20577_v12, %v17468_v8  ;;  %v24059_v33 = vpop.f32.mrf.mxu3 }
 0x49d   : > { %9918 = vmatpush.bf16.msra.mxu2 %v17055_v40  ;;  %v17724_v47 = vld [vmem:[%s22017_s3 + $0xb20] sm:$0xf0]  ;;  %v6587_v17 = vpop.f32.mrf.mxu0 }
 0x49e   : > { %9912 = vmatpush.bf16.msra.mxu1 %v16575_v37  ;;  %9900 = vmatmul.bf16.vlgmr.msra.gmra.mxu0 %v23875_v19  ;;  %v20441_v20 = vld [vmem:[%s22017_s3 + $0x4c4] sm:$0xf]  ;;  %v6600_v34 = vpop.f32.mrf.mxu1  ;;  %v6588_v23 = vadd.f32 %v6587_v17, %v3281_v11  ;;  %v17727_v25 = vor.u32 %v20641_v48, %v17724_v47  ;;  %v16546_v48 = vld [vmem:[%s22017_s3 + $0x1c8] sm:$0xf] }
 0x49f   : > { %9944 = vmatpush.bf16.msrb.mxu0 %v17567_v0  ;;  %v16924_v51 = vld [vmem:[%s22017_s3 + $0x4e0] sm:$0xf0]  ;;  %v24061_v18 = vpop.f32.mrf.mxu2  ;;  %v20350_v47 = vld [vmem:[%s22017_s3 + $0x1e4] sm:$0xf0] }
 0x4a0   : > { %v20569_v14 = vld [vmem:[%s22017_s3 + $0x8c4] sm:$0xf]  ;;  %v16927_v27 = vor.u32 %v20441_v20, %v16924_v51  ;;  %v24065_v42 = vadd.f32 %v6600_v34, %v6588_v23  ;;  %v16802_v20 = vld [vmem:[%s22017_s3 + $0x3c8] sm:$0xf]  ;;  %v18266_v34 = vld [vmem:[%s22017_s3 + $0xf40] sm:$0xf]  ;;  %v6510_v23 = vadd.f32 %v23992_v44, %v23910_v43 }
 0x4a1   : > { %9919 = vmatpush.bf16.msra.mxu2 %v17023_v57  ;;  %9913 = vmatmul.bf16.vlgmr.msra.gmra.mxu1 %v23877_v36  ;;  %v17436_v16 = vld [vmem:[%s22017_s3 + $0x8e0] sm:$0xf0]  ;;  %v20414_v51 = vld [vmem:[%s22017_s3 + $0x3e4] sm:$0xf0]  ;;  %v18234_v43 = vld [vmem:[%s22017_s3 + $0xf00] sm:$0xf] }
 0x4a2   : > { %9957 = vmatpush.bf16.msrb.mxu1 %v17823_v54  ;;  %v20633_v21 = vld [vmem:[%s22017_s3 + $0xac4] sm:$0xf]  ;;  %v17439_v49 = vor.u32 %v20569_v14, %v17436_v16  ;;  %v18330_v54 = vld [vmem:[%s22017_s3 + $0xfc0] sm:$0xf]  ;;  %v16547_v14 = vor.u32 %v20350_v47, %v16546_v48 }
 0x4a3   : > { %9945 = vmatpush.bf16.msrb.mxu0 %v17535_v61  ;;  %v17692_v26 = vld [vmem:[%s22017_s3 + $0xae0] sm:$0xf0]  ;;  %v18331_v57 = vor.u32 %v20797_v55, %v18330_v54  ;;  %v20773_v44 = vld [vmem:[%s22017_s3 + $0xf1c] sm:$0xf0]  ;;  %v16450_v55 = vld [vmem:[%s22017_s3 + $0x108] sm:$0xf] }
 0x4a4   : > { %v20433_v35 = vld [vmem:[%s22017_s3 + $0x484] sm:$0xf]  ;;  %v17695_v3 = vor.u32 %v20633_v21, %v17692_v26  ;;  %v6524_v60 = vpop.f32.mrf.mxu3  ;;  %v16803_v21 = vor.u32 %v20414_v51, %v16802_v20  ;;  %v16514_v26 = vld [vmem:[%s22017_s3 + $0x188] sm:$0xf] }
 0x4a5   : > { %9920 = vmatpush.bf16.msra.mxu2 %v16991_v24  ;;  %v16892_v30 = vld [vmem:[%s22017_s3 + $0x4a0] sm:$0xf0]  ;;  %v6589_v29 = vpop.f32.mrf.mxu0  ;;  %9879 = vmatpush.bf16.msrb.mxu3 %v18331_v57  ;;  %v18298_v24 = vld [vmem:[%s22017_s3 + $0xf80] sm:$0xf]  ;;  %v16386_v20 = vld [vmem:[%s22017_s3 + $0x88] sm:$0xf] }
 0x4a6   : > { %9958 = vmatpush.bf16.msrb.mxu1 %v17791_v53  ;;  %v20561_v32 = vld [vmem:[%s22017_s3 + $0x884] sm:$0xf]  ;;  %v16895_v40 = vor.u32 %v20433_v35, %v16892_v30  ;;  %v6602_v37 = vpop.f32.mrf.mxu1  ;;  %v18299_v12 = vor.u32 %v20789_v5, %v18298_v24  ;;  %v6523_v35 = vadd.f32 %v24059_v33, %v6510_v23  ;;  %v16770_v30 = vld [vmem:[%s22017_s3 + $0x388] sm:$0xf]  ;;  %v20765_v29 = vld [vmem:[%s22017_s3 + $0xedc] sm:$0xf0] }
 0x4a7   : > { %9946 = vmatpush.bf16.msrb.mxu0 %v17503_v15  ;;  %v17404_v46 = vld [vmem:[%s22017_s3 + $0x8a0] sm:$0xf0]  ;;  %v6563_v10 = vpop.f32.mrf.mxu2  ;;  %v16738_v33 = vld [vmem:[%s22017_s3 + $0x348] sm:$0xf]  ;;  %v18170_v57 = vld [vmem:[%s22017_s3 + $0xe80] sm:$0xf] }
 0x4a8   : > { %v20625_v39 = vld [vmem:[%s22017_s3 + $0xa84] sm:$0xf]  ;;  %v17407_v0 = vor.u32 %v20561_v32, %v17404_v46  ;;  %v18235_v32 = vor.u32 %v20773_v44, %v18234_v43  ;;  %v20757_v60 = vld [vmem:[%s22017_s3 + $0xe9c] sm:$0xf0]  ;;  %v16674_v24 = vld [vmem:[%s22017_s3 + $0x2c8] sm:$0xf] }
 0x4a9   : > { %9921 = vmatpush.bf16.msra.mxu2 %v16959_v6  ;;  %v17660_v63 = vld [vmem:[%s22017_s3 + $0xaa0] sm:$0xf0]  ;;  %9880 = vmatpush.bf16.msrb.mxu3 %v18299_v12  ;;  %v20382_v5 = vld [vmem:[%s22017_s3 + $0x2e4] sm:$0xf0] }
 0x4aa   : > { %9959 = vmatpush.bf16.msrb.mxu1 %v17759_v7  ;;  %v20425_v62 = vld [vmem:[%s22017_s3 + $0x444] sm:$0xf]  ;;  %v17663_v59 = vor.u32 %v20625_v39, %v17660_v63  ;;  %v16482_v39 = vld [vmem:[%s22017_s3 + $0x148] sm:$0xf] }
 0x4ab   : > { %9947 = vmatpush.bf16.msrb.mxu0 %v17471_v45  ;;  %v16860_v50 = vld [vmem:[%s22017_s3 + $0x460] sm:$0xf0]  ;;  %v20781_v45 = vld [vmem:[%s22017_s3 + $0xf5c] sm:$0xf0]  ;;  %v20334_v63 = vld [vmem:[%s22017_s3 + $0x164] sm:$0xf0] }
 0x4ac   : > { %v20553_v41 = vld [vmem:[%s22017_s3 + $0x844] sm:$0xf]  ;;  %v16863_v13 = vor.u32 %v20425_v62, %v16860_v50  ;;  %v18267_v16 = vor.u32 %v20781_v45, %v18266_v34  ;;  %v20398_v62 = vld [vmem:[%s22017_s3 + $0x364] sm:$0xf0]  ;;  %v18202_v50 = vld [vmem:[%s22017_s3 + $0xec0] sm:$0xf] }
 0x4ad   : > { %9922 = vmatpush.bf16.msra.mxu2 %v16927_v27  ;;  %v17372_v31 = vld [vmem:[%s22017_s3 + $0x860] sm:$0xf0]  ;;  %v20342_v27 = vld [vmem:[%s22017_s3 + $0x1a4] sm:$0xf0]  ;;  %v18203_v37 = vor.u32 %v20765_v29, %v18202_v50  ;;  %v16739_v54 = vor.u32 %v20398_v62, %v16738_v33 }
 0x4ae   : > { %9960 = vmatpush.bf16.msrb.mxu1 %v17727_v25  ;;  %v20617_v61 = vld [vmem:[%s22017_s3 + $0xa44] sm:$0xf]  ;;  %v17375_v9 = vor.u32 %v20553_v41, %v17372_v31  ;;  %9881 = vmatpush.bf16.msrb.mxu3 %v18267_v16  ;;  %v16706_v41 = vld [vmem:[%s22017_s3 + $0x308] sm:$0xf] }
 0x4af   : > { %9948 = vmatpush.bf16.msrb.mxu0 %v17439_v49  ;;  %v17628_v53 = vld [vmem:[%s22017_s3 + $0xa60] sm:$0xf0]  ;;  %v20406_v49 = vld [vmem:[%s22017_s3 + $0x3a4] sm:$0xf0] }
 0x4b0   : > { %v20417_v1 = vld [vmem:[%s22017_s3 + $0x404] sm:$0xf]  ;;  %v17631_v4 = vor.u32 %v20617_v61, %v17628_v53  ;;  %v16771_v46 = vor.u32 %v20406_v49, %v16770_v30  ;;  %v20390_v31 = vld [vmem:[%s22017_s3 + $0x324] sm:$0xf0]  ;;  %v18171_v61 = vor.u32 %v20757_v60, %v18170_v57 }
 0x4b1   : > { %9923 = vmatpush.bf16.msra.mxu2 %v16895_v40  ;;  %v16828_v56 = vld [vmem:[%s22017_s3 + $0x420] sm:$0xf0]  ;;  %v6536_v40 = vadd.f32 %v23986_v2, %v6523_v35  ;;  %v20326_v2 = vld [vmem:[%s22017_s3 + $0x124] sm:$0xf0] }
 0x4b2   : > { %9961 = vmatpush.bf16.msrb.mxu1 %v17695_v3  ;;  %v20545_v15 = vld [vmem:[%s22017_s3 + $0x804] sm:$0xf]  ;;  %v16831_v6 = vor.u32 %v20417_v1, %v16828_v56  ;;  %v16515_v3 = vor.u32 %v20342_v27, %v16514_v26  ;;  %9882 = vmatpush.bf16.msrb.mxu3 %v18235_v32  ;;  %v16451_v10 = vor.u32 %v20326_v2, %v16450_v55  ;;  %v16418_v1 = vld [vmem:[%s22017_s3 + $0xc8] sm:$0xf] }
 0x4b3   : > { %9949 = vmatpush.bf16.msrb.mxu0 %v17407_v0  ;;  %v17340_v7 = vld [vmem:[%s22017_s3 + $0x820] sm:$0xf0]  ;;  %v16483_v0 = vor.u32 %v20334_v63, %v16482_v39  ;;  %v20318_v56 = vld [vmem:[%s22017_s3 + $0xe4] sm:$0xf0] }
 0x4b4   : > { %v20609_v11 = vld [vmem:[%s22017_s3 + $0xa04] sm:$0xf]  ;;  %v17343_v17 = vor.u32 %v20545_v15, %v17340_v7  ;;  %v18138_v7 = vld [vmem:[%s22017_s3 + $0xe40] sm:$0xf]  ;;  %v20310_v51 = vld [vmem:[%s22017_s3 + $0xa4] sm:$0xf0] }
 0x4b5   : > { %v17596_v8 = vld [vmem:[%s22017_s3 + $0xa20] sm:$0xf0]  ;;  %9924 = vmatpush.bf16.msra.mxu2 %v16863_v13  ;;  %v16642_v34 = vld [vmem:[%s22017_s3 + $0x288] sm:$0xf] }
 0x4b6   : > { %9962 = vmatpush.bf16.msrb.mxu1 %v17663_v59  ;;  %v17599_v25 = vor.u32 %v20609_v11, %v17596_v8  ;;  %v6549_v59 = vadd.f32 %v23988_v58, %v6536_v40  ;;  %9883 = vmatpush.bf16.msrb.mxu3 %v18203_v37  ;;  %v16707_v58 = vor.u32 %v20390_v31, %v16706_v41  ;;  %v20749_v11 = vld [vmem:[%s22017_s3 + $0xe5c] sm:$0xf0]  ;;  %v20729_v48 = vld [vmem:[%s22017_s3 + $0xdc4] sm:$0xf]  ;;  %v20374_v45 = vld [vmem:[%s22017_s3 + $0x2a4] sm:$0xf0] }
 0x4b7   : > { %9950 = vmatpush.bf16.msrb.mxu0 %v17375_v9  ;;  %v16419_v8 = vor.u32 %v20318_v56, %v16418_v1  ;;  %v18076_v47 = vld [vmem:[%s22017_s3 + $0xde0] sm:$0xf0]  ;;  %v16643_v43 = vor.u32 %v20374_v45, %v16642_v34  ;;  %v16354_v44 = vld [vmem:[%s22017_s3 + $0x48] sm:$0xf] }
 0x4b8   : > { %v6562_v9 = vadd.f32 %v24061_v18, %v6549_v59  ;;  %v18139_v18 = vor.u32 %v20749_v11, %v18138_v7  ;;  %v18079_v23 = vor.u32 %v20729_v48, %v18076_v47  ;;  %v20721_v26 = vld [vmem:[%s22017_s3 + $0xd84] sm:$0xf]  ;;  %v20366_v39 = vld [vmem:[%s22017_s3 + $0x264] sm:$0xf0] }
 0x4b9   : > { %9925 = vmatpush.bf16.msra.mxu2 %v16831_v6  ;;  %v16675_v6 = vor.u32 %v20382_v5, %v16674_v24  ;;  %v18044_v27 = vld [vmem:[%s22017_s3 + $0xda0] sm:$0xf0]  ;;  %v16322_v59 = vld [vmem:[%s22017_s3 + $0x8] sm:$0xf] }
 0x4ba   : > { %9963 = vmatpush.bf16.msrb.mxu1 %v17631_v4  ;;  %9884 = vmatpush.bf16.msrb.mxu3 %v18171_v61  ;;  %v20537_v32 = vld [vmem:[%s22017_s3 + $0x7c4] sm:$0xf]  ;;  %v18047_v62 = vor.u32 %v20721_v26, %v18044_v27  ;;  %v20294_v41 = vld [vmem:[%s22017_s3 + $0x24] sm:$0xf0] }
 0x4bb   : > { %9951 = vmatpush.bf16.msrb.mxu0 %v17343_v17  ;;  %v24120_v53 = vpop.f32.mrf.mxu0  ;;  %v17308_v63 = vld [vmem:[%s22017_s3 + $0x7e0] sm:$0xf0]  ;;  %v16578_v31 = vld [vmem:[%s22017_s3 + $0x208] sm:$0xf]  ;;  %v16323_v24 = vor.u32 %v20294_v41, %v16322_v59 }
 0x4bc   : > { %v6574_v4 = vpop.f32.mrf.mxu3  ;;  %v20713_v50 = vld [vmem:[%s22017_s3 + $0xd44] sm:$0xf]  ;;  %v17311_v29 = vor.u32 %v20537_v32, %v17308_v63  ;;  %v20358_v60 = vld [vmem:[%s22017_s3 + $0x224] sm:$0xf0] }
 0x4bd   : > { %v6575_v12 = vadd.f32 %v6574_v4, %v6562_v9  ;;  %v17276_v55 = vld [vmem:[%s22017_s3 + $0x7a0] sm:$0xf0]  ;;  %v20606_v61 = vld [vmem:[%s22017_s3 + $0x9e4] sm:$0xf0]  ;;  %v16579_v11 = vor.u32 %v20358_v60, %v16578_v31 }
 0x4be   : > { %9964 = vmatpush.bf16.msrb.mxu1 %v17599_v25  ;;  %9952 = vmatmul.bf16.vlgmr.msrb.gmra.mxu0 %v23965_v52  ;;  %v24122_v13 = vpop.f32.mrf.mxu1  ;;  %v18106_v25 = vld [vmem:[%s22017_s3 + $0xe00] sm:$0xf]  ;;  %v17826_v1 = vld [vmem:[%s22017_s3 + $0xbc8] sm:$0xf]  ;;  %v20705_v9 = vld [vmem:[%s22017_s3 + $0xd04] sm:$0xf] }
 0x4bf   : > { %9996 = vmatpush.bf16.msra.mxu0 %v16547_v14  ;;  %v24129_v15 = vpop.f32.mrf.mxu2  ;;  %v6688_v17 = vmax.f32 %v6575_v12, 0.0  ;;  %9885 = vmatpush.bf16.msrb.mxu3 %v18139_v18  ;;  %v20741_v14 = vld [vmem:[%s22017_s3 + $0xe1c] sm:$0xf0]  ;;  %v20670_v56 = vld [vmem:[%s22017_s3 + $0xbe4] sm:$0xf0] }
 0x4c0   : > { %v18107_v35 = vor.u32 %v20741_v14, %v18106_v25  ;;  %v17980_v5 = vld [vmem:[%s22017_s3 + $0xd20] sm:$0xf0]  ;;  %v17538_v48 = vld [vmem:[%s22017_s3 + $0x988] sm:$0xf] }
 0x4c1   : > { %9965 = vmatmul.bf16.vlgmr.msrb.gmra.mxu1 %v24005_v22  ;;  %v24141_v16 = vpack.c.bf16 %v6688_v17, %v6688_v17  ;;  %v20521_v4 = vld [vmem:[%s22017_s3 + $0x744] sm:$0xf]  ;;  %v20598_v47 = vld [vmem:[%s22017_s3 + $0x9a4] sm:$0xf0] }
 0x4c2   : > { %10009 = vmatpush.bf16.msra.mxu1 %v16803_v21  ;;  %v16387_v21 = vor.u32 %v20310_v51, %v16386_v20  ;;  %v17244_v7 = vld [vmem:[%s22017_s3 + $0x760] sm:$0xf0]  ;;  %v17794_v20 = vld [vmem:[%s22017_s3 + $0xb88] sm:$0xf]  ;;  %v17539_v25 = vor.u32 %v20598_v47, %v17538_v48 }
 0x4c3   : > { %9997 = vmatpush.bf16.msra.mxu0 %v16515_v3  ;;  %v6641_v30 = vpop.f32.mrf.mxu0  ;;  %v20302_v3 = vld [vmem:[%s22017_s3 + $0x64] sm:$0xf0]  ;;  %9874 = vmatmul.bf16.vlgmr.msrb.gmra.mxu2 %v24141_v16  ;;  %v17247_v18 = vor.u32 %v20521_v4, %v17244_v7  ;;  %v20697_v17 = vld [vmem:[%s22017_s3 + $0xcc4] sm:$0xf] }
 0x4c4   : > { %9886 = vmatpush.bf16.msrb.mxu3 %v18107_v35  ;;  %9970 = vmatpush.bf16.msrb.mxu2 %v18079_v23  ;;  %v6576_v33 = vpop.f32.mrf.mxu3  ;;  %v16355_v37 = vor.u32 %v20302_v3, %v16354_v44  ;;  %v20662_v51 = vld [vmem:[%s22017_s3 + $0xba4] sm:$0xf0]  ;;  %v17948_v34 = vld [vmem:[%s22017_s3 + $0xce0] sm:$0xf0] }
 0x4c5   : > { %v20513_v45 = vld [vmem:[%s22017_s3 + $0x704] sm:$0xf]  ;;  %v17795_v14 = vor.u32 %v20662_v51, %v17794_v20  ;;  %v20590_v26 = vld [vmem:[%s22017_s3 + $0x964] sm:$0xf0]  ;;  %v17951_v35 = vor.u32 %v20697_v17, %v17948_v34 }
 0x4c6   : > { %10010 = vmatpush.bf16.msra.mxu1 %v16771_v46  ;;  %v6654_v49 = vpop.f32.mrf.mxu1  ;;  %v16610_v46 = vld [vmem:[%s22017_s3 + $0x248] sm:$0xf]  ;;  %v17212_v23 = vld [vmem:[%s22017_s3 + $0x720] sm:$0xf0] }
 0x4c7   : > { %9998 = vmatpush.bf16.msra.mxu0 %v16483_v0  ;;  %v6615_v40 = vpop.f32.mrf.mxu2  ;;  %v18012_v0 = vld [vmem:[%s22017_s3 + $0xd60] sm:$0xf0]  ;;  %v16611_v2 = vor.u32 %v20366_v39, %v16610_v46  ;;  %v17762_v27 = vld [vmem:[%s22017_s3 + $0xb48] sm:$0xf]  ;;  %v17215_v44 = vor.u32 %v20513_v45, %v17212_v23 }
 0x4c8   : > { %9931 = vmatpush.bf16.msra.mxu3 %v17311_v29  ;;  %9971 = vmatpush.bf16.msrb.mxu2 %v18047_v62  ;;  %v20654_v30 = vld [vmem:[%s22017_s3 + $0xb64] sm:$0xf0]  ;;  %v17916_v3 = vld [vmem:[%s22017_s3 + $0xca0] sm:$0xf0] }
 0x4c9   : > { %v24182_v49 = vld [vmem:[%s22024_s12] sm:$0xff]  ;;  %v17763_v63 = vor.u32 %v20654_v30, %v17762_v27 }
 0x4ca   : > { %10011 = vmatpush.bf16.msra.mxu1 %v16739_v54  ;;  %v20529_v54 = vld [vmem:[%s22017_s3 + $0x784] sm:$0xf]  ;;  %v7212_v33 = vperm.slane %v24182_v49, 0  ;;  %v17474_v40 = vld [vmem:[%s22017_s3 + $0x908] sm:$0xf] }
 0x4cb   : > { %9999 = vmatpush.bf16.msra.mxu0 %v16451_v10  ;;  %v17279_v57 = vor.u32 %v20529_v54, %v17276_v55  ;;  %v17570_v10 = vld [vmem:[%s22017_s3 + $0x9c8] sm:$0xf]  ;;  %v20505_v32 = vld [vmem:[%s22017_s3 + $0x6c4] sm:$0xf] }
 0x4cc   : > { %v17571_v12 = vor.u32 %v20606_v61, %v17570_v10  ;;  %v17180_v46 = vld [vmem:[%s22017_s3 + $0x6e0] sm:$0xf0]  ;;  %v20582_v62 = vld [vmem:[%s22017_s3 + $0x924] sm:$0xf0] }
 0x4cd   : > { %9932 = vmatpush.bf16.msra.mxu3 %v17279_v57  ;;  %v17730_v29 = vld [vmem:[%s22017_s3 + $0xb08] sm:$0xf]  ;;  %v17183_v54 = vor.u32 %v20505_v32, %v17180_v46  ;;  %v17884_v55 = vld [vmem:[%s22017_s3 + $0xc60] sm:$0xf0]  ;;  %v17475_v41 = vor.u32 %v20582_v62, %v17474_v40 }
 0x4ce   : > { %10012 = vmatpush.bf16.msra.mxu1 %v16707_v58  ;;  %v18015_v58 = vor.u32 %v20713_v50, %v18012_v0  ;;  %v20681_v0 = vld [vmem:[%s22017_s3 + $0xc44] sm:$0xf]  ;;  %v17442_v57 = vld [vmem:[%s22017_s3 + $0x8c8] sm:$0xf] }
 0x4cf   : > { %10000 = vmatpush.bf16.msra.mxu0 %v16419_v8  ;;  %v17827_v8 = vor.u32 %v20670_v56, %v17826_v1  ;;  %v17148_v59 = vld [vmem:[%s22017_s3 + $0x6a0] sm:$0xf0]  ;;  %v20574_v60 = vld [vmem:[%s22017_s3 + $0x8e4] sm:$0xf0] }
 0x4d0   : > { %9972 = vmatpush.bf16.msrb.mxu2 %v18015_v58  ;;  %v17887_v58 = vor.u32 %v20681_v0, %v17884_v55  ;;  %v17698_v1 = vld [vmem:[%s22017_s3 + $0xac8] sm:$0xf]  ;;  %v17852_v4 = vld [vmem:[%s22017_s3 + $0xc20] sm:$0xf0]  ;;  %v17443_v48 = vor.u32 %v20574_v60, %v17442_v57  ;;  %v16548_v57 = vld [vmem:[%s22017_s3 + $0x1e8] sm:$0xf0] }
 0x4d1   : > { %9933 = vmatpush.bf16.msra.mxu3 %v17247_v18  ;;  %v20638_v56 = vld [vmem:[%s22017_s3 + $0xae4] sm:$0xf0]  ;;  %v20489_v7 = vld [vmem:[%s22017_s3 + $0x644] sm:$0xf] }
 0x4d2   : > { %10013 = vmatpush.bf16.msra.mxu1 %v16675_v6  ;;  %v17983_v6 = vor.u32 %v20705_v9, %v17980_v5  ;;  %v20673_v9 = vld [vmem:[%s22017_s3 + $0xc04] sm:$0xf]  ;;  %v17058_v47 = vld [vmem:[%s22017_s3 + $0x5c8] sm:$0xf]  ;;  %v17699_v20 = vor.u32 %v20638_v56, %v17698_v1 }
 0x4d3   : > { %10001 = vmatpush.bf16.msra.mxu0 %v16387_v21  ;;  %v17506_v21 = vld [vmem:[%s22017_s3 + $0x948] sm:$0xf]  ;;  %9926 = vmatmul.bf16.vlgmr.msra.gmra.mxu2 %v23952_v28  ;;  %v17855_v34 = vor.u32 %v20673_v9, %v17852_v4  ;;  %v20338_v4 = vld [vmem:[%s22017_s3 + $0x18c] sm:$0xf] }
 0x4d4   : > { %9973 = vmatpush.bf16.msrb.mxu2 %v17983_v6  ;;  %v17507_v39 = vor.u32 %v20590_v26, %v17506_v21  ;;  %v20478_v18 = vld [vmem:[%s22017_s3 + $0x5e4] sm:$0xf0]  ;;  %v20481_v21 = vld [vmem:[%s22017_s3 + $0x604] sm:$0xf] }
 0x4d5   : > { %9934 = vmatpush.bf16.msra.mxu3 %v17215_v44  ;;  %v17410_v51 = vld [vmem:[%s22017_s3 + $0x888] sm:$0xf]  ;;  %v17084_v26 = vld [vmem:[%s22017_s3 + $0x620] sm:$0xf0] }
 0x4d6   : > { %10014 = vmatpush.bf16.msra.mxu1 %v16643_v43  ;;  %v20689_v43 = vld [vmem:[%s22017_s3 + $0xc84] sm:$0xf]  ;;  %v20566_v17 = vld [vmem:[%s22017_s3 + $0x8a4] sm:$0xf0] }
 0x4d7   : > { %10002 = vmatpush.bf16.msra.mxu0 %v16355_v37  ;;  %v17919_v50 = vor.u32 %v20689_v43, %v17916_v3  ;;  %v20646_v37 = vld [vmem:[%s22017_s3 + $0xb24] sm:$0xf0]  ;;  %v17411_v27 = vor.u32 %v20566_v17, %v17410_v51 }
 0x4d8   : > { %9974 = vmatpush.bf16.msrb.mxu2 %v17951_v35  ;;  %v17731_v31 = vor.u32 %v20646_v37, %v17730_v29  ;;  %v17666_v45 = vld [vmem:[%s22017_s3 + $0xa88] sm:$0xf] }
 0x4d9   : > { %9935 = vmatpush.bf16.msra.mxu3 %v17183_v54  ;;  %v20630_v23 = vld [vmem:[%s22017_s3 + $0xaa4] sm:$0xf0] }
 0x4da   : > { %10015 = vmatpush.bf16.msra.mxu1 %v16611_v2  ;;  %v20497_v2 = vld [vmem:[%s22017_s3 + $0x684] sm:$0xf]  ;;  %v17026_v35 = vld [vmem:[%s22017_s3 + $0x588] sm:$0xf]  ;;  %v17667_v43 = vor.u32 %v20630_v23, %v17666_v45 }
 0x4db   : > { %10003 = vmatpush.bf16.msra.mxu0 %v16323_v24  ;;  %v9797_v10 = vpop.f32.mrf.mxu0  ;;  %v17151_v24 = vor.u32 %v20497_v2, %v17148_v59  ;;  %v20470_v30 = vld [vmem:[%s22017_s3 + $0x5a4] sm:$0xf0] }
 0x4dc   : > { %9975 = vmatpush.bf16.msrb.mxu2 %v17919_v50  ;;  %v9798_v5 = vadd.f32 %v9797_v10, %v7212_v33  ;;  %v17378_v44 = vld [vmem:[%s22017_s3 + $0x848] sm:$0xf]  ;;  %v17087_v33 = vor.u32 %v20481_v21, %v17084_v26  ;;  %v17027_v40 = vor.u32 %v20470_v30, %v17026_v35  ;;  %v20410_v10 = vld [vmem:[%s22017_s3 + $0x3cc] sm:$0xf] }
 0x4dd   : > { %9936 = vmatpush.bf16.msra.mxu3 %v17151_v24  ;;  %v20558_v3 = vld [vmem:[%s22017_s3 + $0x864] sm:$0xf0]  ;;  %v20322_v30 = vld [vmem:[%s22017_s3 + $0x10c] sm:$0xf] }
 0x4de   : > { %10016 = vmatpush.bf16.msra.mxu1 %v16579_v11  ;;  %10004 = vmatmul.bf16.vlgmr.msra.gmra.mxu0 %v23875_v19  ;;  %v9810_v61 = vpop.f32.mrf.mxu1  ;;  %v17116_v11 = vld [vmem:[%s22017_s3 + $0x660] sm:$0xf0]  ;;  %v17379_v29 = vor.u32 %v20558_v3, %v17378_v44  ;;  %v16994_v37 = vld [vmem:[%s22017_s3 + $0x548] sm:$0xf]  ;;  %v20386_v3 = vld [vmem:[%s22017_s3 + $0x30c] sm:$0xf] }
 0x4df   : > { %10048 = vmatpush.bf16.msrb.mxu0 %v17571_v12  ;;  %v24207_v12 = vpop.f32.mrf.mxu3  ;;  %v24213_v6 = vadd.f32 %v9810_v61, %v9798_v5  ;;  %v20462_v0 = vld [vmem:[%s22017_s3 + $0x564] sm:$0xf0]  ;;  %v16804_v61 = vld [vmem:[%s22017_s3 + $0x3e8] sm:$0xf0] }
 0x4e0   : > { %9976 = vmatpush.bf16.msrb.mxu2 %v17887_v58  ;;  %v17346_v55 = vld [vmem:[%s22017_s3 + $0x808] sm:$0xf]  ;;  %v16995_v60 = vor.u32 %v20462_v0, %v16994_v37  ;;  %v16807_v5 = vor.u32 %v20410_v10, %v16804_v61  ;;  %v16676_v37 = vld [vmem:[%s22017_s3 + $0x2e8] sm:$0xf0] }
 0x4e1   : > { %10017 = vmatmul.bf16.vlgmr.msra.gmra.mxu1 %v23877_v36  ;;  %v20550_v2 = vld [vmem:[%s22017_s3 + $0x824] sm:$0xf0]  ;;  %v20306_v10 = vld [vmem:[%s22017_s3 + $0x8c] sm:$0xf] }
 0x4e2   : > { %10061 = vmatpush.bf16.msrb.mxu1 %v17827_v8  ;;  %v24209_v8 = vpop.f32.mrf.mxu2  ;;  %v17602_v59 = vld [vmem:[%s22017_s3 + $0xa08] sm:$0xf]  ;;  %v17347_v58 = vor.u32 %v20550_v2, %v17346_v55  ;;  %v16388_v61 = vld [vmem:[%s22017_s3 + $0xa8] sm:$0xf0] }
 0x4e3   : > { %10049 = vmatpush.bf16.msrb.mxu0 %v17539_v25  ;;  %v17119_v25 = vor.u32 %v20489_v7, %v17116_v11  ;;  %v9799_v32 = vpop.f32.mrf.mxu0  ;;  %v16962_v1 = vld [vmem:[%s22017_s3 + $0x508] sm:$0xf]  ;;  %v16516_v7 = vld [vmem:[%s22017_s3 + $0x1a8] sm:$0xf0]  ;;  %v6614_v11 = vadd.f32 %v24129_v15, %v24065_v42 }
 0x4e4   : > { %9977 = vmatpush.bf16.msrb.mxu2 %v17855_v34  ;;  %v20454_v56 = vld [vmem:[%s22017_s3 + $0x524] sm:$0xf0]  ;;  %v16519_v34 = vor.u32 %v20338_v4, %v16516_v7  ;;  %v20330_v42 = vld [vmem:[%s22017_s3 + $0x14c] sm:$0xf] }
 0x4e5   : > { %9937 = vmatpush.bf16.msra.mxu3 %v17119_v25  ;;  %v20446_v51 = vld [vmem:[%s22017_s3 + $0x4e4] sm:$0xf0]  ;;  %v6627_v17 = vadd.f32 %v24207_v12, %v6614_v11  ;;  %v16484_v15 = vld [vmem:[%s22017_s3 + $0x168] sm:$0xf0]  ;;  %v16391_v11 = vor.u32 %v20306_v10, %v16388_v61 }
 0x4e6   : > { %10062 = vmatpush.bf16.msrb.mxu1 %v17795_v14  ;;  %v17059_v14 = vor.u32 %v20478_v18, %v17058_v47  ;;  %v9812_v46 = vpop.f32.mrf.mxu1  ;;  %v20402_v47 = vld [vmem:[%s22017_s3 + $0x38c] sm:$0xf]  ;;  %v16898_v12 = vld [vmem:[%s22017_s3 + $0x488] sm:$0xf] }
 0x4e7   : > { %10050 = vmatpush.bf16.msrb.mxu0 %v17507_v39  ;;  %v17634_v39 = vld [vmem:[%s22017_s3 + $0xa48] sm:$0xf]  ;;  %v6628_v62 = vpop.f32.mrf.mxu3  ;;  %9978 = vmatmul.bf16.vlgmr.msrb.gmra.mxu2 %v24141_v16  ;;  %v16772_v18 = vld [vmem:[%s22017_s3 + $0x3a8] sm:$0xf0]  ;;  %v6640_v26 = vadd.f32 %v24120_v53, %v6627_v17 }
 0x4e8   : > { %10022 = vmatpush.bf16.msra.mxu2 %v17059_v14  ;;  %v16775_v45 = vor.u32 %v20402_v47, %v16772_v18  ;;  %v20394_v25 = vld [vmem:[%s22017_s3 + $0x34c] sm:$0xf]  ;;  %v20438_v21 = vld [vmem:[%s22017_s3 + $0x4a4] sm:$0xf0] }
 0x4e9   : > { %9938 = vmatpush.bf16.msra.mxu3 %v17087_v33  ;;  %v16740_v14 = vld [vmem:[%s22017_s3 + $0x368] sm:$0xf0]  ;;  %v16899_v44 = vor.u32 %v20438_v21, %v16898_v12  ;;  %v16866_v46 = vld [vmem:[%s22017_s3 + $0x448] sm:$0xf]  ;;  %v6653_v53 = vadd.f32 %v24122_v13, %v6640_v26 }
 0x4ea   : > { %10063 = vmatpush.bf16.msrb.mxu1 %v17763_v63  ;;  %v20622_v63 = vld [vmem:[%s22017_s3 + $0xa64] sm:$0xf0]  ;;  %v6667_v50 = vpop.f32.mrf.mxu2  ;;  %v16743_v35 = vor.u32 %v20394_v25, %v16740_v14  ;;  %v16708_v32 = vld [vmem:[%s22017_s3 + $0x328] sm:$0xf0] }
 0x4eb   : > { %10051 = vmatpush.bf16.msrb.mxu0 %v17475_v41  ;;  %v17635_v54 = vor.u32 %v20622_v63, %v17634_v39  ;;  %v20614_v41 = vld [vmem:[%s22017_s3 + $0xa24] sm:$0xf0]  ;;  %v16711_v33 = vor.u32 %v20386_v3, %v16708_v32  ;;  %v16420_v62 = vld [vmem:[%s22017_s3 + $0xe8] sm:$0xf0]  ;;  %v6666_v13 = vadd.f32 %v24209_v8, %v6653_v53 }
 0x4ec   : > { %10023 = vmatpush.bf16.msra.mxu2 %v17027_v40  ;;  %v17603_v9 = vor.u32 %v20614_v41, %v17602_v59  ;;  %v20430_v39 = vld [vmem:[%s22017_s3 + $0x464] sm:$0xf0]  ;;  %v20314_v40 = vld [vmem:[%s22017_s3 + $0xcc] sm:$0xf] }
 0x4ed   : > { %v16867_v50 = vor.u32 %v20430_v39, %v16866_v46  ;;  %v20422_v55 = vld [vmem:[%s22017_s3 + $0x424] sm:$0xf0]  ;;  %v16423_v2 = vor.u32 %v20314_v40, %v16420_v62  ;;  %v20362_v17 = vld [vmem:[%s22017_s3 + $0x24c] sm:$0xf]  ;;  %v20777_v46 = vld [vmem:[%s22017_s3 + $0xf44] sm:$0xf] }
 0x4ee   : > { %10064 = vmatpush.bf16.msrb.mxu1 %v17731_v31  ;;  %v20346_v31 = vld [vmem:[%s22017_s3 + $0x1cc] sm:$0xf]  ;;  %v18082_v59 = vld [vmem:[%s22017_s3 + $0xdc8] sm:$0xf]  ;;  %v18268_v39 = vld [vmem:[%s22017_s3 + $0xf60] sm:$0xf0] }
 0x4ef   : > { %10052 = vmatpush.bf16.msrb.mxu0 %v17443_v48  ;;  %v16551_v24 = vor.u32 %v20346_v31, %v16548_v57  ;;  %v16963_v48 = vor.u32 %v20454_v56, %v16962_v1  ;;  %v20734_v41 = vld [vmem:[%s22017_s3 + $0xde4] sm:$0xf0]  ;;  %v20290_v12 = vld [vmem:[%s22017_s3 + $0xc] sm:$0xf] }
 0x4f0   : > { %10024 = vmatpush.bf16.msra.mxu2 %v16995_v60  ;;  %v18083_v4 = vor.u32 %v20734_v41, %v18082_v59  ;;  %v20726_v47 = vld [vmem:[%s22017_s3 + $0xda4] sm:$0xf0]  ;;  %v20354_v3 = vld [vmem:[%s22017_s3 + $0x20c] sm:$0xf]  ;;  %v20769_v41 = vld [vmem:[%s22017_s3 + $0xf04] sm:$0xf] }
 0x4f1   : > { %v18018_v21 = vld [vmem:[%s22017_s3 + $0xd48] sm:$0xf]  ;;  %v16580_v32 = vld [vmem:[%s22017_s3 + $0x228] sm:$0xf0] }
 0x4f2   : > { %10065 = vmatpush.bf16.msrb.mxu1 %v17699_v20  ;;  %v16930_v20 = vld [vmem:[%s22017_s3 + $0x4c8] sm:$0xf]  ;;  %v20602_v53 = vld [vmem:[%s22017_s3 + $0x9cc] sm:$0xf] }
 0x4f3   : > { %10053 = vmatpush.bf16.msrb.mxu0 %v17411_v27  ;;  %v16931_v23 = vor.u32 %v20446_v51, %v16930_v20  ;;  %v16487_v27 = vor.u32 %v20330_v42, %v16484_v15  ;;  %v20298_v20 = vld [vmem:[%s22017_s3 + $0x4c] sm:$0xf]  ;;  %v20785_v42 = vld [vmem:[%s22017_s3 + $0xf84] sm:$0xf]  ;;  %v20718_v26 = vld [vmem:[%s22017_s3 + $0xd64] sm:$0xf0] }
 0x4f4   : > { %10025 = vmatpush.bf16.msra.mxu2 %v16963_v48  ;;  %v18050_v48 = vld [vmem:[%s22017_s3 + $0xd88] sm:$0xf]  ;;  %v16356_v51 = vld [vmem:[%s22017_s3 + $0x68] sm:$0xf0]  ;;  %v18300_v15 = vld [vmem:[%s22017_s3 + $0xfa0] sm:$0xf0] }
 0x4f5   : > { %v18051_v25 = vor.u32 %v20726_v47, %v18050_v48  ;;  %v16359_v14 = vor.u32 %v20298_v20, %v16356_v51  ;;  %v20666_v40 = vld [vmem:[%s22017_s3 + $0xbcc] sm:$0xf]  ;;  %v17922_v20 = vld [vmem:[%s22017_s3 + $0xc88] sm:$0xf] }
 0x4f6   : > { %10066 = vmatpush.bf16.msrb.mxu1 %v17667_v43  ;;  %v16452_v43 = vld [vmem:[%s22017_s3 + $0x128] sm:$0xf0]  ;;  %v20694_v51 = vld [vmem:[%s22017_s3 + $0xca4] sm:$0xf0] }
 0x4f7   : > { %10054 = vmatpush.bf16.msrb.mxu0 %v17379_v29  ;;  %v16455_v63 = vor.u32 %v20322_v30, %v16452_v43  ;;  %v20378_v29 = vld [vmem:[%s22017_s3 + $0x2cc] sm:$0xf]  ;;  %v18303_v43 = vor.u32 %v20785_v42, %v18300_v15 }
 0x4f8   : > { %10026 = vmatpush.bf16.msra.mxu2 %v16931_v23  ;;  %v16679_v60 = vor.u32 %v20378_v29, %v16676_v37  ;;  %v17828_v62 = vld [vmem:[%s22017_s3 + $0xbe8] sm:$0xf0]  ;;  %v17986_v29 = vld [vmem:[%s22017_s3 + $0xd08] sm:$0xf] }
 0x4f9   : > { %v20710_v37 = vld [vmem:[%s22017_s3 + $0xd24] sm:$0xf0]  ;;  %v17540_v10 = vld [vmem:[%s22017_s3 + $0x9a8] sm:$0xf0] }
 0x4fa   : > { %10067 = vmatpush.bf16.msrb.mxu1 %v17635_v54  ;;  %v16834_v54 = vld [vmem:[%s22017_s3 + $0x408] sm:$0xf]  ;;  %v20658_v61 = vld [vmem:[%s22017_s3 + $0xb8c] sm:$0xf] }
 0x4fb   : > { %10055 = vmatpush.bf16.msrb.mxu0 %v17347_v58  ;;  %v24269_v0 = vpop.f32.mrf.mxu0  ;;  %v20370_v58 = vld [vmem:[%s22017_s3 + $0x28c] sm:$0xf]  ;;  %v16835_v56 = vor.u32 %v20422_v55, %v16834_v54  ;;  %v16583_v54 = vor.u32 %v20354_v3, %v16580_v32  ;;  %v18271_v55 = vor.u32 %v20777_v46, %v18268_v39  ;;  %v20745_v46 = vld [vmem:[%s22017_s3 + $0xe44] sm:$0xf] }
 0x4fc   : > { %10027 = vmatpush.bf16.msra.mxu2 %v16899_v44  ;;  %v16324_v44 = vld [vmem:[%s22017_s3 + $0x28] sm:$0xf0]  ;;  %v18140_v39 = vld [vmem:[%s22017_s3 + $0xe60] sm:$0xf0] }
 0x4fd   : > { %v6678_v31 = vpop.f32.mrf.mxu3  ;;  %v17508_v47 = vld [vmem:[%s22017_s3 + $0x968] sm:$0xf0] }
 0x4fe   : > { %10068 = vmatpush.bf16.msrb.mxu1 %v17603_v9  ;;  %10056 = vmatmul.bf16.vlgmr.msrb.gmra.mxu0 %v23965_v52  ;;  %v6679_v1 = vadd.f32 %v6678_v31, %v6666_v13  ;;  %v16644_v9 = vld [vmem:[%s22017_s3 + $0x2a8] sm:$0xf0]  ;;  %v18236_v31 = vld [vmem:[%s22017_s3 + $0xf20] sm:$0xf0] }
 0x4ff   : > { %10100 = vmatpush.bf16.msra.mxu0 %v16551_v24  ;;  %v9823_v57 = vpop.f32.mrf.mxu2  ;;  %v20793_v24 = vld [vmem:[%s22017_s3 + $0xfc4] sm:$0xf]  ;;  %v16647_v18 = vor.u32 %v20370_v58, %v16644_v9  ;;  %v17796_v58 = vld [vmem:[%s22017_s3 + $0xba8] sm:$0xf0]  ;;  %v18239_v9 = vor.u32 %v20769_v41, %v18236_v31 }
 0x500   : > { %v24280_v8 = vadd.f32 %v9823_v57, %v24213_v6  ;;  %10028 = vmatpush.bf16.msra.mxu2 %v16867_v50  ;;  %v6689_v7 = vmax.f32 %v6679_v1, 0.0  ;;  %v16327_v50 = vor.u32 %v20290_v12, %v16324_v44  ;;  %v20594_v57 = vld [vmem:[%s22017_s3 + $0x98c] sm:$0xf]  ;;  %v17954_v1 = vld [vmem:[%s22017_s3 + $0xcc8] sm:$0xf]  ;;  %v17923_v12 = vor.u32 %v20694_v51, %v17922_v20 }
 0x501   : > { %10069 = vmatmul.bf16.vlgmr.msrb.gmra.mxu1 %v24005_v22  ;;  %v24311_v59 = vpop.f32.mrf.mxu1  ;;  %v20554_v51 = vld [vmem:[%s22017_s3 + $0x84c] sm:$0xf] }
 0x502   : > { %10113 = vmatpush.bf16.msra.mxu1 %v16807_v5  ;;  %v18332_v5 = vld [vmem:[%s22017_s3 + $0xfe0] sm:$0xf0] }
 0x503   : > { %10101 = vmatpush.bf16.msra.mxu0 %v16519_v34  ;;  %v18335_v6 = vor.u32 %v20793_v24, %v18332_v5  ;;  %v24290_v34 = vpack.c.bf16 %v6689_v7, %v6689_v7  ;;  %v9851_v23 = vpop.f32.mrf.mxu0  ;;  %v17543_v24 = vor.u32 %v20594_v57, %v17540_v10  ;;  %v17799_v5 = vor.u32 %v20658_v61, %v17796_v58  ;;  %v18204_v7 = vld [vmem:[%s22017_s3 + $0xee0] sm:$0xf0]  ;;  %v20562_v10 = vld [vmem:[%s22017_s3 + $0x88c] sm:$0xf] }
 0x504   : > { %10029 = vmatpush.bf16.msra.mxu2 %v16835_v56  ;;  %v20702_v56 = vld [vmem:[%s22017_s3 + $0xce4] sm:$0xf0]  ;;  %v20753_v23 = vld [vmem:[%s22017_s3 + $0xe84] sm:$0xf] }
 0x505   : > { %9887 = vmatmul.bf16.vlgmr.msrb.gmra.mxu3 %v24290_v34  ;;  %v17955_v48 = vor.u32 %v20702_v56, %v17954_v1  ;;  %v20737_v57 = vld [vmem:[%s22017_s3 + $0xe04] sm:$0xf]  ;;  %v17412_v56 = vld [vmem:[%s22017_s3 + $0x8a8] sm:$0xf0] }
 0x506   : > { %10114 = vmatpush.bf16.msra.mxu1 %v16775_v45  ;;  %v16612_v45 = vld [vmem:[%s22017_s3 + $0x268] sm:$0xf0]  ;;  %9983 = vmatpush.bf16.msrb.mxu3 %v18335_v6  ;;  %v17415_v20 = vor.u32 %v20562_v10, %v17412_v56  ;;  %v20343_v10 = vld [vmem:[%s22017_s3 + $0x1ac] sm:$0xf0] }
 0x507   : > { %10102 = vmatpush.bf16.msra.mxu0 %v16487_v27  ;;  %v6680_v27 = vpop.f32.mrf.mxu3  ;;  %v16615_v30 = vor.u32 %v20362_v17, %v16612_v45  ;;  %10030 = vmatmul.bf16.vlgmr.msra.gmra.mxu2 %v23952_v28  ;;  %v17764_v6 = vld [vmem:[%s22017_s3 + $0xb68] sm:$0xf0] }
 0x508   : > { %10074 = vmatpush.bf16.msrb.mxu2 %v18083_v4  ;;  %v20761_v4 = vld [vmem:[%s22017_s3 + $0xec4] sm:$0xf]  ;;  %v17732_v27 = vld [vmem:[%s22017_s3 + $0xb28] sm:$0xf0] }
 0x509   : > { %v18207_v17 = vor.u32 %v20761_v4, %v18204_v7  ;;  %v9864_v15 = vpop.f32.mrf.mxu1  ;;  %v17314_v4 = vld [vmem:[%s22017_s3 + $0x7c8] sm:$0xf]  ;;  %v20442_v56 = vld [vmem:[%s22017_s3 + $0x4cc] sm:$0xf] }
 0x50a   : > { %10115 = vmatpush.bf16.msra.mxu1 %v16743_v35  ;;  %v9825_v35 = vpop.f32.mrf.mxu2  ;;  %9984 = vmatpush.bf16.msrb.mxu3 %v18303_v43  ;;  %v7213_v43 = vperm.slane %v24182_v49, 1  ;;  %v20542_v7 = vld [vmem:[%s22017_s3 + $0x7e4] sm:$0xf0]  ;;  %v17636_v15 = vld [vmem:[%s22017_s3 + $0xa68] sm:$0xf0] }
 0x50b   : > { %10103 = vmatpush.bf16.msra.mxu0 %v16455_v63  ;;  %v18019_v63 = vor.u32 %v20718_v26, %v18018_v21  ;;  %v17476_v21 = vld [vmem:[%s22017_s3 + $0x928] sm:$0xf0]  ;;  %v17890_v35 = vld [vmem:[%s22017_s3 + $0xc48] sm:$0xf] }
 0x50c   : > { %10075 = vmatpush.bf16.msrb.mxu2 %v18051_v25  ;;  %v18172_v25 = vld [vmem:[%s22017_s3 + $0xea0] sm:$0xf0]  ;;  %v20642_v26 = vld [vmem:[%s22017_s3 + $0xb0c] sm:$0xf] }
 0x50d   : > { %v18175_v44 = vor.u32 %v20753_v23, %v18172_v25  ;;  %v17735_v32 = vor.u32 %v20642_v26, %v17732_v27  ;;  %v17282_v25 = vld [vmem:[%s22017_s3 + $0x788] sm:$0xf]  ;;  %v16996_v26 = vld [vmem:[%s22017_s3 + $0x568] sm:$0xf0] }
 0x50e   : > { %10116 = vmatpush.bf16.msra.mxu1 %v16711_v33  ;;  %v17572_v33 = vld [vmem:[%s22017_s3 + $0x9e8] sm:$0xf0]  ;;  %9985 = vmatpush.bf16.msrb.mxu3 %v18271_v55 }
 0x50f   : > { %10104 = vmatpush.bf16.msra.mxu0 %v16423_v2  ;;  %v17575_v13 = vor.u32 %v20602_v53, %v17572_v33  ;;  %v17831_v2 = vor.u32 %v20666_v40, %v17828_v62  ;;  %v20570_v53 = vld [vmem:[%s22017_s3 + $0x8cc] sm:$0xf] }
 0x510   : > { %10076 = vmatpush.bf16.msrb.mxu2 %v18019_v63  ;;  %v17444_v33 = vld [vmem:[%s22017_s3 + $0x8e8] sm:$0xf0] }
 0x511   : > { %v20634_v40 = vld [vmem:[%s22017_s3 + $0xacc] sm:$0xf] }
 0x512   : > { %10117 = vmatpush.bf16.msra.mxu1 %v16679_v60  ;;  %v17987_v60 = vor.u32 %v20710_v37, %v17986_v29  ;;  %9986 = vmatpush.bf16.msrb.mxu3 %v18239_v9  ;;  %v17700_v62 = vld [vmem:[%s22017_s3 + $0xae8] sm:$0xf0]  ;;  %v20678_v29 = vld [vmem:[%s22017_s3 + $0xc24] sm:$0xf0] }
 0x513   : > { %10105 = vmatpush.bf16.msra.mxu0 %v16391_v11  ;;  %v20586_v11 = vld [vmem:[%s22017_s3 + $0x94c] sm:$0xf]  ;;  %v17703_v41 = vor.u32 %v20634_v40, %v17700_v62  ;;  %v20351_v40 = vld [vmem:[%s22017_s3 + $0x1ec] sm:$0xf0] }
 0x514   : > { %10077 = vmatpush.bf16.msrb.mxu2 %v17987_v60  ;;  %v17511_v45 = vor.u32 %v20586_v11, %v17508_v47  ;;  %v20474_v55 = vld [vmem:[%s22017_s3 + $0x5cc] sm:$0xf]  ;;  %v18108_v60 = vld [vmem:[%s22017_s3 + $0xe20] sm:$0xf0]  ;;  %v16810_v62 = vld [vmem:[%s22017_s3 + $0x3d0] sm:$0xf] }
 0x515   : > { %9939 = vmatmul.bf16.vlgmr.msra.gmra.mxu3 %v24033_v38  ;;  %v20626_v9 = vld [vmem:[%s22017_s3 + $0xa8c] sm:$0xf] }
 0x516   : > { %10118 = vmatpush.bf16.msra.mxu1 %v16647_v18  ;;  %v20650_v18 = vld [vmem:[%s22017_s3 + $0xb4c] sm:$0xf]  ;;  %9987 = vmatpush.bf16.msrb.mxu3 %v18207_v17  ;;  %v17315_v17 = vor.u32 %v20542_v7, %v17314_v4  ;;  %v17186_v4 = vld [vmem:[%s22017_s3 + $0x6c8] sm:$0xf] }
 0x517   : > { %10106 = vmatpush.bf16.msra.mxu0 %v16359_v14  ;;  %v17767_v42 = vor.u32 %v20650_v18, %v17764_v6  ;;  %v20578_v14 = vld [vmem:[%s22017_s3 + $0x90c] sm:$0xf]  ;;  %v20510_v7 = vld [vmem:[%s22017_s3 + $0x6e4] sm:$0xf0] }
 0x518   : > { %10078 = vmatpush.bf16.msrb.mxu2 %v17955_v48  ;;  %v17479_v3 = vor.u32 %v20578_v14, %v17476_v21  ;;  %v18111_v48 = vor.u32 %v20737_v57, %v18108_v60  ;;  %v20466_v47 = vld [vmem:[%s22017_s3 + $0x58c] sm:$0xf]  ;;  %v20534_v14 = vld [vmem:[%s22017_s3 + $0x7a4] sm:$0xf0]  ;;  %v16522_v60 = vld [vmem:[%s22017_s3 + $0x190] sm:$0xf] }
 0x519   : > { %v17028_v18 = vld [vmem:[%s22017_s3 + $0x5a8] sm:$0xf0] }
 0x51a   : > { %10119 = vmatpush.bf16.msra.mxu1 %v16615_v30  ;;  %v20686_v30 = vld [vmem:[%s22017_s3 + $0xc64] sm:$0xf0]  ;;  %9988 = vmatpush.bf16.msrb.mxu3 %v18175_v44  ;;  %v20458_v21 = vld [vmem:[%s22017_s3 + $0x54c] sm:$0xf] }
 0x51b   : > { %10107 = vmatpush.bf16.msra.mxu0 %v16327_v50  ;;  %v17891_v63 = vor.u32 %v20686_v30, %v17890_v35  ;;  %v9901_v49 = vpop.f32.mrf.mxu0  ;;  %v17858_v50 = vld [vmem:[%s22017_s3 + $0xc08] sm:$0xf]  ;;  %v17348_v44 = vld [vmem:[%s22017_s3 + $0x828] sm:$0xf0] }
 0x51c   : > { %10079 = vmatpush.bf16.msrb.mxu2 %v17923_v12  ;;  %v9902_v37 = vadd.f32 %v9901_v49, %v7213_v43  ;;  %v17859_v1 = vor.u32 %v20678_v29, %v17858_v50  ;;  %v20546_v43 = vld [vmem:[%s22017_s3 + $0x80c] sm:$0xf]  ;;  %v20415_v49 = vld [vmem:[%s22017_s3 + $0x3ec] sm:$0xf0] }
 0x51d   : > { %v9836_v61 = vpop.f32.mrf.mxu3  ;;  %v20450_v50 = vld [vmem:[%s22017_s3 + $0x50c] sm:$0xf] }
 0x51e   : > { %10120 = vmatpush.bf16.msra.mxu1 %v16583_v54  ;;  %10108 = vmatmul.bf16.vlgmr.msra.gmra.mxu0 %v23875_v19  ;;  %v18143_v54 = vor.u32 %v20745_v46, %v18140_v39  ;;  %v9914_v31 = vpop.f32.mrf.mxu1  ;;  %v17604_v46 = vld [vmem:[%s22017_s3 + $0xa28] sm:$0xf0]  ;;  %v17250_v39 = vld [vmem:[%s22017_s3 + $0x748] sm:$0xf] }
 0x51f   : > { %10152 = vmatpush.bf16.msrb.mxu0 %v17575_v13  ;;  %v17060_v13 = vld [vmem:[%s22017_s3 + $0x5e8] sm:$0xf0]  ;;  %v24354_v58 = vadd.f32 %v9914_v31, %v9902_v37  ;;  %v17351_v37 = vor.u32 %v20546_v43, %v17348_v44  ;;  %v16811_v31 = vor.u32 %v20415_v49, %v16810_v62  ;;  %v17122_v44 = vld [vmem:[%s22017_s3 + $0x648] sm:$0xf] }
 0x520   : > { %10080 = vmatpush.bf16.msrb.mxu2 %v17891_v63  ;;  %v17063_v11 = vor.u32 %v20474_v55, %v17060_v13  ;;  %9989 = vmatpush.bf16.msrb.mxu3 %v18143_v54  ;;  %v16999_v63 = vor.u32 %v20458_v21, %v16996_v26  ;;  %v16964_v29 = vld [vmem:[%s22017_s3 + $0x528] sm:$0xf0]  ;;  %v16714_v21 = vld [vmem:[%s22017_s3 + $0x310] sm:$0xf] }
 0x521   : > { %10121 = vmatmul.bf16.vlgmr.msra.gmra.mxu1 %v23877_v36  ;;  %v16967_v57 = vor.u32 %v20450_v50, %v16964_v29  ;;  %v20391_v26 = vld [vmem:[%s22017_s3 + $0x32c] sm:$0xf0]  ;;  %v16836_v62 = vld [vmem:[%s22017_s3 + $0x428] sm:$0xf0] }
 0x522   : > { %10165 = vmatpush.bf16.msrb.mxu1 %v17831_v2  ;;  %v17447_v2 = vor.u32 %v20570_v53, %v17444_v33  ;;  %v20526_v53 = vld [vmem:[%s22017_s3 + $0x764] sm:$0xf0]  ;;  %v16554_v33 = vld [vmem:[%s22017_s3 + $0x1d0] sm:$0xf]  ;;  %v20730_v50 = vld [vmem:[%s22017_s3 + $0xdcc] sm:$0xf] }
 0x523   : > { %10153 = vmatpush.bf16.msrb.mxu0 %v17543_v24  ;;  %v17668_v24 = vld [vmem:[%s22017_s3 + $0xaa8] sm:$0xf0]  ;;  %v9903_v23 = vpop.f32.mrf.mxu0  ;;  %v17251_v55 = vor.u32 %v20526_v53, %v17250_v39  ;;  %v16555_v13 = vor.u32 %v20351_v40, %v16554_v33  ;;  %v20319_v39 = vld [vmem:[%s22017_s3 + $0xec] sm:$0xf0] }
 0x524   : > { %10081 = vmatpush.bf16.msrb.mxu2 %v17859_v1  ;;  %9990 = vmatpush.bf16.msrb.mxu3 %v18111_v48  ;;  %v20407_v1 = vld [vmem:[%s22017_s3 + $0x3ac] sm:$0xf0]  ;;  %v20418_v40 = vld [vmem:[%s22017_s3 + $0x40c] sm:$0xf] }
 0x525   : > { %v16682_v53 = vld [vmem:[%s22017_s3 + $0x2d0] sm:$0xf]  ;;  %v18084_v29 = vld [vmem:[%s22017_s3 + $0xde8] sm:$0xf0] }
 0x526   : > { %10166 = vmatpush.bf16.msrb.mxu1 %v17799_v5  ;;  %v9837_v5 = vadd.f32 %v9836_v61, %v24280_v8  ;;  %v17671_v8 = vor.u32 %v20626_v9, %v17668_v24  ;;  %v9916_v30 = vpop.f32.mrf.mxu1  ;;  %v16778_v61 = vld [vmem:[%s22017_s3 + $0x390] sm:$0xf]  ;;  %v16932_v9 = vld [vmem:[%s22017_s3 + $0x4e8] sm:$0xf0] }
 0x527   : > { %10154 = vmatpush.bf16.msrb.mxu0 %v17511_v45  ;;  %v17380_v45 = vld [vmem:[%s22017_s3 + $0x868] sm:$0xf0]  ;;  %10082 = vmatmul.bf16.vlgmr.msrb.gmra.mxu2 %v24141_v16  ;;  %v16935_v48 = vor.u32 %v20442_v56, %v16932_v9  ;;  %v20383_v33 = vld [vmem:[%s22017_s3 + $0x2ec] sm:$0xf0]  ;;  %v18087_v56 = vor.u32 %v20730_v50, %v18084_v29  ;;  %v18242_v29 = vld [vmem:[%s22017_s3 + $0xf08] sm:$0xf] }
 0x528   : > { %v9850_v6 = vadd.f32 %v24269_v0, %v9837_v5  ;;  %10126 = vmatpush.bf16.msra.mxu2 %v17063_v11  ;;  %v17031_v0 = vor.u32 %v20466_v47, %v17028_v18  ;;  %v17383_v27 = vor.u32 %v20554_v51, %v17380_v45  ;;  %10035 = vmatpush.bf16.msra.mxu3 %v17315_v17  ;;  %v16490_v47 = vld [vmem:[%s22017_s3 + $0x150] sm:$0xf]  ;;  %v16900_v51 = vld [vmem:[%s22017_s3 + $0x4a8] sm:$0xf0] }
 0x529   : > { %9991 = vmatmul.bf16.vlgmr.msrb.gmra.mxu3 %v24290_v34  ;;  %v16523_v5 = vor.u32 %v20343_v10, %v16522_v60  ;;  %v16779_v11 = vor.u32 %v20407_v1, %v16778_v61  ;;  %v20335_v18 = vld [vmem:[%s22017_s3 + $0x16c] sm:$0xf0]  ;;  %v17187_v17 = vor.u32 %v20510_v7, %v17186_v4  ;;  %v18338_v61 = vld [vmem:[%s22017_s3 + $0xfc8] sm:$0xf]  ;;  %v18052_v4 = vld [vmem:[%s22017_s3 + $0xda8] sm:$0xf0] }
 0x52a   : > { %10167 = vmatpush.bf16.msrb.mxu1 %v17767_v42  ;;  %v20618_v42 = vld [vmem:[%s22017_s3 + $0xa4c] sm:$0xf]  ;;  %v24372_v12 = vadd.f32 %v24311_v59, %v9850_v6  ;;  %v16746_v6 = vld [vmem:[%s22017_s3 + $0x350] sm:$0xf]  ;;  %v16491_v45 = vor.u32 %v20335_v18, %v16490_v47  ;;  %v20798_v1 = vld [vmem:[%s22017_s3 + $0xfe4] sm:$0xf0] }
 0x52b   : > { %10155 = vmatpush.bf16.msrb.mxu0 %v17479_v3  ;;  %v17639_v35 = vor.u32 %v20618_v42, %v17636_v15  ;;  %v20610_v59 = vld [vmem:[%s22017_s3 + $0xa0c] sm:$0xf]  ;;  %v9838_v3 = vpop.f32.mrf.mxu3  ;;  %v17154_v42 = vld [vmem:[%s22017_s3 + $0x688] sm:$0xf]  ;;  %v16650_v60 = vld [vmem:[%s22017_s3 + $0x290] sm:$0xf] }
 0x52c   : > { %10127 = vmatpush.bf16.msra.mxu2 %v17031_v0  ;;  %v17607_v54 = vor.u32 %v20610_v59, %v17604_v46  ;;  %v20502_v15 = vld [vmem:[%s22017_s3 + $0x6a4] sm:$0xf0]  ;;  %v20327_v0 = vld [vmem:[%s22017_s3 + $0x12c] sm:$0xf0]  ;;  %v16715_v3 = vor.u32 %v20391_v26, %v16714_v21 }
 0x52d   : > { %v17155_v30 = vor.u32 %v20502_v15, %v17154_v42  ;;  %v20494_v59 = vld [vmem:[%s22017_s3 + $0x664] sm:$0xf0]  ;;  %v16426_v46 = vld [vmem:[%s22017_s3 + $0xd0] sm:$0xf] }
 0x52e   : > { %10168 = vmatpush.bf16.msrb.mxu1 %v17735_v32  ;;  %v17283_v32 = vor.u32 %v20534_v14, %v17282_v25  ;;  %v16458_v14 = vld [vmem:[%s22017_s3 + $0x110] sm:$0xf] }
 0x52f   : > { %10156 = vmatpush.bf16.msrb.mxu0 %v17447_v2  ;;  %v17218_v2 = vld [vmem:[%s22017_s3 + $0x708] sm:$0xf]  ;;  %v16459_v43 = vor.u32 %v20327_v0, %v16458_v14  ;;  %v20375_v10 = vld [vmem:[%s22017_s3 + $0x2ac] sm:$0xf0] }
 0x530   : > { %10036 = vmatpush.bf16.msra.mxu3 %v17283_v32  ;;  %10128 = vmatpush.bf16.msra.mxu2 %v16999_v63  ;;  %v16651_v7 = vor.u32 %v20375_v10, %v16650_v60  ;;  %v20303_v47 = vld [vmem:[%s22017_s3 + $0x6c] sm:$0xf0] }
 0x531   : > { %v16618_v18 = vld [vmem:[%s22017_s3 + $0x250] sm:$0xf] }
 0x532   : > { %10169 = vmatpush.bf16.msrb.mxu1 %v17703_v41  ;;  %v20518_v41 = vld [vmem:[%s22017_s3 + $0x724] sm:$0xf0]  ;;  %v16330_v15 = vld [vmem:[%s22017_s3 + $0x10] sm:$0xf] }
 0x533   : > { %10157 = vmatpush.bf16.msrb.mxu0 %v17415_v20  ;;  %v17219_v24 = vor.u32 %v20518_v41, %v17218_v2  ;;  %v20399_v20 = vld [vmem:[%s22017_s3 + $0x36c] sm:$0xf0]  ;;  %v16683_v2 = vor.u32 %v20383_v33, %v16682_v53  ;;  %v16839_v41 = vor.u32 %v20418_v40, %v16836_v62  ;;  %v17988_v53 = vld [vmem:[%s22017_s3 + $0xd28] sm:$0xf0] }
 0x534   : > { %10037 = vmatpush.bf16.msra.mxu3 %v17251_v55  ;;  %10129 = vmatpush.bf16.msra.mxu2 %v16967_v57  ;;  %v16747_v23 = vor.u32 %v20399_v20, %v16746_v6  ;;  %v17090_v55 = vld [vmem:[%s22017_s3 + $0x608] sm:$0xf]  ;;  %v20311_v57 = vld [vmem:[%s22017_s3 + $0xac] sm:$0xf0] }
 0x535   : > { %v20367_v20 = vld [vmem:[%s22017_s3 + $0x26c] sm:$0xf0] }
 0x536   : > { %10170 = vmatpush.bf16.msrb.mxu1 %v17671_v8  ;;  %v20434_v8 = vld [vmem:[%s22017_s3 + $0x48c] sm:$0xf]  ;;  %v16619_v14 = vor.u32 %v20367_v20, %v16618_v18  ;;  %v20295_v21 = vld [vmem:[%s22017_s3 + $0x2c] sm:$0xf0] }
 0x537   : > { %10158 = vmatpush.bf16.msrb.mxu0 %v17383_v27  ;;  %v16903_v25 = vor.u32 %v20434_v8, %v16900_v51  ;;  %v20426_v27 = vld [vmem:[%s22017_s3 + $0x44c] sm:$0xf]  ;;  %v18306_v8 = vld [vmem:[%s22017_s3 + $0xf88] sm:$0xf]  ;;  %v16586_v26 = vld [vmem:[%s22017_s3 + $0x210] sm:$0xf] }
 0x538   : > { %10038 = vmatpush.bf16.msra.mxu3 %v17219_v24  ;;  %10130 = vmatpush.bf16.msra.mxu2 %v16935_v48  ;;  %v16362_v48 = vld [vmem:[%s22017_s3 + $0x50] sm:$0xf]  ;;  %v20790_v51 = vld [vmem:[%s22017_s3 + $0xfa4] sm:$0xf0] }
 0x539   : > { %v16363_v42 = vor.u32 %v20303_v47, %v16362_v48  ;;  %v18307_v0 = vor.u32 %v20790_v51, %v18306_v8  ;;  %v20690_v48 = vld [vmem:[%s22017_s3 + $0xc8c] sm:$0xf]  ;;  %v18178_v51 = vld [vmem:[%s22017_s3 + $0xe88] sm:$0xf] }
 0x53a   : > { %10171 = vmatpush.bf16.msrb.mxu1 %v17639_v35  ;;  %v16868_v35 = vld [vmem:[%s22017_s3 + $0x468] sm:$0xf0] }
 0x53b   : > { %10159 = vmatpush.bf16.msrb.mxu0 %v17351_v37  ;;  %v16871_v32 = vor.u32 %v20426_v27, %v16868_v35  ;;  %v24421_v63 = vpop.f32.mrf.mxu0  ;;  %v17123_v37 = vor.u32 %v20494_v59, %v17122_v44  ;;  %v20359_v27 = vld [vmem:[%s22017_s3 + $0x22c] sm:$0xf0]  ;;  %v18274_v35 = vld [vmem:[%s22017_s3 + $0xf48] sm:$0xf]  ;;  %v17924_v47 = vld [vmem:[%s22017_s3 + $0xca8] sm:$0xf0] }
 0x53c   : > { %10039 = vmatpush.bf16.msra.mxu3 %v17187_v17  ;;  %10131 = vmatpush.bf16.msra.mxu2 %v16903_v25  ;;  %v18020_v25 = vld [vmem:[%s22017_s3 + $0xd68] sm:$0xf0]  ;;  %v20607_v59 = vld [vmem:[%s22017_s3 + $0x9ec] sm:$0xf0]  ;;  %v16587_v33 = vor.u32 %v20359_v27, %v16586_v26 }
 0x53e   : > { %10172 = vmatpush.bf16.msrb.mxu1 %v17607_v54  ;;  %10160 = vmatmul.bf16.vlgmr.msrb.gmra.mxu0 %v23965_v52  ;;  %v24426_v49 = vpop.f32.mrf.mxu1  ;;  %v16427_v54 = vor.u32 %v20319_v39, %v16426_v46  ;;  %v16331_v46 = vor.u32 %v20295_v21, %v16330_v15  ;;  %v20706_v39 = vld [vmem:[%s22017_s3 + $0xd0c] sm:$0xf]  ;;  %v20583_v15 = vld [vmem:[%s22017_s3 + $0x92c] sm:$0xf0] }
 0x53f   : > { %10204 = vmatpush.bf16.msra.mxu0 %v16555_v13  ;;  %v20486_v13 = vld [vmem:[%s22017_s3 + $0x624] sm:$0xf0]  ;;  %v17892_v21 = vld [vmem:[%s22017_s3 + $0xc68] sm:$0xf0] }
 0x540   : > { %10040 = vmatpush.bf16.msra.mxu3 %v17155_v30  ;;  %10132 = vmatpush.bf16.msra.mxu2 %v16871_v32  ;;  %v17091_v9 = vor.u32 %v20486_v13, %v17090_v55  ;;  %v20782_v30 = vld [vmem:[%s22017_s3 + $0xf64] sm:$0xf0]  ;;  %v20671_v32 = vld [vmem:[%s22017_s3 + $0xbec] sm:$0xf0]  ;;  %v17991_v55 = vor.u32 %v20706_v39, %v17988_v53 }
 0x541   : > { %10173 = vmatmul.bf16.vlgmr.msrb.gmra.mxu1 %v24005_v22  ;;  %v18275_v40 = vor.u32 %v20782_v30, %v18274_v35  ;;  %v20599_v13 = vld [vmem:[%s22017_s3 + $0x9ac] sm:$0xf0]  ;;  %v18146_v30 = vld [vmem:[%s22017_s3 + $0xe48] sm:$0xf] }
 0x542   : > { %10217 = vmatpush.bf16.msra.mxu1 %v16811_v31  ;;  %v16394_v31 = vld [vmem:[%s22017_s3 + $0x90] sm:$0xf] }
 0x543   : > { %10205 = vmatpush.bf16.msra.mxu0 %v16523_v5  ;;  %v16395_v24 = vor.u32 %v20311_v57, %v16394_v31  ;;  %v20722_v5 = vld [vmem:[%s22017_s3 + $0xd8c] sm:$0xf]  ;;  %v9955_v6 = vpop.f32.mrf.mxu0  ;;  %v20639_v39 = vld [vmem:[%s22017_s3 + $0xaec] sm:$0xf0] }
 0x544   : > { %10041 = vmatpush.bf16.msra.mxu3 %v17123_v37  ;;  %10133 = vmatpush.bf16.msra.mxu2 %v16839_v41  ;;  %v20774_v37 = vld [vmem:[%s22017_s3 + $0xf24] sm:$0xf0]  ;;  %v20663_v41 = vld [vmem:[%s22017_s3 + $0xbac] sm:$0xf0]  ;;  %v20698_v31 = vld [vmem:[%s22017_s3 + $0xccc] sm:$0xf] }
 0x545   : > { %v17956_v57 = vld [vmem:[%s22017_s3 + $0xce8] sm:$0xf0]  ;;  %v18243_v60 = vor.u32 %v20774_v37, %v18242_v29  ;;  %v17066_v37 = vld [vmem:[%s22017_s3 + $0x5d0] sm:$0xf] }
 0x546   : > { %10218 = vmatpush.bf16.msra.mxu1 %v16779_v11  ;;  %v18339_v11 = vor.u32 %v20798_v1, %v18338_v61  ;;  %v9968_v17 = vpop.f32.mrf.mxu1  ;;  %v18210_v1 = vld [vmem:[%s22017_s3 + $0xec8] sm:$0xf] }
 0x547   : > { %10206 = vmatpush.bf16.msra.mxu0 %v16491_v45  ;;  %v18055_v45 = vor.u32 %v20722_v5, %v18052_v4  ;;  %10134 = vmatmul.bf16.vlgmr.msra.gmra.mxu2 %v23952_v28  ;;  %v20591_v5 = vld [vmem:[%s22017_s3 + $0x96c] sm:$0xf0]  ;;  %v20758_v17 = vld [vmem:[%s22017_s3 + $0xea4] sm:$0xf0] }
 0x548   : > { %10178 = vmatpush.bf16.msrb.mxu2 %v18087_v56  ;;  %10042 = vmatpush.bf16.msra.mxu3 %v17091_v9  ;;  %v20766_v56 = vld [vmem:[%s22017_s3 + $0xee4] sm:$0xf0]  ;;  %v17514_v9 = vld [vmem:[%s22017_s3 + $0x950] sm:$0xf]  ;;  %v18179_v26 = vor.u32 %v20758_v17, %v18178_v51 }
 0x549   : > { %v17770_v4 = vld [vmem:[%s22017_s3 + $0xb50] sm:$0xf]  ;;  %v18211_v6 = vor.u32 %v20766_v56, %v18210_v1  ;;  %v17515_v20 = vor.u32 %v20591_v5, %v17514_v9  ;;  %v20538_v56 = vld [vmem:[%s22017_s3 + $0x7cc] sm:$0xf] }
 0x54a   : > { %10219 = vmatpush.bf16.msra.mxu1 %v16747_v23  ;;  %v20714_v23 = vld [vmem:[%s22017_s3 + $0xd4c] sm:$0xf]  ;;  %v20631_v1 = vld [vmem:[%s22017_s3 + $0xaac] sm:$0xf0] }
 0x54b   : > { %10207 = vmatpush.bf16.msra.mxu0 %v16459_v43  ;;  %v17578_v43 = vld [vmem:[%s22017_s3 + $0x9d0] sm:$0xf]  ;;  %10043 = vmatmul.bf16.vlgmr.msra.gmra.mxu3 %v24033_v38  ;;  %v18023_v44 = vor.u32 %v20714_v23, %v18020_v25  ;;  %v17316_v9 = vld [vmem:[%s22017_s3 + $0x7e8] sm:$0xf0] }
 0x54c   : > { %10087 = vmatpush.bf16.msrb.mxu3 %v18339_v11  ;;  %10179 = vmatpush.bf16.msrb.mxu2 %v18055_v45  ;;  %v17579_v62 = vor.u32 %v20607_v59, %v17578_v43  ;;  %v9875_v11 = vpop.f32.mrf.mxu2  ;;  %v17482_v45 = vld [vmem:[%s22017_s3 + $0x910] sm:$0xf]  ;;  %v20750_v43 = vld [vmem:[%s22017_s3 + $0xe64] sm:$0xf0] }
 0x54d   : > { %v24481_v18 = vadd.f32 %v9875_v11, %v24372_v12  ;;  %v17738_v23 = vld [vmem:[%s22017_s3 + $0xb10] sm:$0xf]  ;;  %v24490_v12 = vld [vmem:[%s22024_s12] sm:$0xff]  ;;  %v17483_v27 = vor.u32 %v20583_v15, %v17482_v45  ;;  %v18147_v29 = vor.u32 %v20750_v43, %v18146_v30 }
 0x54e   : > { %10220 = vmatpush.bf16.msra.mxu1 %v16715_v3  ;;  %v17834_v3 = vld [vmem:[%s22017_s3 + $0xbd0] sm:$0xf]  ;;  %v20530_v15 = vld [vmem:[%s22017_s3 + $0x78c] sm:$0xf] }
 0x54f   : > { %10208 = vmatpush.bf16.msra.mxu0 %v16427_v54  ;;  %v17835_v50 = vor.u32 %v20671_v32, %v17834_v3  ;;  %v17546_v54 = vld [vmem:[%s22017_s3 + $0x990] sm:$0xf] }
 0x550   : > { %10088 = vmatpush.bf16.msrb.mxu3 %v18307_v0  ;;  %10180 = vmatpush.bf16.msrb.mxu2 %v18023_v44  ;;  %v17547_v10 = vor.u32 %v20599_v13, %v17546_v54  ;;  %v20647_v25 = vld [vmem:[%s22017_s3 + $0xb2c] sm:$0xf0]  ;;  %v20682_v0 = vld [vmem:[%s22017_s3 + $0xc4c] sm:$0xf] }
 0x551   : > { %v17739_v35 = vor.u32 %v20647_v25, %v17738_v23  ;;  %v17450_v44 = vld [vmem:[%s22017_s3 + $0x8d0] sm:$0xf]  ;;  %v17895_v3 = vor.u32 %v20682_v0, %v17892_v21  ;;  %v17284_v23 = vld [vmem:[%s22017_s3 + $0x7a8] sm:$0xf0] }
 0x552   : > { %10221 = vmatpush.bf16.msra.mxu1 %v16683_v2  ;;  %v17802_v2 = vld [vmem:[%s22017_s3 + $0xb90] sm:$0xf] }
 0x553   : > { %10209 = vmatpush.bf16.msra.mxu0 %v16395_v24  ;;  %v17803_v61 = vor.u32 %v20663_v41, %v17802_v2  ;;  %v17959_v24 = vor.u32 %v20698_v31, %v17956_v57  ;;  %v20575_v32 = vld [vmem:[%s22017_s3 + $0x8ec] sm:$0xf0]  ;;  %v18114_v41 = vld [vmem:[%s22017_s3 + $0xe08] sm:$0xf] }
 0x554   : > { %10089 = vmatpush.bf16.msrb.mxu3 %v18275_v40  ;;  %10181 = vmatpush.bf16.msrb.mxu2 %v17991_v55  ;;  %v9877_v40 = vpop.f32.mrf.mxu2  ;;  %v20479_v54 = vld [vmem:[%s22017_s3 + $0x5ec] sm:$0xf0]  ;;  %v17451_v13 = vor.u32 %v20575_v32, %v17450_v44  ;;  %v20742_v31 = vld [vmem:[%s22017_s3 + $0xe24] sm:$0xf0] }
 0x555   : > { %v17418_v57 = vld [vmem:[%s22017_s3 + $0x890] sm:$0xf]  ;;  %v18115_v5 = vor.u32 %v20742_v31, %v18114_v41 }
 0x556   : > { %10222 = vmatpush.bf16.msra.mxu1 %v16651_v7  ;;  %v20655_v7 = vld [vmem:[%s22017_s3 + $0xb6c] sm:$0xf0] }
 0x557   : > { %10210 = vmatpush.bf16.msra.mxu0 %v16363_v42  ;;  %v17771_v8 = vor.u32 %v20655_v7, %v17770_v4  ;;  %v17927_v42 = vor.u32 %v20690_v48, %v17924_v47  ;;  %v17034_v4 = vld [vmem:[%s22017_s3 + $0x590] sm:$0xf] }
 0x558   : > { %10090 = vmatpush.bf16.msrb.mxu3 %v18243_v60  ;;  %10182 = vmatpush.bf16.msrb.mxu2 %v17959_v24  ;;  %v17067_v24 = vor.u32 %v20479_v54, %v17066_v37  ;;  %v20471_v7 = vld [vmem:[%s22017_s3 + $0x5ac] sm:$0xf0] }
 0x559   : > { %v17386_v47 = vld [vmem:[%s22017_s3 + $0x850] sm:$0xf]  ;;  %v17035_v25 = vor.u32 %v20471_v7, %v17034_v4  ;;  %v20506_v4 = vld [vmem:[%s22017_s3 + $0x6cc] sm:$0xf] }
 0x55a   : > { %10223 = vmatpush.bf16.msra.mxu1 %v16619_v14  ;;  %v7214_v14 = vperm.slane %v24490_v12, 2  ;;  %v17642_v51 = vld [vmem:[%s22017_s3 + $0xa50] sm:$0xf]  ;;  %v17188_v7 = vld [vmem:[%s22017_s3 + $0x6e8] sm:$0xf0] }
 0x55b   : > { %10211 = vmatpush.bf16.msra.mxu0 %v16331_v46  ;;  %v10005_v59 = vpop.f32.mrf.mxu0  ;;  %v17706_v46 = vld [vmem:[%s22017_s3 + $0xad0] sm:$0xf] }
 0x55c   : > { %10091 = vmatpush.bf16.msrb.mxu3 %v18211_v6  ;;  %10183 = vmatpush.bf16.msrb.mxu2 %v17927_v42  ;;  %v10006_v53 = vadd.f32 %v10005_v59, %v7214_v14  ;;  %v17707_v2 = vor.u32 %v20639_v39, %v17706_v46  ;;  %v20623_v17 = vld [vmem:[%s22017_s3 + $0xa6c] sm:$0xf0]  ;;  %v9927_v42 = vpop.f32.mrf.mxu2  ;;  %v20522_v59 = vld [vmem:[%s22017_s3 + $0x74c] sm:$0xf]  ;;  %v20347_v46 = vld [vmem:[%s22017_s3 + $0x1d4] sm:$0xf] }
 0x55d   : > { %v24524_v14 = vadd.f32 %v9927_v42, %v24354_v58  ;;  %v17002_v0 = vld [vmem:[%s22017_s3 + $0x550] sm:$0xf]  ;;  %v17287_v58 = vor.u32 %v20530_v15, %v17284_v23  ;;  %v16556_v39 = vld [vmem:[%s22017_s3 + $0x1f0] sm:$0xf0]  ;;  %v20498_v15 = vld [vmem:[%s22017_s3 + $0x68c] sm:$0xf] }
 0x55e   : > { %10224 = vmatpush.bf16.msra.mxu1 %v16587_v33  ;;  %10212 = vmatmul.bf16.vlgmr.msra.gmra.mxu0 %v23875_v19  ;;  %v10018_v33 = vpop.f32.mrf.mxu1  ;;  %v20463_v21 = vld [vmem:[%s22017_s3 + $0x56c] sm:$0xf0]  ;;  %v16559_v54 = vor.u32 %v20347_v46, %v16556_v39  ;;  %v17156_v23 = vld [vmem:[%s22017_s3 + $0x6a8] sm:$0xf0] }
 0x55f   : > { %10256 = vmatpush.bf16.msrb.mxu0 %v17579_v62  ;;  %v20674_v62 = vld [vmem:[%s22017_s3 + $0xc0c] sm:$0xf]  ;;  %v24505_v55 = vadd.f32 %v10018_v33, %v10006_v53  ;;  %v20551_v30 = vld [vmem:[%s22017_s3 + $0x82c] sm:$0xf0]  ;;  %v17003_v32 = vor.u32 %v20463_v21, %v17002_v0  ;;  %v20411_v53 = vld [vmem:[%s22017_s3 + $0x3d4] sm:$0xf] }
 0x560   : > { %10092 = vmatpush.bf16.msrb.mxu3 %v18179_v26  ;;  %10184 = vmatpush.bf16.msrb.mxu2 %v17895_v3  ;;  %v17610_v43 = vld [vmem:[%s22017_s3 + $0xa10] sm:$0xf]  ;;  %v17252_v3 = vld [vmem:[%s22017_s3 + $0x768] sm:$0xf0]  ;;  %v16812_v33 = vld [vmem:[%s22017_s3 + $0x3f0] sm:$0xf0] }
 0x561   : > { %10225 = vmatmul.bf16.vlgmr.msra.gmra.mxu1 %v23877_v36  ;;  %v20615_v44 = vld [vmem:[%s22017_s3 + $0xa2c] sm:$0xf0]  ;;  %v17255_v37 = vor.u32 %v20522_v59, %v17252_v3  ;;  %v16815_v41 = vor.u32 %v20411_v53, %v16812_v33  ;;  %v20490_v3 = vld [vmem:[%s22017_s3 + $0x64c] sm:$0xf]  ;;  %v20315_v33 = vld [vmem:[%s22017_s3 + $0xd4] sm:$0xf] }
 0x562   : > { %10269 = vmatpush.bf16.msrb.mxu1 %v17835_v50  ;;  %v17860_v50 = vld [vmem:[%s22017_s3 + $0xc28] sm:$0xf0]  ;;  %v16970_v40 = vld [vmem:[%s22017_s3 + $0x510] sm:$0xf] }
 0x563   : > { %10257 = vmatpush.bf16.msrb.mxu0 %v17547_v10  ;;  %v17863_v60 = vor.u32 %v20674_v62, %v17860_v50  ;;  %v20567_v10 = vld [vmem:[%s22017_s3 + $0x8ac] sm:$0xf0]  ;;  %v10007_v6 = vpop.f32.mrf.mxu0 }
 0x564   : > { %10093 = vmatpush.bf16.msrb.mxu3 %v18147_v29  ;;  %v17419_v11 = vor.u32 %v20567_v10, %v17418_v57  ;;  %v20455_v62 = vld [vmem:[%s22017_s3 + $0x52c] sm:$0xf0]  ;;  %v17611_v29 = vor.u32 %v20615_v44, %v17610_v43  ;;  %v9929_v31 = vpop.f32.mrf.mxu2  ;;  %v16524_v10 = vld [vmem:[%s22017_s3 + $0x1b0] sm:$0xf0]  ;;  %v17159_v44 = vor.u32 %v20498_v15, %v17156_v23 }
 0x565   : > { %10185 = vmatpush.bf16.msrb.mxu2 %v17863_v60  ;;  %v16971_v57 = vor.u32 %v20455_v62, %v16970_v40  ;;  %v20339_v60 = vld [vmem:[%s22017_s3 + $0x194] sm:$0xf]  ;;  %v16874_v43 = vld [vmem:[%s22017_s3 + $0x450] sm:$0xf] }
 0x566   : > { %10270 = vmatpush.bf16.msrb.mxu1 %v17803_v61  ;;  %v17674_v61 = vld [vmem:[%s22017_s3 + $0xa90] sm:$0xf]  ;;  %v10020_v45 = vpop.f32.mrf.mxu1  ;;  %v16492_v6 = vld [vmem:[%s22017_s3 + $0x170] sm:$0xf0] }
 0x567   : > { %10258 = vmatpush.bf16.msrb.mxu0 %v17515_v20  ;;  %v17675_v48 = vor.u32 %v20631_v1, %v17674_v61  ;;  %v17319_v20 = vor.u32 %v20538_v56, %v17316_v9  ;;  %v20403_v61 = vld [vmem:[%s22017_s3 + $0x394] sm:$0xf]  ;;  %v16938_v56 = vld [vmem:[%s22017_s3 + $0x4d0] sm:$0xf]  ;;  %v17191_v45 = vor.u32 %v20506_v4, %v17188_v7  ;;  %v20794_v4 = vld [vmem:[%s22017_s3 + $0xfcc] sm:$0xf] }
 0x568   : > { %10094 = vmatpush.bf16.msrb.mxu3 %v18115_v5  ;;  %10186 = vmatmul.bf16.vlgmr.msrb.gmra.mxu2 %v24141_v16  ;;  %v16780_v1 = vld [vmem:[%s22017_s3 + $0x3b0] sm:$0xf0]  ;;  %v20447_v9 = vld [vmem:[%s22017_s3 + $0x4ec] sm:$0xf0]  ;;  %v16527_v5 = vor.u32 %v20339_v60, %v16524_v10  ;;  %v17092_v60 = vld [vmem:[%s22017_s3 + $0x628] sm:$0xf0] }
 0x569   : > { %10230 = vmatpush.bf16.msra.mxu2 %v17067_v24  ;;  %v16428_v40 = vld [vmem:[%s22017_s3 + $0xf0] sm:$0xf0]  ;;  %v18340_v7 = vld [vmem:[%s22017_s3 + $0xfe8] sm:$0xf0] }
 0x56a   : > { %10271 = vmatpush.bf16.msrb.mxu1 %v17771_v8  ;;  %v20559_v8 = vld [vmem:[%s22017_s3 + $0x86c] sm:$0xf0]  ;;  %v20379_v62 = vld [vmem:[%s22017_s3 + $0x2d4] sm:$0xf]  ;;  %v16431_v31 = vor.u32 %v20315_v33, %v16428_v40  ;;  %v18276_v33 = vld [vmem:[%s22017_s3 + $0xf68] sm:$0xf0] }
 0x56b   : > { %10259 = vmatpush.bf16.msrb.mxu0 %v17483_v27  ;;  %v17387_v26 = vor.u32 %v20559_v8, %v17386_v47  ;;  %v17643_v27 = vor.u32 %v20623_v17, %v17642_v51  ;;  %10095 = vmatmul.bf16.vlgmr.msrb.gmra.mxu3 %v24290_v34  ;;  %v20331_v47 = vld [vmem:[%s22017_s3 + $0x154] sm:$0xf]  ;;  %v16906_v51 = vld [vmem:[%s22017_s3 + $0x490] sm:$0xf] }
 0x56c   : > { %10139 = vmatpush.bf16.msra.mxu3 %v17319_v20  ;;  %v20395_v20 = vld [vmem:[%s22017_s3 + $0x354] sm:$0xf]  ;;  %v20439_v17 = vld [vmem:[%s22017_s3 + $0x4ac] sm:$0xf0]  ;;  %v16495_v42 = vor.u32 %v20331_v47, %v16492_v6  ;;  %v24562_v0 = vpop.f32.mrf.mxu2 }
 0x56d   : > { %10231 = vmatpush.bf16.msra.mxu2 %v17035_v25  ;;  %v16748_v8 = vld [vmem:[%s22017_s3 + $0x370] sm:$0xf0]  ;;  %v16907_v21 = vor.u32 %v20439_v17, %v16906_v51  ;;  %v18058_v6 = vld [vmem:[%s22017_s3 + $0xd90] sm:$0xf]  ;;  %v18343_v17 = vor.u32 %v20794_v4, %v18340_v7 }
 0x56e   : > { %10272 = vmatpush.bf16.msrb.mxu1 %v17739_v35  ;;  %v17354_v35 = vld [vmem:[%s22017_s3 + $0x810] sm:$0xf]  ;;  %v16751_v25 = vor.u32 %v20395_v20, %v16748_v8  ;;  %v20363_v15 = vld [vmem:[%s22017_s3 + $0x254] sm:$0xf] }
 0x56f   : > { %10260 = vmatpush.bf16.msrb.mxu0 %v17451_v13  ;;  %v17355_v50 = vor.u32 %v20551_v30, %v17354_v35  ;;  %v20514_v13 = vld [vmem:[%s22017_s3 + $0x70c] sm:$0xf]  ;;  %v20387_v35 = vld [vmem:[%s22017_s3 + $0x314] sm:$0xf]  ;;  %v20727_v20 = vld [vmem:[%s22017_s3 + $0xdac] sm:$0xf0] }
 0x570   : > { %10140 = vmatpush.bf16.msra.mxu3 %v17287_v58  ;;  %v16716_v30 = vld [vmem:[%s22017_s3 + $0x330] sm:$0xf0]  ;;  %v20431_v58 = vld [vmem:[%s22017_s3 + $0x46c] sm:$0xf0] }
 0x571   : > { %10232 = vmatpush.bf16.msra.mxu2 %v17003_v32  ;;  %v17124_v32 = vld [vmem:[%s22017_s3 + $0x668] sm:$0xf0]  ;;  %v16719_v39 = vor.u32 %v20387_v35, %v16716_v30  ;;  %v16875_v53 = vor.u32 %v20431_v58, %v16874_v43  ;;  %v20291_v30 = vld [vmem:[%s22017_s3 + $0x14] sm:$0xf]  ;;  %v18026_v43 = vld [vmem:[%s22017_s3 + $0xd50] sm:$0xf] }
 0x572   : > { %10273 = vmatpush.bf16.msrb.mxu1 %v17707_v2  ;;  %v17220_v2 = vld [vmem:[%s22017_s3 + $0x728] sm:$0xf0]  ;;  %v20719_v58 = vld [vmem:[%s22017_s3 + $0xd6c] sm:$0xf0]  ;;  %v20603_v40 = vld [vmem:[%s22017_s3 + $0x9d4] sm:$0xf] }
 0x573   : > { %10261 = vmatpush.bf16.msrb.mxu0 %v17419_v11  ;;  %v17223_v24 = vor.u32 %v20514_v13, %v17220_v2  ;;  %v16783_v11 = vor.u32 %v20403_v61, %v16780_v1  ;;  %v18090_v13 = vld [vmem:[%s22017_s3 + $0xdd0] sm:$0xf]  ;;  %v17804_v4 = vld [vmem:[%s22017_s3 + $0xbb0] sm:$0xf0] }
 0x574   : > { %10141 = vmatpush.bf16.msra.mxu3 %v17255_v37  ;;  %v16842_v37 = vld [vmem:[%s22017_s3 + $0x410] sm:$0xf]  ;;  %v9981_v61 = vpop.f32.mrf.mxu2 }
 0x575   : > { %10233 = vmatpush.bf16.msra.mxu2 %v16971_v57  ;;  %v20735_v2 = vld [vmem:[%s22017_s3 + $0xdec] sm:$0xf0]  ;;  %v20482_v57 = vld [vmem:[%s22017_s3 + $0x60c] sm:$0xf] }
 0x576   : > { %10274 = vmatpush.bf16.msrb.mxu1 %v17675_v48  ;;  %v16939_v48 = vor.u32 %v20447_v9, %v16938_v56  ;;  %v20307_v56 = vld [vmem:[%s22017_s3 + $0x94] sm:$0xf]  ;;  %v20770_v61 = vld [vmem:[%s22017_s3 + $0xf0c] sm:$0xf]  ;;  %v17962_v7 = vld [vmem:[%s22017_s3 + $0xcd0] sm:$0xf] }
 0x577   : > { %10262 = vmatpush.bf16.msrb.mxu0 %v17387_v26  ;;  %v20323_v26 = vld [vmem:[%s22017_s3 + $0x114] sm:$0xf] }
 0x578   : > { %10142 = vmatpush.bf16.msra.mxu3 %v17223_v24  ;;  %v16396_v9 = vld [vmem:[%s22017_s3 + $0xb0] sm:$0xf0] }
 0x579   : > { %10234 = vmatpush.bf16.msra.mxu2 %v16939_v48  ;;  %v20371_v24 = vld [vmem:[%s22017_s3 + $0x294] sm:$0xf]  ;;  %v17095_v48 = vor.u32 %v20482_v57, %v17092_v60  ;;  %v16399_v47 = vor.u32 %v20307_v56, %v16396_v9 }
 0x57a   : > { %10275 = vmatpush.bf16.msrb.mxu1 %v17643_v27  ;;  %v16460_v27 = vld [vmem:[%s22017_s3 + $0x130] sm:$0xf0] }
 0x57b   : > { %10263 = vmatpush.bf16.msrb.mxu0 %v17355_v50  ;;  %v16463_v59 = vor.u32 %v20323_v26, %v16460_v27  ;;  %v24572_v46 = vpop.f32.mrf.mxu0  ;;  %v18308_v26 = vld [vmem:[%s22017_s3 + $0xfa8] sm:$0xf0]  ;;  %v18059_v27 = vor.u32 %v20727_v20, %v18058_v6  ;;  %v20595_v56 = vld [vmem:[%s22017_s3 + $0x994] sm:$0xf] }
 0x57c   : > { %10143 = vmatpush.bf16.msra.mxu3 %v17191_v45  ;;  %v20299_v45 = vld [vmem:[%s22017_s3 + $0x54] sm:$0xf]  ;;  %v20762_v20 = vld [vmem:[%s22017_s3 + $0xecc] sm:$0xf] }
 0x57d   : > { %10235 = vmatpush.bf16.msra.mxu2 %v16907_v21  ;;  %v20786_v21 = vld [vmem:[%s22017_s3 + $0xf8c] sm:$0xf] }
 0x57e   : > { %10276 = vmatpush.bf16.msrb.mxu1 %v17611_v29  ;;  %10264 = vmatmul.bf16.vlgmr.msrb.gmra.mxu0 %v23965_v52  ;;  %v24577_v50 = vpop.f32.mrf.mxu1  ;;  %v16684_v29 = vld [vmem:[%s22017_s3 + $0x2f0] sm:$0xf0] }
 0x57f   : > { %10308 = vmatpush.bf16.msra.mxu0 %v16559_v54  ;;  %v20423_v54 = vld [vmem:[%s22017_s3 + $0x42c] sm:$0xf0]  ;;  %v16687_v10 = vor.u32 %v20379_v62, %v16684_v29  ;;  %v18027_v62 = vor.u32 %v20719_v58, %v18026_v43  ;;  %v17580_v29 = vld [vmem:[%s22017_s3 + $0x9f0] sm:$0xf0]  ;;  %v20754_v58 = vld [vmem:[%s22017_s3 + $0xe8c] sm:$0xf] }
 0x580   : > { %10144 = vmatpush.bf16.msra.mxu3 %v17159_v44  ;;  %v16843_v1 = vor.u32 %v20423_v54, %v16842_v37  ;;  %v20667_v37 = vld [vmem:[%s22017_s3 + $0xbd4] sm:$0xf]  ;;  %v17583_v60 = vor.u32 %v20603_v40, %v17580_v29  ;;  %v17898_v40 = vld [vmem:[%s22017_s3 + $0xc50] sm:$0xf] }
 0x581   : > { %10277 = vmatmul.bf16.vlgmr.msrb.gmra.mxu1 %v24005_v22  ;;  %10236 = vmatpush.bf16.msra.mxu2 %v16875_v53  ;;  %v20778_v53 = vld [vmem:[%s22017_s3 + $0xf4c] sm:$0xf]  ;;  %v17836_v54 = vld [vmem:[%s22017_s3 + $0xbf0] sm:$0xf0] }
 0x582   : > { %10321 = vmatpush.bf16.msra.mxu1 %v16815_v41  ;;  %v17127_v41 = vor.u32 %v20490_v3, %v17124_v32  ;;  %v16332_v3 = vld [vmem:[%s22017_s3 + $0x30] sm:$0xf0]  ;;  %v18279_v57 = vor.u32 %v20778_v53, %v18276_v33 }
 0x583   : > { %10309 = vmatpush.bf16.msra.mxu0 %v16527_v5  ;;  %v16652_v5 = vld [vmem:[%s22017_s3 + $0x2b0] sm:$0xf0]  ;;  %v10059_v8 = vpop.f32.mrf.mxu0 }
 0x584   : > { %10145 = vmatpush.bf16.msra.mxu3 %v17127_v41  ;;  %v16655_v51 = vor.u32 %v20371_v24, %v16652_v5  ;;  %v20355_v32 = vld [vmem:[%s22017_s3 + $0x214] sm:$0xf]  ;;  %v20711_v41 = vld [vmem:[%s22017_s3 + $0xd2c] sm:$0xf0]  ;;  %v18212_v8 = vld [vmem:[%s22017_s3 + $0xee8] sm:$0xf0] }
 0x585   : > { %10237 = vmatpush.bf16.msra.mxu2 %v16843_v1  ;;  %v18244_v1 = vld [vmem:[%s22017_s3 + $0xf28] sm:$0xf0]  ;;  %v17548_v24 = vld [vmem:[%s22017_s3 + $0x9b0] sm:$0xf0] }
 0x586   : > { %10322 = vmatpush.bf16.msra.mxu1 %v16783_v11  ;;  %v18091_v11 = vor.u32 %v20735_v2, %v18090_v13  ;;  %v10072_v23 = vpop.f32.mrf.mxu1  ;;  %v16335_v13 = vor.u32 %v20291_v30, %v16332_v3  ;;  %v17994_v2 = vld [vmem:[%s22017_s3 + $0xd10] sm:$0xf]  ;;  %v20659_v5 = vld [vmem:[%s22017_s3 + $0xb94] sm:$0xf] }
 0x587   : > { %10310 = vmatpush.bf16.msra.mxu0 %v16495_v42  ;;  %v16364_v42 = vld [vmem:[%s22017_s3 + $0x70] sm:$0xf0]  ;;  %v17995_v9 = vor.u32 %v20711_v41, %v17994_v2  ;;  %v17807_v6 = vor.u32 %v20659_v5, %v17804_v4  ;;  %v17930_v23 = vld [vmem:[%s22017_s3 + $0xc90] sm:$0xf]  ;;  %v18148_v2 = vld [vmem:[%s22017_s3 + $0xe68] sm:$0xf0] }
 0x588   : > { %10146 = vmatpush.bf16.msra.mxu3 %v17095_v48  ;;  %v16367_v35 = vor.u32 %v20299_v45, %v16364_v42  ;;  %10238 = vmatmul.bf16.vlgmr.msra.gmra.mxu2 %v23952_v28  ;;  %v18247_v48 = vor.u32 %v20770_v61, %v18244_v1  ;;  %v17516_v45 = vld [vmem:[%s22017_s3 + $0x970] sm:$0xf0]  ;;  %v17866_v1 = vld [vmem:[%s22017_s3 + $0xc10] sm:$0xf] }
 0x589   : > { %10282 = vmatpush.bf16.msrb.mxu2 %v18091_v11  ;;  %v20703_v11 = vld [vmem:[%s22017_s3 + $0xcec] sm:$0xf0]  ;;  %v20651_v42 = vld [vmem:[%s22017_s3 + $0xb54] sm:$0xf] }
 0x58a   : > { %10323 = vmatpush.bf16.msra.mxu1 %v16751_v25  ;;  %v16620_v25 = vld [vmem:[%s22017_s3 + $0x270] sm:$0xf0]  ;;  %v10031_v3 = vpop.f32.mrf.mxu2 }
 0x58b   : > { %10311 = vmatpush.bf16.msra.mxu0 %v16463_v59  ;;  %v16623_v44 = vor.u32 %v20363_v15, %v16620_v25  ;;  %v18311_v59 = vor.u32 %v20786_v21, %v18308_v26  ;;  %10147 = vmatmul.bf16.vlgmr.msra.gmra.mxu3 %v24033_v38  ;;  %v17772_v15 = vld [vmem:[%s22017_s3 + $0xb70] sm:$0xf0]  ;;  %v20695_v25 = vld [vmem:[%s22017_s3 + $0xcac] sm:$0xf0]  ;;  %v9888_v21 = vpop.f32.mrf.mxu3  ;;  %v18215_v26 = vor.u32 %v20762_v20, %v18212_v8 }
 0x58c   : > { %10191 = vmatpush.bf16.msrb.mxu3 %v18343_v17  ;;  %v17963_v17 = vor.u32 %v20703_v11, %v17962_v7  ;;  %v17775_v43 = vor.u32 %v20651_v42, %v17772_v15  ;;  %v17740_v53 = vld [vmem:[%s22017_s3 + $0xb30] sm:$0xf0]  ;;  %v24645_v33 = vadd.f32 %v10031_v3, %v24505_v55  ;;  %v17322_v15 = vld [vmem:[%s22017_s3 + $0x7d0] sm:$0xf] }
 0x58d   : > { %10283 = vmatpush.bf16.msrb.mxu2 %v18059_v27  ;;  %v7215_v27 = vperm.slane %v24490_v12, 3  ;;  %v20643_v12 = vld [vmem:[%s22017_s3 + $0xb14] sm:$0xf] }
 0x58e   : > { %10324 = vmatpush.bf16.msra.mxu1 %v16719_v39  ;;  %v16588_v39 = vld [vmem:[%s22017_s3 + $0x230] sm:$0xf0] }
 0x58f   : > { %10312 = vmatpush.bf16.msra.mxu0 %v16431_v31  ;;  %v16591_v31 = vor.u32 %v20355_v32, %v16588_v39  ;;  %v17931_v32 = vor.u32 %v20695_v25, %v17930_v23  ;;  %v17484_v39 = vld [vmem:[%s22017_s3 + $0x930] sm:$0xf0]  ;;  %v20543_v23 = vld [vmem:[%s22017_s3 + $0x7ec] sm:$0xf0] }
 0x590   : > { %10192 = vmatpush.bf16.msrb.mxu3 %v18311_v59  ;;  %v20579_v59 = vld [vmem:[%s22017_s3 + $0x914] sm:$0xf]  ;;  %v17323_v3 = vor.u32 %v20543_v23, %v17322_v15  ;;  %v20344_v15 = vld [vmem:[%s22017_s3 + $0x1b4] sm:$0xf0] }
 0x591   : > { %10284 = vmatpush.bf16.msrb.mxu2 %v18027_v62  ;;  %v20571_v55 = vld [vmem:[%s22017_s3 + $0x8d4] sm:$0xf]  ;;  %v16786_v23 = vld [vmem:[%s22017_s3 + $0x398] sm:$0xf] }
 0x592   : > { %10325 = vmatpush.bf16.msra.mxu1 %v16687_v10  ;;  %v17839_v10 = vor.u32 %v20667_v37, %v17836_v54  ;;  %v17487_v37 = vor.u32 %v20579_v59, %v17484_v39  ;;  %v17743_v54 = vor.u32 %v20643_v12, %v17740_v53  ;;  %v17708_v61 = vld [vmem:[%s22017_s3 + $0xaf0] sm:$0xf0]  ;;  %v10033_v8 = vpop.f32.mrf.mxu2  ;;  %v17290_v53 = vld [vmem:[%s22017_s3 + $0x790] sm:$0xf] }
 0x593   : > { %10313 = vmatpush.bf16.msra.mxu0 %v16399_v47  ;;  %v17551_v47 = vor.u32 %v20595_v56, %v17548_v24  ;;  %v20679_v56 = vld [vmem:[%s22017_s3 + $0xc2c] sm:$0xf0]  ;;  %v9890_v24 = vpop.f32.mrf.mxu3  ;;  %v20475_v4 = vld [vmem:[%s22017_s3 + $0x5d4] sm:$0xf] }
 0x594   : > { %10193 = vmatpush.bf16.msrb.mxu3 %v18279_v57  ;;  %v17068_v7 = vld [vmem:[%s22017_s3 + $0x5f0] sm:$0xf0]  ;;  %v20352_v24 = vld [vmem:[%s22017_s3 + $0x1f4] sm:$0xf0]  ;;  %v17226_v8 = vld [vmem:[%s22017_s3 + $0x710] sm:$0xf] }
 0x595   : > { %10285 = vmatpush.bf16.msrb.mxu2 %v17995_v9  ;;  %v20563_v20 = vld [vmem:[%s22017_s3 + $0x894] sm:$0xf]  ;;  %v17071_v25 = vor.u32 %v20475_v4, %v17068_v7  ;;  %v20416_v4 = vld [vmem:[%s22017_s3 + $0x3f4] sm:$0xf0] }
 0x596   : > { %10326 = vmatpush.bf16.msra.mxu1 %v16655_v51  ;;  %v20587_v51 = vld [vmem:[%s22017_s3 + $0x954] sm:$0xf] }
 0x597   : > { %10314 = vmatpush.bf16.msra.mxu0 %v16367_v35  ;;  %v24636_v35 = vadd.f32 %v9888_v21, %v24481_v18  ;;  %v17519_v30 = vor.u32 %v20587_v51, %v17516_v45  ;;  %v20687_v18 = vld [vmem:[%s22017_s3 + $0xc6c] sm:$0xf0]  ;;  %v17867_v51 = vor.u32 %v20679_v56, %v17866_v1  ;;  %v20627_v45 = vld [vmem:[%s22017_s3 + $0xa94] sm:$0xf]  ;;  %v16562_v56 = vld [vmem:[%s22017_s3 + $0x1d8] sm:$0xf] }
 0x598   : > { %10194 = vmatpush.bf16.msrb.mxu3 %v18247_v48  ;;  %v17899_v57 = vor.u32 %v20687_v18, %v17898_v40  ;;  %v17676_v42 = vld [vmem:[%s22017_s3 + $0xab0] sm:$0xf0]  ;;  %v20535_v40 = vld [vmem:[%s22017_s3 + $0x7ac] sm:$0xf0] }
 0x599   : > { %10286 = vmatpush.bf16.msrb.mxu2 %v17963_v17  ;;  %v17420_v17 = vld [vmem:[%s22017_s3 + $0x8b0] sm:$0xf0] }
 0x59a   : > { %10327 = vmatpush.bf16.msra.mxu1 %v16623_v44  ;;  %v18180_v44 = vld [vmem:[%s22017_s3 + $0xea8] sm:$0xf0]  ;;  %v20619_v39 = vld [vmem:[%s22017_s3 + $0xa54] sm:$0xf] }
 0x59b   : > { %10315 = vmatpush.bf16.msra.mxu0 %v16335_v13  ;;  %v18183_v62 = vor.u32 %v20754_v58, %v18180_v44  ;;  %v10109_v29 = vpop.f32.mrf.mxu0  ;;  %v20746_v13 = vld [vmem:[%s22017_s3 + $0xe4c] sm:$0xf]  ;;  %v17679_v58 = vor.u32 %v20627_v45, %v17676_v42  ;;  %v20555_v44 = vld [vmem:[%s22017_s3 + $0x854] sm:$0xf]  ;;  %v16530_v42 = vld [vmem:[%s22017_s3 + $0x198] sm:$0xf] }
 0x59c   : > { %10195 = vmatpush.bf16.msrb.mxu3 %v18215_v26  ;;  %v10110_v41 = vadd.f32 %v10109_v29, %v7215_v27  ;;  %v18151_v5 = vor.u32 %v20746_v13, %v18148_v2  ;;  %v20467_v26 = vld [vmem:[%s22017_s3 + $0x594] sm:$0xf] }
 0x59d   : > { %10287 = vmatpush.bf16.msrb.mxu2 %v17931_v32  ;;  %v17036_v27 = vld [vmem:[%s22017_s3 + $0x5b0] sm:$0xf0] }
 0x59e   : > { %10328 = vmatpush.bf16.msra.mxu1 %v16591_v31  ;;  %10316 = vmatmul.bf16.vlgmr.msra.gmra.mxu0 %v23875_v19  ;;  %v10122_v31 = vpop.f32.mrf.mxu1  ;;  %v17388_v32 = vld [vmem:[%s22017_s3 + $0x870] sm:$0xf0]  ;;  %v17039_v18 = vor.u32 %v20467_v26, %v17036_v27  ;;  %v20408_v26 = vld [vmem:[%s22017_s3 + $0x3b4] sm:$0xf0] }
 0x59f   : > { %10360 = vmatpush.bf16.msrb.mxu0 %v17583_v60  ;;  %v17452_v60 = vld [vmem:[%s22017_s3 + $0x8f0] sm:$0xf0]  ;;  %v24657_v9 = vadd.f32 %v10122_v31, %v10110_v41  ;;  %v17391_v13 = vor.u32 %v20555_v44, %v17388_v32  ;;  %v20511_v44 = vld [vmem:[%s22017_s3 + $0x6ec] sm:$0xf0]  ;;  %v20336_v32 = vld [vmem:[%s22017_s3 + $0x174] sm:$0xf0] }
 0x5a0   : > { %10196 = vmatpush.bf16.msrb.mxu3 %v18183_v62  ;;  %v17455_v11 = vor.u32 %v20571_v55, %v17452_v60  ;;  %v17644_v12 = vld [vmem:[%s22017_s3 + $0xa70] sm:$0xf0]  ;;  %v9940_v62 = vpop.f32.mrf.mxu3 }
 0x5a1   : > { %10329 = vmatmul.bf16.vlgmr.msra.gmra.mxu1 %v23877_v36  ;;  %10288 = vmatpush.bf16.msrb.mxu2 %v17899_v57  ;;  %v20459_v29 = vld [vmem:[%s22017_s3 + $0x554] sm:$0xf]  ;;  %v17647_v2 = vor.u32 %v20619_v39, %v17644_v12  ;;  %v17291_v57 = vor.u32 %v20535_v40, %v17290_v53  ;;  %v16754_v39 = vld [vmem:[%s22017_s3 + $0x358] sm:$0xf] }
 0x5a2   : > { %10373 = vmatpush.bf16.msrb.mxu1 %v17839_v10  ;;  %v20635_v10 = vld [vmem:[%s22017_s3 + $0xad4] sm:$0xf]  ;;  %v20400_v12 = vld [vmem:[%s22017_s3 + $0x374] sm:$0xf0] }
 0x5a3   : > { %10361 = vmatpush.bf16.msrb.mxu0 %v17551_v47  ;;  %v17711_v48 = vor.u32 %v20635_v10, %v17708_v61  ;;  %v20738_v47 = vld [vmem:[%s22017_s3 + $0xe0c] sm:$0xf]  ;;  %v20547_v55 = vld [vmem:[%s22017_s3 + $0x814] sm:$0xf]  ;;  %v17258_v10 = vld [vmem:[%s22017_s3 + $0x750] sm:$0xf] }
 0x5a4   : > { %10197 = vmatpush.bf16.msrb.mxu3 %v18151_v5  ;;  %v17356_v41 = vld [vmem:[%s22017_s3 + $0x830] sm:$0xf0]  ;;  %v20527_v61 = vld [vmem:[%s22017_s3 + $0x76c] sm:$0xf0]  ;;  %v16818_v5 = vld [vmem:[%s22017_s3 + $0x3d8] sm:$0xf] }
 0x5a5   : > { %10289 = vmatpush.bf16.msrb.mxu2 %v17867_v51  ;;  %v20611_v31 = vld [vmem:[%s22017_s3 + $0xa14] sm:$0xf]  ;;  %v20519_v51 = vld [vmem:[%s22017_s3 + $0x72c] sm:$0xf0] }
 0x5a6   : > { %10374 = vmatpush.bf16.msrb.mxu1 %v17807_v6  ;;  %v18116_v6 = vld [vmem:[%s22017_s3 + $0xe28] sm:$0xf0]  ;;  %v10124_v59 = vpop.f32.mrf.mxu1  ;;  %v17612_v60 = vld [vmem:[%s22017_s3 + $0xa30] sm:$0xf0] }
 0x5a7   : > { %10362 = vmatpush.bf16.msrb.mxu0 %v17519_v30  ;;  %v18119_v21 = vor.u32 %v20738_v47, %v18116_v6  ;;  %v10111_v30 = vpop.f32.mrf.mxu0  ;;  %v20451_v7 = vld [vmem:[%s22017_s3 + $0x514] sm:$0xf]  ;;  %v17259_v6 = vor.u32 %v20527_v61, %v17258_v10 }
 0x5a8   : > { %10290 = vmatmul.bf16.vlgmr.msrb.gmra.mxu2 %v24141_v16  ;;  %v16940_v27 = vld [vmem:[%s22017_s3 + $0x4f0] sm:$0xf0]  ;;  %v17227_v30 = vor.u32 %v20519_v51, %v17226_v8 }
 0x5a9   : > { %10334 = vmatpush.bf16.msra.mxu2 %v17071_v25  ;;  %10198 = vmatpush.bf16.msrb.mxu3 %v18119_v21  ;;  %v9942_v21 = vpop.f32.mrf.mxu3  ;;  %v20435_v53 = vld [vmem:[%s22017_s3 + $0x494] sm:$0xf] }
 0x5aa   : > { %10375 = vmatpush.bf16.msrb.mxu1 %v17775_v43  ;;  %v17423_v43 = vor.u32 %v20563_v20, %v17420_v17  ;;  %v16563_v20 = vor.u32 %v20352_v24, %v16562_v56  ;;  %v16819_v17 = vor.u32 %v20416_v4, %v16818_v5  ;;  %v16908_v40 = vld [vmem:[%s22017_s3 + $0x4b0] sm:$0xf0]  ;;  %v17130_v24 = vld [vmem:[%s22017_s3 + $0x650] sm:$0xf] }
 0x5ab   : > { %10363 = vmatpush.bf16.msrb.mxu0 %v17487_v37  ;;  %v17004_v37 = vld [vmem:[%s22017_s3 + $0x570] sm:$0xf0]  ;;  %v20495_v5 = vld [vmem:[%s22017_s3 + $0x66c] sm:$0xf0] }
 0x5ac   : > { %10199 = vmatmul.bf16.vlgmr.msrb.gmra.mxu3 %v24290_v34  ;;  %v17007_v1 = vor.u32 %v20459_v29, %v17004_v37  ;;  %v17162_v29 = vld [vmem:[%s22017_s3 + $0x690] sm:$0xf]  ;;  %v20427_v10 = vld [vmem:[%s22017_s3 + $0x454] sm:$0xf] }
 0x5ad   : > { %10243 = vmatpush.bf16.msra.mxu3 %v17323_v3  ;;  %10335 = vmatpush.bf16.msra.mxu2 %v17039_v18  ;;  %v16498_v3 = vld [vmem:[%s22017_s3 + $0x158] sm:$0xf]  ;;  %v20503_v37 = vld [vmem:[%s22017_s3 + $0x6ac] sm:$0xf0]  ;;  %v16876_v61 = vld [vmem:[%s22017_s3 + $0x470] sm:$0xf0] }
 0x5ae   : > { %10376 = vmatpush.bf16.msrb.mxu1 %v17743_v54  ;;  %v9941_v54 = vadd.f32 %v9940_v62, %v24524_v14  ;;  %v16499_v62 = vor.u32 %v20336_v32, %v16498_v3  ;;  %v20419_v8 = vld [vmem:[%s22017_s3 + $0x414] sm:$0xf] }
 0x5af   : > { %10364 = vmatpush.bf16.msrb.mxu0 %v17455_v11  ;;  %v16972_v11 = vld [vmem:[%s22017_s3 + $0x530] sm:$0xf0] }
 0x5b0   : > { %v9954_v14 = vadd.f32 %v24421_v63, %v9941_v54  ;;  %v17615_v63 = vor.u32 %v20611_v31, %v17612_v60  ;;  %v16975_v45 = vor.u32 %v20451_v7, %v16972_v11  ;;  %v16755_v54 = vor.u32 %v20400_v12, %v16754_v39  ;;  %v16722_v31 = vld [vmem:[%s22017_s3 + $0x318] sm:$0xf]  ;;  %v16844_v51 = vld [vmem:[%s22017_s3 + $0x430] sm:$0xf0] }
 0x5b1   : > { %10244 = vmatpush.bf16.msra.mxu3 %v17291_v57  ;;  %10336 = vmatpush.bf16.msra.mxu2 %v17007_v1  ;;  %v9992_v57 = vpop.f32.mrf.mxu3  ;;  %v20392_v60 = vld [vmem:[%s22017_s3 + $0x334] sm:$0xf0]  ;;  %v17163_v1 = vor.u32 %v20503_v37, %v17162_v29  ;;  %v20723_v12 = vld [vmem:[%s22017_s3 + $0xd94] sm:$0xf] }
 0x5b2   : > { %10377 = vmatpush.bf16.msrb.mxu1 %v17711_v48  ;;  %v17359_v48 = vor.u32 %v20547_v55, %v17356_v41  ;;  %v9967_v47 = vadd.f32 %v24426_v49, %v9954_v14  ;;  %v20443_v49 = vld [vmem:[%s22017_s3 + $0x4d4] sm:$0xf]  ;;  %v16466_v55 = vld [vmem:[%s22017_s3 + $0x118] sm:$0xf]  ;;  %v16723_v11 = vor.u32 %v20392_v60, %v16722_v31  ;;  %v20791_v31 = vld [vmem:[%s22017_s3 + $0xfac] sm:$0xf0] }
 0x5b3   : > { %10365 = vmatpush.bf16.msrb.mxu0 %v17423_v43  ;;  %v16531_v43 = vor.u32 %v20344_v15, %v16530_v42  ;;  %v16943_v59 = vor.u32 %v20443_v49, %v16940_v27  ;;  %v20328_v41 = vld [vmem:[%s22017_s3 + $0x134] sm:$0xf0]  ;;  %v17131_v42 = vor.u32 %v20495_v5, %v17130_v24  ;;  %v16847_v49 = vor.u32 %v20419_v8, %v16844_v51 }
 0x5b4   : > { %v9980_v25 = vadd.f32 %v24562_v0, %v9967_v47  ;;  %v16787_v0 = vor.u32 %v20408_v26, %v16786_v23  ;;  %v16467_v56 = vor.u32 %v20328_v41, %v16466_v55  ;;  %v20320_v47 = vld [vmem:[%s22017_s3 + $0xf4] sm:$0xf0]  ;;  %v17098_v23 = vld [vmem:[%s22017_s3 + $0x610] sm:$0xf] }
 0x5b5   : > { %10245 = vmatpush.bf16.msra.mxu3 %v17259_v6  ;;  %10337 = vmatpush.bf16.msra.mxu2 %v16975_v45  ;;  %v16690_v6 = vld [vmem:[%s22017_s3 + $0x2d8] sm:$0xf]  ;;  %v18092_v45 = vld [vmem:[%s22017_s3 + $0xdf0] sm:$0xf0]  ;;  %v18314_v41 = vld [vmem:[%s22017_s3 + $0xf90] sm:$0xf] }
 0x5b6   : > { %10378 = vmatpush.bf16.msrb.mxu1 %v17679_v58  ;;  %v17194_v58 = vld [vmem:[%s22017_s3 + $0x6d0] sm:$0xf]  ;;  %v24725_v14 = vadd.f32 %v9992_v57, %v9980_v25  ;;  %v16402_v27 = vld [vmem:[%s22017_s3 + $0x98] sm:$0xf]  ;;  %v18315_v24 = vor.u32 %v20791_v31, %v18314_v41  ;;  %v24792_v31 = vld [vmem:[%s22024_s12] sm:$0xff] }
 0x5b7   : > { %10366 = vmatpush.bf16.msrb.mxu0 %v17391_v13  ;;  %v17195_v18 = vor.u32 %v20511_v44, %v17194_v58  ;;  %v24717_v13 = vpop.f32.mrf.mxu2  ;;  %v20487_v25 = vld [vmem:[%s22017_s3 + $0x62c] sm:$0xf0]  ;;  %v20376_v44 = vld [vmem:[%s22017_s3 + $0x2b4] sm:$0xf0] }
 0x5b8   : > { %v17099_v32 = vor.u32 %v20487_v25, %v17098_v23  ;;  %v16370_v37 = vld [vmem:[%s22017_s3 + $0x58] sm:$0xf] }
 0x5b9   : > { %10246 = vmatpush.bf16.msra.mxu3 %v17227_v30  ;;  %10338 = vmatpush.bf16.msra.mxu2 %v16943_v59  ;;  %v20312_v30 = vld [vmem:[%s22017_s3 + $0xb4] sm:$0xf0]  ;;  %v9994_v58 = vpop.f32.mrf.mxu3  ;;  %v20799_v59 = vld [vmem:[%s22017_s3 + $0xfec] sm:$0xf0] }
 0x5ba   : > { %10379 = vmatpush.bf16.msrb.mxu1 %v17647_v2  ;;  %v16911_v2 = vor.u32 %v20435_v53, %v16908_v40  ;;  %v16403_v39 = vor.u32 %v20312_v30, %v16402_v27  ;;  %v18060_v53 = vld [vmem:[%s22017_s3 + $0xdb0] sm:$0xf0]  ;;  %v20368_v55 = vld [vmem:[%s22017_s3 + $0x274] sm:$0xf0]  ;;  %v20775_v27 = vld [vmem:[%s22017_s3 + $0xf2c] sm:$0xf0] }
 0x5bb   : > { %10367 = vmatpush.bf16.msrb.mxu0 %v17359_v48  ;;  %v24729_v4 = vpop.f32.mrf.mxu0  ;;  %v16879_v48 = vor.u32 %v20427_v10, %v16876_v61  ;;  %v18063_v57 = vor.u32 %v20723_v12, %v18060_v53  ;;  %v16338_v10 = vld [vmem:[%s22017_s3 + $0x18] sm:$0xf]  ;;  %v20715_v61 = vld [vmem:[%s22017_s3 + $0xd54] sm:$0xf]  ;;  %v18218_v53 = vld [vmem:[%s22017_s3 + $0xed0] sm:$0xf] }
 0x5bc   : > { %v20296_v5 = vld [vmem:[%s22017_s3 + $0x34] sm:$0xf0] }
 0x5bd   : > { %10247 = vmatpush.bf16.msra.mxu3 %v17195_v18  ;;  %10339 = vmatpush.bf16.msra.mxu2 %v16911_v2  ;;  %v16626_v2 = vld [vmem:[%s22017_s3 + $0x258] sm:$0xf] }
 0x5be   : > { %10380 = vmatpush.bf16.msrb.mxu1 %v17615_v63  ;;  %10368 = vmatmul.bf16.vlgmr.msrb.gmra.mxu0 %v23965_v52  ;;  %v24731_v7 = vpop.f32.mrf.mxu1  ;;  %v16434_v63 = vld [vmem:[%s22017_s3 + $0xd8] sm:$0xf] }
 0x5bf   : > { %10412 = vmatpush.bf16.msra.mxu0 %v16563_v20  ;;  %v20384_v20 = vld [vmem:[%s22017_s3 + $0x2f4] sm:$0xf0]  ;;  %v16435_v15 = vor.u32 %v20320_v47, %v16434_v63  ;;  %v10085_v26 = vpop.f32.mrf.mxu2  ;;  %v18282_v63 = vld [vmem:[%s22017_s3 + $0xf50] sm:$0xf] }
 0x5c0   : > { %v16691_v21 = vor.u32 %v20384_v20, %v16690_v6  ;;  %v20783_v47 = vld [vmem:[%s22017_s3 + $0xf6c] sm:$0xf0]  ;;  %v17586_v6 = vld [vmem:[%s22017_s3 + $0x9d8] sm:$0xf] }
 0x5c1   : > { %10381 = vmatmul.bf16.vlgmr.msrb.gmra.mxu1 %v24005_v22  ;;  %10248 = vmatpush.bf16.msra.mxu3 %v17163_v1  ;;  %v18028_v1 = vld [vmem:[%s22017_s3 + $0xd70] sm:$0xf0]  ;;  %v20608_v8 = vld [vmem:[%s22017_s3 + $0x9f4] sm:$0xf0]  ;;  %v18283_v25 = vor.u32 %v20783_v47, %v18282_v63 }
 0x5c2   : > { %10425 = vmatpush.bf16.msra.mxu1 %v16819_v17  ;;  %v20731_v17 = vld [vmem:[%s22017_s3 + $0xdd4] sm:$0xf]  ;;  %10340 = vmatpush.bf16.msra.mxu2 %v16879_v48  ;;  %v20360_v48 = vld [vmem:[%s22017_s3 + $0x234] sm:$0xf0]  ;;  %v18031_v20 = vor.u32 %v20715_v61, %v18028_v1  ;;  %v18186_v61 = vld [vmem:[%s22017_s3 + $0xe90] sm:$0xf] }
 0x5c3   : > { %10413 = vmatpush.bf16.msra.mxu0 %v16531_v43  ;;  %v16658_v43 = vld [vmem:[%s22017_s3 + $0x298] sm:$0xf]  ;;  %v18095_v3 = vor.u32 %v20731_v17, %v18092_v45  ;;  %v10163_v40 = vpop.f32.mrf.mxu0  ;;  %v16339_v45 = vor.u32 %v20296_v5, %v16338_v10  ;;  %v20759_v1 = vld [vmem:[%s22017_s3 + $0xeac] sm:$0xf0] }
 0x5c4   : > { %v17842_v51 = vld [vmem:[%s22017_s3 + $0xbd8] sm:$0xf]  ;;  %v20767_v40 = vld [vmem:[%s22017_s3 + $0xeec] sm:$0xf0] }
 0x5c5   : > { %10249 = vmatpush.bf16.msra.mxu3 %v17131_v42  ;;  %v20672_v17 = vld [vmem:[%s22017_s3 + $0xbf4] sm:$0xf0]  ;;  %v20707_v42 = vld [vmem:[%s22017_s3 + $0xd14] sm:$0xf]  ;;  %v18219_v41 = vor.u32 %v20767_v40, %v18218_v53  ;;  %v18122_v53 = vld [vmem:[%s22017_s3 + $0xe10] sm:$0xf] }
 0x5c6   : > { %10426 = vmatpush.bf16.msra.mxu1 %v16787_v0  ;;  %v18346_v0 = vld [vmem:[%s22017_s3 + $0xfd0] sm:$0xf]  ;;  %v10176_v18 = vpop.f32.mrf.mxu1  ;;  %10341 = vmatpush.bf16.msra.mxu2 %v16847_v49  ;;  %v17843_v26 = vor.u32 %v20672_v17, %v17842_v51  ;;  %v17554_v30 = vld [vmem:[%s22017_s3 + $0x998] sm:$0xf]  ;;  %v18187_v17 = vor.u32 %v20759_v1, %v18186_v61 }
 0x5c7   : > { %10414 = vmatpush.bf16.msra.mxu0 %v16499_v62  ;;  %v16659_v62 = vor.u32 %v20376_v44, %v16658_v43  ;;  %v18347_v29 = vor.u32 %v20799_v59, %v18346_v0  ;;  %v18250_v49 = vld [vmem:[%s22017_s3 + $0xf10] sm:$0xf]  ;;  %v20600_v58 = vld [vmem:[%s22017_s3 + $0x9b4] sm:$0xf0]  ;;  %v20699_v59 = vld [vmem:[%s22017_s3 + $0xcd4] sm:$0xf] }
 0x5c8   : > { %v17810_v44 = vld [vmem:[%s22017_s3 + $0xb98] sm:$0xf]  ;;  %v20743_v40 = vld [vmem:[%s22017_s3 + $0xe2c] sm:$0xf0] }
 0x5c9   : > { %10250 = vmatpush.bf16.msra.mxu3 %v17099_v32  ;;  %10342 = vmatmul.bf16.vlgmr.msra.gmra.mxu2 %v23952_v28  ;;  %v20664_v0 = vld [vmem:[%s22017_s3 + $0xbb4] sm:$0xf0]  ;;  %v18251_v32 = vor.u32 %v20775_v27, %v18250_v49 }
 0x5ca   : > { %10427 = vmatpush.bf16.msra.mxu1 %v16755_v54  ;;  %v20304_v54 = vld [vmem:[%s22017_s3 + $0x74] sm:$0xf0]  ;;  %10386 = vmatpush.bf16.msrb.mxu2 %v18095_v3  ;;  %v17964_v3 = vld [vmem:[%s22017_s3 + $0xcf0] sm:$0xf0]  ;;  %v17811_v12 = vor.u32 %v20664_v0, %v17810_v44 }
 0x5cb   : > { %10415 = vmatpush.bf16.msra.mxu0 %v16467_v56  ;;  %v16371_v60 = vor.u32 %v20304_v54, %v16370_v37  ;;  %v16627_v56 = vor.u32 %v20368_v55, %v16626_v2  ;;  %v17522_v18 = vld [vmem:[%s22017_s3 + $0x958] sm:$0xf]  ;;  %v20691_v2 = vld [vmem:[%s22017_s3 + $0xc94] sm:$0xf] }
 0x5cc   : > { %10251 = vmatmul.bf16.vlgmr.msra.gmra.mxu3 %v24033_v38  ;;  %v17778_v37 = vld [vmem:[%s22017_s3 + $0xb58] sm:$0xf]  ;;  %v17932_v55 = vld [vmem:[%s22017_s3 + $0xcb0] sm:$0xf0] }
 0x5cd   : > { %10295 = vmatpush.bf16.msrb.mxu3 %v18347_v29  ;;  %v20592_v29 = vld [vmem:[%s22017_s3 + $0x974] sm:$0xf0]  ;;  %v17935_v5 = vor.u32 %v20691_v2, %v17932_v55  ;;  %v17868_v44 = vld [vmem:[%s22017_s3 + $0xc30] sm:$0xf0] }
 0x5ce   : > { %10428 = vmatpush.bf16.msra.mxu1 %v16723_v11  ;;  %v16594_v11 = vld [vmem:[%s22017_s3 + $0x218] sm:$0xf]  ;;  %10387 = vmatpush.bf16.msrb.mxu2 %v18063_v57  ;;  %v7216_v57 = vperm.slane %v24792_v31, 4  ;;  %v10044_v47 = vpop.f32.mrf.mxu3 }
 0x5cf   : > { %10416 = vmatpush.bf16.msra.mxu0 %v16435_v15  ;;  %v17996_v15 = vld [vmem:[%s22017_s3 + $0xd30] sm:$0xf0]  ;;  %v16595_v23 = vor.u32 %v20360_v48, %v16594_v11  ;;  %v20656_v54 = vld [vmem:[%s22017_s3 + $0xb74] sm:$0xf0]  ;;  %v10045_v51 = vadd.f32 %v10044_v47, %v24645_v33 }
 0x5d0   : > { %v17999_v43 = vor.u32 %v20707_v42, %v17996_v15  ;;  %v17779_v10 = vor.u32 %v20656_v54, %v17778_v37  ;;  %v20584_v11 = vld [vmem:[%s22017_s3 + $0x934] sm:$0xf0] }
 0x5d1   : > { %10296 = vmatpush.bf16.msrb.mxu3 %v18315_v24  ;;  %v10135_v24 = vpop.f32.mrf.mxu2  ;;  %v17746_v48 = vld [vmem:[%s22017_s3 + $0xb18] sm:$0xf] }
 0x5d2   : > { %10429 = vmatpush.bf16.msra.mxu1 %v16691_v21  ;;  %v17587_v21 = vor.u32 %v20608_v8, %v17586_v6  ;;  %10388 = vmatpush.bf16.msrb.mxu2 %v18031_v20  ;;  %v20648_v63 = vld [vmem:[%s22017_s3 + $0xb34] sm:$0xf0]  ;;  %v24802_v6 = vadd.f32 %v10135_v24, %v24657_v9  ;;  %v20683_v20 = vld [vmem:[%s22017_s3 + $0xc54] sm:$0xf]  ;;  %v20751_v9 = vld [vmem:[%s22017_s3 + $0xe6c] sm:$0xf0] }
 0x5d3   : > { %10417 = vmatpush.bf16.msra.mxu0 %v16403_v39  ;;  %v17555_v39 = vor.u32 %v20600_v58, %v17554_v30  ;;  %v17900_v8 = vld [vmem:[%s22017_s3 + $0xc70] sm:$0xf0]  ;;  %v17747_v15 = vor.u32 %v20648_v63, %v17746_v48  ;;  %v20576_v27 = vld [vmem:[%s22017_s3 + $0x8f4] sm:$0xf0] }
 0x5d4   : > { %v17903_v33 = vor.u32 %v20683_v20, %v17900_v8  ;;  %v17714_v30 = vld [vmem:[%s22017_s3 + $0xad8] sm:$0xf]  ;;  %v20675_v58 = vld [vmem:[%s22017_s3 + $0xc14] sm:$0xf] }
 0x5d5   : > { %10297 = vmatpush.bf16.msrb.mxu3 %v18283_v25  ;;  %v17458_v25 = vld [vmem:[%s22017_s3 + $0x8d8] sm:$0xf]  ;;  %v20531_v8 = vld [vmem:[%s22017_s3 + $0x794] sm:$0xf] }
 0x5d6   : > { %10430 = vmatpush.bf16.msra.mxu1 %v16659_v62  ;;  %10389 = vmatpush.bf16.msrb.mxu2 %v17999_v43  ;;  %v17967_v62 = vor.u32 %v20699_v59, %v17964_v3  ;;  %v20640_v43 = vld [vmem:[%s22017_s3 + $0xaf4] sm:$0xf0]  ;;  %v10046_v55 = vpop.f32.mrf.mxu3 }
 0x5d7   : > { %10418 = vmatpush.bf16.msra.mxu0 %v16371_v60  ;;  %v17523_v60 = vor.u32 %v20592_v29, %v17522_v18  ;;  %v20480_v3 = vld [vmem:[%s22017_s3 + $0x5f4] sm:$0xf0]  ;;  %v17871_v29 = vor.u32 %v20675_v58, %v17868_v44  ;;  %v16564_v58 = vld [vmem:[%s22017_s3 + $0x1f8] sm:$0xf0] }
 0x5d8   : > { %v17426_v18 = vld [vmem:[%s22017_s3 + $0x898] sm:$0xf]  ;;  %v20412_v44 = vld [vmem:[%s22017_s3 + $0x3dc] sm:$0xf] }
 0x5d9   : > { %10298 = vmatpush.bf16.msrb.mxu3 %v18251_v32  ;;  %v20568_v37 = vld [vmem:[%s22017_s3 + $0x8b4] sm:$0xf0]  ;;  %v16788_v55 = vld [vmem:[%s22017_s3 + $0x3b8] sm:$0xf0] }
 0x5da   : > { %10431 = vmatpush.bf16.msra.mxu1 %v16627_v56  ;;  %v17490_v56 = vld [vmem:[%s22017_s3 + $0x918] sm:$0xf]  ;;  %10390 = vmatpush.bf16.msrb.mxu2 %v17967_v62  ;;  %v10137_v62 = vpop.f32.mrf.mxu2 }
 0x5db   : > { %10419 = vmatpush.bf16.msra.mxu0 %v16339_v45  ;;  %v10213_v45 = vpop.f32.mrf.mxu0  ;;  %v17491_v42 = vor.u32 %v20584_v11, %v17490_v56  ;;  %v17682_v54 = vld [vmem:[%s22017_s3 + $0xa98] sm:$0xf] }
 0x5dc   : > { %v20632_v2 = vld [vmem:[%s22017_s3 + $0xab4] sm:$0xf0] }
 0x5dd   : > { %10299 = vmatpush.bf16.msrb.mxu3 %v18219_v41  ;;  %v20539_v41 = vld [vmem:[%s22017_s3 + $0x7d4] sm:$0xf]  ;;  %v17042_v61 = vld [vmem:[%s22017_s3 + $0x598] sm:$0xf]  ;;  %v17683_v24 = vor.u32 %v20632_v2, %v17682_v54  ;;  %v16532_v54 = vld [vmem:[%s22017_s3 + $0x1b8] sm:$0xf0] }
 0x5de   : > { %10432 = vmatpush.bf16.msra.mxu1 %v16595_v23  ;;  %10420 = vmatmul.bf16.vlgmr.msra.gmra.mxu0 %v23875_v19  ;;  %v18154_v23 = vld [vmem:[%s22017_s3 + $0xe50] sm:$0xf]  ;;  %v10226_v49 = vpop.f32.mrf.mxu1  ;;  %v20472_v1 = vld [vmem:[%s22017_s3 + $0x5b4] sm:$0xf0]  ;;  %v20404_v2 = vld [vmem:[%s22017_s3 + $0x39c] sm:$0xf] }
 0x5df   : > { %10464 = vmatpush.bf16.msrb.mxu0 %v17587_v21  ;;  %v10058_v21 = vadd.f32 %v24572_v46, %v10045_v51  ;;  %10391 = vmatpush.bf16.msrb.mxu2 %v17935_v5  ;;  %v18155_v59 = vor.u32 %v20751_v9, %v18154_v23  ;;  %v17074_v46 = vld [vmem:[%s22017_s3 + $0x5d8] sm:$0xf]  ;;  %v17292_v51 = vld [vmem:[%s22017_s3 + $0x7b0] sm:$0xf0] }
 0x5e0   : > { %v17394_v5 = vld [vmem:[%s22017_s3 + $0x858] sm:$0xf] }
 0x5e1   : > { %10433 = vmatmul.bf16.vlgmr.msra.gmra.mxu1 %v23877_v36  ;;  %10300 = vmatpush.bf16.msrb.mxu3 %v18187_v17  ;;  %v10071_v32 = vadd.f32 %v24577_v50, %v10058_v21  ;;  %v20560_v63 = vld [vmem:[%s22017_s3 + $0x874] sm:$0xf0]  ;;  %v17043_v17 = vor.u32 %v20472_v1, %v17042_v61  ;;  %v20507_v61 = vld [vmem:[%s22017_s3 + $0x6d4] sm:$0xf] }
 0x5e2   : > { %10477 = vmatpush.bf16.msrb.mxu1 %v17843_v26  ;;  %v10214_v26 = vadd.f32 %v10213_v45, %v7216_v57  ;;  %v17324_v57 = vld [vmem:[%s22017_s3 + $0x7f0] sm:$0xf0]  ;;  %v17650_v47 = vld [vmem:[%s22017_s3 + $0xa58] sm:$0xf] }
 0x5e3   : > { %10465 = vmatpush.bf16.msrb.mxu0 %v17555_v39  ;;  %v17459_v39 = vor.u32 %v20576_v27, %v17458_v25  ;;  %10392 = vmatpush.bf16.msrb.mxu2 %v17903_v33  ;;  %v24828_v50 = vadd.f32 %v24717_v13, %v10071_v32  ;;  %v10215_v56 = vpop.f32.mrf.mxu0  ;;  %v17427_v13 = vor.u32 %v20568_v37, %v17426_v18  ;;  %v20624_v20 = vld [vmem:[%s22017_s3 + $0xa74] sm:$0xf0]  ;;  %v20523_v33 = vld [vmem:[%s22017_s3 + $0x754] sm:$0xf]  ;;  %v20340_v37 = vld [vmem:[%s22017_s3 + $0x19c] sm:$0xf] }
 0x5e4   : > { %v24816_v0 = vadd.f32 %v10226_v49, %v10214_v26  ;;  %v17327_v48 = vor.u32 %v20539_v41, %v17324_v57  ;;  %v17010_v45 = vld [vmem:[%s22017_s3 + $0x558] sm:$0xf]  ;;  %v17651_v23 = vor.u32 %v20624_v20, %v17650_v47  ;;  %v17295_v26 = vor.u32 %v20531_v8, %v17292_v51  ;;  %v17260_v27 = vld [vmem:[%s22017_s3 + $0x770] sm:$0xf0] }
 0x5e5   : > { %10301 = vmatpush.bf16.msrb.mxu3 %v18155_v59  ;;  %v17362_v9 = vld [vmem:[%s22017_s3 + $0x818] sm:$0xf]  ;;  %v16820_v59 = vld [vmem:[%s22017_s3 + $0x3f8] sm:$0xf0]  ;;  %v17228_v18 = vld [vmem:[%s22017_s3 + $0x730] sm:$0xf0]  ;;  %v16791_v56 = vor.u32 %v20404_v2, %v16788_v55 }
 0x5e6   : > { %10478 = vmatpush.bf16.msrb.mxu1 %v17811_v12  ;;  %v17715_v12 = vor.u32 %v20640_v43, %v17714_v30  ;;  %v10228_v11 = vpop.f32.mrf.mxu1  ;;  %v20552_v25 = vld [vmem:[%s22017_s3 + $0x834] sm:$0xf0]  ;;  %v20348_v43 = vld [vmem:[%s22017_s3 + $0x1dc] sm:$0xf]  ;;  %v16823_v62 = vor.u32 %v20412_v44, %v16820_v59  ;;  %v17196_v1 = vld [vmem:[%s22017_s3 + $0x6f0] sm:$0xf0] }
 0x5e7   : > { %10466 = vmatpush.bf16.msrb.mxu0 %v17523_v60  ;;  %v17075_v60 = vor.u32 %v20480_v3, %v17074_v46  ;;  %10393 = vmatpush.bf16.msrb.mxu2 %v17871_v29  ;;  %v17618_v21 = vld [vmem:[%s22017_s3 + $0xa18] sm:$0xf]  ;;  %v17363_v32 = vor.u32 %v20552_v25, %v17362_v9  ;;  %v20396_v11 = vld [vmem:[%s22017_s3 + $0x35c] sm:$0xf]  ;;  %v17199_v20 = vor.u32 %v20507_v61, %v17196_v1  ;;  %v20499_v51 = vld [vmem:[%s22017_s3 + $0x694] sm:$0xf] }
 0x5e8   : > { %v20616_v49 = vld [vmem:[%s22017_s3 + $0xa34] sm:$0xf0]  ;;  %v16468_v9 = vld [vmem:[%s22017_s3 + $0x138] sm:$0xf0]  ;;  %v17132_v44 = vld [vmem:[%s22017_s3 + $0x670] sm:$0xf0] }
 0x5e9   : > { %v16978_v46 = vld [vmem:[%s22017_s3 + $0x518] sm:$0xf]  ;;  %v20388_v25 = vld [vmem:[%s22017_s3 + $0x31c] sm:$0xf]  ;;  %v20483_v2 = vld [vmem:[%s22017_s3 + $0x614] sm:$0xf] }
 0x5ea   : > { %10479 = vmatpush.bf16.msrb.mxu1 %v17779_v10  ;;  %v18123_v10 = vor.u32 %v20743_v40, %v18122_v53  ;;  %10394 = vmatmul.bf16.vlgmr.msrb.gmra.mxu2 %v24141_v16  ;;  %v20456_v3 = vld [vmem:[%s22017_s3 + $0x534] sm:$0xf0]  ;;  %v16567_v53 = vor.u32 %v20348_v43, %v16564_v58  ;;  %v20515_v40 = vld [vmem:[%s22017_s3 + $0x714] sm:$0xf]  ;;  %v16404_v61 = vld [vmem:[%s22017_s3 + $0xb8] sm:$0xf0] }
 0x5eb   : > { %10467 = vmatpush.bf16.msrb.mxu0 %v17491_v42  ;;  %10438 = vmatpush.bf16.msra.mxu2 %v17075_v60  ;;  %v20464_v42 = vld [vmem:[%s22017_s3 + $0x574] sm:$0xf0]  ;;  %v16979_v29 = vor.u32 %v20456_v3, %v16978_v46  ;;  %v17231_v60 = vor.u32 %v20515_v40, %v17228_v18  ;;  %v20491_v58 = vld [vmem:[%s22017_s3 + $0x654] sm:$0xf]  ;;  %v20372_v1 = vld [vmem:[%s22017_s3 + $0x29c] sm:$0xf] }
 0x5ec   : > { %10302 = vmatpush.bf16.msrb.mxu3 %v18123_v10  ;;  %v17011_v30 = vor.u32 %v20464_v42, %v17010_v45  ;;  %v16946_v41 = vld [vmem:[%s22017_s3 + $0x4d8] sm:$0xf]  ;;  %v16535_v10 = vor.u32 %v20340_v37, %v16532_v54  ;;  %v24876_v42 = vpop.f32.mrf.mxu2  ;;  %v17135_v37 = vor.u32 %v20491_v58, %v17132_v44  ;;  %v17100_v55 = vld [vmem:[%s22017_s3 + $0x630] sm:$0xf0] }
 0x5ed   : > { %v20448_v57 = vld [vmem:[%s22017_s3 + $0x4f4] sm:$0xf0] }
 0x5ee   : > { %10480 = vmatpush.bf16.msrb.mxu1 %v17747_v15  ;;  %v17395_v15 = vor.u32 %v20560_v63, %v17394_v5  ;;  %v16500_v5 = vld [vmem:[%s22017_s3 + $0x178] sm:$0xf0]  ;;  %v16914_v63 = vld [vmem:[%s22017_s3 + $0x498] sm:$0xf] }
 0x5ef   : > { %10468 = vmatpush.bf16.msrb.mxu0 %v17459_v39  ;;  %10303 = vmatmul.bf16.vlgmr.msrb.gmra.mxu3 %v24290_v34  ;;  %v17619_v39 = vor.u32 %v20616_v49, %v17618_v21  ;;  %v20440_v47 = vld [vmem:[%s22017_s3 + $0x4b4] sm:$0xf0]  ;;  %v10096_v21 = vpop.f32.mrf.mxu3 }
 0x5f0   : > { %10347 = vmatpush.bf16.msra.mxu3 %v17327_v48  ;;  %10439 = vmatpush.bf16.msra.mxu2 %v17043_v17  ;;  %v16756_v48 = vld [vmem:[%s22017_s3 + $0x378] sm:$0xf0]  ;;  %v17164_v17 = vld [vmem:[%s22017_s3 + $0x6b0] sm:$0xf0]  ;;  %v16882_v49 = vld [vmem:[%s22017_s3 + $0x458] sm:$0xf] }
 0x5f1   : > { %v16759_v45 = vor.u32 %v20396_v11, %v16756_v48  ;;  %v16850_v40 = vld [vmem:[%s22017_s3 + $0x418] sm:$0xf]  ;;  %v17103_v48 = vor.u32 %v20483_v2, %v17100_v55 }
 0x5f2   : > { %10481 = vmatpush.bf16.msrb.mxu1 %v17715_v12  ;;  %v17263_v12 = vor.u32 %v20523_v33, %v17260_v27  ;;  %v20432_v33 = vld [vmem:[%s22017_s3 + $0x474] sm:$0xf0]  ;;  %v24885_v27 = vadd.f32 %v10096_v21, %v24828_v50  ;;  %v20787_v21 = vld [vmem:[%s22017_s3 + $0xf94] sm:$0xf] }
 0x5f3   : > { %10469 = vmatpush.bf16.msrb.mxu0 %v17427_v13  ;;  %v16947_v13 = vor.u32 %v20448_v57, %v16946_v41  ;;  %v16883_v3 = vor.u32 %v20432_v33, %v16882_v49  ;;  %v20424_v18 = vld [vmem:[%s22017_s3 + $0x434] sm:$0xf0] }
 0x5f4   : > { %10348 = vmatpush.bf16.msra.mxu3 %v17295_v26  ;;  %10440 = vmatpush.bf16.msra.mxu2 %v17011_v30  ;;  %v16724_v26 = vld [vmem:[%s22017_s3 + $0x338] sm:$0xf0]  ;;  %v17167_v30 = vor.u32 %v20499_v51, %v17164_v17  ;;  %v10189_v57 = vpop.f32.mrf.mxu2  ;;  %v20720_v58 = vld [vmem:[%s22017_s3 + $0xd74] sm:$0xf0] }
 0x5f5   : > { %v16727_v50 = vor.u32 %v20388_v25, %v16724_v26  ;;  %v16628_v25 = vld [vmem:[%s22017_s3 + $0x278] sm:$0xf0]  ;;  %v18316_v26 = vld [vmem:[%s22017_s3 + $0xfb0] sm:$0xf0]  ;;  %v18002_v2 = vld [vmem:[%s22017_s3 + $0xd18] sm:$0xf] }
 0x5f6   : > { %10482 = vmatpush.bf16.msrb.mxu1 %v17683_v24  ;;  %v20332_v24 = vld [vmem:[%s22017_s3 + $0x15c] sm:$0xf]  ;;  %v20712_v55 = vld [vmem:[%s22017_s3 + $0xd34] sm:$0xf0] }
 0x5f7   : > { %10470 = vmatpush.bf16.msrb.mxu0 %v17395_v15  ;;  %v16503_v8 = vor.u32 %v20332_v24, %v16500_v5  ;;  %v16915_v15 = vor.u32 %v20440_v47, %v16914_v63  ;;  %v20795_v24 = vld [vmem:[%s22017_s3 + $0xfd4] sm:$0xf]  ;;  %v18066_v47 = vld [vmem:[%s22017_s3 + $0xd98] sm:$0xf] }
 0x5f8   : > { %10349 = vmatpush.bf16.msra.mxu3 %v17263_v12  ;;  %10441 = vmatpush.bf16.msra.mxu2 %v16979_v29  ;;  %v20380_v12 = vld [vmem:[%s22017_s3 + $0x2dc] sm:$0xf]  ;;  %v20736_v29 = vld [vmem:[%s22017_s3 + $0xdf4] sm:$0xf0]  ;;  %v18348_v5 = vld [vmem:[%s22017_s3 + $0xff0] sm:$0xf0] }
 0x5fa   : > { %10483 = vmatpush.bf16.msrb.mxu1 %v17651_v23  ;;  %v20324_v23 = vld [vmem:[%s22017_s3 + $0x11c] sm:$0xf] }
 0x5fb   : > { %10471 = vmatpush.bf16.msrb.mxu0 %v17363_v32  ;;  %v16471_v43 = vor.u32 %v20324_v23, %v16468_v9  ;;  %v24889_v59 = vpop.f32.mrf.mxu0  ;;  %v20316_v32 = vld [vmem:[%s22017_s3 + $0xdc] sm:$0xf] }
 0x5fc   : > { %10350 = vmatpush.bf16.msra.mxu3 %v17231_v60  ;;  %10442 = vmatpush.bf16.msra.mxu2 %v16947_v13  ;;  %v16851_v60 = vor.u32 %v20424_v18, %v16850_v40  ;;  %v16660_v13 = vld [vmem:[%s22017_s3 + $0x2b8] sm:$0xf0] }
 0x5fd   : > { %v16663_v17 = vor.u32 %v20372_v1, %v16660_v13  ;;  %v16372_v23 = vld [vmem:[%s22017_s3 + $0x78] sm:$0xf0]  ;;  %v18252_v1 = vld [vmem:[%s22017_s3 + $0xf30] sm:$0xf0]  ;;  %v18003_v13 = vor.u32 %v20712_v55, %v18002_v2 }
 0x5fe   : > { %10484 = vmatpush.bf16.msrb.mxu1 %v17619_v39  ;;  %10472 = vmatmul.bf16.vlgmr.msrb.gmra.mxu0 %v23965_v52  ;;  %v24891_v46 = vpop.f32.mrf.mxu1  ;;  %v16436_v39 = vld [vmem:[%s22017_s3 + $0xf8] sm:$0xf0]  ;;  %v20747_v2 = vld [vmem:[%s22017_s3 + $0xe54] sm:$0xf] }
 0x5ff   : > { %10516 = vmatpush.bf16.msra.mxu0 %v16567_v53  ;;  %v16692_v53 = vld [vmem:[%s22017_s3 + $0x2f8] sm:$0xf0]  ;;  %v16439_v54 = vor.u32 %v20316_v32, %v16436_v39 }
 0x600   : > { %10351 = vmatpush.bf16.msra.mxu3 %v17199_v20  ;;  %10443 = vmatpush.bf16.msra.mxu2 %v16915_v15  ;;  %v16695_v41 = vor.u32 %v20380_v12, %v16692_v53  ;;  %v20728_v20 = vld [vmem:[%s22017_s3 + $0xdb4] sm:$0xf0]  ;;  %v20300_v15 = vld [vmem:[%s22017_s3 + $0x5c] sm:$0xf]  ;;  %v20779_v12 = vld [vmem:[%s22017_s3 + $0xf54] sm:$0xf] }
 0x601   : > { %10485 = vmatmul.bf16.vlgmr.msrb.gmra.mxu1 %v24005_v22  ;;  %v20364_v9 = vld [vmem:[%s22017_s3 + $0x25c] sm:$0xf]  ;;  %v18067_v49 = vor.u32 %v20728_v20, %v18066_v47  ;;  %v16375_v33 = vor.u32 %v20300_v15, %v16372_v23  ;;  %v18284_v53 = vld [vmem:[%s22017_s3 + $0xf70] sm:$0xf0] }
 0x602   : > { %10529 = vmatpush.bf16.msra.mxu1 %v16823_v62  ;;  %v18098_v62 = vld [vmem:[%s22017_s3 + $0xdd8] sm:$0xf]  ;;  %v16631_v44 = vor.u32 %v20364_v9, %v16628_v25  ;;  %v20356_v32 = vld [vmem:[%s22017_s3 + $0x21c] sm:$0xf]  ;;  %v18287_v57 = vor.u32 %v20779_v12, %v18284_v53 }
 0x603   : > { %10517 = vmatpush.bf16.msra.mxu0 %v16535_v10  ;;  %v20308_v10 = vld [vmem:[%s22017_s3 + $0x9c] sm:$0xf]  ;;  %v18099_v11 = vor.u32 %v20736_v29, %v18098_v62  ;;  %v17906_v53 = vld [vmem:[%s22017_s3 + $0xc58] sm:$0xf] }
 0x604   : > { %10352 = vmatpush.bf16.msra.mxu3 %v17167_v30  ;;  %10444 = vmatpush.bf16.msra.mxu2 %v16883_v3  ;;  %v16407_v63 = vor.u32 %v20308_v10, %v16404_v61  ;;  %v20292_v30 = vld [vmem:[%s22017_s3 + $0x1c] sm:$0xf]  ;;  %v20771_v61 = vld [vmem:[%s22017_s3 + $0xf14] sm:$0xf] }
 0x605   : > { %v16340_v3 = vld [vmem:[%s22017_s3 + $0x38] sm:$0xf0]  ;;  %v18255_v47 = vor.u32 %v20771_v61, %v18252_v1 }
 0x606   : > { %10530 = vmatpush.bf16.msra.mxu1 %v16791_v56  ;;  %v10098_v56 = vpop.f32.mrf.mxu3  ;;  %v10280_v51 = vpop.f32.mrf.mxu1  ;;  %v16596_v39 = vld [vmem:[%s22017_s3 + $0x238] sm:$0xf0] }
 0x607   : > { %10518 = vmatpush.bf16.msra.mxu0 %v16503_v8  ;;  %v10267_v8 = vpop.f32.mrf.mxu0  ;;  %v20604_v40 = vld [vmem:[%s22017_s3 + $0x9dc] sm:$0xf]  ;;  %v20763_v51 = vld [vmem:[%s22017_s3 + $0xed4] sm:$0xf] }
 0x608   : > { %10353 = vmatpush.bf16.msra.mxu3 %v17135_v37  ;;  %10445 = vmatpush.bf16.msra.mxu2 %v16851_v60  ;;  %v17588_v62 = vld [vmem:[%s22017_s3 + $0x9f8] sm:$0xf0] }
 0x609   : > { %v20668_v29 = vld [vmem:[%s22017_s3 + $0xbdc] sm:$0xf]  ;;  %v17591_v60 = vor.u32 %v20604_v40, %v17588_v62  ;;  %v20688_v40 = vld [vmem:[%s22017_s3 + $0xc74] sm:$0xf0] }
 0x60a   : > { %10531 = vmatpush.bf16.msra.mxu1 %v16759_v45  ;;  %v18351_v45 = vor.u32 %v20795_v24, %v18348_v5  ;;  %v17844_v37 = vld [vmem:[%s22017_s3 + $0xbf8] sm:$0xf0] }
 0x60b   : > { %10519 = vmatpush.bf16.msra.mxu0 %v16471_v43  ;;  %v18034_v43 = vld [vmem:[%s22017_s3 + $0xd58] sm:$0xf]  ;;  %10446 = vmatmul.bf16.vlgmr.msra.gmra.mxu2 %v23952_v28  ;;  %v17847_v10 = vor.u32 %v20668_v29, %v17844_v37  ;;  %v20596_v56 = vld [vmem:[%s22017_s3 + $0x99c] sm:$0xf] }
 0x60c   : > { %10490 = vmatpush.bf16.msrb.mxu2 %v18099_v11  ;;  %10354 = vmatpush.bf16.msra.mxu3 %v17103_v48  ;;  %v18035_v18 = vor.u32 %v20720_v58, %v18034_v43  ;;  %v17556_v24 = vld [vmem:[%s22017_s3 + $0x9b8] sm:$0xf0]  ;;  %v17970_v48 = vld [vmem:[%s22017_s3 + $0xcd8] sm:$0xf]  ;;  %v20755_v43 = vld [vmem:[%s22017_s3 + $0xe94] sm:$0xf] }
 0x60d   : > { %v20660_v5 = vld [vmem:[%s22017_s3 + $0xb9c] sm:$0xf]  ;;  %v17559_v20 = vor.u32 %v20596_v56, %v17556_v24  ;;  %v18188_v58 = vld [vmem:[%s22017_s3 + $0xeb0] sm:$0xf0]  ;;  %v17874_v56 = vld [vmem:[%s22017_s3 + $0xc18] sm:$0xf] }
 0x60e   : > { %10532 = vmatpush.bf16.msra.mxu1 %v16727_v50  ;;  %v18319_v50 = vor.u32 %v20787_v21, %v18316_v26  ;;  %v17812_v11 = vld [vmem:[%s22017_s3 + $0xbb8] sm:$0xf0]  ;;  %v17938_v21 = vld [vmem:[%s22017_s3 + $0xc98] sm:$0xf]  ;;  %v10148_v12 = vpop.f32.mrf.mxu3  ;;  %v18191_v62 = vor.u32 %v20755_v43, %v18188_v58 }
 0x60f   : > { %10520 = vmatpush.bf16.msra.mxu0 %v16439_v54  ;;  %10355 = vmatmul.bf16.vlgmr.msra.gmra.mxu3 %v24033_v38  ;;  %v16343_v54 = vor.u32 %v20292_v30, %v16340_v3  ;;  %v17815_v8 = vor.u32 %v20660_v5, %v17812_v11  ;;  %v17524_v23 = vld [vmem:[%s22017_s3 + $0x978] sm:$0xf0]  ;;  %v20696_v26 = vld [vmem:[%s22017_s3 + $0xcb4] sm:$0xf0] }
 0x610   : > { %10399 = vmatpush.bf16.msrb.mxu3 %v18351_v45  ;;  %10491 = vmatpush.bf16.msrb.mxu2 %v18067_v49  ;;  %v20588_v45 = vld [vmem:[%s22017_s3 + $0x95c] sm:$0xf] }
 0x611   : > { %v20652_v9 = vld [vmem:[%s22017_s3 + $0xb5c] sm:$0xf] }
 0x612   : > { %10533 = vmatpush.bf16.msra.mxu1 %v16695_v41  ;;  %v16599_v41 = vor.u32 %v20356_v32, %v16596_v39  ;;  %v17780_v25 = vld [vmem:[%s22017_s3 + $0xb78] sm:$0xf0] }
 0x613   : > { %10521 = vmatpush.bf16.msra.mxu0 %v16407_v63  ;;  %v20704_v63 = vld [vmem:[%s22017_s3 + $0xcf4] sm:$0xf0]  ;;  %v17783_v30 = vor.u32 %v20652_v9, %v17780_v25  ;;  %v17492_v3 = vld [vmem:[%s22017_s3 + $0x938] sm:$0xf0] }
 0x614   : > { %10400 = vmatpush.bf16.msrb.mxu3 %v18319_v50  ;;  %10492 = vmatpush.bf16.msrb.mxu2 %v18035_v18  ;;  %v17971_v15 = vor.u32 %v20704_v63, %v17970_v48  ;;  %v17939_v50 = vor.u32 %v20696_v26, %v17938_v21  ;;  %v20644_v32 = vld [vmem:[%s22017_s3 + $0xb1c] sm:$0xf]  ;;  %v10149_v18 = vadd.f32 %v10148_v12, %v24802_v6  ;;  %v17330_v21 = vld [vmem:[%s22017_s3 + $0x7d8] sm:$0xf] }
 0x615   : > { %v17748_v39 = vld [vmem:[%s22017_s3 + $0xb38] sm:$0xf0]  ;;  %v17907_v6 = vor.u32 %v20688_v40, %v17906_v53  ;;  %v20544_v26 = vld [vmem:[%s22017_s3 + $0x7f4] sm:$0xf0] }
 0x616   : > { %10534 = vmatpush.bf16.msra.mxu1 %v16663_v17  ;;  %v18220_v17 = vld [vmem:[%s22017_s3 + $0xef0] sm:$0xf0]  ;;  %v20572_v55 = vld [vmem:[%s22017_s3 + $0x8dc] sm:$0xf]  ;;  %v10150_v25 = vpop.f32.mrf.mxu3  ;;  %v17298_v12 = vld [vmem:[%s22017_s3 + $0x798] sm:$0xf] }
 0x617   : > { %10522 = vmatpush.bf16.msra.mxu0 %v16375_v33  ;;  %v18223_v49 = vor.u32 %v20763_v51, %v18220_v17  ;;  %v7217_v33 = vperm.slane %v24792_v31, 5  ;;  %v20636_v61 = vld [vmem:[%s22017_s3 + $0xadc] sm:$0xf]  ;;  %v20536_v53 = vld [vmem:[%s22017_s3 + $0x7b4] sm:$0xf0] }
 0x618   : > { %10401 = vmatpush.bf16.msrb.mxu3 %v18287_v57  ;;  %10493 = vmatpush.bf16.msrb.mxu2 %v18003_v13  ;;  %v17716_v1 = vld [vmem:[%s22017_s3 + $0xaf8] sm:$0xf0]  ;;  %v20680_v13 = vld [vmem:[%s22017_s3 + $0xc34] sm:$0xf0] }
 0x619   : > { %v17076_v11 = vld [vmem:[%s22017_s3 + $0x5f8] sm:$0xf0] }
 0x61a   : > { %10535 = vmatpush.bf16.msra.mxu1 %v16631_v44  ;;  %v20580_v44 = vld [vmem:[%s22017_s3 + $0x91c] sm:$0xf] }
 0x61b   : > { %10523 = vmatpush.bf16.msra.mxu0 %v16343_v54  ;;  %v10317_v29 = vpop.f32.mrf.mxu0  ;;  %v17495_v37 = vor.u32 %v20580_v44, %v17492_v3  ;;  %v17751_v54 = vor.u32 %v20644_v32, %v17748_v39  ;;  %v20564_v51 = vld [vmem:[%s22017_s3 + $0x89c] sm:$0xf] }
 0x61c   : > { %10402 = vmatpush.bf16.msrb.mxu3 %v18255_v47  ;;  %10494 = vmatpush.bf16.msrb.mxu2 %v17971_v15  ;;  %v10318_v57 = vadd.f32 %v10317_v29, %v7217_v33  ;;  %v17719_v47 = vor.u32 %v20636_v61, %v17716_v1  ;;  %v17428_v15 = vld [vmem:[%s22017_s3 + $0x8b8] sm:$0xf0]  ;;  %v20831_v61 = vld [vmem:[%s22027_s13 + $0xec] sm:$0xf0]  ;;  %v18602_v1 = vld [vmem:[%s22027_s13 + $0x1e0] sm:$0xf] }
 0x61d   : > { %v17684_v9 = vld [vmem:[%s22017_s3 + $0xab8] sm:$0xf0] }
 0x61e   : > { %10536 = vmatpush.bf16.msra.mxu1 %v16599_v41  ;;  %10524 = vmatmul.bf16.vlgmr.msra.gmra.mxu0 %v23875_v19  ;;  %v17527_v19 = vor.u32 %v20588_v45, %v17524_v23  ;;  %v10162_v41 = vadd.f32 %v24729_v4, %v10149_v18  ;;  %v20476_v4 = vld [vmem:[%s22017_s3 + $0x5dc] sm:$0xf]  ;;  %v17875_v45 = vor.u32 %v20680_v13, %v17874_v56  ;;  %v20863_v56 = vld [vmem:[%s22027_s13 + $0x1ec] sm:$0xf0] }
 0x61f   : > { %10568 = vmatpush.bf16.msrb.mxu0 %v17591_v60  ;;  %v10330_v60 = vpop.f32.mrf.mxu1  ;;  %v20628_v23 = vld [vmem:[%s22017_s3 + $0xa9c] sm:$0xf] }
 0x620   : > { %10403 = vmatpush.bf16.msrb.mxu3 %v18223_v49  ;;  %10495 = vmatpush.bf16.msrb.mxu2 %v17939_v50  ;;  %v24973_v24 = vadd.f32 %v10330_v60, %v10318_v57  ;;  %v10175_v48 = vadd.f32 %v24731_v7, %v10162_v41  ;;  %v17079_v49 = vor.u32 %v20476_v4, %v17076_v11  ;;  %v20556_v44 = vld [vmem:[%s22017_s3 + $0x85c] sm:$0xf]  ;;  %v17266_v57 = vld [vmem:[%s22017_s3 + $0x758] sm:$0xf] }
 0x621   : > { %10537 = vmatmul.bf16.vlgmr.msra.gmra.mxu1 %v23877_v36  ;;  %v10239_v36 = vpop.f32.mrf.mxu2  ;;  %v17687_v58 = vor.u32 %v20628_v23, %v17684_v9  ;;  %v17331_v50 = vor.u32 %v20544_v26, %v17330_v21  ;;  %v17396_v3 = vld [vmem:[%s22017_s3 + $0x878] sm:$0xf0]  ;;  %v20528_v60 = vld [vmem:[%s22017_s3 + $0x774] sm:$0xf0]  ;;  %v20859_v23 = vld [vmem:[%s22027_s13 + $0x1cc] sm:$0xf0] }
 0x622   : > { %10581 = vmatpush.bf16.msrb.mxu1 %v17847_v10  ;;  %v24959_v31 = vadd.f32 %v10239_v36, %v24816_v0  ;;  %v18156_v0 = vld [vmem:[%s22017_s3 + $0xe70] sm:$0xf0]  ;;  %v17460_v10 = vld [vmem:[%s22017_s3 + $0x8f8] sm:$0xf0]  ;;  %v24985_v7 = vadd.f32 %v24876_v42, %v10175_v48  ;;  %v17431_v42 = vor.u32 %v20564_v51, %v17428_v15  ;;  %v17399_v29 = vor.u32 %v20556_v44, %v17396_v3  ;;  %v18586_v15 = vld [vmem:[%s22027_s13 + $0x1c0] sm:$0xf] }
 0x623   : > { %10569 = vmatpush.bf16.msrb.mxu0 %v17559_v20  ;;  %v18159_v5 = vor.u32 %v20747_v2, %v18156_v0  ;;  %v17463_v63 = vor.u32 %v20572_v55, %v17460_v10  ;;  %v20739_v20 = vld [vmem:[%s22017_s3 + $0xe14] sm:$0xf]  ;;  %v10319_v43 = vpop.f32.mrf.mxu0  ;;  %v20620_v32 = vld [vmem:[%s22017_s3 + $0xa5c] sm:$0xf]  ;;  %v17299_v55 = vor.u32 %v20536_v53, %v17298_v12  ;;  %v18474_v10 = vld [vmem:[%s22027_s13 + $0xe0] sm:$0xf]  ;;  %v17267_v48 = vor.u32 %v20528_v60, %v17266_v57 }
 0x624   : > { %10404 = vmatpush.bf16.msrb.mxu3 %v18191_v62  ;;  %10496 = vmatpush.bf16.msrb.mxu2 %v17907_v6  ;;  %v17652_v39 = vld [vmem:[%s22017_s3 + $0xa78] sm:$0xf0]  ;;  %v18442_v43 = vld [vmem:[%s22027_s13 + $0xa0] sm:$0xf]  ;;  %v20855_v44 = vld [vmem:[%s22027_s13 + $0x1ac] sm:$0xf0] }
 0x625   : > { %v20460_v18 = vld [vmem:[%s22017_s3 + $0x55c] sm:$0xf]  ;;  %v20504_v12 = vld [vmem:[%s22017_s3 + $0x6b4] sm:$0xf0] }
 0x626   : > { %10582 = vmatpush.bf16.msrb.mxu1 %v17815_v8  ;;  %v18124_v8 = vld [vmem:[%s22017_s3 + $0xe30] sm:$0xf0]  ;;  %v17012_v62 = vld [vmem:[%s22017_s3 + $0x578] sm:$0xf0]  ;;  %v17138_v57 = vld [vmem:[%s22017_s3 + $0x658] sm:$0xf] }
 0x627   : > { %10570 = vmatpush.bf16.msrb.mxu0 %v17527_v19  ;;  %v18127_v33 = vor.u32 %v20739_v20, %v18124_v8  ;;  %v20468_v19 = vld [vmem:[%s22017_s3 + $0x59c] sm:$0xf]  ;;  %v10332_v36 = vpop.f32.mrf.mxu1  ;;  %v17015_v6 = vor.u32 %v20460_v18, %v17012_v62  ;;  %v20520_v20 = vld [vmem:[%s22017_s3 + $0x734] sm:$0xf0]  ;;  %v18603_v8 = vor.u32 %v20863_v56, %v18602_v1  ;;  %v20819_v18 = vld [vmem:[%s22027_s13 + $0x8c] sm:$0xf0] }
 0x628   : > { %10405 = vmatpush.bf16.msrb.mxu3 %v18159_v5  ;;  %10497 = vmatpush.bf16.msrb.mxu2 %v17875_v45  ;;  %v17364_v2 = vld [vmem:[%s22017_s3 + $0x838] sm:$0xf0]  ;;  %v20827_v45 = vld [vmem:[%s22027_s13 + $0xcc] sm:$0xf0]  ;;  %v18554_v62 = vld [vmem:[%s22027_s13 + $0x180] sm:$0xf] }
 0x629   : > { %v10241_v17 = vpop.f32.mrf.mxu2  ;;  %v20612_v0 = vld [vmem:[%s22017_s3 + $0xa1c] sm:$0xf]  ;;  %v20496_v60 = vld [vmem:[%s22017_s3 + $0x674] sm:$0xf0]  ;;  %v18410_v1 = vld [vmem:[%s22027_s13 + $0x60] sm:$0xf] }
 0x62a   : > { %10583 = vmatpush.bf16.msrb.mxu1 %v17783_v30  ;;  %v17044_v30 = vld [vmem:[%s22017_s3 + $0x5b8] sm:$0xf0]  ;;  %v18458_v17 = vld [vmem:[%s22027_s13 + $0xc0] sm:$0xf]  ;;  %v20815_v56 = vld [vmem:[%s22027_s13 + $0x6c] sm:$0xf0] }
 0x62b   : > { %10571 = vmatpush.bf16.msrb.mxu0 %v17495_v37  ;;  %v17047_v40 = vor.u32 %v20468_v19, %v17044_v30  ;;  %v17655_v37 = vor.u32 %v20620_v32, %v17652_v39  ;;  %10498 = vmatmul.bf16.vlgmr.msrb.gmra.mxu2 %v24141_v16  ;;  %v17620_v41 = vld [vmem:[%s22017_s3 + $0xa38] sm:$0xf0]  ;;  %v18459_v26 = vor.u32 %v20827_v45, %v18458_v17  ;;  %v17170_v39 = vld [vmem:[%s22017_s3 + $0x698] sm:$0xf] }
 0x62c   : > { %10542 = vmatpush.bf16.msra.mxu2 %v17079_v49  ;;  %10406 = vmatpush.bf16.msrb.mxu3 %v18127_v33  ;;  %v20452_v13 = vld [vmem:[%s22017_s3 + $0x51c] sm:$0xf]  ;;  %v17623_v11 = vor.u32 %v20612_v0, %v17620_v41  ;;  %v17202_v49 = vld [vmem:[%s22017_s3 + $0x6d8] sm:$0xf]  ;;  %v18587_v19 = vor.u32 %v20859_v23, %v18586_v15  ;;  %v18394_v23 = vld [vmem:[%s22027_s13 + $0x40] sm:$0xf] }
 0x62d   : > { %v16980_v5 = vld [vmem:[%s22017_s3 + $0x538] sm:$0xf0]  ;;  %v20512_v33 = vld [vmem:[%s22017_s3 + $0x6f4] sm:$0xf0] }
 0x62e   : > { %10584 = vmatpush.bf16.msrb.mxu1 %v17751_v54  ;;  %v20548_v54 = vld [vmem:[%s22017_s3 + $0x81c] sm:$0xf]  ;;  %v16983_v51 = vor.u32 %v20452_v13, %v16980_v5  ;;  %v17203_v3 = vor.u32 %v20512_v33, %v17202_v49  ;;  %v18538_v13 = vld [vmem:[%s22027_s13 + $0x160] sm:$0xf]  ;;  %v20847_v5 = vld [vmem:[%s22027_s13 + $0x16c] sm:$0xf0] }
 0x62f   : > { %10572 = vmatpush.bf16.msrb.mxu0 %v17463_v63  ;;  %10407 = vmatmul.bf16.vlgmr.msrb.gmra.mxu3 %v24290_v34  ;;  %v17367_v4 = vor.u32 %v20548_v54, %v17364_v2  ;;  %v18475_v63 = vor.u32 %v20831_v61, %v18474_v10  ;;  %v20444_v9 = vld [vmem:[%s22017_s3 + $0x4dc] sm:$0xf]  ;;  %v18539_v17 = vor.u32 %v20847_v5, %v18538_v13  ;;  %v18354_v49 = vld [vmem:[%s22017_s3 + $0xfd8] sm:$0xf]  ;;  %v20959_v13 = vld [vmem:[%s22027_s13 + $0x4ec] sm:$0xf0] }
 0x630   : > { %10451 = vmatpush.bf16.msra.mxu3 %v17331_v50  ;;  %10543 = vmatpush.bf16.msra.mxu2 %v17047_v40  ;;  %v16948_v25 = vld [vmem:[%s22017_s3 + $0x4f8] sm:$0xf0]  ;;  %v18426_v40 = vld [vmem:[%s22027_s13 + $0x80] sm:$0xf]  ;;  %v20800_v33 = vld [vmem:[%s22017_s3 + $0xff4] sm:$0xf0] }
 0x631   : > { %v16951_v30 = vor.u32 %v20444_v9, %v16948_v25  ;;  %v20436_v36 = vld [vmem:[%s22017_s3 + $0x49c] sm:$0xf]  ;;  %v18427_v41 = vor.u32 %v20819_v18, %v18426_v40  ;;  %v20811_v9 = vld [vmem:[%s22027_s13 + $0x4c] sm:$0xf0]  ;;  %v18522_v25 = vld [vmem:[%s22027_s13 + $0x140] sm:$0xf] }
 0x632   : > { %10585 = vmatpush.bf16.msrb.mxu1 %v17719_v47  ;;  %v17234_v47 = vld [vmem:[%s22017_s3 + $0x718] sm:$0xf]  ;;  %v16916_v50 = vld [vmem:[%s22017_s3 + $0x4b8] sm:$0xf0] }
 0x633   : > { %10573 = vmatpush.bf16.msrb.mxu0 %v17431_v42  ;;  %v17235_v21 = vor.u32 %v20520_v20, %v17234_v47  ;;  %v20823_v42 = vld [vmem:[%s22027_s13 + $0xac] sm:$0xf0]  ;;  %v16919_v53 = vor.u32 %v20436_v36, %v16916_v50  ;;  %v20428_v54 = vld [vmem:[%s22017_s3 + $0x45c] sm:$0xf]  ;;  %v17139_v47 = vor.u32 %v20496_v60, %v17138_v57  ;;  %v18411_v20 = vor.u32 %v20815_v56, %v18410_v1  ;;  %v20792_v40 = vld [vmem:[%s22017_s3 + $0xfb4] sm:$0xf0] }
 0x634   : > { %10452 = vmatpush.bf16.msra.mxu3 %v17299_v55  ;;  %10544 = vmatpush.bf16.msra.mxu2 %v17015_v6  ;;  %v18443_v32 = vor.u32 %v20823_v42, %v18442_v43  ;;  %v16884_v2 = vld [vmem:[%s22017_s3 + $0x478] sm:$0xf0]  ;;  %v17171_v55 = vor.u32 %v20504_v12, %v17170_v39  ;;  %v18395_v43 = vor.u32 %v20811_v9, %v18394_v23  ;;  %v20807_v39 = vld [vmem:[%s22027_s13 + $0x2c] sm:$0xf0]  ;;  %v18506_v12 = vld [vmem:[%s22027_s13 + $0x120] sm:$0xf] }
 0x635   : > { %v16887_v61 = vor.u32 %v20428_v54, %v16884_v2  ;;  %v20724_v42 = vld [vmem:[%s22017_s3 + $0xd9c] sm:$0xf]  ;;  %v18490_v57 = vld [vmem:[%s22027_s13 + $0x100] sm:$0xf]  ;;  %v20835_v60 = vld [vmem:[%s22027_s13 + $0x10c] sm:$0xf0] }
 0x636   : > { %10586 = vmatpush.bf16.msrb.mxu1 %v17687_v58  ;;  %v18570_v58 = vld [vmem:[%s22027_s13 + $0x1a0] sm:$0xf]  ;;  %v20700_v23 = vld [vmem:[%s22017_s3 + $0xcdc] sm:$0xf] }
 0x637   : > { %10574 = vmatpush.bf16.msrb.mxu0 %v17399_v29  ;;  %v10200_v29 = vpop.f32.mrf.mxu3  ;;  %v18986_v56 = vld [vmem:[%s22027_s13 + $0x4e0] sm:$0xf] }
 0x638   : > { %10453 = vmatpush.bf16.msra.mxu3 %v17267_v48  ;;  %10545 = vmatpush.bf16.msra.mxu2 %v16983_v51  ;;  %v25042_v0 = vadd.f32 %v10200_v29, %v24985_v7  ;;  %v20732_v48 = vld [vmem:[%s22017_s3 + $0xddc] sm:$0xf]  ;;  %v20488_v51 = vld [vmem:[%s22017_s3 + $0x634] sm:$0xf0] }
 0x639   : > { %v20716_v29 = vld [vmem:[%s22017_s3 + $0xd5c] sm:$0xf] }
 0x63a   : > { %10587 = vmatpush.bf16.msrb.mxu1 %v17655_v37  ;;  %v20851_v37 = vld [vmem:[%s22027_s13 + $0x18c] sm:$0xf0] }
 0x63b   : > { %10575 = vmatpush.bf16.msrb.mxu0 %v17367_v4  ;;  %v25046_v6 = vpop.f32.mrf.mxu0  ;;  %v18555_v7 = vor.u32 %v20851_v37, %v18554_v62  ;;  %v20420_v4 = vld [vmem:[%s22017_s3 + $0x41c] sm:$0xf] }
 0x63c   : > { %10454 = vmatpush.bf16.msra.mxu3 %v17235_v21  ;;  %10546 = vmatpush.bf16.msra.mxu2 %v16951_v30  ;;  %v18036_v37 = vld [vmem:[%s22017_s3 + $0xd78] sm:$0xf0] }
 0x63d   : > { %v18039_v1 = vor.u32 %v20716_v29, %v18036_v37  ;;  %v17908_v29 = vld [vmem:[%s22017_s3 + $0xc78] sm:$0xf0] }
 0x63e   : > { %10588 = vmatpush.bf16.msrb.mxu1 %v17623_v11  ;;  %10576 = vmatmul.bf16.vlgmr.msrb.gmra.mxu0 %v23965_v52  ;;  %v18571_v52 = vor.u32 %v20855_v44, %v18570_v58  ;;  %v25048_v10 = vpop.f32.mrf.mxu1  ;;  %v16852_v11 = vld [vmem:[%s22017_s3 + $0x438] sm:$0xf0] }
 0x63f   : > { %12182 = vmatpush.bf16.msra.mxu0 %v18475_v63  ;;  %v18100_v63 = vld [vmem:[%s22017_s3 + $0xdf8] sm:$0xf0]  ;;  %v16855_v15 = vor.u32 %v20420_v4, %v16852_v11  ;;  %v10202_v21 = vpop.f32.mrf.mxu3 }
 0x640   : > { %10455 = vmatpush.bf16.msra.mxu3 %v17203_v3  ;;  %10547 = vmatpush.bf16.msra.mxu2 %v16919_v53  ;;  %v18068_v58 = vld [vmem:[%s22017_s3 + $0xdb8] sm:$0xf0]  ;;  %v18355_v3 = vor.u32 %v20800_v33, %v18354_v49  ;;  %v18322_v53 = vld [vmem:[%s22017_s3 + $0xf98] sm:$0xf] }
 0x641   : > { %10589 = vmatmul.bf16.vlgmr.msrb.gmra.mxu1 %v24005_v22  ;;  %v25033_v22 = vpop.f32.mrf.mxu2  ;;  %v18071_v18 = vor.u32 %v20724_v42, %v18068_v58  ;;  %v18323_v2 = vor.u32 %v20792_v40, %v18322_v53  ;;  %v20708_v4 = vld [vmem:[%s22017_s3 + $0xd1c] sm:$0xf]  ;;  %v20768_v49 = vld [vmem:[%s22017_s3 + $0xef4] sm:$0xf0]  ;;  %v20947_v53 = vld [vmem:[%s22027_s13 + $0x48c] sm:$0xf0] }
 0x642   : > { %12195 = vmatpush.bf16.msra.mxu1 %v18603_v8  ;;  %v17106_v8 = vld [vmem:[%s22017_s3 + $0x618] sm:$0xf]  ;;  %v18004_v11 = vld [vmem:[%s22017_s3 + $0xd38] sm:$0xf0] }
 0x643   : > { %12183 = vmatpush.bf16.msra.mxu0 %v18459_v26  ;;  %v20843_v26 = vld [vmem:[%s22027_s13 + $0x14c] sm:$0xf0]  ;;  %v17107_v30 = vor.u32 %v20488_v51, %v17106_v8  ;;  %v10371_v44 = vpop.f32.mrf.mxu0  ;;  %v18258_v8 = vld [vmem:[%s22017_s3 + $0xf18] sm:$0xf]  ;;  %v17940_v42 = vld [vmem:[%s22017_s3 + $0xcb8] sm:$0xf0] }
 0x644   : > { %10456 = vmatpush.bf16.msra.mxu3 %v17171_v55  ;;  %10548 = vmatpush.bf16.msra.mxu2 %v16887_v61  ;;  %v18523_v50 = vor.u32 %v20843_v26, %v18522_v25  ;;  %v18362_v55 = vld [vmem:[%s22027_s13] sm:$0xf]  ;;  %v20784_v61 = vld [vmem:[%s22017_s3 + $0xf74] sm:$0xf0] }
 0x645   : > { %v20776_v51 = vld [vmem:[%s22017_s3 + $0xf34] sm:$0xf0] }
 0x646   : > { %12196 = vmatpush.bf16.msra.mxu1 %v18587_v19  ;;  %v18103_v19 = vor.u32 %v20732_v48, %v18100_v63  ;;  %v10384_v36 = vpop.f32.mrf.mxu1  ;;  %v18491_v48 = vor.u32 %v20835_v60, %v18490_v57  ;;  %v18226_v26 = vld [vmem:[%s22017_s3 + $0xed8] sm:$0xf] }
 0x647   : > { %12184 = vmatpush.bf16.msra.mxu0 %v18443_v32  ;;  %v18378_v32 = vld [vmem:[%s22027_s13 + $0x20] sm:$0xf]  ;;  %v18227_v58 = vor.u32 %v20768_v49, %v18226_v26  ;;  %v18194_v36 = vld [vmem:[%s22017_s3 + $0xe98] sm:$0xf] }
 0x648   : > { %10457 = vmatpush.bf16.msra.mxu3 %v17139_v47  ;;  %10549 = vmatpush.bf16.msra.mxu2 %v16855_v15  ;;  %v18379_v62 = vor.u32 %v20807_v39, %v18378_v32  ;;  %v10621_v47 = vmax.f32 %v24725_v14, 0.0  ;;  %v20955_v15 = vld [vmem:[%s22027_s13 + $0x4cc] sm:$0xf0]  ;;  %v18259_v14 = vor.u32 %v20776_v51, %v18258_v8  ;;  %v18906_v8 = vld [vmem:[%s22027_s13 + $0x440] sm:$0xf] }
 0x649   : > { %v10293_v45 = vpop.f32.mrf.mxu2  ;;  %v25111_v32 = vld [vmem:[%s22024_s12] sm:$0xff]  ;;  %v18714_v26 = vld [vmem:[%s22027_s13 + $0x2c0] sm:$0xf]  ;;  %s21550_s12 = sshra.s32 %s12931_s11, 4  ;;  %s21551_s12 = int_to_ptr.hbm [resolvable:$true] %s21550_s12 }
 0x64a   : > { %12197 = vmatpush.bf16.msra.mxu1 %v18571_v52  ;;  %v20839_v52 = vld [vmem:[%s22027_s13 + $0x12c] sm:$0xf0]  ;;  %v18970_v45 = vld [vmem:[%s22027_s13 + $0x4c0] sm:$0xf]  ;;  %v25098_v25 = vpack.c.bf16 %v10621_v47, %v10621_v47  ;;  %v7218_v39 = vperm.slane %v25111_v32, 6  ;;  %s21552_s7 = scalar_lea.hbm %s21551_s12, 8  ;;  %p21557_p1 = scmp.lt.s32.totalorder %s21551_s12, %s25933_s5 }
 0x64b   : > { %12185 = vmatpush.bf16.msra.mxu0 %v18427_v41  ;;  %v18507_v54 = vor.u32 %v20839_v52, %v18506_v12  ;;  %v20803_v41 = vld [vmem:[%s22027_s13 + $0xc] sm:$0xf0]  ;;  %10550 = vmatmul.bf16.vlgmr.msra.gmra.mxu2 %v23952_v28  ;;  %v10620_v28 = vmax.f32 %v24636_v35, 0.0  ;;  %v17972_v35 = vld [vmem:[%s22017_s3 + $0xcf8] sm:$0xf0]  ;;  %v18971_v21 = vor.u32 %v20955_v15, %v18970_v45  ;;  %p21553_p5 = scmp.ne.s32.totalorder %s21551_s12, %s21552_s7  ;;  %p21558_p4 = scmp.lt.s32.totalorder %s21556_s1, %s21552_s7 }
 0x64c   : > { %10594 = vmatpush.bf16.msrb.mxu2 %v18103_v19  ;;  %10458 = vmatpush.bf16.msra.mxu3 %v17107_v30  ;;  %v18363_v5 = vor.u32 %v20803_v41, %v18362_v55  ;;  %v17975_v33 = vor.u32 %v20700_v23, %v17972_v35  ;;  %v18954_v19 = vld [vmem:[%s22027_s13 + $0x4a0] sm:$0xf]  ;;  %v20951_v30 = vld [vmem:[%s22027_s13 + $0x4ac] sm:$0xf0]  ;;  %v18162_v55 = vld [vmem:[%s22017_s3 + $0xe58] sm:$0xf] }
 0x64d   : > { %v25096_v9 = vpack.c.bf16 %v10620_v28, %v10620_v28  ;;  %v18955_v44 = vor.u32 %v20951_v30, %v18954_v19  ;;  %v18938_v52 = vld [vmem:[%s22027_s13 + $0x480] sm:$0xf]  ;;  %v20752_v41 = vld [vmem:[%s22017_s3 + $0xe74] sm:$0xf0]  ;;  %v20895_v28 = vld [vmem:[%s22027_s13 + $0x2ec] sm:$0xf0]  ;;  %p21554_p13 = pnand %p21553_p5, %p21870_p2  ;;  %p21559_p0 = por %p21558_p4, %p21557_p1 }
 0x64e   : > { %12198 = vmatpush.bf16.msra.mxu1 %v18555_v7  ;;  %v18290_v7 = vld [vmem:[%s22017_s3 + $0xf58] sm:$0xf]  ;;  %v20939_v15 = vld [vmem:[%s22027_s13 + $0x44c] sm:$0xf0]  ;;  %v20540_v23 = vld [vmem:[%s22017_s3 + $0x7dc] sm:$0xf] }
 0x64f   : > { %12186 = vmatpush.bf16.msra.mxu0 %v18411_v20  ;;  %10459 = vmatmul.bf16.vlgmr.msra.gmra.mxu3 %v24033_v38  ;;  %v18291_v63 = vor.u32 %v20784_v61, %v18290_v7  ;;  %v18987_v20 = vor.u32 %v20959_v13, %v18986_v56  ;;  %v25116_v40 = vpop.f32.mrf.mxu3  ;;  %v18922_v7 = vld [vmem:[%s22027_s13 + $0x460] sm:$0xf]  ;;  %v20943_v61 = vld [vmem:[%s22027_s13 + $0x46c] sm:$0xf0]  ;;  %v17876_v56 = vld [vmem:[%s22017_s3 + $0xc38] sm:$0xf0]  ;;  %p21555_p6 = pneg %p21554_p13 }
 0x650   : > { %10503 = vmatpush.bf16.msrb.mxu3 %v18355_v3  ;;  %10595 = vmatpush.bf16.msrb.mxu2 %v18071_v18  ;;  %v19114_v13 = vld [vmem:[%s22027_s13 + $0x5e0] sm:$0xf]  ;;  %v18130_v47 = vld [vmem:[%s22017_s3 + $0xe18] sm:$0xf]  ;;  %v17332_v35 = vld [vmem:[%s22017_s3 + $0x7f8] sm:$0xf0] }
 0x651   : > { %v10343_v3 = vpop.f32.mrf.mxu2  ;;  %v19098_v19 = vld [vmem:[%s22027_s13 + $0x5c0] sm:$0xf]  ;;  %v20987_v30 = vld [vmem:[%s22027_s13 + $0x5cc] sm:$0xf0]  ;;  %p21560_p10 = pnand %p21559_p0, %p21555_p6 }
 0x652   : > { %12199 = vmatpush.bf16.msra.mxu1 %v18539_v17  ;;  %v18007_v17 = vor.u32 %v20708_v4, %v18004_v11  ;;  %v25119_v18 = vadd.f32 %v10343_v3, %v24973_v24  ;;  %v18163_v4 = vor.u32 %v20752_v41, %v18162_v55  ;;  %v18730_v11 = vld [vmem:[%s22027_s13 + $0x2e0] sm:$0xf]  ;;  %v20935_v3 = vld [vmem:[%s22027_s13 + $0x42c] sm:$0xf0] }
 0x653   : > { %12187 = vmatpush.bf16.msra.mxu0 %v18395_v43  ;;  %v20692_v43 = vld [vmem:[%s22017_s3 + $0xc9c] sm:$0xf]  ;;  %v18874_v41 = vld [vmem:[%s22027_s13 + $0x400] sm:$0xf] }
 0x654   : > { %10504 = vmatpush.bf16.msrb.mxu3 %v18323_v2  ;;  %10596 = vmatpush.bf16.msrb.mxu2 %v18039_v1  ;;  %v17943_v12 = vor.u32 %v20692_v43, %v17940_v42  ;;  %v18939_v2 = vor.u32 %v20947_v53, %v18938_v52  ;;  %v20676_v1 = vld [vmem:[%s22017_s3 + $0xc1c] sm:$0xf]  ;;  %v18907_v42 = vor.u32 %v20939_v15, %v18906_v8  ;;  %v19082_v53 = vld [vmem:[%s22027_s13 + $0x5a0] sm:$0xf]  ;;  %v20975_v15 = vld [vmem:[%s22027_s13 + $0x56c] sm:$0xf0] }
 0x655   : > { %v17879_v45 = vor.u32 %v20676_v1, %v17876_v56  ;;  %v10253_v1 = vadd.f32 %v25116_v40, %v24959_v31 }
 0x656   : > { %12200 = vmatpush.bf16.msra.mxu1 %v18523_v50  ;;  %v20760_v50 = vld [vmem:[%s22017_s3 + $0xeb4] sm:$0xf0] }
 0x657   : > { %12188 = vmatpush.bf16.msra.mxu0 %v18379_v62  ;;  %v20684_v62 = vld [vmem:[%s22017_s3 + $0xc5c] sm:$0xf]  ;;  %v18195_v37 = vor.u32 %v20760_v50, %v18194_v36  ;;  %v19099_v36 = vor.u32 %v20987_v30, %v19098_v19  ;;  %v10266_v8 = vadd.f32 %v24889_v59, %v10253_v1  ;;  %v18444_v30 = vld [vmem:[%s22027_s13 + $0xb0] sm:$0xf0] }
 0x658   : > { %10505 = vmatpush.bf16.msrb.mxu3 %v18291_v63  ;;  %10597 = vmatpush.bf16.msrb.mxu2 %v18007_v17  ;;  %v17911_v24 = vor.u32 %v20684_v62, %v17908_v29  ;;  %v18923_v63 = vor.u32 %v20943_v61, %v18922_v7  ;;  %v20983_v62 = vld [vmem:[%s22027_s13 + $0x5ac] sm:$0xf0]  ;;  %v18698_v29 = vld [vmem:[%s22027_s13 + $0x2a0] sm:$0xf]  ;;  %v17140_v1 = vld [vmem:[%s22017_s3 + $0x678] sm:$0xf0] }
 0x659   : > { %v10345_v17 = vpop.f32.mrf.mxu2  ;;  %v19066_v7 = vld [vmem:[%s22027_s13 + $0x580] sm:$0xf]  ;;  %v20979_v61 = vld [vmem:[%s22027_s13 + $0x58c] sm:$0xf0] }
 0x65a   : > { %12201 = vmatpush.bf16.msra.mxu1 %v18507_v54  ;;  %v18460_v17 = vld [vmem:[%s22027_s13 + $0xd0] sm:$0xf0] }
 0x65b   : > { %12189 = vmatpush.bf16.msra.mxu0 %v18363_v5  ;;  %v10421_v54 = vpop.f32.mrf.mxu0 }
 0x65c   : > { %10506 = vmatpush.bf16.msrb.mxu3 %v18259_v14  ;;  %10598 = vmatpush.bf16.msrb.mxu2 %v17975_v33  ;;  %v10422_v57 = vadd.f32 %v10421_v54, %v7218_v39  ;;  %v10254_v14 = vpop.f32.mrf.mxu3  ;;  %v20891_v33 = vld [vmem:[%s22027_s13 + $0x2cc] sm:$0xf0]  ;;  %v20532_v39 = vld [vmem:[%s22017_s3 + $0x79c] sm:$0xf]  ;;  %v19083_v54 = vor.u32 %v20983_v62, %v19082_v53  ;;  %v20817_v53 = vld [vmem:[%s22027_s13 + $0x84] sm:$0xf] }
 0x65d   : > { %v18715_v52 = vor.u32 %v20891_v33, %v18714_v26  ;;  %v20508_v26 = vld [vmem:[%s22017_s3 + $0x6dc] sm:$0xf]  ;;  %v20821_v33 = vld [vmem:[%s22027_s13 + $0xa4] sm:$0xf] }
 0x65e   : > { %12202 = vmatpush.bf16.msra.mxu1 %v18491_v48  ;;  %12190 = vmatmul.bf16.vlgmr.msra.gmra.mxu0 %v25096_v9  ;;  %v10434_v60 = vpop.f32.mrf.mxu1  ;;  %v20991_v48 = vld [vmem:[%s22027_s13 + $0x5ec] sm:$0xf0] }
 0x65f   : > { %12234 = vmatpush.bf16.msrb.mxu0 %v18987_v20  ;;  %v25130_v5 = vadd.f32 %v10434_v60, %v10422_v57  ;;  %v20744_v20 = vld [vmem:[%s22017_s3 + $0xe34] sm:$0xf0]  ;;  %v19115_v51 = vor.u32 %v20991_v48, %v19114_v13  ;;  %v20931_v57 = vld [vmem:[%s22027_s13 + $0x40c] sm:$0xf0]  ;;  %v20524_v60 = vld [vmem:[%s22017_s3 + $0x75c] sm:$0xf] }
 0x660   : > { %10507 = vmatpush.bf16.msrb.mxu3 %v18227_v58  ;;  %10599 = vmatpush.bf16.msrb.mxu2 %v17943_v12  ;;  %v18131_v49 = vor.u32 %v20744_v20, %v18130_v47  ;;  %v17335_v58 = vor.u32 %v20540_v23, %v17332_v35  ;;  %v17300_v12 = vld [vmem:[%s22017_s3 + $0x7b8] sm:$0xf0]  ;;  %v20829_v13 = vld [vmem:[%s22027_s13 + $0xe4] sm:$0xf]  ;;  %v18875_v31 = vor.u32 %v20931_v57, %v18874_v41  ;;  %v18666_v23 = vld [vmem:[%s22027_s13 + $0x260] sm:$0xf] }
 0x661   : > { %12203 = vmatmul.bf16.vlgmr.msra.gmra.mxu1 %v25098_v25  ;;  %v17303_v55 = vor.u32 %v20532_v39, %v17300_v12  ;;  %v17236_v47 = vld [vmem:[%s22017_s3 + $0x738] sm:$0xf0]  ;;  %v20825_v20 = vld [vmem:[%s22027_s13 + $0xc4] sm:$0xf]  ;;  %v20879_v35 = vld [vmem:[%s22027_s13 + $0x26c] sm:$0xf0]  ;;  %v18447_v39 = vor.u32 %v20821_v33, %v18444_v30 }
 0x662   : > { %12247 = vmatpush.bf16.msrb.mxu1 %v19115_v51  ;;  %v18463_v59 = vor.u32 %v20825_v20, %v18460_v17  ;;  %v18667_v19 = vor.u32 %v20879_v35, %v18666_v23  ;;  %v20500_v12 = vld [vmem:[%s22017_s3 + $0x69c] sm:$0xf]  ;;  %v18634_v41 = vld [vmem:[%s22027_s13 + $0x220] sm:$0xf]  ;;  %v20871_v57 = vld [vmem:[%s22027_s13 + $0x22c] sm:$0xf0] }
 0x663   : > { %12235 = vmatpush.bf16.msrb.mxu0 %v18971_v21  ;;  %v18731_v21 = vor.u32 %v20895_v28, %v18730_v11  ;;  %v10423_v43 = vpop.f32.mrf.mxu0  ;;  %v18682_v11 = vld [vmem:[%s22027_s13 + $0x280] sm:$0xf]  ;;  %v20883_v28 = vld [vmem:[%s22027_s13 + $0x28c] sm:$0xf0]  ;;  %v20861_v20 = vld [vmem:[%s22027_s13 + $0x1e4] sm:$0xf] }
 0x664   : > { %10508 = vmatpush.bf16.msrb.mxu3 %v18195_v37  ;;  %10600 = vmatpush.bf16.msrb.mxu2 %v17911_v24  ;;  %v20887_v37 = vld [vmem:[%s22027_s13 + $0x2ac] sm:$0xf0]  ;;  %v17268_v24 = vld [vmem:[%s22017_s3 + $0x778] sm:$0xf0]  ;;  %v18683_v51 = vor.u32 %v20883_v28, %v18682_v11  ;;  %v10279_v43 = vadd.f32 %v24891_v46, %v10266_v8  ;;  %v18604_v17 = vld [vmem:[%s22027_s13 + $0x1f0] sm:$0xf0] }
 0x665   : > { %v18699_v56 = vor.u32 %v20887_v37, %v18698_v29  ;;  %v17271_v40 = vor.u32 %v20524_v60, %v17268_v24  ;;  %v18428_v37 = vld [vmem:[%s22027_s13 + $0x90] sm:$0xf0]  ;;  %v17108_v23 = vld [vmem:[%s22017_s3 + $0x638] sm:$0xf0]  ;;  %v20809_v35 = vld [vmem:[%s22027_s13 + $0x44] sm:$0xf] }
 0x666   : > { %v10436_v50 = vpop.f32.mrf.mxu1  ;;  %12248 = vmatpush.bf16.msrb.mxu1 %v19099_v36  ;;  %v20875_v36 = vld [vmem:[%s22027_s13 + $0x24c] sm:$0xf0]  ;;  %v10292_v46 = vadd.f32 %v25033_v22, %v10279_v43  ;;  %v18356_v33 = vld [vmem:[%s22017_s3 + $0xff8] sm:$0xf0]  ;;  %v20857_v30 = vld [vmem:[%s22027_s13 + $0x1c4] sm:$0xf] }
 0x667   : > { %12236 = vmatpush.bf16.msrb.mxu0 %v18955_v44  ;;  %v18890_v44 = vld [vmem:[%s22027_s13 + $0x420] sm:$0xf]  ;;  %v10622_v43 = vmax.f32 %v24885_v27, 0.0  ;;  %v18324_v27 = vld [vmem:[%s22017_s3 + $0xfb8] sm:$0xf0] }
 0x668   : > { %10509 = vmatpush.bf16.msrb.mxu3 %v18163_v4  ;;  %10601 = vmatpush.bf16.msrb.mxu2 %v17879_v45  ;;  %v18476_v4 = vld [vmem:[%s22027_s13 + $0xf0] sm:$0xf0]  ;;  %v19050_v45 = vld [vmem:[%s22027_s13 + $0x560] sm:$0xf] }
 0x669   : > { %v18479_v48 = vor.u32 %v20829_v13, %v18476_v4  ;;  %v19051_v14 = vor.u32 %v20975_v15, %v19050_v45  ;;  %v18412_v13 = vld [vmem:[%s22027_s13 + $0x70] sm:$0xf0]  ;;  %v20484_v15 = vld [vmem:[%s22017_s3 + $0x61c] sm:$0xf] }
 0x66a   : > { %12249 = vmatpush.bf16.msrb.mxu1 %v19083_v54  ;;  %v19018_v54 = vld [vmem:[%s22027_s13 + $0x520] sm:$0xf] }
 0x66b   : > { %12237 = vmatpush.bf16.msrb.mxu0 %v18939_v2  ;;  %v18891_v2 = vor.u32 %v20935_v3, %v18890_v44  ;;  %10602 = vmatmul.bf16.vlgmr.msrb.gmra.mxu2 %v24141_v16  ;;  %v19067_v16 = vor.u32 %v20979_v61, %v19066_v7  ;;  %v18650_v44 = vld [vmem:[%s22027_s13 + $0x240] sm:$0xf]  ;;  %v20492_v7 = vld [vmem:[%s22017_s3 + $0x65c] sm:$0xf]  ;;  %v18431_v61 = vor.u32 %v20817_v53, %v18428_v37 }
 0x66c   : > { %12208 = vmatpush.bf16.msra.mxu2 %v18731_v21  ;;  %10510 = vmatpush.bf16.msrb.mxu3 %v18131_v49  ;;  %v17204_v49 = vld [vmem:[%s22017_s3 + $0x6f8] sm:$0xf0]  ;;  %v18651_v29 = vor.u32 %v20875_v36, %v18650_v44  ;;  %v25228_v37 = vpack.c.bf16 %v10622_v43, %v10622_v43  ;;  %v18940_v43 = vld [vmem:[%s22027_s13 + $0x490] sm:$0xf0] }
 0x66d   : > { %v17207_v3 = vor.u32 %v20508_v26, %v17204_v49  ;;  %v25189_v62 = vpop.f32.mrf.mxu2  ;;  %v18396_v26 = vld [vmem:[%s22027_s13 + $0x50] sm:$0xf0]  ;;  %v20796_v49 = vld [vmem:[%s22017_s3 + $0xfdc] sm:$0xf] }
 0x66e   : > { %12250 = vmatpush.bf16.msrb.mxu1 %v19067_v16  ;;  %v18635_v16 = vor.u32 %v20871_v57, %v18634_v41  ;;  %v18399_v44 = vor.u32 %v20809_v35, %v18396_v26  ;;  %v18359_v36 = vor.u32 %v20796_v49, %v18356_v33  ;;  %v20788_v53 = vld [vmem:[%s22017_s3 + $0xf9c] sm:$0xf]  ;;  %v20801_v41 = vld [vmem:[%s22027_s13 + $0x4] sm:$0xf]  ;;  %v18364_v57 = vld [vmem:[%s22027_s13 + $0x10] sm:$0xf0] }
 0x66f   : > { %12238 = vmatpush.bf16.msrb.mxu0 %v18923_v63  ;;  %10511 = vmatmul.bf16.vlgmr.msrb.gmra.mxu3 %v24290_v34  ;;  %v20516_v63 = vld [vmem:[%s22017_s3 + $0x71c] sm:$0xf]  ;;  %v18956_v35 = vld [vmem:[%s22027_s13 + $0x4b0] sm:$0xf0] }
 0x670   : > { %10555 = vmatpush.bf16.msra.mxu3 %v17335_v58  ;;  %12209 = vmatpush.bf16.msra.mxu2 %v18715_v52  ;;  %v17239_v21 = vor.u32 %v20516_v63, %v17236_v47  ;;  %v20971_v58 = vld [vmem:[%s22027_s13 + $0x54c] sm:$0xf0]  ;;  %v17172_v52 = vld [vmem:[%s22017_s3 + $0x6b8] sm:$0xf0] }
 0x671   : > { %v17175_v22 = vor.u32 %v20500_v12, %v17172_v52  ;;  %v20867_v63 = vld [vmem:[%s22027_s13 + $0x20c] sm:$0xf0]  ;;  %v18380_v52 = vld [vmem:[%s22027_s13 + $0x30] sm:$0xf0]  ;;  %v20756_v33 = vld [vmem:[%s22017_s3 + $0xe9c] sm:$0xf] }
 0x672   : > { %12251 = vmatpush.bf16.msrb.mxu1 %v19051_v14  ;;  %v18607_v14 = vor.u32 %v20861_v20, %v18604_v17 }
 0x673   : > { %12239 = vmatpush.bf16.msrb.mxu0 %v18907_v42  ;;  %v19034_v42 = vld [vmem:[%s22027_s13 + $0x540] sm:$0xf] }
 0x674   : > { %10556 = vmatpush.bf16.msra.mxu3 %v17303_v55  ;;  %12210 = vmatpush.bf16.msra.mxu2 %v18699_v56  ;;  %v19035_v50 = vor.u32 %v20971_v58, %v19034_v42  ;;  %v10304_v55 = vpop.f32.mrf.mxu3  ;;  %v20813_v56 = vld [vmem:[%s22027_s13 + $0x64] sm:$0xf]  ;;  %v17111_v42 = vor.u32 %v20484_v15, %v17108_v23  ;;  %v18588_v58 = vld [vmem:[%s22027_s13 + $0x1d0] sm:$0xf0]  ;;  %v18228_v15 = vld [vmem:[%s22017_s3 + $0xef8] sm:$0xf0] }
 0x675   : > { %v10305_v24 = vadd.f32 %v10304_v55, %v10292_v46  ;;  %v18415_v45 = vor.u32 %v20813_v56, %v18412_v13  ;;  %v20853_v46 = vld [vmem:[%s22027_s13 + $0x1a4] sm:$0xf]  ;;  %v18327_v55 = vor.u32 %v20788_v53, %v18324_v27  ;;  %v18367_v13 = vor.u32 %v20801_v41, %v18364_v57  ;;  %v20748_v53 = vld [vmem:[%s22017_s3 + $0xe5c] sm:$0xf]  ;;  %v19242_v57 = vld [vmem:[%s22027_s13 + $0x6e0] sm:$0xf] }
 0x676   : > { %12252 = vmatpush.bf16.msrb.mxu1 %v19035_v50  ;;  %v20805_v50 = vld [vmem:[%s22027_s13 + $0x24] sm:$0xf]  ;;  %v18164_v27 = vld [vmem:[%s22017_s3 + $0xe78] sm:$0xf0] }
 0x677   : > { %12240 = vmatpush.bf16.msrb.mxu0 %v18891_v2  ;;  %v20967_v2 = vld [vmem:[%s22027_s13 + $0x52c] sm:$0xf0]  ;;  %v10624_v4 = vmax.f32 %v10305_v24, 0.0  ;;  %v18292_v24 = vld [vmem:[%s22017_s3 + $0xf78] sm:$0xf0] }
 0x678   : > { %10557 = vmatpush.bf16.msra.mxu3 %v17271_v40  ;;  %12211 = vmatpush.bf16.msra.mxu2 %v18683_v51  ;;  %v19019_v60 = vor.u32 %v20967_v2, %v19018_v54  ;;  %v20963_v40 = vld [vmem:[%s22027_s13 + $0x50c] sm:$0xf0]  ;;  %v17143_v51 = vor.u32 %v20492_v7, %v17140_v1  ;;  %v18383_v2 = vor.u32 %v20805_v50, %v18380_v52  ;;  %v18556_v7 = vld [vmem:[%s22027_s13 + $0x190] sm:$0xf0]  ;;  %v20949_v23 = vld [vmem:[%s22027_s13 + $0x4a4] sm:$0xf] }
 0x679   : > { %v25209_v8 = vpack.c.bf16 %v10624_v4, %v10624_v4  ;;  %v18988_v1 = vld [vmem:[%s22027_s13 + $0x4f0] sm:$0xf0]  ;;  %v18959_v49 = vor.u32 %v20949_v23, %v18956_v35  ;;  %v18842_v35 = vld [vmem:[%s22027_s13 + $0x3c0] sm:$0xf] }
 0x67a   : > { %12253 = vmatpush.bf16.msrb.mxu1 %v19019_v60  ;;  %v20780_v60 = vld [vmem:[%s22017_s3 + $0xf5c] sm:$0xf]  ;;  %v18892_v23 = vld [vmem:[%s22027_s13 + $0x430] sm:$0xf0] }
 0x67b   : > { %12241 = vmatpush.bf16.msrb.mxu0 %v18875_v31  ;;  %v25200_v11 = vpop.f32.mrf.mxu0  ;;  %v19002_v31 = vld [vmem:[%s22027_s13 + $0x500] sm:$0xf]  ;;  %v18295_v4 = vor.u32 %v20780_v60, %v18292_v24  ;;  %v21023_v60 = vld [vmem:[%s22027_s13 + $0x6ec] sm:$0xf0]  ;;  %v18167_v24 = vor.u32 %v20748_v53, %v18164_v27 }
 0x67c   : > { %10558 = vmatpush.bf16.msra.mxu3 %v17239_v21  ;;  %12212 = vmatpush.bf16.msra.mxu2 %v18667_v19  ;;  %v19003_v47 = vor.u32 %v20963_v40, %v19002_v31  ;;  %v10397_v21 = vpop.f32.mrf.mxu2  ;;  %v10306_v19 = vpop.f32.mrf.mxu3  ;;  %v20772_v31 = vld [vmem:[%s22017_s3 + $0xf1c] sm:$0xf] }
 0x67d   : > { %v18260_v40 = vld [vmem:[%s22017_s3 + $0xf38] sm:$0xf0]  ;;  %v18524_v21 = vld [vmem:[%s22027_s13 + $0x150] sm:$0xf0] }
 0x67e   : > { %v25202_v28 = vpop.f32.mrf.mxu1  ;;  %12242 = vmatmul.bf16.vlgmr.msrb.gmra.mxu0 %v25209_v8  ;;  %12254 = vmatpush.bf16.msrb.mxu1 %v19003_v47  ;;  %v18540_v47 = vld [vmem:[%s22027_s13 + $0x170] sm:$0xf0]  ;;  %v18196_v19 = vld [vmem:[%s22017_s3 + $0xeb8] sm:$0xf0] }
 0x67f   : > { %12286 = vmatpush.bf16.msra.mxu0 %v18479_v48  ;;  %v18618_v48 = vld [vmem:[%s22027_s13 + $0x200] sm:$0xf] }
 0x680   : > { %10559 = vmatpush.bf16.msra.mxu3 %v17207_v3  ;;  %12213 = vmatpush.bf16.msra.mxu2 %v18651_v29  ;;  %v18591_v3 = vor.u32 %v20857_v30, %v18588_v58  ;;  %v18572_v29 = vld [vmem:[%s22027_s13 + $0x1b0] sm:$0xf0]  ;;  %v20945_v30 = vld [vmem:[%s22027_s13 + $0x484] sm:$0xf] }
 0x681   : > { %v18575_v54 = vor.u32 %v20853_v46, %v18572_v29  ;;  %v18508_v58 = vld [vmem:[%s22027_s13 + $0x130] sm:$0xf0]  ;;  %v18943_v52 = vor.u32 %v20945_v30, %v18940_v43  ;;  %v20941_v46 = vld [vmem:[%s22027_s13 + $0x464] sm:$0xf] }
 0x682   : > { %12299 = vmatpush.bf16.msra.mxu1 %v18607_v14  ;;  %v20841_v14 = vld [vmem:[%s22027_s13 + $0x144] sm:$0xf]  ;;  %v18876_v43 = vld [vmem:[%s22027_s13 + $0x410] sm:$0xf0] }
 0x683   : > { %12287 = vmatpush.bf16.msra.mxu0 %v18463_v59  ;;  %v18619_v59 = vor.u32 %v20867_v63, %v18618_v48  ;;  %v20953_v48 = vld [vmem:[%s22027_s13 + $0x4c4] sm:$0xf]  ;;  %v18972_v63 = vld [vmem:[%s22027_s13 + $0x4d0] sm:$0xf0] }
 0x684   : > { %10560 = vmatpush.bf16.msra.mxu3 %v17175_v22  ;;  %12214 = vmatpush.bf16.msra.mxu2 %v18635_v16  ;;  %v20849_v22 = vld [vmem:[%s22027_s13 + $0x184] sm:$0xf]  ;;  %v18975_v17 = vor.u32 %v20953_v48, %v18972_v63  ;;  %v19226_v48 = vld [vmem:[%s22027_s13 + $0x6c0] sm:$0xf] }
 0x685   : > { %v18559_v56 = vor.u32 %v20849_v22, %v18556_v7  ;;  %v19243_v22 = vor.u32 %v21023_v60, %v19242_v57  ;;  %v20929_v30 = vld [vmem:[%s22027_s13 + $0x404] sm:$0xf]  ;;  %v18794_v60 = vld [vmem:[%s22027_s13 + $0x360] sm:$0xf] }
 0x686   : > { %v10488_v12 = vpop.f32.mrf.mxu1  ;;  %12300 = vmatpush.bf16.msra.mxu1 %v18591_v3  ;;  %v18879_v27 = vor.u32 %v20929_v30, %v18876_v43 }
 0x687   : > { %12288 = vmatpush.bf16.msra.mxu0 %v18447_v39  ;;  %v10475_v39 = vpop.f32.mrf.mxu0  ;;  %v18199_v12 = vor.u32 %v20756_v33, %v18196_v19 }
 0x688   : > { %10561 = vmatpush.bf16.msra.mxu3 %v17143_v51  ;;  %12215 = vmatpush.bf16.msra.mxu2 %v18619_v59  ;;  %v18263_v51 = vor.u32 %v20772_v31, %v18260_v40  ;;  %v18527_v59 = vor.u32 %v20841_v14, %v18524_v21  ;;  %v20927_v31 = vld [vmem:[%s22027_s13 + $0x3ec] sm:$0xf0] }
 0x689   : > { %v20923_v14 = vld [vmem:[%s22027_s13 + $0x3cc] sm:$0xf0] }
 0x68a   : > { %12301 = vmatpush.bf16.msra.mxu1 %v18575_v54  ;;  %v18924_v54 = vld [vmem:[%s22027_s13 + $0x470] sm:$0xf0]  ;;  %v18843_v19 = vor.u32 %v20923_v14, %v18842_v35 }
 0x68b   : > { %12289 = vmatpush.bf16.msra.mxu0 %v18431_v61  ;;  %12216 = vmatmul.bf16.vlgmr.msra.gmra.mxu2 %v25228_v37  ;;  %v20957_v61 = vld [vmem:[%s22027_s13 + $0x4e4] sm:$0xf] }
 0x68c   : > { %10562 = vmatpush.bf16.msra.mxu3 %v17111_v42  ;;  %v18991_v16 = vor.u32 %v20957_v61, %v18988_v1  ;;  %v20837_v42 = vld [vmem:[%s22027_s13 + $0x124] sm:$0xf]  ;;  %v18927_v61 = vor.u32 %v20941_v46, %v18924_v54  ;;  %v20740_v1 = vld [vmem:[%s22017_s3 + $0xe1c] sm:$0xf]  ;;  %12260 = vmatpush.bf16.msrb.mxu2 %v19243_v22  ;;  %v18810_v54 = vld [vmem:[%s22027_s13 + $0x380] sm:$0xf] }
 0x68d   : > { %v18511_v50 = vor.u32 %v20837_v42, %v18508_v58  ;;  %v18826_v42 = vld [vmem:[%s22027_s13 + $0x3a0] sm:$0xf]  ;;  %v20919_v58 = vld [vmem:[%s22027_s13 + $0x3ac] sm:$0xf0]  ;;  %v18450_v22 = vld [vmem:[%s22027_s13 + $0xa8] sm:$0xf] }
 0x68e   : > { %12302 = vmatpush.bf16.msra.mxu1 %v18559_v56  ;;  %v18132_v56 = vld [vmem:[%s22017_s3 + $0xe38] sm:$0xf0]  ;;  %v18827_v46 = vor.u32 %v20919_v58, %v18826_v42  ;;  %v20893_v58 = vld [vmem:[%s22027_s13 + $0x2e4] sm:$0xf] }
 0x68f   : > { %12290 = vmatpush.bf16.msra.mxu0 %v18415_v45  ;;  %10563 = vmatmul.bf16.vlgmr.msra.gmra.mxu3 %v24033_v38  ;;  %v20845_v38 = vld [vmem:[%s22027_s13 + $0x164] sm:$0xf]  ;;  %v20764_v45 = vld [vmem:[%s22017_s3 + $0xedc] sm:$0xf]  ;;  %s12916_s3 = scalar_lea.sflag [#allocation4], %s21991_s10 }
 0x690   : > { %10607 = vmatpush.bf16.msrb.mxu3 %v18359_v36  ;;  %v18543_v20 = vor.u32 %v20845_v38, %v18540_v47  ;;  %v18231_v26 = vor.u32 %v20764_v45, %v18228_v15  ;;  %v7219_v36 = vperm.slane %v25111_v32, 7  ;;  %v20833_v32 = vld [vmem:[%s22027_s13 + $0x104] sm:$0xf]  ;;  %v18135_v38 = vor.u32 %v20740_v1, %v18132_v56  ;;  %v21019_v47 = vld [vmem:[%s22027_s13 + $0x6cc] sm:$0xf0] }
 0x691   : > { %v19227_v45 = vor.u32 %v21019_v47, %v19226_v48  ;;  %v19162_v1 = vld [vmem:[%s22027_s13 + $0x640] sm:$0xf]  ;;  %v21003_v56 = vld [vmem:[%s22027_s13 + $0x64c] sm:$0xf0]  ;;  %v18434_v48 = vld [vmem:[%s22027_s13 + $0x88] sm:$0xf] }
 0x692   : > { %12303 = vmatpush.bf16.msra.mxu1 %v18543_v20  ;;  %v25260_v3 = vpop.f32.mrf.mxu3  ;;  %v20999_v47 = vld [vmem:[%s22027_s13 + $0x62c] sm:$0xf0] }
 0x693   : > { %12291 = vmatpush.bf16.msra.mxu0 %v18399_v44  ;;  %v10447_v44 = vpop.f32.mrf.mxu2  ;;  %12261 = vmatpush.bf16.msrb.mxu2 %v19227_v45  ;;  %v10357_v53 = vadd.f32 %v25260_v3, %v25119_v18 }
 0x694   : > { %10608 = vmatpush.bf16.msrb.mxu3 %v18327_v55  ;;  %v25263_v39 = vadd.f32 %v10447_v44, %v25130_v5  ;;  %v19194_v44 = vld [vmem:[%s22027_s13 + $0x680] sm:$0xf] }
 0x695   : > { %v10370_v18 = vadd.f32 %v25046_v6, %v10357_v53 }
 0x696   : > { %12304 = vmatpush.bf16.msra.mxu1 %v18527_v59  ;;  %v19210_v59 = vld [vmem:[%s22027_s13 + $0x6a0] sm:$0xf] }
 0x697   : > { %12292 = vmatpush.bf16.msra.mxu0 %v18383_v2  ;;  %v18492_v2 = vld [vmem:[%s22027_s13 + $0x110] sm:$0xf0]  ;;  %v10383_v6 = vadd.f32 %v25048_v10, %v10370_v18  ;;  %v10623_v18 = vmax.f32 %v25042_v0, 0.0 }
 0x698   : > { %10609 = vmatpush.bf16.msrb.mxu3 %v18295_v4  ;;  %v18495_v5 = vor.u32 %v20833_v32, %v18492_v2  ;;  %v18908_v4 = vld [vmem:[%s22027_s13 + $0x450] sm:$0xf0]  ;;  %v20915_v32 = vld [vmem:[%s22027_s13 + $0x38c] sm:$0xf0]  ;;  %v20828_v2 = vld [vmem:[%s22027_s13 + $0xd4] sm:$0xf0] }
 0x699   : > { %v10396_v10 = vadd.f32 %v25189_v62, %v10383_v6  ;;  %v20816_v62 = vld [vmem:[%s22027_s13 + $0x74] sm:$0xf0]  ;;  %v20885_v6 = vld [vmem:[%s22027_s13 + $0x2a4] sm:$0xf] }
 0x69a   : > { %12305 = vmatpush.bf16.msra.mxu1 %v18511_v50  ;;  %v10358_v63 = vpop.f32.mrf.mxu3  ;;  %v18482_v50 = vld [vmem:[%s22027_s13 + $0xe8] sm:$0xf] }
 0x69b   : > { %12293 = vmatpush.bf16.msra.mxu0 %v18367_v13  ;;  %v10525_v29 = vpop.f32.mrf.mxu0  ;;  %v20937_v13 = vld [vmem:[%s22027_s13 + $0x444] sm:$0xf]  ;;  %v10449_v40 = vpop.f32.mrf.mxu2  ;;  %v20820_v63 = vld [vmem:[%s22027_s13 + $0x94] sm:$0xf0] }
 0x69c   : > { %10610 = vmatpush.bf16.msrb.mxu3 %v18263_v51  ;;  %v10526_v55 = vadd.f32 %v10525_v29, %v7219_v36  ;;  %v18911_v20 = vor.u32 %v20937_v13, %v18908_v4  ;;  %v21011_v36 = vld [vmem:[%s22027_s13 + $0x68c] sm:$0xf0]  ;;  %v19163_v13 = vor.u32 %v21003_v56, %v19162_v1  ;;  %v18435_v14 = vor.u32 %v20820_v63, %v18434_v48  ;;  %v18386_v1 = vld [vmem:[%s22027_s13 + $0x28] sm:$0xf]  ;;  %v20808_v56 = vld [vmem:[%s22027_s13 + $0x34] sm:$0xf0] }
 0x69d   : > { %v20907_v40 = vld [vmem:[%s22027_s13 + $0x34c] sm:$0xf0]  ;;  %v18387_v48 = vor.u32 %v20808_v56, %v18386_v1  ;;  %v20977_v63 = vld [vmem:[%s22027_s13 + $0x584] sm:$0xf]  ;;  %v19004_v1 = vld [vmem:[%s22027_s13 + $0x510] sm:$0xf0] }
 0x69e   : > { %12294 = vmatmul.bf16.vlgmr.msra.gmra.mxu0 %v25096_v9  ;;  %v10538_v41 = vpop.f32.mrf.mxu1  ;;  %12306 = vmatpush.bf16.msra.mxu1 %v18495_v5  ;;  %v18811_v5 = vor.u32 %v20915_v32, %v18810_v54  ;;  %v18402_v32 = vld [vmem:[%s22027_s13 + $0x48] sm:$0xf] }
 0x69f   : > { %12338 = vmatpush.bf16.msrb.mxu0 %v18991_v16  ;;  %v25273_v7 = vadd.f32 %v10538_v41, %v10526_v55  ;;  %v18858_v16 = vld [vmem:[%s22027_s13 + $0x3e0] sm:$0xf]  ;;  %v21007_v41 = vld [vmem:[%s22027_s13 + $0x66c] sm:$0xf0] }
 0x6a0   : > { %10611 = vmatpush.bf16.msrb.mxu3 %v18231_v26  ;;  %v18859_v51 = vor.u32 %v20927_v31, %v18858_v16  ;;  %v21015_v26 = vld [vmem:[%s22027_s13 + $0x6ac] sm:$0xf0]  ;;  %v19178_v55 = vld [vmem:[%s22027_s13 + $0x660] sm:$0xf] }
 0x6a1   : > { %v19179_v3 = vor.u32 %v21007_v41, %v19178_v55  ;;  %v18778_v31 = vld [vmem:[%s22027_s13 + $0x340] sm:$0xf]  ;;  %v20889_v55 = vld [vmem:[%s22027_s13 + $0x2c4] sm:$0xf]  ;;  %v18716_v41 = vld [vmem:[%s22027_s13 + $0x2d0] sm:$0xf0] }
 0x6a2   : > { %v18779_v45 = vor.u32 %v20907_v40, %v18778_v31  ;;  %v25356_v40 = vpack.c.bf16 %v10623_v18, %v10623_v18  ;;  %v20948_v18 = vld [vmem:[%s22027_s13 + $0x494] sm:$0xf0] }
 0x6a3   : > { %12339 = vmatpush.bf16.msrb.mxu0 %v18975_v17  ;;  %v20933_v17 = vld [vmem:[%s22027_s13 + $0x424] sm:$0xf]  ;;  %v10527_v15 = vpop.f32.mrf.mxu0 }
 0x6a4   : > { %10612 = vmatpush.bf16.msrb.mxu3 %v18199_v12  ;;  %v18895_v33 = vor.u32 %v20933_v17, %v18892_v23  ;;  %v20832_v12 = vld [vmem:[%s22027_s13 + $0xf4] sm:$0xf0]  ;;  %v18762_v15 = vld [vmem:[%s22027_s13 + $0x320] sm:$0xf]  ;;  %v20903_v23 = vld [vmem:[%s22027_s13 + $0x32c] sm:$0xf0] }
 0x6a5   : > { %v18483_v29 = vor.u32 %v20832_v12, %v18482_v50  ;;  %v18746_v50 = vld [vmem:[%s22027_s13 + $0x300] sm:$0xf]  ;;  %v18732_v12 = vld [vmem:[%s22027_s13 + $0x2f0] sm:$0xf0] }
 0x6a6   : > { %v10540_v21 = vpop.f32.mrf.mxu1  ;;  %v18735_v54 = vor.u32 %v20893_v58, %v18732_v12  ;;  %v18962_v12 = vld [vmem:[%s22027_s13 + $0x4a8] sm:$0xf] }
 0x6a7   : > { %12340 = vmatpush.bf16.msrb.mxu0 %v18959_v49  ;;  %v19211_v49 = vor.u32 %v21015_v26, %v19210_v59  ;;  %v20989_v21 = vld [vmem:[%s22027_s13 + $0x5e4] sm:$0xf]  ;;  %v19116_v59 = vld [vmem:[%s22027_s13 + $0x5f0] sm:$0xf0]  ;;  %v18418_v26 = vld [vmem:[%s22027_s13 + $0x68] sm:$0xf] }
 0x6a8   : > { %10613 = vmatpush.bf16.msrb.mxu3 %v18167_v24  ;;  %v20911_v24 = vld [vmem:[%s22027_s13 + $0x36c] sm:$0xf0]  ;;  %v18419_v53 = vor.u32 %v20816_v62, %v18418_v26  ;;  %v18978_v62 = vld [vmem:[%s22027_s13 + $0x4c8] sm:$0xf] }
 0x6a9   : > { %12262 = vmatpush.bf16.msrb.mxu2 %v19211_v49  ;;  %v18795_v4 = vor.u32 %v20911_v24, %v18794_v60  ;;  %v19130_v49 = vld [vmem:[%s22027_s13 + $0x600] sm:$0xf]  ;;  %v18719_v60 = vor.u32 %v20889_v55, %v18716_v41  ;;  %v18946_v41 = vld [vmem:[%s22027_s13 + $0x488] sm:$0xf] }
 0x6aa   : > { %v25384_v55 = vld [vmem:[%s22035_s26] sm:$0xf] }
 0x6ab   : > { %12341 = vmatpush.bf16.msrb.mxu0 %v18943_v52  ;;  %v19195_v52 = vor.u32 %v21011_v36, %v19194_v44  ;;  %v18763_v44 = vor.u32 %v20903_v23, %v18762_v15  ;;  %v19119_v36 = vor.u32 %v20989_v21, %v19116_v59  ;;  %v20960_v15 = vld [vmem:[%s22027_s13 + $0x4f4] sm:$0xf0]  ;;  %v20973_v21 = vld [vmem:[%s22027_s13 + $0x564] sm:$0xf]  ;;  %v19052_v59 = vld [vmem:[%s22027_s13 + $0x570] sm:$0xf0] }
 0x6ac   : > { %10614 = vmatpush.bf16.msrb.mxu3 %v18135_v38  ;;  %v19146_v38 = vld [vmem:[%s22027_s13 + $0x620] sm:$0xf] }
 0x6ad   : > { %12263 = vmatpush.bf16.msrb.mxu2 %v19195_v52 }
 0x6af   : > { %12342 = vmatpush.bf16.msrb.mxu0 %v18927_v61  ;;  %10615 = vmatmul.bf16.vlgmr.msrb.gmra.mxu3 %v24290_v34  ;;  %v18466_v34 = vld [vmem:[%s22027_s13 + $0xc8] sm:$0xf]  ;;  %v20824_v61 = vld [vmem:[%s22027_s13 + $0xb4] sm:$0xf0] }
 0x6b0   : > { %12221 = vmatpush.bf16.msra.mxu3 %v18859_v51  ;;  %v18467_v57 = vor.u32 %v20828_v2, %v18466_v34  ;;  %v18451_v16 = vor.u32 %v20824_v61, %v18450_v22  ;;  %v19147_v51 = vor.u32 %v20999_v47, %v19146_v38  ;;  %v20812_v34 = vld [vmem:[%s22027_s13 + $0x54] sm:$0xf0]  ;;  %v20981_v22 = vld [vmem:[%s22027_s13 + $0x5a4] sm:$0xf]  ;;  %v19084_v61 = vld [vmem:[%s22027_s13 + $0x5b0] sm:$0xf0] }
 0x6b1   : > { %12264 = vmatpush.bf16.msrb.mxu2 %v19179_v3  ;;  %v18403_v24 = vor.u32 %v20812_v34, %v18402_v32  ;;  %v19087_v31 = vor.u32 %v20981_v22, %v19084_v61  ;;  %v19068_v38 = vld [vmem:[%s22027_s13 + $0x590] sm:$0xf0]  ;;  %v18370_v47 = vld [vmem:[%s22027_s13 + $0x8] sm:$0xf]  ;;  %v20965_v32 = vld [vmem:[%s22027_s13 + $0x524] sm:$0xf] }
 0x6b2   : > { %v10408_v17 = vpop.f32.mrf.mxu3  ;;  %v19020_v34 = vld [vmem:[%s22027_s13 + $0x530] sm:$0xf0]  ;;  %v10894_v22 = vperm.slane %v25384_v55, 0  ;;  %v20961_v61 = vld [vmem:[%s22027_s13 + $0x504] sm:$0xf] }
 0x6b3   : > { %12343 = vmatpush.bf16.msrb.mxu0 %v18911_v20  ;;  %v25322_v20 = vpop.f32.mrf.mxu2  ;;  %v10409_v35 = vadd.f32 %v10408_v17, %v10396_v10  ;;  %v20804_v10 = vld [vmem:[%s22027_s13 + $0x14] sm:$0xf0]  ;;  %v18684_v17 = vld [vmem:[%s22027_s13 + $0x290] sm:$0xf0] }
 0x6b4   : > { %12222 = vmatpush.bf16.msra.mxu3 %v18843_v19 }
 0x6b5   : > { %12265 = vmatpush.bf16.msrb.mxu2 %v19163_v13  ;;  %v10625_v19 = vmax.f32 %v10409_v35, 0.0  ;;  %v18700_v13 = vld [vmem:[%s22027_s13 + $0x2b0] sm:$0xf0]  ;;  %v19071_v35 = vor.u32 %v20977_v63, %v19068_v38 }
 0x6b6   : > { %v18620_v63 = vld [vmem:[%s22027_s13 + $0x210] sm:$0xf0] }
 0x6b7   : > { %12344 = vmatpush.bf16.msrb.mxu0 %v18895_v33  ;;  %v20995_v33 = vld [vmem:[%s22027_s13 + $0x60c] sm:$0xf0]  ;;  %v25339_v52 = vpack.c.bf16 %v10625_v19, %v10625_v19  ;;  %v18668_v19 = vld [vmem:[%s22027_s13 + $0x270] sm:$0xf0] }
 0x6b8   : > { %12223 = vmatpush.bf16.msra.mxu3 %v18827_v46  ;;  %v19131_v42 = vor.u32 %v20995_v33, %v19130_v49  ;;  %v20985_v46 = vld [vmem:[%s22027_s13 + $0x5c4] sm:$0xf]  ;;  %v20956_v49 = vld [vmem:[%s22027_s13 + $0x4d4] sm:$0xf0] }
 0x6b9   : > { %12266 = vmatpush.bf16.msrb.mxu2 %v19147_v51  ;;  %12255 = vmatmul.bf16.vlgmr.msrb.gmra.mxu1 %v25339_v52  ;;  %v20881_v51 = vld [vmem:[%s22027_s13 + $0x284] sm:$0xf] }
 0x6ba   : > { %12351 = vmatpush.bf16.msrb.mxu1 %v19119_v36  ;;  %v10410_v3 = vpop.f32.mrf.mxu3  ;;  %v18687_v23 = vor.u32 %v20881_v51, %v18684_v17  ;;  %v20877_v33 = vld [vmem:[%s22027_s13 + $0x264] sm:$0xf]  ;;  %v19036_v36 = vld [vmem:[%s22027_s13 + $0x550] sm:$0xf0]  ;;  %v19370_v51 = vld [vmem:[%s22027_s13 + $0x7e0] sm:$0xf] }
 0x6bb   : > { %12345 = vmatpush.bf16.msrb.mxu0 %v18879_v27  ;;  %v25332_v30 = vpop.f32.mrf.mxu0  ;;  %v20899_v27 = vld [vmem:[%s22027_s13 + $0x30c] sm:$0xf0]  ;;  %v10501_v2 = vpop.f32.mrf.mxu2  ;;  %v18671_v58 = vor.u32 %v20877_v33, %v18668_v19  ;;  %v20869_v3 = vld [vmem:[%s22027_s13 + $0x224] sm:$0xf] }
 0x6bc   : > { %12224 = vmatpush.bf16.msra.mxu3 %v18811_v5  ;;  %v18747_v5 = vor.u32 %v20899_v27, %v18746_v50  ;;  %v18979_v50 = vor.u32 %v20956_v49, %v18978_v62  ;;  %v20873_v27 = vld [vmem:[%s22027_s13 + $0x244] sm:$0xf]  ;;  %v20940_v62 = vld [vmem:[%s22027_s13 + $0x454] sm:$0xf0]  ;;  %v19354_v49 = vld [vmem:[%s22027_s13 + $0x7c0] sm:$0xf] }
 0x6bd   : > { %12267 = vmatpush.bf16.msrb.mxu2 %v19131_v42  ;;  %v19055_v42 = vor.u32 %v20973_v21, %v19052_v59  ;;  %v20860_v21 = vld [vmem:[%s22027_s13 + $0x1d4] sm:$0xf0]  ;;  %v21051_v33 = vld [vmem:[%s22027_s13 + $0x7cc] sm:$0xf0] }
 0x6be   : > { %12346 = vmatmul.bf16.vlgmr.msrb.gmra.mxu0 %v25209_v8  ;;  %v25334_v43 = vpop.f32.mrf.mxu1 }
 0x6bf   : > { %12390 = vmatpush.bf16.msra.mxu0 %v18483_v29  ;;  %v19100_v29 = vld [vmem:[%s22027_s13 + $0x5d0] sm:$0xf0] }
 0x6c0   : > { %12225 = vmatpush.bf16.msra.mxu3 %v18795_v4 }
 0x6c1   : > { %12312 = vmatpush.bf16.msra.mxu2 %v18735_v54 }
 0x6c3   : > { %12391 = vmatpush.bf16.msra.mxu0 %v18467_v57  ;;  %v19103_v57 = vor.u32 %v20985_v46, %v19100_v29  ;;  %v10579_v0 = vpop.f32.mrf.mxu0  ;;  %v18652_v46 = vld [vmem:[%s22027_s13 + $0x250] sm:$0xf0] }
 0x6c4   : > { %12226 = vmatpush.bf16.msra.mxu3 %v18779_v45  ;;  %v18994_v45 = vld [vmem:[%s22027_s13 + $0x4e8] sm:$0xf]  ;;  %v18655_v54 = vor.u32 %v20873_v27, %v18652_v46  ;;  %v20936_v27 = vld [vmem:[%s22027_s13 + $0x434] sm:$0xf0]  ;;  %v19338_v46 = vld [vmem:[%s22027_s13 + $0x7a0] sm:$0xf] }
 0x6c5   : > { %12313 = vmatpush.bf16.msra.mxu2 %v18719_v60  ;;  %12352 = vmatpush.bf16.msrb.mxu1 %v19103_v57  ;;  %v18995_v26 = vor.u32 %v20960_v15, %v18994_v45  ;;  %v19023_v57 = vor.u32 %v20965_v32, %v19020_v34  ;;  %v18610_v0 = vld [vmem:[%s22027_s13 + $0x1e8] sm:$0xf] }
 0x6c6   : > { %v10592_v4 = vpop.f32.mrf.mxu1 }
 0x6c7   : > { %12392 = vmatpush.bf16.msra.mxu0 %v18451_v16  ;;  %v18703_v16 = vor.u32 %v20885_v6, %v18700_v13  ;;  %v18947_v13 = vor.u32 %v20948_v18, %v18946_v41  ;;  %v20864_v4 = vld [vmem:[%s22027_s13 + $0x1f4] sm:$0xf0]  ;;  %v18562_v18 = vld [vmem:[%s22027_s13 + $0x188] sm:$0xf] }
 0x6c8   : > { %12227 = vmatpush.bf16.msra.mxu3 %v18763_v44  ;;  %v20969_v44 = vld [vmem:[%s22027_s13 + $0x544] sm:$0xf]  ;;  %v18611_v15 = vor.u32 %v20864_v4, %v18610_v0 }
 0x6c9   : > { %12314 = vmatpush.bf16.msra.mxu2 %v18703_v16  ;;  %12353 = vmatpush.bf16.msrb.mxu1 %v19087_v31  ;;  %v19039_v29 = vor.u32 %v20969_v44, %v19036_v36  ;;  %v18930_v16 = vld [vmem:[%s22027_s13 + $0x468] sm:$0xf]  ;;  %v20944_v31 = vld [vmem:[%s22027_s13 + $0x474] sm:$0xf0] }
 0x6ca   : > { %12307 = vmatmul.bf16.vlgmr.msra.gmra.mxu1 %v25098_v25 }
 0x6cb   : > { %12393 = vmatpush.bf16.msra.mxu0 %v18435_v14  ;;  %v18371_v14 = vor.u32 %v20804_v10, %v18370_v47  ;;  %v19007_v47 = vor.u32 %v20961_v61, %v19004_v1  ;;  %v18484_v61 = vld [vmem:[%s22027_s13 + $0xf8] sm:$0xf0] }
 0x6cc   : > { %12228 = vmatpush.bf16.msra.mxu3 %v18747_v5  ;;  %v18636_v5 = vld [vmem:[%s22027_s13 + $0x230] sm:$0xf0] }
 0x6cd   : > { %12315 = vmatpush.bf16.msra.mxu2 %v18687_v23  ;;  %12354 = vmatpush.bf16.msrb.mxu1 %v19071_v35  ;;  %v18639_v60 = vor.u32 %v20869_v3, %v18636_v5  ;;  %v18931_v35 = vor.u32 %v20944_v31, %v18930_v16  ;;  %v20852_v3 = vld [vmem:[%s22027_s13 + $0x194] sm:$0xf0]  ;;  %v18882_v5 = vld [vmem:[%s22027_s13 + $0x408] sm:$0xf] }
 0x6ce   : > { %v18546_v16 = vld [vmem:[%s22027_s13 + $0x168] sm:$0xf]  ;;  %v20848_v31 = vld [vmem:[%s22027_s13 + $0x174] sm:$0xf0] }
 0x6cf   : > { %12394 = vmatpush.bf16.msra.mxu0 %v18419_v53  ;;  %12229 = vmatmul.bf16.vlgmr.msra.gmra.mxu3 %v25356_v40  ;;  %v20952_v53 = vld [vmem:[%s22027_s13 + $0x4b4] sm:$0xf0] }
 0x6d0   : > { %v18963_v2 = vor.u32 %v20952_v53, %v18962_v12  ;;  %v20856_v12 = vld [vmem:[%s22027_s13 + $0x1b4] sm:$0xf0]  ;;  %v18898_v53 = vld [vmem:[%s22027_s13 + $0x428] sm:$0xf] }
 0x6d1   : > { %12316 = vmatpush.bf16.msra.mxu2 %v18671_v58  ;;  %12355 = vmatpush.bf16.msrb.mxu1 %v19055_v42  ;;  %v19355_v58 = vor.u32 %v21051_v33, %v19354_v49  ;;  %v18899_v41 = vor.u32 %v20936_v27, %v18898_v53  ;;  %v20840_v49 = vld [vmem:[%s22027_s13 + $0x134] sm:$0xf0] }
 0x6d2   : > { %v25393_v56 = vpop.f32.mrf.mxu3  ;;  %v20836_v27 = vld [vmem:[%s22027_s13 + $0x114] sm:$0xf0] }
 0x6d3   : > { %12395 = vmatpush.bf16.msra.mxu0 %v18403_v24  ;;  %v10551_v24 = vpop.f32.mrf.mxu2  ;;  %v10461_v0 = vadd.f32 %v25393_v56, %v25263_v39  ;;  %v18530_v56 = vld [vmem:[%s22027_s13 + $0x148] sm:$0xf] }
 0x6d4   : > { %v25396_v6 = vadd.f32 %v10551_v24, %v25273_v7  ;;  %v21055_v7 = vld [vmem:[%s22027_s13 + $0x7ec] sm:$0xf0] }
 0x6d5   : > { %12317 = vmatpush.bf16.msra.mxu2 %v18655_v54  ;;  %12356 = vmatpush.bf16.msrb.mxu1 %v19039_v29  ;;  %v19371_v23 = vor.u32 %v21055_v7, %v19370_v51  ;;  %v21047_v29 = vld [vmem:[%s22027_s13 + $0x7ac] sm:$0xf0]  ;;  %v18547_v51 = vor.u32 %v20848_v31, %v18546_v16  ;;  %v10474_v39 = vadd.f32 %v25200_v11, %v10461_v0  ;;  %v19106_v16 = vld [vmem:[%s22027_s13 + $0x5c8] sm:$0xf]  ;;  %v20988_v31 = vld [vmem:[%s22027_s13 + $0x5d4] sm:$0xf0] }
 0x6d6   : > { %v19339_v32 = vor.u32 %v21047_v29, %v19338_v46  ;;  %v21043_v24 = vld [vmem:[%s22027_s13 + $0x78c] sm:$0xf0]  ;;  %v21021_v46 = vld [vmem:[%s22027_s13 + $0x6e4] sm:$0xf]  ;;  %v19244_v29 = vld [vmem:[%s22027_s13 + $0x6f0] sm:$0xf0] }
 0x6d7   : > { %12396 = vmatpush.bf16.msra.mxu0 %v18387_v48  ;;  %v20865_v48 = vld [vmem:[%s22027_s13 + $0x204] sm:$0xf]  ;;  %12273 = vmatpush.bf16.msrb.mxu3 %v19371_v23  ;;  %v18452_v23 = vld [vmem:[%s22027_s13 + $0xb8] sm:$0xf0] }
 0x6d8   : > { %v18623_v10 = vor.u32 %v20865_v48, %v18620_v63  ;;  %v20826_v63 = vld [vmem:[%s22027_s13 + $0xcc] sm:$0xf] }
 0x6d9   : > { %12318 = vmatpush.bf16.msra.mxu2 %v18639_v60  ;;  %12357 = vmatpush.bf16.msrb.mxu1 %v19023_v57  ;;  %v20932_v57 = vld [vmem:[%s22027_s13 + $0x414] sm:$0xf0]  ;;  %v19322_v60 = vld [vmem:[%s22027_s13 + $0x780] sm:$0xf] }
 0x6da   : > { %v10462_v44 = vpop.f32.mrf.mxu3  ;;  %v19323_v1 = vor.u32 %v21043_v24, %v19322_v60  ;;  %v18883_v4 = vor.u32 %v20932_v57, %v18882_v5  ;;  %v21027_v5 = vld [vmem:[%s22027_s13 + $0x70c] sm:$0xf0] }
 0x6db   : > { %12397 = vmatpush.bf16.msra.mxu0 %v18371_v14  ;;  %v12191_v38 = vpop.f32.mrf.mxu0  ;;  %v18594_v14 = vld [vmem:[%s22027_s13 + $0x1c8] sm:$0xf]  ;;  %v10553_v19 = vpop.f32.mrf.mxu2  ;;  %12274 = vmatpush.bf16.msrb.mxu3 %v19355_v58  ;;  %v19274_v58 = vld [vmem:[%s22027_s13 + $0x720] sm:$0xf]  ;;  %v21031_v44 = vld [vmem:[%s22027_s13 + $0x72c] sm:$0xf0] }
 0x6dc   : > { %v12192_v17 = vadd.f32 %v12191_v38, %v10894_v22  ;;  %v18595_v42 = vor.u32 %v20860_v21, %v18594_v14  ;;  %v20830_v22 = vld [vmem:[%s22027_s13 + $0xec] sm:$0xf]  ;;  %v18468_v38 = vld [vmem:[%s22027_s13 + $0xd8] sm:$0xf0]  ;;  %v21035_v14 = vld [vmem:[%s22027_s13 + $0x74c] sm:$0xf0] }
 0x6dd   : > { %12319 = vmatpush.bf16.msra.mxu2 %v18623_v10  ;;  %12358 = vmatpush.bf16.msrb.mxu1 %v19007_v47  ;;  %v18487_v48 = vor.u32 %v20830_v22, %v18484_v61  ;;  %v19306_v47 = vld [vmem:[%s22027_s13 + $0x760] sm:$0xf]  ;;  %v21039_v10 = vld [vmem:[%s22027_s13 + $0x76c] sm:$0xf0]  ;;  %v20818_v19 = vld [vmem:[%s22027_s13 + $0x8c] sm:$0xf] }
 0x6de   : > { %12398 = vmatmul.bf16.vlgmr.msra.gmra.mxu0 %v25096_v9  ;;  %v12204_v45 = vpop.f32.mrf.mxu1  ;;  %v19307_v7 = vor.u32 %v21039_v10, %v19306_v47  ;;  %v20925_v61 = vld [vmem:[%s22027_s13 + $0x3e4] sm:$0xf]  ;;  %v20810_v47 = vld [vmem:[%s22027_s13 + $0x4c] sm:$0xf]  ;;  %v18404_v10 = vld [vmem:[%s22027_s13 + $0x58] sm:$0xf0] }
 0x6df   : > { %12442 = vmatpush.bf16.msrb.mxu0 %v18995_v26  ;;  %v25408_v59 = vadd.f32 %v12204_v45, %v12192_v17  ;;  %v18914_v26 = vld [vmem:[%s22027_s13 + $0x448] sm:$0xf]  ;;  %12275 = vmatpush.bf16.msrb.mxu3 %v19339_v32  ;;  %v20844_v17 = vld [vmem:[%s22027_s13 + $0x154] sm:$0xf0]  ;;  %v18471_v45 = vor.u32 %v20826_v63, %v18468_v38  ;;  %v19228_v38 = vld [vmem:[%s22027_s13 + $0x6d0] sm:$0xf0] }
 0x6e0   : > { %v18915_v36 = vor.u32 %v20940_v62, %v18914_v26  ;;  %12359 = vmatmul.bf16.vlgmr.msrb.gmra.mxu1 %v25339_v52  ;;  %v18531_v11 = vor.u32 %v20844_v17, %v18530_v56  ;;  %v10487_v26 = vadd.f32 %v25202_v28, %v10474_v39  ;;  %v18514_v62 = vld [vmem:[%s22027_s13 + $0x128] sm:$0xf]  ;;  %v19275_v28 = vor.u32 %v21031_v44, %v19274_v58  ;;  %v20921_v39 = vld [vmem:[%s22027_s13 + $0x3c4] sm:$0xf]  ;;  %v18844_v56 = vld [vmem:[%s22027_s13 + $0x3d0] sm:$0xf0] }
 0x6e1   : > { %12403 = vmatpush.bf16.msra.mxu1 %v18611_v15  ;;  %v20822_v15 = vld [vmem:[%s22027_s13 + $0xac] sm:$0xf] }
 0x6e2   : > { %v18455_v33 = vor.u32 %v20822_v15, %v18452_v23  ;;  %v18407_v15 = vor.u32 %v20810_v47, %v18404_v10  ;;  %v21013_v23 = vld [vmem:[%s22027_s13 + $0x6a4] sm:$0xf]  ;;  %v19042_v10 = vld [vmem:[%s22027_s13 + $0x548] sm:$0xf] }
 0x6e3   : > { %12443 = vmatpush.bf16.msrb.mxu0 %v18979_v50  ;;  %v18578_v50 = vld [vmem:[%s22027_s13 + $0x1a8] sm:$0xf]  ;;  %v12193_v54 = vpop.f32.mrf.mxu0  ;;  %12276 = vmatpush.bf16.msrb.mxu3 %v19323_v1  ;;  %v18860_v1 = vld [vmem:[%s22027_s13 + $0x3f0] sm:$0xf0] }
 0x6e5   : > { %12404 = vmatpush.bf16.msra.mxu1 %v18595_v42  ;;  %v18436_v42 = vld [vmem:[%s22027_s13 + $0x98] sm:$0xf0] }
 0x6e6   : > { %v12206_v34 = vpop.f32.mrf.mxu1  ;;  %v18439_v32 = vor.u32 %v20818_v19, %v18436_v42  ;;  %v21009_v42 = vld [vmem:[%s22027_s13 + $0x684] sm:$0xf] }
 0x6e7   : > { %12444 = vmatpush.bf16.msrb.mxu0 %v18963_v2  ;;  %v18579_v2 = vor.u32 %v20856_v12, %v18578_v50  ;;  %12277 = vmatpush.bf16.msrb.mxu3 %v19307_v7  ;;  %v18498_v50 = vld [vmem:[%s22027_s13 + $0x108] sm:$0xf]  ;;  %v10500_v12 = vadd.f32 %v25322_v20, %v10487_v26  ;;  %v19258_v20 = vld [vmem:[%s22027_s13 + $0x700] sm:$0xf]  ;;  %v19107_v7 = vor.u32 %v20988_v31, %v19106_v16  ;;  %v20806_v26 = vld [vmem:[%s22027_s13 + $0x2c] sm:$0xf] }
 0x6e8   : > { %v19122_v34 = vld [vmem:[%s22027_s13 + $0x5e8] sm:$0xf]  ;;  %v18499_v57 = vor.u32 %v20836_v27, %v18498_v50  ;;  %v19259_v60 = vor.u32 %v21027_v5, %v19258_v20  ;;  %v19196_v50 = vld [vmem:[%s22027_s13 + $0x690] sm:$0xf0]  ;;  %v20802_v27 = vld [vmem:[%s22027_s13 + $0xc] sm:$0xf] }
 0x6e9   : > { %12405 = vmatpush.bf16.msra.mxu1 %v18579_v2  ;;  %v20992_v2 = vld [vmem:[%s22027_s13 + $0x5f4] sm:$0xf0]  ;;  %v21005_v5 = vld [vmem:[%s22027_s13 + $0x664] sm:$0xf] }
 0x6ea   : > { %v19123_v22 = vor.u32 %v20992_v2, %v19122_v34  ;;  %v20913_v34 = vld [vmem:[%s22027_s13 + $0x384] sm:$0xf]  ;;  %v18812_v2 = vld [vmem:[%s22027_s13 + $0x390] sm:$0xf0] }
 0x6eb   : > { %12445 = vmatpush.bf16.msrb.mxu0 %v18947_v13  ;;  %v18563_v13 = vor.u32 %v20852_v3, %v18562_v18  ;;  %v18420_v3 = vld [vmem:[%s22027_s13 + $0x78] sm:$0xf0]  ;;  %v21001_v31 = vld [vmem:[%s22027_s13 + $0x644] sm:$0xf] }
 0x6ed   : > { %12406 = vmatpush.bf16.msra.mxu1 %v18563_v13  ;;  %v19247_v13 = vor.u32 %v21021_v46, %v19244_v29  ;;  %v18372_v46 = vld [vmem:[%s22027_s13 + $0x18] sm:$0xf0]  ;;  %v20958_v29 = vld [vmem:[%s22027_s13 + $0x4ec] sm:$0xf] }
 0x6ee   : > { %v25454_v53 = vpop.f32.mrf.mxu2  ;;  %v18375_v20 = vor.u32 %v20802_v27, %v18372_v46 }
 0x6ef   : > { %12446 = vmatpush.bf16.msrb.mxu0 %v18931_v35  ;;  %v19290_v35 = vld [vmem:[%s22027_s13 + $0x740] sm:$0xf] }
 0x6f0   : > { %v19291_v21 = vor.u32 %v21035_v14, %v19290_v35  ;;  %v19090_v35 = vld [vmem:[%s22027_s13 + $0x5a8] sm:$0xf]  ;;  %v20984_v14 = vld [vmem:[%s22027_s13 + $0x5b4] sm:$0xf0] }
 0x6f1   : > { %12407 = vmatpush.bf16.msra.mxu1 %v18547_v51  ;;  %v19091_v19 = vor.u32 %v20984_v14, %v19090_v35  ;;  %v20997_v14 = vld [vmem:[%s22027_s13 + $0x624] sm:$0xf] }
 0x6f2   : > { %12278 = vmatpush.bf16.msrb.mxu3 %v19291_v21  ;;  %v10512_v54 = vpop.f32.mrf.mxu3  ;;  %v19212_v21 = vld [vmem:[%s22027_s13 + $0x6b0] sm:$0xf0] }
 0x6f3   : > { %12447 = vmatpush.bf16.msrb.mxu0 %v18915_v36  ;;  %v18515_v36 = vor.u32 %v20840_v49, %v18514_v62  ;;  %v10513_v18 = vadd.f32 %v10512_v54, %v10500_v12  ;;  %v18388_v62 = vld [vmem:[%s22027_s13 + $0x38] sm:$0xf0]  ;;  %v20917_v49 = vld [vmem:[%s22027_s13 + $0x3a4] sm:$0xf]  ;;  %v19215_v44 = vor.u32 %v21013_v23, %v19212_v21  ;;  %v20980_v12 = vld [vmem:[%s22027_s13 + $0x594] sm:$0xf0] }
 0x6f4   : > { %v19148_v21 = vld [vmem:[%s22027_s13 + $0x630] sm:$0xf0] }
 0x6f5   : > { %12408 = vmatpush.bf16.msra.mxu1 %v18531_v11  ;;  %v10626_v24 = vmax.f32 %v10513_v18, 0.0  ;;  %v18847_v11 = vor.u32 %v20921_v39, %v18844_v56  ;;  %v18815_v18 = vor.u32 %v20913_v34, %v18812_v2  ;;  %v18964_v56 = vld [vmem:[%s22027_s13 + $0x4b8] sm:$0xf0]  ;;  %v18738_v34 = vld [vmem:[%s22027_s13 + $0x2e8] sm:$0xf] }
 0x6f6   : > { %12279 = vmatpush.bf16.msrb.mxu3 %v19275_v28  ;;  %v10605_v51 = vpop.f32.mrf.mxu2  ;;  %v19074_v28 = vld [vmem:[%s22027_s13 + $0x588] sm:$0xf]  ;;  %v20896_v2 = vld [vmem:[%s22027_s13 + $0x2f4] sm:$0xf0] }
 0x6f7   : > { %12448 = vmatpush.bf16.msrb.mxu0 %v18899_v41  ;;  %v20814_v41 = vld [vmem:[%s22027_s13 + $0x6c] sm:$0xf]  ;;  %v25470_v63 = vpack.c.bf16 %v10626_v24, %v10626_v24  ;;  %v19058_v24 = vld [vmem:[%s22027_s13 + $0x568] sm:$0xf]  ;;  %v20972_v51 = vld [vmem:[%s22027_s13 + $0x554] sm:$0xf0] }
 0x6f8   : > { %v18423_v0 = vor.u32 %v20814_v41, %v18420_v3  ;;  %v19075_v41 = vor.u32 %v20980_v12, %v19074_v28  ;;  %v19199_v3 = vor.u32 %v21009_v42, %v19196_v50  ;;  %v19043_v35 = vor.u32 %v20972_v51, %v19042_v10  ;;  %v19132_v50 = vld [vmem:[%s22027_s13 + $0x610] sm:$0xf0]  ;;  %v19010_v28 = vld [vmem:[%s22027_s13 + $0x508] sm:$0xf] }
 0x6f9   : > { %12409 = vmatpush.bf16.msra.mxu1 %v18515_v36  ;;  %12268 = vmatmul.bf16.vlgmr.msrb.gmra.mxu2 %v25470_v63  ;;  %v18391_v36 = vor.u32 %v20806_v26, %v18388_v62  ;;  %v19026_v26 = vld [vmem:[%s22027_s13 + $0x528] sm:$0xf]  ;;  %v20968_v62 = vld [vmem:[%s22027_s13 + $0x534] sm:$0xf0] }
 0x6fa   : > { %12280 = vmatpush.bf16.msrb.mxu3 %v19259_v60  ;;  %12364 = vmatpush.bf16.msrb.mxu2 %v19247_v13  ;;  %v10514_v17 = vpop.f32.mrf.mxu3  ;;  %v19180_v60 = vld [vmem:[%s22027_s13 + $0x670] sm:$0xf0]  ;;  %v20909_v13 = vld [vmem:[%s22027_s13 + $0x364] sm:$0xf] }
 0x6fb   : > { %12449 = vmatpush.bf16.msrb.mxu0 %v18883_v4  ;;  %v21017_v4 = vld [vmem:[%s22027_s13 + $0x6c4] sm:$0xf]  ;;  %v25494_v54 = vpop.f32.mrf.mxu0 }
 0x6fc   : > { %v20905_v17 = vld [vmem:[%s22027_s13 + $0x344] sm:$0xf] }
 0x6fd   : > { %12410 = vmatpush.bf16.msra.mxu1 %v18499_v57 }
 0x6fe   : > { %12450 = vmatmul.bf16.vlgmr.msrb.gmra.mxu0 %v25209_v8 }
 0x6ff   : > { %12494 = vmatpush.bf16.msra.mxu0 %v18487_v48  ;;  %v18863_v48 = vor.u32 %v20925_v61, %v18860_v1  ;;  %v20954_v61 = vld [vmem:[%s22027_s13 + $0x4cc] sm:$0xf]  ;;  %v18980_v1 = vld [vmem:[%s22027_s13 + $0x4d8] sm:$0xf0] }
 0x700   : > { %12411 = vmatmul.bf16.vlgmr.msra.gmra.mxu1 %v25098_v25  ;;  %v18983_v47 = vor.u32 %v20954_v61, %v18980_v1  ;;  %v18739_v61 = vor.u32 %v20896_v2, %v18738_v34  ;;  %v18658_v2 = vld [vmem:[%s22027_s13 + $0x248] sm:$0xf] }
 0x701   : > { %12325 = vmatpush.bf16.msra.mxu3 %v18863_v48  ;;  %12455 = vmatpush.bf16.msrb.mxu1 %v19123_v22  ;;  %v20976_v22 = vld [vmem:[%s22027_s13 + $0x574] sm:$0xf0]  ;;  %v19164_v48 = vld [vmem:[%s22027_s13 + $0x650] sm:$0xf0] }
 0x702   : > { %v19059_v16 = vor.u32 %v20976_v22, %v19058_v24  ;;  %v19167_v23 = vor.u32 %v21001_v31, %v19164_v48  ;;  %v18596_v31 = vld [vmem:[%s22027_s13 + $0x1d8] sm:$0xf0]  ;;  %v20938_v48 = vld [vmem:[%s22027_s13 + $0x44c] sm:$0xf] }
 0x703   : > { %12495 = vmatpush.bf16.msra.mxu0 %v18471_v45  ;;  %v19231_v45 = vor.u32 %v21017_v4, %v19228_v38  ;;  %v19183_v4 = vor.u32 %v21005_v5, %v19180_v60  ;;  %v12245_v39 = vpop.f32.mrf.mxu0  ;;  %v20897_v5 = vld [vmem:[%s22027_s13 + $0x304] sm:$0xf] }
 0x704   : > { %v18706_v39 = vld [vmem:[%s22027_s13 + $0x2a8] sm:$0xf] }
 0x705   : > { %12326 = vmatpush.bf16.msra.mxu3 %v18847_v11  ;;  %12456 = vmatpush.bf16.msrb.mxu1 %v19107_v7  ;;  %v20950_v7 = vld [vmem:[%s22027_s13 + $0x4ac] sm:$0xf] }
 0x706   : > { %12365 = vmatpush.bf16.msrb.mxu2 %v19231_v45  ;;  %v18780_v45 = vld [vmem:[%s22027_s13 + $0x350] sm:$0xf0]  ;;  %v18967_v11 = vor.u32 %v20950_v7, %v18964_v56 }
 0x707   : > { %12496 = vmatpush.bf16.msra.mxu0 %v18455_v33  ;;  %v18828_v33 = vld [vmem:[%s22027_s13 + $0x3b0] sm:$0xf0] }
 0x708   : > { %v18831_v58 = vor.u32 %v20917_v49, %v18828_v33  ;;  %v20946_v49 = vld [vmem:[%s22027_s13 + $0x48c] sm:$0xf]  ;;  %v20901_v33 = vld [vmem:[%s22027_s13 + $0x324] sm:$0xf] }
 0x709   : > { %12457 = vmatpush.bf16.msrb.mxu1 %v19091_v19  ;;  %12320 = vmatmul.bf16.vlgmr.msra.gmra.mxu2 %v25228_v37  ;;  %v18764_v19 = vld [vmem:[%s22027_s13 + $0x330] sm:$0xf0] }
 0x70a   : > { %12327 = vmatpush.bf16.msra.mxu3 %v18831_v58  ;;  %12366 = vmatpush.bf16.msrb.mxu2 %v19215_v44  ;;  %v19151_v58 = vor.u32 %v20997_v14, %v19148_v21  ;;  %v19027_v44 = vor.u32 %v20968_v62, %v19026_v26  ;;  %v18767_v12 = vor.u32 %v20901_v33, %v18764_v19  ;;  %v18690_v26 = vld [vmem:[%s22027_s13 + $0x288] sm:$0xf]  ;;  %v18564_v33 = vld [vmem:[%s22027_s13 + $0x198] sm:$0xf0]  ;;  %v20930_v19 = vld [vmem:[%s22027_s13 + $0x40c] sm:$0xf] }
 0x70b   : > { %12497 = vmatpush.bf16.msra.mxu0 %v18439_v32  ;;  %v18996_v32 = vld [vmem:[%s22027_s13 + $0x4f8] sm:$0xf0] }
 0x70c   : > { %v18999_v57 = vor.u32 %v20958_v29, %v18996_v32  ;;  %v20964_v32 = vld [vmem:[%s22027_s13 + $0x514] sm:$0xf0] }
 0x70d   : > { %12458 = vmatpush.bf16.msrb.mxu1 %v19075_v41  ;;  %v20862_v41 = vld [vmem:[%s22027_s13 + $0x1ec] sm:$0xf]  ;;  %v19011_v24 = vor.u32 %v20964_v32, %v19010_v28  ;;  %v18674_v28 = vld [vmem:[%s22027_s13 + $0x268] sm:$0xf]  ;;  %v18548_v32 = vld [vmem:[%s22027_s13 + $0x178] sm:$0xf0] }
 0x70e   : > { %12328 = vmatpush.bf16.msra.mxu3 %v18815_v18  ;;  %12367 = vmatpush.bf16.msrb.mxu2 %v19199_v3  ;;  %v12217_v42 = vpop.f32.mrf.mxu2  ;;  %v18612_v18 = vld [vmem:[%s22027_s13 + $0x1f8] sm:$0xf0]  ;;  %v20942_v3 = vld [vmem:[%s22027_s13 + $0x46c] sm:$0xf] }
 0x70f   : > { %12498 = vmatpush.bf16.msra.mxu0 %v18423_v0  ;;  %v18796_v0 = vld [vmem:[%s22027_s13 + $0x370] sm:$0xf0]  ;;  %v25529_v46 = vadd.f32 %v12217_v42, %v25408_v59  ;;  %v18615_v1 = vor.u32 %v20862_v41, %v18612_v18  ;;  %v18884_v42 = vld [vmem:[%s22027_s13 + $0x418] sm:$0xf0]  ;;  %v20876_v41 = vld [vmem:[%s22027_s13 + $0x254] sm:$0xf0] }
 0x710   : > { %v18799_v38 = vor.u32 %v20909_v13, %v18796_v0  ;;  %v18722_v13 = vld [vmem:[%s22027_s13 + $0x2c8] sm:$0xf]  ;;  %v20842_v18 = vld [vmem:[%s22027_s13 + $0x14c] sm:$0xf] }
 0x711   : > { %12459 = vmatpush.bf16.msrb.mxu1 %v19059_v16  ;;  %v20858_v16 = vld [vmem:[%s22027_s13 + $0x1cc] sm:$0xf] }
 0x712   : > { %12329 = vmatpush.bf16.msra.mxu3 %v18799_v38  ;;  %12368 = vmatpush.bf16.msrb.mxu2 %v19183_v4  ;;  %v10564_v27 = vpop.f32.mrf.mxu3  ;;  %v20892_v4 = vld [vmem:[%s22027_s13 + $0x2d4] sm:$0xf0]  ;;  %v18916_v38 = vld [vmem:[%s22027_s13 + $0x458] sm:$0xf0]  ;;  %v18599_v7 = vor.u32 %v20858_v16, %v18596_v31 }
 0x713   : > { %12499 = vmatpush.bf16.msra.mxu0 %v18407_v15  ;;  %v18783_v15 = vor.u32 %v20905_v17, %v18780_v45  ;;  %v18723_v51 = vor.u32 %v20892_v4, %v18722_v13  ;;  %v18919_v56 = vor.u32 %v20938_v48, %v18916_v38  ;;  %v20888_v17 = vld [vmem:[%s22027_s13 + $0x2b4] sm:$0xf0]  ;;  %v20854_v45 = vld [vmem:[%s22027_s13 + $0x1ac] sm:$0xf]  ;;  %v18500_v16 = vld [vmem:[%s22027_s13 + $0x118] sm:$0xf0] }
 0x714   : > { %v20834_v4 = vld [vmem:[%s22027_s13 + $0x10c] sm:$0xf]  ;;  %v21053_v48 = vld [vmem:[%s22027_s13 + $0x7e4] sm:$0xf]  ;;  %v19372_v38 = vld [vmem:[%s22027_s13 + $0x7f0] sm:$0xf0] }
 0x715   : > { %12460 = vmatpush.bf16.msrb.mxu1 %v19043_v35  ;;  %v18900_v35 = vld [vmem:[%s22027_s13 + $0x438] sm:$0xf0] }
 0x716   : > { %12330 = vmatpush.bf16.msra.mxu3 %v18783_v15  ;;  %12369 = vmatpush.bf16.msrb.mxu2 %v19167_v23  ;;  %v18580_v15 = vld [vmem:[%s22027_s13 + $0x1b8] sm:$0xf0]  ;;  %v20934_v23 = vld [vmem:[%s22027_s13 + $0x42c] sm:$0xf] }
 0x717   : > { %12500 = vmatpush.bf16.msra.mxu0 %v18391_v36  ;;  %v20993_v36 = vld [vmem:[%s22027_s13 + $0x604] sm:$0xf]  ;;  %v18583_v21 = vor.u32 %v20854_v45, %v18580_v15  ;;  %v18903_v62 = vor.u32 %v20934_v23, %v18900_v35  ;;  %v19375_v45 = vor.u32 %v21053_v48, %v19372_v38  ;;  %v21004_v48 = vld [vmem:[%s22027_s13 + $0x654] sm:$0xf0]  ;;  %v20970_v38 = vld [vmem:[%s22027_s13 + $0x54c] sm:$0xf] }
 0x718   : > { %v19135_v60 = vor.u32 %v20993_v36, %v19132_v50  ;;  %v18887_v50 = vor.u32 %v20930_v19, %v18884_v42 }
 0x719   : > { %12461 = vmatpush.bf16.msrb.mxu1 %v19027_v44 }
 0x71a   : > { %12331 = vmatpush.bf16.msra.mxu3 %v18767_v12  ;;  %12370 = vmatpush.bf16.msrb.mxu2 %v19151_v58  ;;  %v10566_v10 = vpop.f32.mrf.mxu3  ;;  %v10565_v58 = vadd.f32 %v10564_v27, %v25396_v6  ;;  %v20880_v12 = vld [vmem:[%s22027_s13 + $0x274] sm:$0xf0] }
 0x71b   : > { %12501 = vmatpush.bf16.msra.mxu0 %v18375_v20  ;;  %v18932_v20 = vld [vmem:[%s22027_s13 + $0x478] sm:$0xf0]  ;;  %v25540_v59 = vpop.f32.mrf.mxu0  ;;  %v18675_v6 = vor.u32 %v20880_v12, %v18674_v28  ;;  %v21024_v10 = vld [vmem:[%s22027_s13 + $0x6f4] sm:$0xf0]  ;;  %v20982_v28 = vld [vmem:[%s22027_s13 + $0x5ac] sm:$0xf] }
 0x71c   : > { %v18935_v0 = vor.u32 %v20942_v3, %v18932_v20  ;;  %v10578_v34 = vadd.f32 %v25332_v30, %v10565_v58  ;;  %v18532_v3 = vld [vmem:[%s22027_s13 + $0x158] sm:$0xf0]  ;;  %v18659_v20 = vor.u32 %v20876_v41, %v18658_v2  ;;  %v21045_v58 = vld [vmem:[%s22027_s13 + $0x7a4] sm:$0xf]  ;;  %v19324_v2 = vld [vmem:[%s22027_s13 + $0x790] sm:$0xf0] }
 0x71d   : > { %12462 = vmatpush.bf16.msrb.mxu1 %v19011_v24  ;;  %v20838_v24 = vld [vmem:[%s22027_s13 + $0x12c] sm:$0xf]  ;;  %v19092_v12 = vld [vmem:[%s22027_s13 + $0x5b8] sm:$0xf0]  ;;  %v19202_v41 = vld [vmem:[%s22027_s13 + $0x688] sm:$0xf] }
 0x71e   : > { %12502 = vmatmul.bf16.vlgmr.msra.gmra.mxu0 %v25096_v9  ;;  %v18948_v9 = vld [vmem:[%s22027_s13 + $0x498] sm:$0xf0]  ;;  %12371 = vmatpush.bf16.msrb.mxu2 %v19135_v60  ;;  %v10591_v30 = vadd.f32 %v25334_v43, %v10578_v34  ;;  %v20872_v60 = vld [vmem:[%s22027_s13 + $0x234] sm:$0xf0] }
 0x71f   : > { %12546 = vmatpush.bf16.msrb.mxu0 %v18999_v57  ;;  %v18951_v29 = vor.u32 %v20946_v49, %v18948_v9  ;;  %v18748_v57 = vld [vmem:[%s22027_s13 + $0x310] sm:$0xf0]  ;;  %v20884_v49 = vld [vmem:[%s22027_s13 + $0x294] sm:$0xf0]  ;;  %v20850_v9 = vld [vmem:[%s22027_s13 + $0x18c] sm:$0xf] }
 0x720   : > { %v18751_v22 = vor.u32 %v20897_v5, %v18748_v57  ;;  %12463 = vmatmul.bf16.vlgmr.msrb.gmra.mxu1 %v25339_v52  ;;  %v18691_v44 = vor.u32 %v20884_v49, %v18690_v26  ;;  %v18567_v36 = vor.u32 %v20850_v9, %v18564_v33  ;;  %v18535_v5 = vor.u32 %v20842_v18, %v18532_v3  ;;  %v18642_v57 = vld [vmem:[%s22027_s13 + $0x228] sm:$0xf]  ;;  %v21020_v26 = vld [vmem:[%s22027_s13 + $0x6d4] sm:$0xf0]  ;;  %v19108_v49 = vld [vmem:[%s22027_s13 + $0x5d8] sm:$0xf0] }
 0x721   : > { %12507 = vmatpush.bf16.msra.mxu1 %v18615_v1  ;;  %12372 = vmatmul.bf16.vlgmr.msrb.gmra.mxu2 %v25470_v63  ;;  %v18626_v1 = vld [vmem:[%s22027_s13 + $0x208] sm:$0xf]  ;;  %v21012_v18 = vld [vmem:[%s22027_s13 + $0x694] sm:$0xf0]  ;;  %v20978_v3 = vld [vmem:[%s22027_s13 + $0x58c] sm:$0xf] }
 0x722   : > { %12332 = vmatpush.bf16.msra.mxu3 %v18751_v22  ;;  %12416 = vmatpush.bf16.msra.mxu2 %v18739_v61  ;;  %v18516_v22 = vld [vmem:[%s22027_s13 + $0x138] sm:$0xf0]  ;;  %v18643_v61 = vor.u32 %v20872_v60, %v18642_v57  ;;  %v21037_v60 = vld [vmem:[%s22027_s13 + $0x764] sm:$0xf] }
 0x723   : > { %12547 = vmatpush.bf16.msrb.mxu0 %v18983_v47  ;;  %v12219_v47 = vpop.f32.mrf.mxu2  ;;  %v12297_v14 = vpop.f32.mrf.mxu0  ;;  %v18519_v13 = vor.u32 %v20838_v24, %v18516_v22  ;;  %v19308_v24 = vld [vmem:[%s22027_s13 + $0x770] sm:$0xf0]  ;;  %v19186_v22 = vld [vmem:[%s22027_s13 + $0x668] sm:$0xf] }
 0x724   : > { %v19250_v47 = vld [vmem:[%s22027_s13 + $0x6e8] sm:$0xf]  ;;  %v21049_v14 = vld [vmem:[%s22027_s13 + $0x7c4] sm:$0xf] }
 0x725   : > { %12508 = vmatpush.bf16.msra.mxu1 %v18599_v7  ;;  %v19251_v23 = vor.u32 %v21024_v10, %v19250_v47  ;;  %v19044_v47 = vld [vmem:[%s22027_s13 + $0x558] sm:$0xf0] }
 0x726   : > { %12417 = vmatpush.bf16.msra.mxu2 %v18723_v51  ;;  %v20990_v51 = vld [vmem:[%s22027_s13 + $0x5ec] sm:$0xf] }
 0x727   : > { %12548 = vmatpush.bf16.msrb.mxu0 %v18967_v11  ;;  %v18707_v11 = vor.u32 %v20888_v17, %v18706_v39  ;;  %v18503_v17 = vor.u32 %v20834_v4, %v18500_v16  ;;  %v21033_v4 = vld [vmem:[%s22027_s13 + $0x744] sm:$0xf]  ;;  %v19292_v16 = vld [vmem:[%s22027_s13 + $0x750] sm:$0xf0] }
 0x729   : > { %12509 = vmatpush.bf16.msra.mxu1 %v18583_v21  ;;  %v19234_v21 = vld [vmem:[%s22027_s13 + $0x6c8] sm:$0xf] }
 0x72a   : > { %12418 = vmatpush.bf16.msra.mxu2 %v18707_v11  ;;  %v19356_v11 = vld [vmem:[%s22027_s13 + $0x7d0] sm:$0xf0]  ;;  %v19235_v19 = vor.u32 %v21020_v26, %v19234_v21  ;;  %v21025_v21 = vld [vmem:[%s22027_s13 + $0x704] sm:$0xf] }
 0x72b   : > { %12549 = vmatpush.bf16.msrb.mxu0 %v18951_v29  ;;  %v20846_v29 = vld [vmem:[%s22027_s13 + $0x16c] sm:$0xf]  ;;  %v19359_v33 = vor.u32 %v21049_v14, %v19356_v11  ;;  %v19028_v11 = vld [vmem:[%s22027_s13 + $0x538] sm:$0xf0] }
 0x72c   : > { %v18551_v27 = vor.u32 %v20846_v29, %v18548_v32  ;;  %v20966_v14 = vld [vmem:[%s22027_s13 + $0x52c] sm:$0xf] }
 0x72d   : > { %12510 = vmatpush.bf16.msra.mxu1 %v18567_v36  ;;  %v19218_v36 = vld [vmem:[%s22027_s13 + $0x6a8] sm:$0xf] }
 0x72e   : > { %12419 = vmatpush.bf16.msra.mxu2 %v18691_v44  ;;  %v19340_v44 = vld [vmem:[%s22027_s13 + $0x7b0] sm:$0xf0] }
 0x72f   : > { %12550 = vmatpush.bf16.msrb.mxu0 %v18935_v0  ;;  %v20868_v0 = vld [vmem:[%s22027_s13 + $0x214] sm:$0xf0]  ;;  %v19343_v32 = vor.u32 %v21045_v58, %v19340_v44  ;;  %v20962_v44 = vld [vmem:[%s22027_s13 + $0x50c] sm:$0xf] }
 0x731   : > { %12511 = vmatpush.bf16.msra.mxu1 %v18551_v27  ;;  %v21041_v27 = vld [vmem:[%s22027_s13 + $0x784] sm:$0xf] }
 0x732   : > { %12420 = vmatpush.bf16.msra.mxu2 %v18675_v6  ;;  %v10616_v43 = vpop.f32.mrf.mxu3  ;;  %v19095_v6 = vor.u32 %v20982_v28, %v19092_v12  ;;  %v20928_v12 = vld [vmem:[%s22027_s13 + $0x3f4] sm:$0xf0] }
 0x733   : > { %12551 = vmatpush.bf16.msrb.mxu0 %v18919_v56  ;;  %v18627_v56 = vor.u32 %v20868_v0, %v18626_v1  ;;  %v19060_v1 = vld [vmem:[%s22027_s13 + $0x578] sm:$0xf0] }
 0x735   : > { %12512 = vmatpush.bf16.msra.mxu1 %v18535_v5  ;;  %v19203_v5 = vor.u32 %v21012_v18, %v19202_v41 }
 0x736   : > { %12421 = vmatpush.bf16.msra.mxu2 %v18659_v20  ;;  %v19076_v20 = vld [vmem:[%s22027_s13 + $0x598] sm:$0xf0] }
 0x737   : > { %12552 = vmatpush.bf16.msrb.mxu0 %v18903_v62  ;;  %v20986_v62 = vld [vmem:[%s22027_s13 + $0x5cc] sm:$0xf]  ;;  %v19079_v57 = vor.u32 %v20978_v3, %v19076_v20  ;;  %v18850_v3 = vld [vmem:[%s22027_s13 + $0x3c8] sm:$0xf] }
 0x738   : > { %v19111_v42 = vor.u32 %v20986_v62, %v19108_v49  ;;  %v19031_v49 = vor.u32 %v20966_v14, %v19028_v11  ;;  %v18660_v14 = vld [vmem:[%s22027_s13 + $0x258] sm:$0xf0] }
 0x739   : > { %12513 = vmatpush.bf16.msra.mxu1 %v18519_v13 }
 0x73a   : > { %12422 = vmatpush.bf16.msra.mxu2 %v18643_v61  ;;  %v10618_v9 = vpop.f32.mrf.mxu3  ;;  %v20974_v61 = vld [vmem:[%s22027_s13 + $0x56c] sm:$0xf] }
 0x73b   : > { %12553 = vmatpush.bf16.msrb.mxu0 %v18887_v50  ;;  %v25589_v39 = vpop.f32.mrf.mxu0  ;;  %v21016_v50 = vld [vmem:[%s22027_s13 + $0x6b4] sm:$0xf0]  ;;  %v19063_v0 = vor.u32 %v20974_v61, %v19060_v1  ;;  %v19260_v9 = vld [vmem:[%s22027_s13 + $0x710] sm:$0xf0]  ;;  %v20886_v61 = vld [vmem:[%s22027_s13 + $0x2ac] sm:$0xf] }
 0x73c   : > { %v19219_v34 = vor.u32 %v21016_v50, %v19218_v36  ;;  %v19012_v36 = vld [vmem:[%s22027_s13 + $0x518] sm:$0xf0]  ;;  %v18866_v50 = vld [vmem:[%s22027_s13 + $0x3e8] sm:$0xf] }
 0x73d   : > { %12514 = vmatpush.bf16.msra.mxu1 %v18503_v17  ;;  %v21029_v17 = vld [vmem:[%s22027_s13 + $0x724] sm:$0xf]  ;;  %v18867_v41 = vor.u32 %v20928_v12, %v18866_v50  ;;  %v18708_v1 = vld [vmem:[%s22027_s13 + $0x2b8] sm:$0xf0]  ;;  %v19378_v50 = vld [vmem:[%s22027_s13 + $0x7e8] sm:$0xf] }
 0x73e   : > { %12554 = vmatmul.bf16.vlgmr.msrb.gmra.mxu0 %v25209_v8  ;;  %v10604_v8 = vadd.f32 %v25454_v53, %v10591_v30  ;;  %v19124_v53 = vld [vmem:[%s22027_s13 + $0x5f8] sm:$0xf0]  ;;  %12423 = vmatpush.bf16.msra.mxu2 %v18627_v56  ;;  %v19327_v30 = vor.u32 %v21041_v27, %v19324_v2  ;;  %v19047_v56 = vor.u32 %v20970_v38, %v19044_v47  ;;  %v18802_v47 = vld [vmem:[%s22027_s13 + $0x368] sm:$0xf]  ;;  %v21022_v12 = vld [vmem:[%s22027_s13 + $0x6ec] sm:$0xf] }
 0x73f   : > { %v19127_v35 = vor.u32 %v20990_v51, %v19124_v53  ;;  %v10895_v51 = vperm.slane %v25384_v55, 1  ;;  %v19295_v53 = vor.u32 %v21033_v4, %v19292_v16  ;;  %v19015_v2 = vor.u32 %v20962_v44, %v19012_v36  ;;  %v18818_v4 = vld [vmem:[%s22027_s13 + $0x388] sm:$0xf]  ;;  %v20916_v16 = vld [vmem:[%s22027_s13 + $0x394] sm:$0xf0] }
 0x740   : > { %v10617_v31 = vadd.f32 %v10616_v43, %v10604_v8  ;;  %12515 = vmatmul.bf16.vlgmr.msra.gmra.mxu1 %v25098_v25  ;;  %v25614_v25 = vpop.f32.mrf.mxu1  ;;  %v21008_v8 = vld [vmem:[%s22027_s13 + $0x674] sm:$0xf0]  ;;  %v19311_v43 = vor.u32 %v21037_v60, %v19308_v24  ;;  %v18819_v38 = vor.u32 %v20916_v16, %v18818_v4  ;;  %v20866_v44 = vld [vmem:[%s22027_s13 + $0x20c] sm:$0xf]  ;;  %v18628_v36 = vld [vmem:[%s22027_s13 + $0x218] sm:$0xf0] }
 0x741   : > { %12559 = vmatpush.bf16.msrb.mxu1 %v19127_v35  ;;  %12424 = vmatmul.bf16.vlgmr.msra.gmra.mxu2 %v25228_v37  ;;  %v19187_v13 = vor.u32 %v21008_v8, %v19186_v22  ;;  %v21000_v35 = vld [vmem:[%s22027_s13 + $0x634] sm:$0xf0]  ;;  %v18834_v22 = vld [vmem:[%s22027_s13 + $0x3a8] sm:$0xf]  ;;  %v21010_v4 = vld [vmem:[%s22027_s13 + $0x68c] sm:$0xf] }
 0x742   : > { %v10627_v7 = vmax.f32 %v10617_v31, 0.0  ;;  %12468 = vmatpush.bf16.msrb.mxu2 %v19251_v23  ;;  %v19170_v31 = vld [vmem:[%s22027_s13 + $0x648] sm:$0xf]  ;;  %v20920_v8 = vld [vmem:[%s22027_s13 + $0x3b4] sm:$0xf0] }
 0x743   : > { %v12349_v29 = vpop.f32.mrf.mxu0  ;;  %v19154_v23 = vld [vmem:[%s22027_s13 + $0x628] sm:$0xf]  ;;  %v19204_v16 = vld [vmem:[%s22027_s13 + $0x698] sm:$0xf0] }
 0x744   : > { %v25591_v15 = vpack.c.bf16 %v10627_v7, %v10627_v7  ;;  %v19171_v7 = vor.u32 %v21004_v48, %v19170_v31  ;;  %v19155_v62 = vor.u32 %v21000_v35, %v19154_v23  ;;  %v20894_v29 = vld [vmem:[%s22027_s13 + $0x2ec] sm:$0xf]  ;;  %v18692_v48 = vld [vmem:[%s22027_s13 + $0x298] sm:$0xf0]  ;;  %v20908_v23 = vld [vmem:[%s22027_s13 + $0x354] sm:$0xf0] }
 0x745   : > { %12560 = vmatpush.bf16.msrb.mxu1 %v19111_v42  ;;  %v12296_v42 = vadd.f32 %v25540_v59, %v10895_v51  ;;  %v19263_v59 = vor.u32 %v21025_v21, %v19260_v9  ;;  %v20882_v31 = vld [vmem:[%s22027_s13 + $0x28c] sm:$0xf]  ;;  %v20912_v51 = vld [vmem:[%s22027_s13 + $0x374] sm:$0xf0]  ;;  %v18770_v21 = vld [vmem:[%s22027_s13 + $0x328] sm:$0xf] }
 0x746   : > { %12281 = vmatmul.bf16.vlgmr.msrb.gmra.mxu3 %v25591_v15  ;;  %12469 = vmatpush.bf16.msrb.mxu2 %v19235_v19  ;;  %v20996_v19 = vld [vmem:[%s22027_s13 + $0x614] sm:$0xf0]  ;;  %v20874_v35 = vld [vmem:[%s22027_s13 + $0x24c] sm:$0xf]  ;;  %v18644_v9 = vld [vmem:[%s22027_s13 + $0x238] sm:$0xf0] }
 0x747   : > { %12377 = vmatpush.bf16.msrb.mxu3 %v19375_v45  ;;  %v19276_v45 = vld [vmem:[%s22027_s13 + $0x730] sm:$0xf0] }
 0x748   : > { %v12258_v10 = vpop.f32.mrf.mxu1  ;;  %v19279_v55 = vor.u32 %v21029_v17, %v19276_v45  ;;  %v18786_v45 = vld [vmem:[%s22027_s13 + $0x348] sm:$0xf] }
 0x749   : > { %12561 = vmatpush.bf16.msrb.mxu1 %v19095_v6  ;;  %v18787_v11 = vor.u32 %v20908_v23, %v18786_v45  ;;  %v21036_v45 = vld [vmem:[%s22027_s13 + $0x754] sm:$0xf0] }
 0x74a   : > { %12470 = vmatpush.bf16.msrb.mxu2 %v19219_v34 }
 0x74b   : > { %12378 = vmatpush.bf16.msrb.mxu3 %v19359_v33  ;;  %v19138_v33 = vld [vmem:[%s22027_s13 + $0x608] sm:$0xf] }
 0x74d   : > { %12562 = vmatpush.bf16.msrb.mxu1 %v19079_v57 }
 0x74e   : > { %12471 = vmatpush.bf16.msrb.mxu2 %v19203_v5  ;;  %v18724_v5 = vld [vmem:[%s22027_s13 + $0x2d8] sm:$0xf0] }
 0x74f   : > { %12379 = vmatpush.bf16.msrb.mxu3 %v19343_v32  ;;  %v18740_v32 = vld [vmem:[%s22027_s13 + $0x2f8] sm:$0xf0] }
 0x750   : > { %v12308_v28 = vpop.f32.mrf.mxu1  ;;  %v18743_v18 = vor.u32 %v20894_v29, %v18740_v32  ;;  %v19252_v29 = vld [vmem:[%s22027_s13 + $0x6f8] sm:$0xf0] }
 0x751   : > { %12563 = vmatpush.bf16.msrb.mxu1 %v19063_v0  ;;  %v25651_v27 = vadd.f32 %v12308_v28, %v12296_v42  ;;  %v18711_v0 = vor.u32 %v20886_v61, %v18708_v1  ;;  %v18754_v42 = vld [vmem:[%s22027_s13 + $0x308] sm:$0xf]  ;;  %v21056_v28 = vld [vmem:[%s22027_s13 + $0x7f4] sm:$0xf0] }
 0x752   : > { %12472 = vmatpush.bf16.msrb.mxu2 %v19187_v13  ;;  %v12230_v26 = vpop.f32.mrf.mxu3  ;;  %v18835_v13 = vor.u32 %v20920_v8, %v18834_v22  ;;  %v19220_v22 = vld [vmem:[%s22027_s13 + $0x6b8] sm:$0xf0]  ;;  %v25706_v8 = vld [vmem:[%s22035_s26] sm:$0xf] }
 0x753   : > { %12380 = vmatpush.bf16.msrb.mxu3 %v19327_v30  ;;  %v12231_v58 = vadd.f32 %v12230_v26, %v25529_v46  ;;  %v19139_v46 = vor.u32 %v20996_v19, %v19138_v33  ;;  %v20890_v30 = vld [vmem:[%s22027_s13 + $0x2cc] sm:$0xf]  ;;  %v10896_v61 = vperm.slane %v25706_v8, 2 }
 0x754   : > { %v18727_v24 = vor.u32 %v20890_v30, %v18724_v5 }
 0x755   : > { %12564 = vmatpush.bf16.msrb.mxu1 %v19047_v56  ;;  %v12244_v34 = vadd.f32 %v25494_v54, %v12231_v58  ;;  %v20924_v54 = vld [vmem:[%s22027_s13 + $0x3d4] sm:$0xf0]  ;;  %v18803_v56 = vor.u32 %v20912_v51, %v18802_v47  ;;  %v21006_v51 = vld [vmem:[%s22027_s13 + $0x66c] sm:$0xf] }
 0x756   : > { %12333 = vmatmul.bf16.vlgmr.msra.gmra.mxu3 %v25356_v40  ;;  %12473 = vmatpush.bf16.msrb.mxu2 %v19171_v7  ;;  %v18851_v60 = vor.u32 %v20924_v54, %v18850_v3  ;;  %v18676_v7 = vld [vmem:[%s22027_s13 + $0x278] sm:$0xf0]  ;;  %v20900_v58 = vld [vmem:[%s22027_s13 + $0x314] sm:$0xf0]  ;;  %v21018_v3 = vld [vmem:[%s22027_s13 + $0x6cc] sm:$0xf] }
 0x757   : > { %12381 = vmatpush.bf16.msrb.mxu3 %v19311_v43  ;;  %v25655_v20 = vadd.f32 %v25614_v25, %v12244_v34  ;;  %v18755_v34 = vor.u32 %v20900_v58, %v18754_v42  ;;  %v19236_v54 = vld [vmem:[%s22027_s13 + $0x6d8] sm:$0xf0]  ;;  %v21040_v47 = vld [vmem:[%s22027_s13 + $0x774] sm:$0xf0] }
 0x758   : > { %v12310_v25 = vpop.f32.mrf.mxu1  ;;  %v19239_v5 = vor.u32 %v21018_v3, %v19236_v54  ;;  %v21061_v3 = vld [vmem:[%s22038_s21 + $0x20] sm:$0xff] }
 0x759   : > { %12565 = vmatpush.bf16.msrb.mxu1 %v19031_v49  ;;  %v20870_v49 = vld [vmem:[%s22027_s13 + $0x22c] sm:$0xf] }
 0x75a   : > { %12474 = vmatpush.bf16.msrb.mxu2 %v19155_v62  ;;  %v12232_v57 = vpop.f32.mrf.mxu3  ;;  %v20904_v62 = vld [vmem:[%s22027_s13 + $0x334] sm:$0xf0]  ;;  %v18647_v19 = vor.u32 %v20870_v49, %v18644_v9  ;;  %v20998_v9 = vld [vmem:[%s22027_s13 + $0x62c] sm:$0xf] }
 0x75b   : > { %12382 = vmatpush.bf16.msrb.mxu3 %v19295_v53  ;;  %v25649_v6 = vpop.f32.mrf.mxu0  ;;  %v20878_v53 = vld [vmem:[%s22027_s13 + $0x26c] sm:$0xf]  ;;  %v18771_v33 = vor.u32 %v20904_v62, %v18770_v21  ;;  %v19346_v57 = vld [vmem:[%s22027_s13 + $0x7a8] sm:$0xf]  ;;  %v21032_v62 = vld [vmem:[%s22027_s13 + $0x734] sm:$0xf0] }
 0x75c   : > { %v18679_v17 = vor.u32 %v20878_v53, %v18676_v7  ;;  %v19188_v53 = vld [vmem:[%s22027_s13 + $0x678] sm:$0xf0]  ;;  %v20922_v54 = vld [vmem:[%s22027_s13 + $0x3cc] sm:$0xf] }
 0x75d   : > { %12566 = vmatpush.bf16.msrb.mxu1 %v19015_v2  ;;  %v19255_v2 = vor.u32 %v21022_v12, %v19252_v29  ;;  %v19140_v12 = vld [vmem:[%s22027_s13 + $0x618] sm:$0xf0]  ;;  %v21062_v29 = vld [vmem:[%s22038_s21 + $0x28] sm:$0xff] }
 0x75e   : > { %12475 = vmatpush.bf16.msrb.mxu2 %v19139_v46  ;;  %v19379_v46 = vor.u32 %v21056_v28, %v19378_v50  ;;  %v20994_v28 = vld [vmem:[%s22027_s13 + $0x60c] sm:$0xf] }
 0x75f   : > { %12383 = vmatpush.bf16.msrb.mxu3 %v19279_v55  ;;  %v18663_v55 = vor.u32 %v20874_v35, %v18660_v14  ;;  %v21002_v35 = vld [vmem:[%s22027_s13 + $0x64c] sm:$0xf]  ;;  %v19172_v14 = vld [vmem:[%s22027_s13 + $0x658] sm:$0xf0] }
 0x760   : > { %12567 = vmatmul.bf16.vlgmr.msrb.gmra.mxu1 %v25339_v52  ;;  %v18695_v52 = vor.u32 %v20882_v31, %v18692_v48  ;;  %v25672_v10 = vpop.f32.mrf.mxu1  ;;  %v19207_v48 = vor.u32 %v21010_v4, %v19204_v16  ;;  %v19175_v21 = vor.u32 %v21002_v35, %v19172_v14  ;;  %v21058_v16 = vld [vmem:[%s22038_s21 + $0x8] sm:$0xff]  ;;  %v21071_v14 = vld [vmem:[%s22038_s21 + $0x70] sm:$0xff] }
 0x761   : > { %12476 = vmatmul.bf16.vlgmr.msrb.gmra.mxu2 %v25470_v63 }
 0x762   : > { %12520 = vmatpush.bf16.msra.mxu2 %v18743_v18  ;;  %v21052_v18 = vld [vmem:[%s22027_s13 + $0x7d4] sm:$0xf0] }
 0x763   : > { %12384 = vmatpush.bf16.msrb.mxu3 %v19263_v59  ;;  %v12401_v43 = vpop.f32.mrf.mxu0  ;;  %v18631_v59 = vor.u32 %v20866_v44, %v18628_v36  ;;  %v19266_v44 = vld [vmem:[%s22027_s13 + $0x708] sm:$0xf]  ;;  %v21028_v36 = vld [vmem:[%s22027_s13 + $0x714] sm:$0xf0] }
 0x766   : > { %12385 = vmatmul.bf16.vlgmr.msrb.gmra.mxu3 %v25591_v15  ;;  %12521 = vmatpush.bf16.msra.mxu2 %v18727_v24  ;;  %v21014_v24 = vld [vmem:[%s22027_s13 + $0x6ac] sm:$0xf] }
 0x767   : > { %12429 = vmatpush.bf16.msra.mxu3 %v18867_v41  ;;  %v19362_v41 = vld [vmem:[%s22027_s13 + $0x7c8] sm:$0xf]  ;;  %v19223_v43 = vor.u32 %v21014_v24, %v19220_v22  ;;  %v20918_v22 = vld [vmem:[%s22027_s13 + $0x3ac] sm:$0xf] }
 0x768   : > { %v12362_v26 = vpop.f32.mrf.mxu1  ;;  %v19363_v30 = vor.u32 %v21052_v18, %v19362_v41  ;;  %v19143_v41 = vor.u32 %v20994_v28, %v19140_v12  ;;  %v19348_v28 = vld [vmem:[%s22027_s13 + $0x7b8] sm:$0xf0]  ;;  %v21068_v12 = vld [vmem:[%s22038_s21 + $0x58] sm:$0xff] }
 0x769   : > { %v19282_v26 = vld [vmem:[%s22027_s13 + $0x728] sm:$0xf] }
 0x76a   : > { %12522 = vmatpush.bf16.msra.mxu2 %v18711_v0  ;;  %v21044_v0 = vld [vmem:[%s22027_s13 + $0x794] sm:$0xf0]  ;;  %v19283_v42 = vor.u32 %v21032_v62, %v19282_v26  ;;  %v19380_v26 = vld [vmem:[%s22027_s13 + $0x7f8] sm:$0xf0] }
 0x76b   : > { %12430 = vmatpush.bf16.msra.mxu3 %v18851_v60  ;;  %v21048_v60 = vld [vmem:[%s22027_s13 + $0x7b4] sm:$0xf0] }
 0x76c   : > { %v19347_v1 = vor.u32 %v21048_v60, %v19346_v57  ;;  %v21060_v60 = vld [vmem:[%s22038_s21 + $0x18] sm:$0xff] }
 0x76e   : > { %12523 = vmatpush.bf16.msra.mxu2 %v18695_v52 }
 0x76f   : > { %12431 = vmatpush.bf16.msra.mxu3 %v18835_v13  ;;  %v19330_v13 = vld [vmem:[%s22027_s13 + $0x788] sm:$0xf] }
 0x770   : > { %v19331_v31 = vor.u32 %v21044_v0, %v19330_v13  ;;  %v20914_v13 = vld [vmem:[%s22027_s13 + $0x38c] sm:$0xf] }
 0x772   : > { %12524 = vmatpush.bf16.msra.mxu2 %v18679_v17  ;;  %v19298_v17 = vld [vmem:[%s22027_s13 + $0x748] sm:$0xf] }
 0x773   : > { %12432 = vmatpush.bf16.msra.mxu3 %v18819_v38  ;;  %v19314_v38 = vld [vmem:[%s22027_s13 + $0x768] sm:$0xf] }
 0x776   : > { %12525 = vmatpush.bf16.msra.mxu2 %v18663_v55  ;;  %v19299_v55 = vor.u32 %v21036_v45, %v19298_v17  ;;  %v18772_v17 = vld [vmem:[%s22027_s13 + $0x338] sm:$0xf0] }
 0x777   : > { %12433 = vmatpush.bf16.msra.mxu3 %v18803_v56  ;;  %v19191_v56 = vor.u32 %v21006_v51, %v19188_v53 }
 0x77a   : > { %12526 = vmatpush.bf16.msra.mxu2 %v18647_v19  ;;  %v21063_v19 = vld [vmem:[%s22038_s21 + $0x30] sm:$0xff] }
 0x77b   : > { %12434 = vmatpush.bf16.msra.mxu3 %v18787_v11  ;;  %v25693_v32 = vpop.f32.mrf.mxu0  ;;  %v21064_v11 = vld [vmem:[%s22038_s21 + $0x38] sm:$0xff] }
 0x77c   : > { %v25722_v23 = vpop.f32.mrf.mxu2  ;;  %12862 = vmatpush.bf16.msra.mxu0 %v21064_v11  ;;  %v20898_v11 = vld [vmem:[%s22027_s13 + $0x30c] sm:$0xf] }
 0x77d   : > { %v12412_v52 = vpop.f32.mrf.mxu1 }
 0x77e   : > { %12527 = vmatpush.bf16.msra.mxu2 %v18631_v59  ;;  %v18868_v59 = vld [vmem:[%s22027_s13 + $0x3f8] sm:$0xf0] }
 0x77f   : > { %12435 = vmatpush.bf16.msra.mxu3 %v18771_v33  ;;  %v19156_v33 = vld [vmem:[%s22027_s13 + $0x638] sm:$0xf0] }
 0x780   : > { %12863 = vmatpush.bf16.msra.mxu0 %v21063_v19  ;;  %v19159_v58 = vor.u32 %v20998_v9, %v19156_v33  ;;  %v21070_v33 = vld [vmem:[%s22038_s21 + $0x68] sm:$0xff] }
 0x781   : > { %12528 = vmatmul.bf16.vlgmr.msra.gmra.mxu2 %v25228_v37  ;;  %v12400_v37 = vadd.f32 %v25649_v6, %v10896_v61  ;;  %v19315_v6 = vor.u32 %v21040_v47, %v19314_v38  ;;  %v21057_v38 = vld [vmem:[%s22038_s21] sm:$0xff]  ;;  %v18788_v47 = vld [vmem:[%s22027_s13 + $0x358] sm:$0xf0] }
 0x782   : > { %12572 = vmatpush.bf16.msrb.mxu2 %v19255_v2  ;;  %v19267_v2 = vor.u32 %v21028_v36, %v19266_v44  ;;  %v21069_v44 = vld [vmem:[%s22038_s21 + $0x60] sm:$0xff] }
 0x783   : > { %12436 = vmatpush.bf16.msra.mxu3 %v18755_v34  ;;  %v12453_v25 = vpop.f32.mrf.mxu0  ;;  %v25718_v7 = vadd.f32 %v12412_v52, %v12400_v37  ;;  %v20926_v34 = vld [vmem:[%s22027_s13 + $0x3ec] sm:$0xf] }
 0x784   : > { %v12271_v50 = vpop.f32.mrf.mxu2  ;;  %12864 = vmatpush.bf16.msra.mxu0 %v21062_v29  ;;  %v18871_v18 = vor.u32 %v20926_v34, %v18868_v59  ;;  %v18836_v25 = vld [vmem:[%s22027_s13 + $0x3b8] sm:$0xf0]  ;;  %v20910_v37 = vld [vmem:[%s22027_s13 + $0x36c] sm:$0xf] }
 0x785   : > { %v12414_v49 = vpop.f32.mrf.mxu1  ;;  %v20906_v52 = vld [vmem:[%s22027_s13 + $0x34c] sm:$0xf] }
 0x786   : > { %12437 = vmatmul.bf16.vlgmr.msra.gmra.mxu3 %v25356_v40  ;;  %12573 = vmatpush.bf16.msrb.mxu2 %v19239_v5  ;;  %v18791_v53 = vor.u32 %v20906_v52, %v18788_v47  ;;  %v21046_v50 = vld [vmem:[%s22027_s13 + $0x7ac] sm:$0xf] }
 0x787   : > { %12481 = vmatpush.bf16.msrb.mxu3 %v19379_v46  ;;  %v19351_v34 = vor.u32 %v21046_v50, %v19348_v28  ;;  %v21042_v59 = vld [vmem:[%s22027_s13 + $0x78c] sm:$0xf] }
 0x788   : > { %12865 = vmatpush.bf16.msra.mxu0 %v21061_v3 }
 0x78a   : > { %12574 = vmatpush.bf16.msrb.mxu2 %v19223_v43  ;;  %v21059_v43 = vld [vmem:[%s22038_s21 + $0x10] sm:$0xff] }
 0x78b   : > { %12482 = vmatpush.bf16.msrb.mxu3 %v19363_v30  ;;  %v18852_v30 = vld [vmem:[%s22027_s13 + $0x3d8] sm:$0xf0] }
 0x78c   : > { %v12321_v5 = vpop.f32.mrf.mxu2  ;;  %v18855_v57 = vor.u32 %v20922_v54, %v18852_v30  ;;  %12866 = vmatpush.bf16.msra.mxu0 %v21060_v60  ;;  %v21038_v54 = vld [vmem:[%s22027_s13 + $0x76c] sm:$0xf]  ;;  %v19316_v30 = vld [vmem:[%s22027_s13 + $0x778] sm:$0xf0]  ;;  %v12270_v60 = vadd.f32 %v25722_v23, %v25655_v20 }
 0x78d   : > { %v25746_v24 = vadd.f32 %v12321_v5, %v25651_v27  ;;  %v18820_v27 = vld [vmem:[%s22027_s13 + $0x398] sm:$0xf0]  ;;  %v21066_v5 = vld [vmem:[%s22038_s21 + $0x48] sm:$0xff]  ;;  %v21030_v23 = vld [vmem:[%s22027_s13 + $0x72c] sm:$0xf] }
 0x78e   : > { %12575 = vmatpush.bf16.msrb.mxu2 %v19207_v48  ;;  %v18823_v4 = vor.u32 %v20914_v13, %v18820_v27  ;;  %v21065_v13 = vld [vmem:[%s22038_s21 + $0x40] sm:$0xff] }
 0x78f   : > { %12483 = vmatpush.bf16.msrb.mxu3 %v19347_v1  ;;  %v18839_v1 = vor.u32 %v20918_v22, %v18836_v25 }
 0x790   : > { %12867 = vmatpush.bf16.msra.mxu0 %v21059_v43 }
 0x792   : > { %12576 = vmatpush.bf16.msrb.mxu2 %v19191_v56  ;;  %v20902_v56 = vld [vmem:[%s22027_s13 + $0x32c] sm:$0xf] }
 0x793   : > { %12484 = vmatpush.bf16.msrb.mxu3 %v19331_v31  ;;  %v18775_v35 = vor.u32 %v20902_v56, %v18772_v17 }
 0x794   : > { %v12323_v0 = vpop.f32.mrf.mxu2  ;;  %12868 = vmatpush.bf16.msra.mxu0 %v21058_v16 }
 0x796   : > { %12577 = vmatpush.bf16.msrb.mxu2 %v19175_v21  ;;  %v21054_v21 = vld [vmem:[%s22027_s13 + $0x7ec] sm:$0xf] }
 0x797   : > { %12485 = vmatpush.bf16.msrb.mxu3 %v19315_v6  ;;  %v21072_v6 = vld [vmem:[%s22038_s21 + $0x78] sm:$0xff]  ;;  %v19383_v19 = vor.u32 %v21054_v21, %v19380_v26  ;;  %v21078_v26 = vld [vmem:[%s22038_s21 + $0xa8] sm:$0xff] }
 0x798   : > { %12869 = vmatpush.bf16.msra.mxu0 %v21057_v38  ;;  %12875 = vmatpush.bf16.msra.mxu1 %v21072_v6  ;;  %v19268_v38 = vld [vmem:[%s22027_s13 + $0x718] sm:$0xf0] }
 0x79a   : > { %12578 = vmatpush.bf16.msrb.mxu2 %v19159_v58  ;;  %v19364_v58 = vld [vmem:[%s22027_s13 + $0x7d8] sm:$0xf0] }
 0x79b   : > { %12486 = vmatpush.bf16.msrb.mxu3 %v19299_v55  ;;  %v25739_v46 = vpop.f32.mrf.mxu0  ;;  %v18756_v55 = vld [vmem:[%s22027_s13 + $0x318] sm:$0xf0] }
 0x79c   : > { %12876 = vmatpush.bf16.msra.mxu1 %v21071_v14  ;;  %v18759_v9 = vor.u32 %v20898_v11, %v18756_v55  ;;  %v21080_v14 = vld [vmem:[%s22038_s21 + $0xb8] sm:$0xff] }
 0x79d   : > { %v25758_v31 = vpop.f32.mrf.mxu1 }
 0x79e   : > { %12579 = vmatpush.bf16.msrb.mxu2 %v19143_v41  ;;  %v10897_v41 = vperm.slane %v25706_v8, 3  ;;  %v19319_v8 = vor.u32 %v21038_v54, %v19316_v30 }
 0x79f   : > { %12487 = vmatpush.bf16.msrb.mxu3 %v19283_v42  ;;  %v21050_v42 = vld [vmem:[%s22027_s13 + $0x7cc] sm:$0xf] }
 0x7a0   : > { %12877 = vmatpush.bf16.msra.mxu1 %v21070_v33  ;;  %v19367_v36 = vor.u32 %v21050_v42, %v19364_v58  ;;  %v21075_v33 = vld [vmem:[%s22038_s21 + $0x90] sm:$0xff]  ;;  %v21073_v42 = vld [vmem:[%s22038_s21 + $0x80] sm:$0xff] }
 0x7a1   : > { %12580 = vmatmul.bf16.vlgmr.msrb.gmra.mxu2 %v25470_v63  ;;  %v18804_v63 = vld [vmem:[%s22027_s13 + $0x378] sm:$0xf0] }
 0x7a2   : > { %v18807_v48 = vor.u32 %v20910_v37, %v18804_v63  ;;  %12888 = vmatpush.bf16.msra.mxu2 %v21080_v14 }
 0x7a3   : > { %12488 = vmatpush.bf16.msrb.mxu3 %v19267_v2  ;;  %v12505_v61 = vpop.f32.mrf.mxu0  ;;  %v19332_v2 = vld [vmem:[%s22027_s13 + $0x798] sm:$0xf0] }
 0x7a4   : > { %v25763_v51 = vpop.f32.mrf.mxu2  ;;  %12878 = vmatpush.bf16.msra.mxu1 %v21069_v44  ;;  %v19335_v3 = vor.u32 %v21042_v59, %v19332_v2  ;;  %v21034_v61 = vld [vmem:[%s22027_s13 + $0x74c] sm:$0xf]  ;;  %v21088_v59 = vld [vmem:[%s22038_s21 + $0xf8] sm:$0xff] }
 0x7a5   : > { %v12466_v45 = vpop.f32.mrf.mxu1 }
 0x7a6   : > { %12489 = vmatmul.bf16.vlgmr.msrb.gmra.mxu3 %v25591_v15 }
 0x7a7   : > { %12533 = vmatpush.bf16.msra.mxu3 %v18871_v18  ;;  %v21067_v18 = vld [vmem:[%s22038_s21 + $0x50] sm:$0xff] }
 0x7a8   : > { %12879 = vmatpush.bf16.msra.mxu1 %v21068_v12 }
 0x7ab   : > { %12534 = vmatpush.bf16.msra.mxu3 %v18855_v57 }
 0x7ac   : > { %v12375_v49 = vpop.f32.mrf.mxu2  ;;  %12880 = vmatpush.bf16.msra.mxu1 %v21067_v18 }
 0x7af   : > { %12535 = vmatpush.bf16.msra.mxu3 %v18839_v1  ;;  %v19300_v1 = vld [vmem:[%s22027_s13 + $0x758] sm:$0xf0] }
 0x7b0   : > { %12881 = vmatpush.bf16.msra.mxu1 %v21066_v5  ;;  %v19303_v0 = vor.u32 %v21034_v61, %v19300_v1  ;;  %v21086_v5 = vld [vmem:[%s22038_s21 + $0xe8] sm:$0xff] }
 0x7b3   : > { %12536 = vmatpush.bf16.msra.mxu3 %v18823_v4  ;;  %v19284_v4 = vld [vmem:[%s22027_s13 + $0x738] sm:$0xf0] }
 0x7b4   : > { %12882 = vmatpush.bf16.msra.mxu1 %v21065_v13  ;;  %v19287_v37 = vor.u32 %v21030_v23, %v19284_v4 }
 0x7b7   : > { %12537 = vmatpush.bf16.msra.mxu3 %v18807_v48  ;;  %v21026_v48 = vld [vmem:[%s22027_s13 + $0x70c] sm:$0xf] }
 0x7b8   : > { %v19271_v47 = vor.u32 %v21026_v48, %v19268_v38 }
 0x7bb   : > { %12538 = vmatpush.bf16.msra.mxu3 %v18791_v53  ;;  %v25773_v62 = vpop.f32.mrf.mxu0 }
 0x7bd   : > { %v12516_v57 = vpop.f32.mrf.mxu1 }
 0x7bf   : > { %12539 = vmatpush.bf16.msra.mxu3 %v18775_v35 }
 0x7c3   : > { %12540 = vmatpush.bf16.msra.mxu3 %v18759_v9  ;;  %v12557_v29 = vpop.f32.mrf.mxu0  ;;  %v21077_v9 = vld [vmem:[%s22038_s21 + $0xa0] sm:$0xff] }
 0x7c4   : > { %v12425_v27 = vpop.f32.mrf.mxu2 }
 0x7c5   : > { %v12426_v20 = vadd.f32 %v12425_v27, %v25718_v7  ;;  %v12518_v16 = vpop.f32.mrf.mxu1 }
 0x7c6   : > { %12541 = vmatmul.bf16.vlgmr.msra.gmra.mxu3 %v25356_v40  ;;  %v12504_v40 = vadd.f32 %v25739_v46, %v10897_v41  ;;  %v21197_v16 = vld [vmem:[%s682_s28] ss:$0 sm:$0xff] }
 0x7c7   : > { %12585 = vmatpush.bf16.msrb.mxu3 %v19383_v19  ;;  %v21074_v19 = vld [vmem:[%s22038_s21 + $0x88] sm:$0xff] }
 0x7c8   : > { %v25793_v22 = vadd.f32 %v12516_v57, %v12504_v40  ;;  %v21085_v57 = vld [vmem:[%s22038_s21 + $0xe0] sm:$0xff] }
 0x7c9   : > { %v12282_v25 = vpop.f32.mrf.mxu3 }
 0x7ca   : > { %v12283_v43 = vadd.f32 %v12282_v25, %v12270_v60  ;;  %v21083_v60 = vld [vmem:[%s22038_s21 + $0xd0] sm:$0xff] }
 0x7cb   : > { %12586 = vmatpush.bf16.msrb.mxu3 %v19367_v36 }
 0x7cc   : > { %v12598_v46 = vpack.c.bf16 %v12283_v43, %v12283_v43  ;;  %v12427_v52 = vpop.f32.mrf.mxu2 }
 0x7ce   : > { %12870 = vmatmul.bf16.vlgmr.msra.gmra.mxu0 %v12598_v46 }
 0x7cf   : > { %12587 = vmatpush.bf16.msrb.mxu3 %v19351_v34 }
 0x7d1   : > { %v12284_v63 = vpop.f32.mrf.mxu3 }
 0x7d3   : > { %12588 = vmatpush.bf16.msrb.mxu3 %v19335_v3  ;;  %v21087_v3 = vld [vmem:[%s22038_s21 + $0xf0] sm:$0xff] }
 0x7d7   : > { %12589 = vmatpush.bf16.msrb.mxu3 %v19319_v8  ;;  %v21081_v8 = vld [vmem:[%s22038_s21 + $0xc0] sm:$0xff] }
 0x7d9   : > { %v12334_v53 = vpop.f32.mrf.mxu3 }
 0x7da   : > { %v12335_v7 = vadd.f32 %v12334_v53, %v25746_v24 }
 0x7db   : > { %12590 = vmatpush.bf16.msrb.mxu3 %v19303_v0 }
 0x7dc   : > { %v12348_v6 = vadd.f32 %v25589_v39, %v12335_v7 }
 0x7dd   : > { %v25807_v17 = vpop.f32.mrf.mxu1 }
 0x7de   : > { %v12361_v45 = vadd.f32 %v25672_v10, %v12348_v6 }
 0x7df   : > { %12591 = vmatpush.bf16.msrb.mxu3 %v19287_v37 }
 0x7e0   : > { %v12374_v35 = vadd.f32 %v25763_v51, %v12361_v45  ;;  %v21076_v51 = vld [vmem:[%s22038_s21 + $0x98] sm:$0xff] }
 0x7e1   : > { %v12336_v56 = vpop.f32.mrf.mxu3 }
 0x7e3   : > { %12592 = vmatpush.bf16.msrb.mxu3 %v19271_v47 }
 0x7e4   : > { %v12477_v55 = vpop.f32.mrf.mxu2 }
 0x7e5   : > { %v12570_v39 = vpop.f32.mrf.mxu1 }
 0x7e6   : > { %12593 = vmatmul.bf16.vlgmr.msrb.gmra.mxu3 %v25591_v15  ;;  %v21079_v15 = vld [vmem:[%s22038_s21 + $0xb0] sm:$0xff] }
 0x7e7   : > { %12889 = vmatpush.bf16.msra.mxu2 %v21079_v15  ;;  %12901 = vmatpush.bf16.msra.mxu3 %v21088_v59 }
 0x7e9   : > { %v12386_v11 = vpop.f32.mrf.mxu3 }
 0x7ea   : > { %v12387_v21 = vadd.f32 %v12386_v11, %v12374_v35 }
 0x7eb   : > { %12890 = vmatpush.bf16.msra.mxu2 %v21078_v26  ;;  %12902 = vmatpush.bf16.msra.mxu3 %v21087_v3 }
 0x7ec   : > { %v12599_v24 = vpack.c.bf16 %v12387_v21, %v12387_v21  ;;  %v12479_v10 = vpop.f32.mrf.mxu2 }
 0x7ee   : > { %12883 = vmatmul.bf16.vlgmr.msra.gmra.mxu1 %v12599_v24 }
 0x7ef   : > { %12891 = vmatpush.bf16.msra.mxu2 %v21077_v9  ;;  %12903 = vmatpush.bf16.msra.mxu3 %v21086_v5 }
 0x7f1   : > { %v12388_v49 = vpop.f32.mrf.mxu3 }
 0x7f3   : > { %12892 = vmatpush.bf16.msra.mxu2 %v21076_v51  ;;  %12904 = vmatpush.bf16.msra.mxu3 %v21085_v57 }
 0x7f7   : > { %12893 = vmatpush.bf16.msra.mxu2 %v21075_v33 }
 0x7fb   : > { %12894 = vmatpush.bf16.msra.mxu2 %v21074_v19 }
 0x7ff   : > { %12895 = vmatpush.bf16.msra.mxu2 %v21073_v42 }
 0x804   : > { %v12529_v44 = vpop.f32.mrf.mxu2 }
 0x805   : > { %v12530_v36 = vadd.f32 %v12529_v44, %v25793_v22  ;;  %v21082_v22 = vld [vmem:[%s22038_s21 + $0xc8] sm:$0xff] }
 0x809   : > { %v12438_v58 = vpop.f32.mrf.mxu3 }
 0x80a   : > { %v12439_v12 = vadd.f32 %v12438_v58, %v12426_v20 }
 0x80c   : > { %v12531_v28 = vpop.f32.mrf.mxu2  ;;  %v12452_v29 = vadd.f32 %v25693_v32, %v12439_v12 }
 0x80e   : > { %v12465_v34 = vadd.f32 %v25758_v31, %v12452_v29  ;;  %v21084_v31 = vld [vmem:[%s22038_s21 + $0xd8] sm:$0xff] }
 0x80f   : > { %12905 = vmatpush.bf16.msra.mxu3 %v21084_v31 }
 0x810   : > { %v12478_v2 = vadd.f32 %v12477_v55, %v12465_v34 }
 0x811   : > { %v12440_v50 = vpop.f32.mrf.mxu3 }
 0x813   : > { %12906 = vmatpush.bf16.msra.mxu3 %v21083_v60 }
 0x817   : > { %12907 = vmatpush.bf16.msra.mxu3 %v21082_v22 }
 0x81b   : > { %12908 = vmatpush.bf16.msra.mxu3 %v21081_v8 }
 0x824   : > { %v12581_v18 = vpop.f32.mrf.mxu2 }
 0x829   : > { %v12490_v41 = vpop.f32.mrf.mxu3 }
 0x82a   : > { %v12491_v54 = vadd.f32 %v12490_v41, %v12478_v2 }
 0x82c   : > { %v12600_v30 = vpack.c.bf16 %v12491_v54, %v12491_v54  ;;  %v12583_v32 = vpop.f32.mrf.mxu2 }
 0x82e   : > { %12896 = vmatmul.bf16.vlgmr.msra.gmra.mxu2 %v12600_v30 }
 0x831   : > { %v12492_v40 = vpop.f32.mrf.mxu3 }
 0x849   : > { %v12542_v25 = vpop.f32.mrf.mxu3 }
 0x84a   : > { %v12543_v43 = vadd.f32 %v12542_v25, %v12530_v36 }
 0x84b   : > { %v12871_v1 = vpop.f32.mrf.mxu0 }
 0x84c   : > { %v12556_v46 = vadd.f32 %v25773_v62, %v12543_v43  ;;  %v12872_v63 = vadd.f32 %v21197_v16, %v12871_v1 }
 0x84e   : > { %v12569_v27 = vadd.f32 %v25807_v17, %v12556_v46 }
 0x850   : > { %v12582_v0 = vadd.f32 %v12581_v18, %v12569_v27 }
 0x851   : > { %v12544_v61 = vpop.f32.mrf.mxu3 }
 0x853   : > { %v12873_v13 = vpop.f32.mrf.mxu0 }
 0x869   : > { %v12594_v20 = vpop.f32.mrf.mxu3 }
 0x86a   : > { %v12595_v23 = vadd.f32 %v12594_v20, %v12582_v0 }
 0x86b   : > { %v12884_v48 = vpop.f32.mrf.mxu1 }
 0x86c   : > { %v12601_v4 = vpack.c.bf16 %v12595_v23, %v12595_v23  ;;  %v12885_v38 = vadd.f32 %v12884_v48, %v12872_v63 }
 0x86e   : > { %12909 = vmatmul.bf16.vlgmr.msra.gmra.mxu3 %v12601_v4 }
 0x871   : > { %v12596_v37 = vpop.f32.mrf.mxu3 }
 0x873   : > { %v12886_v52 = vpop.f32.mrf.mxu1 }
 0x8b1   : > { %v12897_v47 = vpop.f32.mrf.mxu2 }
 0x8b2   : > { %v12898_v62 = vadd.f32 %v12897_v47, %v12885_v38 }
 0x8b9   : > { %v12899_v53 = vpop.f32.mrf.mxu2 }
 0x8f1   : > { %v12910_v7 = vpop.f32.mrf.mxu3 }
 0x8f2   : > { %v12911_v6 = vadd.f32 %v12910_v7, %v12898_v62 }
 0x8f4   : > { %12914 = vst [vmem:[%s765_s30] sm:$0xff] %v12911_v6 }
 0x8f5   : > { %21563 = shalt.err (!%p21560_p10)
}
 0x8f6   : > { %21113 = dma.vmem_to_hbm [thread:$0]  (%p21870_p2), %s12929_s15, 128, %s12931_s11, %s12916_s3  }
 0x8f9   : > { %v12912_v56 = vpop.f32.mrf.mxu3 }
 0x8fa PF: > { %p21157_p8 = scmp.ge.s32.totalorder %s21622_s20, 2  ;;  %s12942_s10 = sand.u32 1, %s21610_s17  }
 0x8fb   : > { %s12943_s26 = scalar_lea.sflag [#allocation4], %s12942_s10 }
 0x8fc   : > { %p21151_p9 = pnand %p21157_p8, %p21874_p3 }
 0x8fe   : > { %p21152_p11 = pneg %p21151_p9 }
 0x900   : > { %21605 = dma.done.wait (%p21152_p11), %s12943_s26, 128  }
 0x901   : > { %21607 = vsyncadd (%p21152_p11), %s12943_s26, 4294967168  ;;  %s25934_s20 = sld [smem:[#allocation28_spill]]  ;;  %s25936_s17 = smov %s21614_s18 }
 0x902   : > { %s25935_s16 = sld [smem:[#allocation29_spill]]  ;;  %s25937_s18 = smov %s21618_s19 }
 0x907   : > { %p37_p7 = scmp.ge.s32.totalorder %s25934_s20, 5  }
 0x908   : > { %s25938_s19 = smov %s25935_s16 }
 0x909   :  { %39 = sbr.rel (!%p37_p7) target bundleno = 26 (0x1a), region = 221 }
 0x90e   :  { %12949 = vsyncpa [#allocation3], 1 }
 0x90f   :  { %12951 = vsyncpa [#allocation3 + $0x1], 1 }
 0x910   :  { %12952 = vsyncpa [#allocation6], 1 }
 0x911   :  { %12954 = vsyncpa [#allocation6 + $0x1], 1 }
 0x912   :  { %12955 = vsyncpa [#allocation9], 1 }
 0x913   :  { %12957 = vsyncpa [#allocation9 + $0x1], 1 }
 0x914   :  { %12958 = vsyncpa [#allocation12], 1 }
 0x915   :  { %12960 = vsyncpa [#allocation12 + $0x1], 1 }
 0x916   :  { %12961 = vsyncpa [#allocation15], 1 }
 0x917   :  { %12963 = vsyncpa [#allocation15 + $0x1], 1 }
 0x918   :  { %12964 = vsyncpa [#allocation18], 1 }
 0x919   :  { %12966 = vsyncpa [#allocation18 + $0x1], 1 }
 0x91a   :  { %12967 = vsyncpa [#allocation4], 1 }
 0x91b   :  { %12969 = vsyncpa [#allocation4 + $0x1], 1 }

</bundles_post_ra>
